<compile_context>
chip_gen: v6e
topology: v6e:2x2x1
jax: 0.10.0
libtpu: 0.0.40
codegen_flags: <defaults>
</compile_context>

<pallas_src>
import jax
import jax.numpy as jnp
from jax.experimental import pallas as pl
from jax.experimental.pallas import tpu as pltpu


# ---------------------------------------------------------------------------
# Small helpers
# ---------------------------------------------------------------------------
def _round_up(x, m):
    return (x + m - 1) // m * m


def _pick_tile(dim, candidates):
    """Largest candidate tile that divides `dim` (dim is a multiple of 128)."""
    for c in candidates:
        if dim % c == 0:
            return c
    return dim


# ---------------------------------------------------------------------------
# Pallas kernels
# ---------------------------------------------------------------------------
def _gemm_bias_relu_kernel(p_ref, w_ref, b_ref, o_ref, acc_ref):
    """K-tiled GEMM (bf16 in, f32 accumulate); bias+ReLU fused at the last K step."""
    k = pl.program_id(2)

    @pl.when(k == 0)
    def _():
        acc_ref[...] = jnp.zeros_like(acc_ref)

    acc_ref[...] += jnp.dot(p_ref[...], w_ref[...],
                            preferred_element_type=jnp.float32)

    @pl.when(k == pl.num_programs(2) - 1)
    def _():
        o_ref[...] = jnp.maximum(acc_ref[...] + b_ref[...], 0.0).astype(o_ref.dtype)


def _smooth_l1_sum_kernel(a_ref, b_ref, o_ref, acc_ref):
    """Streaming SmoothL1 (beta=1) partial-sum reduction over row tiles."""
    i = pl.program_id(0)

    @pl.when(i == 0)
    def _():
        acc_ref[...] = jnp.zeros_like(acc_ref)

    d = a_ref[...].astype(jnp.float32) - b_ref[...].astype(jnp.float32)
    ad = jnp.abs(d)
    l = jnp.where(ad < 1.0, 0.5 * d * d, ad - 0.5)
    acc_ref[...] += jnp.sum(l)

    @pl.when(i == pl.num_programs(0) - 1)
    def _():
        o_ref[...] = acc_ref[...]


# ---------------------------------------------------------------------------
# Wrappers around pallas_call
# ---------------------------------------------------------------------------
def conv3x3_relu(x_nhwc, w, b, *, tm_max=512, tn_max=256, tk_max=512):
    """3x3 same-padding conv + bias + ReLU as a tiled im2col GEMM.

    x_nhwc: (N, H, W, Cs)       bf16, channel-padded storage
    w:      (9*Cs, Cout_pad)    bf16, rows ordered (ky, kx, cin)
    b:      (1, Cout_pad)       f32
    returns (N, H, W, Cout_pad) bf16
    """
    N, H, W, Cs = x_nhwc.shape
    K, Co = w.shape

    # im2col (XLA glue): pad + 9 shifted views concatenated on channels.
    # TODO(synk): move halo-tile im2col inside the kernel (manual DMA of an
    # NHWC row tile + 1-px halo) to avoid the 9x activation HBM round trip.
    xp = jnp.pad(x_nhwc, ((0, 0), (1, 1), (1, 1), (0, 0)))
    patches = jnp.concatenate(
        [xp[:, ky:ky + H, kx:kx + W, :] for ky in range(3) for kx in range(3)],
        axis=-1).reshape(N * H * W, 9 * Cs)

    M = N * H * W
    Mp = _round_up(M, 128)
    Kp = _round_up(K, 128)
    if Kp != K:  # only the first conv (K = 27) needs K padding
        patches = jnp.pad(patches, ((0, 0), (0, Kp - K)))
        w = jnp.pad(w, ((0, Kp - K), (0, 0)))
    if Mp != M:
        patches = jnp.pad(patches, ((0, Mp - M), (0, 0)))

    tm = _pick_tile(Mp, (tm_max, 256, 128))
    tn = _pick_tile(Co, (tn_max, 128))
    tk = _pick_tile(Kp, (tk_max, 256, 128))
    grid = (Mp // tm, Co // tn, Kp // tk)

    out = pl.pallas_call(
        _gemm_bias_relu_kernel,
        out_shape=jax.ShapeDtypeStruct((Mp, Co), jnp.bfloat16),
        grid=grid,
        in_specs=[
            pl.BlockSpec((tm, tk), lambda i, j, k: (i, k)),
            pl.BlockSpec((tk, tn), lambda i, j, k: (k, j)),
            pl.BlockSpec((1, tn), lambda i, j, k: (0, j)),
        ],
        out_specs=pl.BlockSpec((tm, tn), lambda i, j, k: (i, j)),
        scratch_shapes=[pltpu.VMEM((tm, tn), jnp.float32)],
        compiler_params=pltpu.CompilerParams(
            dimension_semantics=("parallel", "parallel", "arbitrary"),
            vmem_limit_bytes=32 * 1024 * 1024),
    )(patches.astype(jnp.bfloat16), w.astype(jnp.bfloat16), b)
    return out[:M].reshape(N, H, W, Co)


def smooth_l1_mean(a, b, true_elems, *, tm_cap=512):
    """nn.SmoothL1Loss() (beta=1.0, reduction='mean').

    a, b are same-shape (channel-padded) feature maps; `true_elems` is the
    number of *real* (unpadded) elements.  Padded channels are identically
    zero on both sides, so they contribute nothing to the sum.
    """
    C = a.shape[-1]
    a2 = a.reshape(-1, C)
    b2 = b.reshape(-1, C)
    M = a2.shape[0]
    tm = min(tm_cap, _round_up(M, 8))
    Mp = _round_up(M, tm)
    if Mp != M:  # zero rows on both sides -> zero loss contribution
        a2 = jnp.pad(a2, ((0, Mp - M), (0, 0)))
        b2 = jnp.pad(b2, ((0, Mp - M), (0, 0)))

    s = pl.pallas_call(
        _smooth_l1_sum_kernel,
        out_shape=jax.ShapeDtypeStruct((1, 1), jnp.float32),
        grid=(Mp // tm,),
        in_specs=[
            pl.BlockSpec((tm, C), lambda i: (i, 0)),
            pl.BlockSpec((tm, C), lambda i: (i, 0)),
        ],
        out_specs=pl.BlockSpec((1, 1), lambda i: (0, 0)),
        scratch_shapes=[pltpu.VMEM((1, 1), jnp.float32)],
        compiler_params=pltpu.CompilerParams(
            dimension_semantics=("arbitrary",),
            vmem_limit_bytes=32 * 1024 * 1024),
    )(a2, b2)
    return s[0, 0] / jnp.float32(true_elems)


def maxpool2x2(x_nhwc):
    # 2x2 / stride-2 max pool (cheap XLA glue on bf16 activations).
    N, H, W, C = x_nhwc.shape
    return x_nhwc.reshape(N, H // 2, 2, W // 2, 2, C).max(axis=(2, 4))


# ---------------------------------------------------------------------------
# Synthetic VGG16 feature stack (layers 0..15) + LossNetwork forward
# ---------------------------------------------------------------------------
# (Cin, Cout) for the 7 convs before layer index 15 in VGG16.features
_VGG_CONVS = [(3, 64), (64, 64), (64, 128), (128, 128),
              (128, 256), (256, 256), (256, 256)]


def init_vgg_params(key):
    """Synthetic VGG weights, packed for the Pallas GEMM.

    w: (9*cin_store, cout_store) bf16 with rows ordered (ky, kx, cin);
       zero rows/cols where channels are lane-padded.
    b: (1, cout_store) f32, zero in padded columns.
    (If real torch VGG weights were loaded, the (Cout,Cin,3,3) tensor must be
    permuted to (ky,kx,cin,Cout) before this packing.)
    """
    params = []
    for idx, (cin, cout) in enumerate(_VGG_CONVS):
        cin_store = cin if idx == 0 else _round_up(cin, 128)
        cout_store = _round_up(cout, 128)
        key, kw, kb = jax.random.split(key, 3)
        fan_in = 9 * cin
        w_true = jax.random.normal(kw, (3, 3, cin, cout), jnp.float32) / jnp.sqrt(
            jnp.float32(fan_in))
        b_true = 0.01 * jax.random.normal(kb, (cout,), jnp.float32)
        w = jnp.zeros((3, 3, cin_store, cout_store), jnp.float32)
        w = w.at[:, :, :cin, :cout].set(w_true)
        b = jnp.zeros((cout_store,), jnp.float32).at[:cout].set(b_true)
        params.append((w.reshape(9 * cin_store, cout_store).astype(jnp.bfloat16),
                       b.reshape(1, cout_store)))
    return params


def output_features(x_nchw, params):
    """Returns [(relu1_2, 64), (relu2_2, 128), (relu3_3, 256)] (NHWC, channel-padded)."""
    x = jnp.transpose(x_nchw, (0, 2, 3, 1)).astype(jnp.bfloat16)  # NCHW -> NHWC
    (w11, b11), (w12, b12), (w21, b21), (w22, b22), \
        (w31, b31), (w32, b32), (w33, b33) = params

    x = conv3x3_relu(x, w11, b11)          # layers 0,1
    x = conv3x3_relu(x, w12, b12)          # layers 2,3
    relu1_2 = x
    x = maxpool2x2(x)                      # layer 4
    x = conv3x3_relu(x, w21, b21)          # layers 5,6
    x = conv3x3_relu(x, w22, b22)          # layers 7,8
    relu2_2 = x
    x = maxpool2x2(x)                      # layer 9
    x = conv3x3_relu(x, w31, b31)          # layers 10,11
    x = conv3x3_relu(x, w32, b32)          # layers 12,13
    x = conv3x3_relu(x, w33, b33)          # layers 14,15
    relu3_3 = x
    return [(relu1_2, 64), (relu2_2, 128), (relu3_3, 256)]


@jax.jit
def loss_network_forward(dehaze_nchw, gt_nchw, params):
    # One feature pass over [dehaze; gt]: weights streamed once, 2x GEMM M.
    n = dehaze_nchw.shape[0]
    both = jnp.concatenate([dehaze_nchw, gt_nchw], axis=0)
    feats = output_features(both, params)
    losses = []
    for feat, c_true in feats:
        df, gf = feat[:n], feat[n:]
        m_true = df.shape[0] * df.shape[1] * df.shape[2]
        losses.append(smooth_l1_mean(df, gf, m_true * c_true))
    return sum(losses) / jnp.float32(len(losses))


# ---------------------------------------------------------------------------
if __name__ == "__main__":
    key = jax.random.PRNGKey(0)
    kp, kd, kg = jax.random.split(key, 3)

    params = init_vgg_params(kp)
    # PyTorch-convention NCHW inputs: batch=2, channels=3 (RGB), spatial=16.
    dehaze = jax.random.normal(kd, (2, 3, 16, 16), jnp.float32)
    gt = jax.random.normal(kg, (2, 3, 16, 16), jnp.float32)

    loss = loss_network_forward(dehaze, gt, params)
    jax.block_until_ready(loss)
    assert loss.shape == () and jnp.isfinite(loss)
    print("KERNEL_OK")
</pallas_src>

<mosaic_0001>
module attributes {stable_mosaic.version = 11 : i64} {
  func.func @_gemm_bias_relu_kernel(%arg0: i32, %arg1: i32, %arg2: i32, %arg3: memref<512x128xbf16, #tpu.memory_space<vmem>>, %arg4: memref<128x128xbf16, #tpu.memory_space<vmem>>, %arg5: memref<1x128xf32, #tpu.memory_space<vmem>>, %arg6: memref<512x128xbf16, #tpu.memory_space<vmem>>, %arg7: memref<512x128xf32, #tpu.memory_space<vmem>>) attributes {dimension_semantics = [#tpu.dimension_semantics<parallel>, #tpu.dimension_semantics<parallel>, #tpu.dimension_semantics<arbitrary>], iteration_bounds = array<i64: 2, 1, 1>, scalar_prefetch = 0 : i64, scratch_operands = 1 : i64, tpu.core_type = #tpu.core_type<tc>, window_params = [{transform_indices = @transform_0, window_bounds = array<i64: 512, 128>}, {transform_indices = @transform_1, window_bounds = array<i64: 128, 128>}, {transform_indices = @transform_2, window_bounds = array<i64: 1, 128>}, {transform_indices = @transform_3, window_bounds = array<i64: 512, 128>}]} {
    %c0_i32 = arith.constant 0 : i32
    %0 = arith.cmpi eq, %arg2, %c0_i32 : i32
    %1 = arith.extui %0 : i1 to i32
    %c0_i32_0 = arith.constant 0 : i32
    %2 = arith.cmpi ne, %1, %c0_i32_0 : i32
    scf.if %2 {
      %cst_10 = arith.constant 0.000000e+00 : f32
      %12 = vector.broadcast %cst_10 : f32 to vector<512x128xf32>
      %c0_11 = arith.constant 0 : index
      %c0_12 = arith.constant 0 : index
      %13 = vector.load %arg7[%c0_11, %c0_12] : memref<512x128xf32, #tpu.memory_space<vmem>>, vector<512x128xf32>
      tpu.vector_store %arg7[%c0_11, %c0_12], %12 {strides = array<i32>} : memref<512x128xf32, #tpu.memory_space<vmem>>, vector<512x128xf32>,
    } else {
    }
    %c0 = arith.constant 0 : index
    %c0_1 = arith.constant 0 : index
    %3 = vector.load %arg7[%c0, %c0_1] : memref<512x128xf32, #tpu.memory_space<vmem>>, vector<512x128xf32>
    %c0_2 = arith.constant 0 : index
    %c0_3 = arith.constant 0 : index
    %4 = vector.load %arg3[%c0_2, %c0_3] : memref<512x128xbf16, #tpu.memory_space<vmem>>, vector<512x128xbf16>
    %c0_4 = arith.constant 0 : index
    %c0_5 = arith.constant 0 : index
    %5 = vector.load %arg4[%c0_4, %c0_5] : memref<128x128xbf16, #tpu.memory_space<vmem>>, vector<128x128xbf16>
    %cst = arith.constant dense<0.000000e+00> : vector<512x128xf32>
    %6 = tpu.matmul %4, %5, %cst {dimension_numbers = #tpu.dot_dimension_numbers<[1], [0], [0], [1], [0, 0, 1, 1], [], []>} : vector<512x128xbf16>, vector<128x128xbf16>, vector<512x128xf32> -> vector<512x128xf32>
    %7 = arith.addf %3, %6 : vector<512x128xf32>
    %c0_6 = arith.constant 0 : index
    %c0_7 = arith.constant 0 : index
    %8 = vector.load %arg7[%c0_6, %c0_7] : memref<512x128xf32, #tpu.memory_space<vmem>>, vector<512x128xf32>
    tpu.vector_store %arg7[%c0_6, %c0_7], %7 {strides = array<i32>} : memref<512x128xf32, #tpu.memory_space<vmem>>, vector<512x128xf32>,
    %c0_i32_8 = arith.constant 0 : i32
    %9 = arith.cmpi eq, %arg2, %c0_i32_8 : i32
    %10 = arith.extui %9 : i1 to i32
    %c0_i32_9 = arith.constant 0 : i32
    %11 = arith.cmpi ne, %10, %c0_i32_9 : i32
    scf.if %11 {
      %c0_10 = arith.constant 0 : index
      %c0_11 = arith.constant 0 : index
      %12 = vector.load %arg7[%c0_10, %c0_11] : memref<512x128xf32, #tpu.memory_space<vmem>>, vector<512x128xf32>
      %c0_12 = arith.constant 0 : index
      %c0_13 = arith.constant 0 : index
      %13 = vector.load %arg5[%c0_12, %c0_13] : memref<1x128xf32, #tpu.memory_space<vmem>>, vector<1x128xf32>
      %14 = vector.broadcast %13 : vector<1x128xf32> to vector<512x128xf32>
      %15 = arith.addf %12, %14 : vector<512x128xf32>
      %cst_14 = arith.constant 0.000000e+00 : f32
      %16 = vector.broadcast %cst_14 : f32 to vector<512x128xf32>
      %17 = arith.maximumf %15, %16 : vector<512x128xf32>
      %18 = arith.truncf %17 : vector<512x128xf32> to vector<512x128xbf16>
      %c0_15 = arith.constant 0 : index
      %c0_16 = arith.constant 0 : index
      %19 = vector.load %arg6[%c0_15, %c0_16] : memref<512x128xbf16, #tpu.memory_space<vmem>>, vector<512x128xbf16>
      tpu.vector_store %arg6[%c0_15, %c0_16], %18 {strides = array<i32>} : memref<512x128xbf16, #tpu.memory_space<vmem>>, vector<512x128xbf16>,
    } else {
    }
    return
  }
  func.func @transform_0(%arg0: i32, %arg1: i32, %arg2: i32) -> (i32, i32) {
    %c0_i32 = arith.constant 0 : i32
    return %arg0, %arg2 : i32, i32
  }
  func.func @transform_1(%arg0: i32, %arg1: i32, %arg2: i32) -> (i32, i32) {
    %c0_i32 = arith.constant 0 : i32
    return %arg2, %arg1 : i32, i32
  }
  func.func @transform_2(%arg0: i32, %arg1: i32, %arg2: i32) -> (i32, i32) {
    %c0_i32 = arith.constant 0 : i32
    %c0_i32_0 = arith.constant 0 : i32
    return %c0_i32, %arg1 : i32, i32
  }
  func.func @transform_3(%arg0: i32, %arg1: i32, %arg2: i32) -> (i32, i32) {
    %c0_i32 = arith.constant 0 : i32
    return %arg0, %arg1 : i32, i32
  }
}

module attributes {stable_mosaic.version = 11 : i64} {
  func.func @_gemm_bias_relu_kernel(%arg0: i32, %arg1: i32, %arg2: i32, %arg3: memref<512x128xbf16, #tpu.memory_space<vmem>>, %arg4: memref<128x128xbf16, #tpu.memory_space<vmem>>, %arg5: memref<1x128xf32, #tpu.memory_space<vmem>>, %arg6: memref<512x128xbf16, #tpu.memory_space<vmem>>, %arg7: memref<512x128xf32, #tpu.memory_space<vmem>>) attributes {dimension_semantics = [#tpu.dimension_semantics<parallel>, #tpu.dimension_semantics<parallel>, #tpu.dimension_semantics<arbitrary>], iteration_bounds = array<i64: 2, 1, 9>, scalar_prefetch = 0 : i64, scratch_operands = 1 : i64, tpu.core_type = #tpu.core_type<tc>, window_params = [{transform_indices = @transform_0, window_bounds = array<i64: 512, 128>}, {transform_indices = @transform_1, window_bounds = array<i64: 128, 128>}, {transform_indices = @transform_2, window_bounds = array<i64: 1, 128>}, {transform_indices = @transform_3, window_bounds = array<i64: 512, 128>}]} {
    %c0_i32 = arith.constant 0 : i32
    %0 = arith.cmpi eq, %arg2, %c0_i32 : i32
    %1 = arith.extui %0 : i1 to i32
    %c0_i32_0 = arith.constant 0 : i32
    %2 = arith.cmpi ne, %1, %c0_i32_0 : i32
    scf.if %2 {
      %cst_9 = arith.constant 0.000000e+00 : f32
      %12 = vector.broadcast %cst_9 : f32 to vector<512x128xf32>
      %c0_10 = arith.constant 0 : index
      %c0_11 = arith.constant 0 : index
      %13 = vector.load %arg7[%c0_10, %c0_11] : memref<512x128xf32, #tpu.memory_space<vmem>>, vector<512x128xf32>
      tpu.vector_store %arg7[%c0_10, %c0_11], %12 {strides = array<i32>} : memref<512x128xf32, #tpu.memory_space<vmem>>, vector<512x128xf32>,
    } else {
    }
    %c0 = arith.constant 0 : index
    %c0_1 = arith.constant 0 : index
    %3 = vector.load %arg7[%c0, %c0_1] : memref<512x128xf32, #tpu.memory_space<vmem>>, vector<512x128xf32>
    %c0_2 = arith.constant 0 : index
    %c0_3 = arith.constant 0 : index
    %4 = vector.load %arg3[%c0_2, %c0_3] : memref<512x128xbf16, #tpu.memory_space<vmem>>, vector<512x128xbf16>
    %c0_4 = arith.constant 0 : index
    %c0_5 = arith.constant 0 : index
    %5 = vector.load %arg4[%c0_4, %c0_5] : memref<128x128xbf16, #tpu.memory_space<vmem>>, vector<128x128xbf16>
    %cst = arith.constant dense<0.000000e+00> : vector<512x128xf32>
    %6 = tpu.matmul %4, %5, %cst {dimension_numbers = #tpu.dot_dimension_numbers<[1], [0], [0], [1], [0, 0, 1, 1], [], []>} : vector<512x128xbf16>, vector<128x128xbf16>, vector<512x128xf32> -> vector<512x128xf32>
    %7 = arith.addf %3, %6 : vector<512x128xf32>
    %c0_6 = arith.constant 0 : index
    %c0_7 = arith.constant 0 : index
    %8 = vector.load %arg7[%c0_6, %c0_7] : memref<512x128xf32, #tpu.memory_space<vmem>>, vector<512x128xf32>
    tpu.vector_store %arg7[%c0_6, %c0_7], %7 {strides = array<i32>} : memref<512x128xf32, #tpu.memory_space<vmem>>, vector<512x128xf32>,
    %c8_i32 = arith.constant 8 : i32
    %9 = arith.cmpi eq, %arg2, %c8_i32 : i32
    %10 = arith.extui %9 : i1 to i32
    %c0_i32_8 = arith.constant 0 : i32
    %11 = arith.cmpi ne, %10, %c0_i32_8 : i32
    scf.if %11 {
      %c0_9 = arith.constant 0 : index
      %c0_10 = arith.constant 0 : index
      %12 = vector.load %arg7[%c0_9, %c0_10] : memref<512x128xf32, #tpu.memory_space<vmem>>, vector<512x128xf32>
      %c0_11 = arith.constant 0 : index
      %c0_12 = arith.constant 0 : index
      %13 = vector.load %arg5[%c0_11, %c0_12] : memref<1x128xf32, #tpu.memory_space<vmem>>, vector<1x128xf32>
      %14 = vector.broadcast %13 : vector<1x128xf32> to vector<512x128xf32>
      %15 = arith.addf %12, %14 : vector<512x128xf32>
      %cst_13 = arith.constant 0.000000e+00 : f32
      %16 = vector.broadcast %cst_13 : f32 to vector<512x128xf32>
      %17 = arith.maximumf %15, %16 : vector<512x128xf32>
      %18 = arith.truncf %17 : vector<512x128xf32> to vector<512x128xbf16>
      %c0_14 = arith.constant 0 : index
      %c0_15 = arith.constant 0 : index
      %19 = vector.load %arg6[%c0_14, %c0_15] : memref<512x128xbf16, #tpu.memory_space<vmem>>, vector<512x128xbf16>
      tpu.vector_store %arg6[%c0_14, %c0_15], %18 {strides = array<i32>} : memref<512x128xbf16, #tpu.memory_space<vmem>>, vector<512x128xbf16>,
    } else {
    }
    return
  }
  func.func @transform_0(%arg0: i32, %arg1: i32, %arg2: i32) -> (i32, i32) {
    %c0_i32 = arith.constant 0 : i32
    return %arg0, %arg2 : i32, i32
  }
  func.func @transform_1(%arg0: i32, %arg1: i32, %arg2: i32) -> (i32, i32) {
    %c0_i32 = arith.constant 0 : i32
    return %arg2, %arg1 : i32, i32
  }
  func.func @transform_2(%arg0: i32, %arg1: i32, %arg2: i32) -> (i32, i32) {
    %c0_i32 = arith.constant 0 : i32
    %c0_i32_0 = arith.constant 0 : i32
    return %c0_i32, %arg1 : i32, i32
  }
  func.func @transform_3(%arg0: i32, %arg1: i32, %arg2: i32) -> (i32, i32) {
    %c0_i32 = arith.constant 0 : i32
    return %arg0, %arg1 : i32, i32
  }
}

module attributes {stable_mosaic.version = 11 : i64} {
  func.func @_smooth_l1_sum_kernel(%arg0: i32, %arg1: memref<512x128xbf16, #tpu.memory_space<vmem>>, %arg2: memref<512x128xbf16, #tpu.memory_space<vmem>>, %arg3: memref<1x1xf32, #tpu.memory_space<vmem>>, %arg4: memref<1x1xf32, #tpu.memory_space<vmem>>) attributes {dimension_semantics = [#tpu.dimension_semantics<arbitrary>], iteration_bounds = array<i64: 1>, scalar_prefetch = 0 : i64, scratch_operands = 1 : i64, tpu.core_type = #tpu.core_type<tc>, window_params = [{transform_indices = @transform_0, window_bounds = array<i64: 512, 128>}, {transform_indices = @transform_1, window_bounds = array<i64: 512, 128>}, {pipeline_mode = #tpu.pipeline_mode<synchronous>, transform_indices = @transform_2, window_bounds = array<i64: 1, 1>}]} {
    %c0_i32 = arith.constant 0 : i32
    %0 = arith.cmpi eq, %arg0, %c0_i32 : i32
    %1 = arith.extui %0 : i1 to i32
    %c0_i32_0 = arith.constant 0 : i32
    %2 = arith.cmpi ne, %1, %c0_i32_0 : i32
    scf.if %2 {
      %cst_13 = arith.constant 0.000000e+00 : f32
      %28 = vector.broadcast %cst_13 : f32 to vector<1x1xf32>
      %c0_14 = arith.constant 0 : index
      %c0_15 = arith.constant 0 : index
      %29 = vector.load %arg4[%c0_14, %c0_15] : memref<1x1xf32, #tpu.memory_space<vmem>>, vector<1x1xf32>
      tpu.vector_store %arg4[%c0_14, %c0_15], %28 {strides = array<i32>} : memref<1x1xf32, #tpu.memory_space<vmem>>, vector<1x1xf32>,
    } else {
    }
    %c0 = arith.constant 0 : index
    %c0_1 = arith.constant 0 : index
    %3 = vector.load %arg1[%c0, %c0_1] : memref<512x128xbf16, #tpu.memory_space<vmem>>, vector<512x128xbf16>
    %4 = arith.extf %3 : vector<512x128xbf16> to vector<512x128xf32>
    %c0_2 = arith.constant 0 : index
    %c0_3 = arith.constant 0 : index
    %5 = vector.load %arg2[%c0_2, %c0_3] : memref<512x128xbf16, #tpu.memory_space<vmem>>, vector<512x128xbf16>
    %6 = arith.extf %5 : vector<512x128xbf16> to vector<512x128xf32>
    %7 = arith.subf %4, %6 : vector<512x128xf32>
    %8 = math.absf %7 : vector<512x128xf32>
    %cst = arith.constant 1.000000e+00 : f32
    %9 = vector.broadcast %cst : f32 to vector<512x128xf32>
    %10 = arith.cmpf olt, %8, %9 : vector<512x128xf32>
    %cst_4 = arith.constant 5.000000e-01 : f32
    %11 = vector.broadcast %cst_4 : f32 to vector<512x128xf32>
    %12 = arith.mulf %11, %7 : vector<512x128xf32>
    %13 = arith.mulf %12, %7 : vector<512x128xf32>
    %cst_5 = arith.constant 5.000000e-01 : f32
    %14 = vector.broadcast %cst_5 : f32 to vector<512x128xf32>
    %15 = arith.subf %8, %14 : vector<512x128xf32>
    %16 = arith.select %10, %13, %15 : vector<512x128xi1>, vector<512x128xf32>
    %c0_6 = arith.constant 0 : index
    %c0_7 = arith.constant 0 : index
    %17 = vector.load %arg4[%c0_6, %c0_7] : memref<1x1xf32, #tpu.memory_space<vmem>>, vector<1x1xf32>
    %18 = vector.shape_cast %16 : vector<512x128xf32> to vector<1x512x128xf32>
    %cst_8 = arith.constant dense<0.000000e+00> : vector<1xf32>
    %19 = vector.multi_reduction <add>, %18, %cst_8 [1, 2] : vector<1x512x128xf32> to vector<1xf32>
    %20 = vector.shape_cast %19 : vector<1xf32> to vector<1x1x1xf32>
    %21 = vector.extract %20[0, 0, 0] : f32 from vector<1x1x1xf32>
    %22 = vector.broadcast %21 : f32 to vector<1x1xf32>
    %23 = arith.addf %17, %22 : vector<1x1xf32>
    %c0_9 = arith.constant 0 : index
    %c0_10 = arith.constant 0 : index
    %24 = vector.load %arg4[%c0_9, %c0_10] : memref<1x1xf32, #tpu.memory_space<vmem>>, vector<1x1xf32>
    tpu.vector_store %arg4[%c0_9, %c0_10], %23 {strides = array<i32>} : memref<1x1xf32, #tpu.memory_space<vmem>>, vector<1x1xf32>,
    %c0_i32_11 = arith.constant 0 : i32
    %25 = arith.cmpi eq, %arg0, %c0_i32_11 : i32
    %26 = arith.extui %25 : i1 to i32
    %c0_i32_12 = arith.constant 0 : i32
    %27 = arith.cmpi ne, %26, %c0_i32_12 : i32
    scf.if %27 {
      %c0_13 = arith.constant 0 : index
      %c0_14 = arith.constant 0 : index
      %28 = vector.load %arg4[%c0_13, %c0_14] : memref<1x1xf32, #tpu.memory_space<vmem>>, vector<1x1xf32>
      %c0_15 = arith.constant 0 : index
      %c0_16 = arith.constant 0 : index
      %29 = vector.load %arg3[%c0_15, %c0_16] : memref<1x1xf32, #tpu.memory_space<vmem>>, vector<1x1xf32>
      tpu.vector_store %arg3[%c0_15, %c0_16], %28 {strides = array<i32>} : memref<1x1xf32, #tpu.memory_space<vmem>>, vector<1x1xf32>,
    } else {
    }
    return
  }
  func.func @transform_0(%arg0: i32) -> (i32, i32) {
    %c0_i32 = arith.constant 0 : i32
    %c0_i32_0 = arith.constant 0 : i32
    return %arg0, %c0_i32 : i32, i32
  }
  func.func @transform_1(%arg0: i32) -> (i32, i32) {
    %c0_i32 = arith.constant 0 : i32
    %c0_i32_0 = arith.constant 0 : i32
    return %arg0, %c0_i32 : i32, i32
  }
  func.func @transform_2(%arg0: i32) -> (i32, i32) {
    %c0_i32 = arith.constant 0 : i32
    %c0_i32_0 = arith.constant 0 : i32
    %c0_i32_1 = arith.constant 0 : i32
    return %c0_i32, %c0_i32_0 : i32, i32
  }
}

module attributes {stable_mosaic.version = 11 : i64} {
  func.func @_gemm_bias_relu_kernel(%arg0: i32, %arg1: i32, %arg2: i32, %arg3: memref<256x128xbf16, #tpu.memory_space<vmem>>, %arg4: memref<128x128xbf16, #tpu.memory_space<vmem>>, %arg5: memref<1x128xf32, #tpu.memory_space<vmem>>, %arg6: memref<256x128xbf16, #tpu.memory_space<vmem>>, %arg7: memref<256x128xf32, #tpu.memory_space<vmem>>) attributes {dimension_semantics = [#tpu.dimension_semantics<parallel>, #tpu.dimension_semantics<parallel>, #tpu.dimension_semantics<arbitrary>], iteration_bounds = array<i64: 1, 1, 9>, scalar_prefetch = 0 : i64, scratch_operands = 1 : i64, tpu.core_type = #tpu.core_type<tc>, window_params = [{transform_indices = @transform_0, window_bounds = array<i64: 256, 128>}, {transform_indices = @transform_1, window_bounds = array<i64: 128, 128>}, {transform_indices = @transform_2, window_bounds = array<i64: 1, 128>}, {transform_indices = @transform_3, window_bounds = array<i64: 256, 128>}]} {
    %c0_i32 = arith.constant 0 : i32
    %0 = arith.cmpi eq, %arg2, %c0_i32 : i32
    %1 = arith.extui %0 : i1 to i32
    %c0_i32_0 = arith.constant 0 : i32
    %2 = arith.cmpi ne, %1, %c0_i32_0 : i32
    scf.if %2 {
      %cst_9 = arith.constant 0.000000e+00 : f32
      %12 = vector.broadcast %cst_9 : f32 to vector<256x128xf32>
      %c0_10 = arith.constant 0 : index
      %c0_11 = arith.constant 0 : index
      %13 = vector.load %arg7[%c0_10, %c0_11] : memref<256x128xf32, #tpu.memory_space<vmem>>, vector<256x128xf32>
      tpu.vector_store %arg7[%c0_10, %c0_11], %12 {strides = array<i32>} : memref<256x128xf32, #tpu.memory_space<vmem>>, vector<256x128xf32>,
    } else {
    }
    %c0 = arith.constant 0 : index
    %c0_1 = arith.constant 0 : index
    %3 = vector.load %arg7[%c0, %c0_1] : memref<256x128xf32, #tpu.memory_space<vmem>>, vector<256x128xf32>
    %c0_2 = arith.constant 0 : index
    %c0_3 = arith.constant 0 : index
    %4 = vector.load %arg3[%c0_2, %c0_3] : memref<256x128xbf16, #tpu.memory_space<vmem>>, vector<256x128xbf16>
    %c0_4 = arith.constant 0 : index
    %c0_5 = arith.constant 0 : index
    %5 = vector.load %arg4[%c0_4, %c0_5] : memref<128x128xbf16, #tpu.memory_space<vmem>>, vector<128x128xbf16>
    %cst = arith.constant dense<0.000000e+00> : vector<256x128xf32>
    %6 = tpu.matmul %4, %5, %cst {dimension_numbers = #tpu.dot_dimension_numbers<[1], [0], [0], [1], [0, 0, 1, 1], [], []>} : vector<256x128xbf16>, vector<128x128xbf16>, vector<256x128xf32> -> vector<256x128xf32>
    %7 = arith.addf %3, %6 : vector<256x128xf32>
    %c0_6 = arith.constant 0 : index
    %c0_7 = arith.constant 0 : index
    %8 = vector.load %arg7[%c0_6, %c0_7] : memref<256x128xf32, #tpu.memory_space<vmem>>, vector<256x128xf32>
    tpu.vector_store %arg7[%c0_6, %c0_7], %7 {strides = array<i32>} : memref<256x128xf32, #tpu.memory_space<vmem>>, vector<256x128xf32>,
    %c8_i32 = arith.constant 8 : i32
    %9 = arith.cmpi eq, %arg2, %c8_i32 : i32
    %10 = arith.extui %9 : i1 to i32
    %c0_i32_8 = arith.constant 0 : i32
    %11 = arith.cmpi ne, %10, %c0_i32_8 : i32
    scf.if %11 {
      %c0_9 = arith.constant 0 : index
      %c0_10 = arith.constant 0 : index
      %12 = vector.load %arg7[%c0_9, %c0_10] : memref<256x128xf32, #tpu.memory_space<vmem>>, vector<256x128xf32>
      %c0_11 = arith.constant 0 : index
      %c0_12 = arith.constant 0 : index
      %13 = vector.load %arg5[%c0_11, %c0_12] : memref<1x128xf32, #tpu.memory_space<vmem>>, vector<1x128xf32>
      %14 = vector.broadcast %13 : vector<1x128xf32> to vector<256x128xf32>
      %15 = arith.addf %12, %14 : vector<256x128xf32>
      %cst_13 = arith.constant 0.000000e+00 : f32
      %16 = vector.broadcast %cst_13 : f32 to vector<256x128xf32>
      %17 = arith.maximumf %15, %16 : vector<256x128xf32>
      %18 = arith.truncf %17 : vector<256x128xf32> to vector<256x128xbf16>
      %c0_14 = arith.constant 0 : index
      %c0_15 = arith.constant 0 : index
      %19 = vector.load %arg6[%c0_14, %c0_15] : memref<256x128xbf16, #tpu.memory_space<vmem>>, vector<256x128xbf16>
      tpu.vector_store %arg6[%c0_14, %c0_15], %18 {strides = array<i32>} : memref<256x128xbf16, #tpu.memory_space<vmem>>, vector<256x128xbf16>,
    } else {
    }
    return
  }
  func.func @transform_0(%arg0: i32, %arg1: i32, %arg2: i32) -> (i32, i32) {
    %c0_i32 = arith.constant 0 : i32
    return %arg0, %arg2 : i32, i32
  }
  func.func @transform_1(%arg0: i32, %arg1: i32, %arg2: i32) -> (i32, i32) {
    %c0_i32 = arith.constant 0 : i32
    return %arg2, %arg1 : i32, i32
  }
  func.func @transform_2(%arg0: i32, %arg1: i32, %arg2: i32) -> (i32, i32) {
    %c0_i32 = arith.constant 0 : i32
    %c0_i32_0 = arith.constant 0 : i32
    return %c0_i32, %arg1 : i32, i32
  }
  func.func @transform_3(%arg0: i32, %arg1: i32, %arg2: i32) -> (i32, i32) {
    %c0_i32 = arith.constant 0 : i32
    return %arg0, %arg1 : i32, i32
  }
}

module attributes {stable_mosaic.version = 11 : i64} {
  func.func @_smooth_l1_sum_kernel(%arg0: i32, %arg1: memref<128x128xbf16, #tpu.memory_space<vmem>>, %arg2: memref<128x128xbf16, #tpu.memory_space<vmem>>, %arg3: memref<1x1xf32, #tpu.memory_space<vmem>>, %arg4: memref<1x1xf32, #tpu.memory_space<vmem>>) attributes {dimension_semantics = [#tpu.dimension_semantics<arbitrary>], iteration_bounds = array<i64: 1>, scalar_prefetch = 0 : i64, scratch_operands = 1 : i64, tpu.core_type = #tpu.core_type<tc>, window_params = [{transform_indices = @transform_0, window_bounds = array<i64: 128, 128>}, {transform_indices = @transform_1, window_bounds = array<i64: 128, 128>}, {pipeline_mode = #tpu.pipeline_mode<synchronous>, transform_indices = @transform_2, window_bounds = array<i64: 1, 1>}]} {
    %c0_i32 = arith.constant 0 : i32
    %0 = arith.cmpi eq, %arg0, %c0_i32 : i32
    %1 = arith.extui %0 : i1 to i32
    %c0_i32_0 = arith.constant 0 : i32
    %2 = arith.cmpi ne, %1, %c0_i32_0 : i32
    scf.if %2 {
      %cst_13 = arith.constant 0.000000e+00 : f32
      %28 = vector.broadcast %cst_13 : f32 to vector<1x1xf32>
      %c0_14 = arith.constant 0 : index
      %c0_15 = arith.constant 0 : index
      %29 = vector.load %arg4[%c0_14, %c0_15] : memref<1x1xf32, #tpu.memory_space<vmem>>, vector<1x1xf32>
      tpu.vector_store %arg4[%c0_14, %c0_15], %28 {strides = array<i32>} : memref<1x1xf32, #tpu.memory_space<vmem>>, vector<1x1xf32>,
    } else {
    }
    %c0 = arith.constant 0 : index
    %c0_1 = arith.constant 0 : index
    %3 = vector.load %arg1[%c0, %c0_1] : memref<128x128xbf16, #tpu.memory_space<vmem>>, vector<128x128xbf16>
    %4 = arith.extf %3 : vector<128x128xbf16> to vector<128x128xf32>
    %c0_2 = arith.constant 0 : index
    %c0_3 = arith.constant 0 : index
    %5 = vector.load %arg2[%c0_2, %c0_3] : memref<128x128xbf16, #tpu.memory_space<vmem>>, vector<128x128xbf16>
    %6 = arith.extf %5 : vector<128x128xbf16> to vector<128x128xf32>
    %7 = arith.subf %4, %6 : vector<128x128xf32>
    %8 = math.absf %7 : vector<128x128xf32>
    %cst = arith.constant 1.000000e+00 : f32
    %9 = vector.broadcast %cst : f32 to vector<128x128xf32>
    %10 = arith.cmpf olt, %8, %9 : vector<128x128xf32>
    %cst_4 = arith.constant 5.000000e-01 : f32
    %11 = vector.broadcast %cst_4 : f32 to vector<128x128xf32>
    %12 = arith.mulf %11, %7 : vector<128x128xf32>
    %13 = arith.mulf %12, %7 : vector<128x128xf32>
    %cst_5 = arith.constant 5.000000e-01 : f32
    %14 = vector.broadcast %cst_5 : f32 to vector<128x128xf32>
    %15 = arith.subf %8, %14 : vector<128x128xf32>
    %16 = arith.select %10, %13, %15 : vector<128x128xi1>, vector<128x128xf32>
    %c0_6 = arith.constant 0 : index
    %c0_7 = arith.constant 0 : index
    %17 = vector.load %arg4[%c0_6, %c0_7] : memref<1x1xf32, #tpu.memory_space<vmem>>, vector<1x1xf32>
    %18 = vector.shape_cast %16 : vector<128x128xf32> to vector<1x128x128xf32>
    %cst_8 = arith.constant dense<0.000000e+00> : vector<1xf32>
    %19 = vector.multi_reduction <add>, %18, %cst_8 [1, 2] : vector<1x128x128xf32> to vector<1xf32>
    %20 = vector.shape_cast %19 : vector<1xf32> to vector<1x1x1xf32>
    %21 = vector.extract %20[0, 0, 0] : f32 from vector<1x1x1xf32>
    %22 = vector.broadcast %21 : f32 to vector<1x1xf32>
    %23 = arith.addf %17, %22 : vector<1x1xf32>
    %c0_9 = arith.constant 0 : index
    %c0_10 = arith.constant 0 : index
    %24 = vector.load %arg4[%c0_9, %c0_10] : memref<1x1xf32, #tpu.memory_space<vmem>>, vector<1x1xf32>
    tpu.vector_store %arg4[%c0_9, %c0_10], %23 {strides = array<i32>} : memref<1x1xf32, #tpu.memory_space<vmem>>, vector<1x1xf32>,
    %c0_i32_11 = arith.constant 0 : i32
    %25 = arith.cmpi eq, %arg0, %c0_i32_11 : i32
    %26 = arith.extui %25 : i1 to i32
    %c0_i32_12 = arith.constant 0 : i32
    %27 = arith.cmpi ne, %26, %c0_i32_12 : i32
    scf.if %27 {
      %c0_13 = arith.constant 0 : index
      %c0_14 = arith.constant 0 : index
      %28 = vector.load %arg4[%c0_13, %c0_14] : memref<1x1xf32, #tpu.memory_space<vmem>>, vector<1x1xf32>
      %c0_15 = arith.constant 0 : index
      %c0_16 = arith.constant 0 : index
      %29 = vector.load %arg3[%c0_15, %c0_16] : memref<1x1xf32, #tpu.memory_space<vmem>>, vector<1x1xf32>
      tpu.vector_store %arg3[%c0_15, %c0_16], %28 {strides = array<i32>} : memref<1x1xf32, #tpu.memory_space<vmem>>, vector<1x1xf32>,
    } else {
    }
    return
  }
  func.func @transform_0(%arg0: i32) -> (i32, i32) {
    %c0_i32 = arith.constant 0 : i32
    %c0_i32_0 = arith.constant 0 : i32
    return %arg0, %c0_i32 : i32, i32
  }
  func.func @transform_1(%arg0: i32) -> (i32, i32) {
    %c0_i32 = arith.constant 0 : i32
    %c0_i32_0 = arith.constant 0 : i32
    return %arg0, %c0_i32 : i32, i32
  }
  func.func @transform_2(%arg0: i32) -> (i32, i32) {
    %c0_i32 = arith.constant 0 : i32
    %c0_i32_0 = arith.constant 0 : i32
    %c0_i32_1 = arith.constant 0 : i32
    return %c0_i32, %c0_i32_0 : i32, i32
  }
}

module attributes {stable_mosaic.version = 11 : i64} {
  func.func @_gemm_bias_relu_kernel(%arg0: i32, %arg1: i32, %arg2: i32, %arg3: memref<128x128xbf16, #tpu.memory_space<vmem>>, %arg4: memref<128x256xbf16, #tpu.memory_space<vmem>>, %arg5: memref<1x256xf32, #tpu.memory_space<vmem>>, %arg6: memref<128x256xbf16, #tpu.memory_space<vmem>>, %arg7: memref<128x256xf32, #tpu.memory_space<vmem>>) attributes {dimension_semantics = [#tpu.dimension_semantics<parallel>, #tpu.dimension_semantics<parallel>, #tpu.dimension_semantics<arbitrary>], iteration_bounds = array<i64: 1, 1, 9>, scalar_prefetch = 0 : i64, scratch_operands = 1 : i64, tpu.core_type = #tpu.core_type<tc>, window_params = [{transform_indices = @transform_0, window_bounds = array<i64: 128, 128>}, {transform_indices = @transform_1, window_bounds = array<i64: 128, 256>}, {transform_indices = @transform_2, window_bounds = array<i64: 1, 256>}, {transform_indices = @transform_3, window_bounds = array<i64: 128, 256>}]} {
    %c0_i32 = arith.constant 0 : i32
    %0 = arith.cmpi eq, %arg2, %c0_i32 : i32
    %1 = arith.extui %0 : i1 to i32
    %c0_i32_0 = arith.constant 0 : i32
    %2 = arith.cmpi ne, %1, %c0_i32_0 : i32
    scf.if %2 {
      %cst_9 = arith.constant 0.000000e+00 : f32
      %12 = vector.broadcast %cst_9 : f32 to vector<128x256xf32>
      %c0_10 = arith.constant 0 : index
      %c0_11 = arith.constant 0 : index
      %13 = vector.load %arg7[%c0_10, %c0_11] : memref<128x256xf32, #tpu.memory_space<vmem>>, vector<128x256xf32>
      tpu.vector_store %arg7[%c0_10, %c0_11], %12 {strides = array<i32>} : memref<128x256xf32, #tpu.memory_space<vmem>>, vector<128x256xf32>,
    } else {
    }
    %c0 = arith.constant 0 : index
    %c0_1 = arith.constant 0 : index
    %3 = vector.load %arg7[%c0, %c0_1] : memref<128x256xf32, #tpu.memory_space<vmem>>, vector<128x256xf32>
    %c0_2 = arith.constant 0 : index
    %c0_3 = arith.constant 0 : index
    %4 = vector.load %arg3[%c0_2, %c0_3] : memref<128x128xbf16, #tpu.memory_space<vmem>>, vector<128x128xbf16>
    %c0_4 = arith.constant 0 : index
    %c0_5 = arith.constant 0 : index
    %5 = vector.load %arg4[%c0_4, %c0_5] : memref<128x256xbf16, #tpu.memory_space<vmem>>, vector<128x256xbf16>
    %cst = arith.constant dense<0.000000e+00> : vector<128x256xf32>
    %6 = tpu.matmul %4, %5, %cst {dimension_numbers = #tpu.dot_dimension_numbers<[1], [0], [0], [1], [0, 0, 1, 1], [], []>} : vector<128x128xbf16>, vector<128x256xbf16>, vector<128x256xf32> -> vector<128x256xf32>
    %7 = arith.addf %3, %6 : vector<128x256xf32>
    %c0_6 = arith.constant 0 : index
    %c0_7 = arith.constant 0 : index
    %8 = vector.load %arg7[%c0_6, %c0_7] : memref<128x256xf32, #tpu.memory_space<vmem>>, vector<128x256xf32>
    tpu.vector_store %arg7[%c0_6, %c0_7], %7 {strides = array<i32>} : memref<128x256xf32, #tpu.memory_space<vmem>>, vector<128x256xf32>,
    %c8_i32 = arith.constant 8 : i32
    %9 = arith.cmpi eq, %arg2, %c8_i32 : i32
    %10 = arith.extui %9 : i1 to i32
    %c0_i32_8 = arith.constant 0 : i32
    %11 = arith.cmpi ne, %10, %c0_i32_8 : i32
    scf.if %11 {
      %c0_9 = arith.constant 0 : index
      %c0_10 = arith.constant 0 : index
      %12 = vector.load %arg7[%c0_9, %c0_10] : memref<128x256xf32, #tpu.memory_space<vmem>>, vector<128x256xf32>
      %c0_11 = arith.constant 0 : index
      %c0_12 = arith.constant 0 : index
      %13 = vector.load %arg5[%c0_11, %c0_12] : memref<1x256xf32, #tpu.memory_space<vmem>>, vector<1x256xf32>
      %14 = vector.broadcast %13 : vector<1x256xf32> to vector<128x256xf32>
      %15 = arith.addf %12, %14 : vector<128x256xf32>
      %cst_13 = arith.constant 0.000000e+00 : f32
      %16 = vector.broadcast %cst_13 : f32 to vector<128x256xf32>
      %17 = arith.maximumf %15, %16 : vector<128x256xf32>
      %18 = arith.truncf %17 : vector<128x256xf32> to vector<128x256xbf16>
      %c0_14 = arith.constant 0 : index
      %c0_15 = arith.constant 0 : index
      %19 = vector.load %arg6[%c0_14, %c0_15] : memref<128x256xbf16, #tpu.memory_space<vmem>>, vector<128x256xbf16>
      tpu.vector_store %arg6[%c0_14, %c0_15], %18 {strides = array<i32>} : memref<128x256xbf16, #tpu.memory_space<vmem>>, vector<128x256xbf16>,
    } else {
    }
    return
  }
  func.func @transform_0(%arg0: i32, %arg1: i32, %arg2: i32) -> (i32, i32) {
    %c0_i32 = arith.constant 0 : i32
    return %arg0, %arg2 : i32, i32
  }
  func.func @transform_1(%arg0: i32, %arg1: i32, %arg2: i32) -> (i32, i32) {
    %c0_i32 = arith.constant 0 : i32
    return %arg2, %arg1 : i32, i32
  }
  func.func @transform_2(%arg0: i32, %arg1: i32, %arg2: i32) -> (i32, i32) {
    %c0_i32 = arith.constant 0 : i32
    %c0_i32_0 = arith.constant 0 : i32
    return %c0_i32, %arg1 : i32, i32
  }
  func.func @transform_3(%arg0: i32, %arg1: i32, %arg2: i32) -> (i32, i32) {
    %c0_i32 = arith.constant 0 : i32
    return %arg0, %arg1 : i32, i32
  }
}

module attributes {stable_mosaic.version = 11 : i64} {
  func.func @_gemm_bias_relu_kernel(%arg0: i32, %arg1: i32, %arg2: i32, %arg3: memref<128x256xbf16, #tpu.memory_space<vmem>>, %arg4: memref<256x256xbf16, #tpu.memory_space<vmem>>, %arg5: memref<1x256xf32, #tpu.memory_space<vmem>>, %arg6: memref<128x256xbf16, #tpu.memory_space<vmem>>, %arg7: memref<128x256xf32, #tpu.memory_space<vmem>>) attributes {dimension_semantics = [#tpu.dimension_semantics<parallel>, #tpu.dimension_semantics<parallel>, #tpu.dimension_semantics<arbitrary>], iteration_bounds = array<i64: 1, 1, 9>, scalar_prefetch = 0 : i64, scratch_operands = 1 : i64, tpu.core_type = #tpu.core_type<tc>, window_params = [{transform_indices = @transform_0, window_bounds = array<i64: 128, 256>}, {transform_indices = @transform_1, window_bounds = array<i64: 256, 256>}, {transform_indices = @transform_2, window_bounds = array<i64: 1, 256>}, {transform_indices = @transform_3, window_bounds = array<i64: 128, 256>}]} {
    %c0_i32 = arith.constant 0 : i32
    %0 = arith.cmpi eq, %arg2, %c0_i32 : i32
    %1 = arith.extui %0 : i1 to i32
    %c0_i32_0 = arith.constant 0 : i32
    %2 = arith.cmpi ne, %1, %c0_i32_0 : i32
    scf.if %2 {
      %cst_9 = arith.constant 0.000000e+00 : f32
      %12 = vector.broadcast %cst_9 : f32 to vector<128x256xf32>
      %c0_10 = arith.constant 0 : index
      %c0_11 = arith.constant 0 : index
      %13 = vector.load %arg7[%c0_10, %c0_11] : memref<128x256xf32, #tpu.memory_space<vmem>>, vector<128x256xf32>
      tpu.vector_store %arg7[%c0_10, %c0_11], %12 {strides = array<i32>} : memref<128x256xf32, #tpu.memory_space<vmem>>, vector<128x256xf32>,
    } else {
    }
    %c0 = arith.constant 0 : index
    %c0_1 = arith.constant 0 : index
    %3 = vector.load %arg7[%c0, %c0_1] : memref<128x256xf32, #tpu.memory_space<vmem>>, vector<128x256xf32>
    %c0_2 = arith.constant 0 : index
    %c0_3 = arith.constant 0 : index
    %4 = vector.load %arg3[%c0_2, %c0_3] : memref<128x256xbf16, #tpu.memory_space<vmem>>, vector<128x256xbf16>
    %c0_4 = arith.constant 0 : index
    %c0_5 = arith.constant 0 : index
    %5 = vector.load %arg4[%c0_4, %c0_5] : memref<256x256xbf16, #tpu.memory_space<vmem>>, vector<256x256xbf16>
    %cst = arith.constant dense<0.000000e+00> : vector<128x256xf32>
    %6 = tpu.matmul %4, %5, %cst {dimension_numbers = #tpu.dot_dimension_numbers<[1], [0], [0], [1], [0, 0, 1, 1], [], []>} : vector<128x256xbf16>, vector<256x256xbf16>, vector<128x256xf32> -> vector<128x256xf32>
    %7 = arith.addf %3, %6 : vector<128x256xf32>
    %c0_6 = arith.constant 0 : index
    %c0_7 = arith.constant 0 : index
    %8 = vector.load %arg7[%c0_6, %c0_7] : memref<128x256xf32, #tpu.memory_space<vmem>>, vector<128x256xf32>
    tpu.vector_store %arg7[%c0_6, %c0_7], %7 {strides = array<i32>} : memref<128x256xf32, #tpu.memory_space<vmem>>, vector<128x256xf32>,
    %c8_i32 = arith.constant 8 : i32
    %9 = arith.cmpi eq, %arg2, %c8_i32 : i32
    %10 = arith.extui %9 : i1 to i32
    %c0_i32_8 = arith.constant 0 : i32
    %11 = arith.cmpi ne, %10, %c0_i32_8 : i32
    scf.if %11 {
      %c0_9 = arith.constant 0 : index
      %c0_10 = arith.constant 0 : index
      %12 = vector.load %arg7[%c0_9, %c0_10] : memref<128x256xf32, #tpu.memory_space<vmem>>, vector<128x256xf32>
      %c0_11 = arith.constant 0 : index
      %c0_12 = arith.constant 0 : index
      %13 = vector.load %arg5[%c0_11, %c0_12] : memref<1x256xf32, #tpu.memory_space<vmem>>, vector<1x256xf32>
      %14 = vector.broadcast %13 : vector<1x256xf32> to vector<128x256xf32>
      %15 = arith.addf %12, %14 : vector<128x256xf32>
      %cst_13 = arith.constant 0.000000e+00 : f32
      %16 = vector.broadcast %cst_13 : f32 to vector<128x256xf32>
      %17 = arith.maximumf %15, %16 : vector<128x256xf32>
      %18 = arith.truncf %17 : vector<128x256xf32> to vector<128x256xbf16>
      %c0_14 = arith.constant 0 : index
      %c0_15 = arith.constant 0 : index
      %19 = vector.load %arg6[%c0_14, %c0_15] : memref<128x256xbf16, #tpu.memory_space<vmem>>, vector<128x256xbf16>
      tpu.vector_store %arg6[%c0_14, %c0_15], %18 {strides = array<i32>} : memref<128x256xbf16, #tpu.memory_space<vmem>>, vector<128x256xbf16>,
    } else {
    }
    return
  }
  func.func @transform_0(%arg0: i32, %arg1: i32, %arg2: i32) -> (i32, i32) {
    %c0_i32 = arith.constant 0 : i32
    return %arg0, %arg2 : i32, i32
  }
  func.func @transform_1(%arg0: i32, %arg1: i32, %arg2: i32) -> (i32, i32) {
    %c0_i32 = arith.constant 0 : i32
    return %arg2, %arg1 : i32, i32
  }
  func.func @transform_2(%arg0: i32, %arg1: i32, %arg2: i32) -> (i32, i32) {
    %c0_i32 = arith.constant 0 : i32
    %c0_i32_0 = arith.constant 0 : i32
    return %c0_i32, %arg1 : i32, i32
  }
  func.func @transform_3(%arg0: i32, %arg1: i32, %arg2: i32) -> (i32, i32) {
    %c0_i32 = arith.constant 0 : i32
    return %arg0, %arg1 : i32, i32
  }
}

module attributes {stable_mosaic.version = 11 : i64} {
  func.func @_smooth_l1_sum_kernel(%arg0: i32, %arg1: memref<32x256xbf16, #tpu.memory_space<vmem>>, %arg2: memref<32x256xbf16, #tpu.memory_space<vmem>>, %arg3: memref<1x1xf32, #tpu.memory_space<vmem>>, %arg4: memref<1x1xf32, #tpu.memory_space<vmem>>) attributes {dimension_semantics = [#tpu.dimension_semantics<arbitrary>], iteration_bounds = array<i64: 1>, scalar_prefetch = 0 : i64, scratch_operands = 1 : i64, tpu.core_type = #tpu.core_type<tc>, window_params = [{transform_indices = @transform_0, window_bounds = array<i64: 32, 256>}, {transform_indices = @transform_1, window_bounds = array<i64: 32, 256>}, {pipeline_mode = #tpu.pipeline_mode<synchronous>, transform_indices = @transform_2, window_bounds = array<i64: 1, 1>}]} {
    %c0_i32 = arith.constant 0 : i32
    %0 = arith.cmpi eq, %arg0, %c0_i32 : i32
    %1 = arith.extui %0 : i1 to i32
    %c0_i32_0 = arith.constant 0 : i32
    %2 = arith.cmpi ne, %1, %c0_i32_0 : i32
    scf.if %2 {
      %cst_13 = arith.constant 0.000000e+00 : f32
      %28 = vector.broadcast %cst_13 : f32 to vector<1x1xf32>
      %c0_14 = arith.constant 0 : index
      %c0_15 = arith.constant 0 : index
      %29 = vector.load %arg4[%c0_14, %c0_15] : memref<1x1xf32, #tpu.memory_space<vmem>>, vector<1x1xf32>
      tpu.vector_store %arg4[%c0_14, %c0_15], %28 {strides = array<i32>} : memref<1x1xf32, #tpu.memory_space<vmem>>, vector<1x1xf32>,
    } else {
    }
    %c0 = arith.constant 0 : index
    %c0_1 = arith.constant 0 : index
    %3 = vector.load %arg1[%c0, %c0_1] : memref<32x256xbf16, #tpu.memory_space<vmem>>, vector<32x256xbf16>
    %4 = arith.extf %3 : vector<32x256xbf16> to vector<32x256xf32>
    %c0_2 = arith.constant 0 : index
    %c0_3 = arith.constant 0 : index
    %5 = vector.load %arg2[%c0_2, %c0_3] : memref<32x256xbf16, #tpu.memory_space<vmem>>, vector<32x256xbf16>
    %6 = arith.extf %5 : vector<32x256xbf16> to vector<32x256xf32>
    %7 = arith.subf %4, %6 : vector<32x256xf32>
    %8 = math.absf %7 : vector<32x256xf32>
    %cst = arith.constant 1.000000e+00 : f32
    %9 = vector.broadcast %cst : f32 to vector<32x256xf32>
    %10 = arith.cmpf olt, %8, %9 : vector<32x256xf32>
    %cst_4 = arith.constant 5.000000e-01 : f32
    %11 = vector.broadcast %cst_4 : f32 to vector<32x256xf32>
    %12 = arith.mulf %11, %7 : vector<32x256xf32>
    %13 = arith.mulf %12, %7 : vector<32x256xf32>
    %cst_5 = arith.constant 5.000000e-01 : f32
    %14 = vector.broadcast %cst_5 : f32 to vector<32x256xf32>
    %15 = arith.subf %8, %14 : vector<32x256xf32>
    %16 = arith.select %10, %13, %15 : vector<32x256xi1>, vector<32x256xf32>
    %c0_6 = arith.constant 0 : index
    %c0_7 = arith.constant 0 : index
    %17 = vector.load %arg4[%c0_6, %c0_7] : memref<1x1xf32, #tpu.memory_space<vmem>>, vector<1x1xf32>
    %18 = vector.shape_cast %16 : vector<32x256xf32> to vector<1x32x256xf32>
    %cst_8 = arith.constant dense<0.000000e+00> : vector<1xf32>
    %19 = vector.multi_reduction <add>, %18, %cst_8 [1, 2] : vector<1x32x256xf32> to vector<1xf32>
    %20 = vector.shape_cast %19 : vector<1xf32> to vector<1x1x1xf32>
    %21 = vector.extract %20[0, 0, 0] : f32 from vector<1x1x1xf32>
    %22 = vector.broadcast %21 : f32 to vector<1x1xf32>
    %23 = arith.addf %17, %22 : vector<1x1xf32>
    %c0_9 = arith.constant 0 : index
    %c0_10 = arith.constant 0 : index
    %24 = vector.load %arg4[%c0_9, %c0_10] : memref<1x1xf32, #tpu.memory_space<vmem>>, vector<1x1xf32>
    tpu.vector_store %arg4[%c0_9, %c0_10], %23 {strides = array<i32>} : memref<1x1xf32, #tpu.memory_space<vmem>>, vector<1x1xf32>,
    %c0_i32_11 = arith.constant 0 : i32
    %25 = arith.cmpi eq, %arg0, %c0_i32_11 : i32
    %26 = arith.extui %25 : i1 to i32
    %c0_i32_12 = arith.constant 0 : i32
    %27 = arith.cmpi ne, %26, %c0_i32_12 : i32
    scf.if %27 {
      %c0_13 = arith.constant 0 : index
      %c0_14 = arith.constant 0 : index
      %28 = vector.load %arg4[%c0_13, %c0_14] : memref<1x1xf32, #tpu.memory_space<vmem>>, vector<1x1xf32>
      %c0_15 = arith.constant 0 : index
      %c0_16 = arith.constant 0 : index
      %29 = vector.load %arg3[%c0_15, %c0_16] : memref<1x1xf32, #tpu.memory_space<vmem>>, vector<1x1xf32>
      tpu.vector_store %arg3[%c0_15, %c0_16], %28 {strides = array<i32>} : memref<1x1xf32, #tpu.memory_space<vmem>>, vector<1x1xf32>,
    } else {
    }
    return
  }
  func.func @transform_0(%arg0: i32) -> (i32, i32) {
    %c0_i32 = arith.constant 0 : i32
    %c0_i32_0 = arith.constant 0 : i32
    return %arg0, %c0_i32 : i32, i32
  }
  func.func @transform_1(%arg0: i32) -> (i32, i32) {
    %c0_i32 = arith.constant 0 : i32
    %c0_i32_0 = arith.constant 0 : i32
    return %arg0, %c0_i32 : i32, i32
  }
  func.func @transform_2(%arg0: i32) -> (i32, i32) {
    %c0_i32 = arith.constant 0 : i32
    %c0_i32_0 = arith.constant 0 : i32
    %c0_i32_1 = arith.constant 0 : i32
    return %c0_i32, %c0_i32_0 : i32, i32
  }
}

</mosaic_0001>

<bundles_post_ra>
// kernel: loss_network_forward.10
= control target key start
LH: loop header
LB: loop body
LE: loop exit
PB: predicated region body
PF: predicated region fallthrough
CT: control target
= control target key end

     0   :  { %s2379_s12 = smov 0   ;;  %s2381_s13 = smov 0   ;;  %s2580_s0 = inlined_call_operand.vmem [shape: bf16[1024,128], index: 0, kind: input, shape index: {}]   ;;  %s2581_s1 = inlined_call_operand.vmem [shape: bf16[128,128], index: 1, kind: input, shape index: {}]   ;;  %s2582_s2 = inlined_call_operand.vmem [shape: f32[1,128], index: 2, kind: input, shape index: {}]   ;;  %s2583_s3 = inlined_call_operand.vmem [shape: bf16[1024,128], index: 3, kind: output, shape index: {}]  }
   0x1   :  { %s2383_s14 = smov 0  }
   0x2 LB: > { %s32_s15 = sadd.s32 1, %s2353_s13  ;;  %p1768_p0 = scmp.ge.s32.totalorder %s2357_s14, 1  ;;  %s2357_s14 = sphi %s2383_s14, %s13_s14   ;;  %s2353_s13 = sphi %s2381_s13, %s2585_s13   ;;  %s2349_s12 = sphi %s2379_s12, %s2584_s12  }
   0x3   : > { %p34_p1 = scmp.ge.s32.totalorder %s32_s15, 2  ;;  %p188_p2 = scmp.lt.s32.totalorder %s2357_s14, 3 }
   0x5   : > { %s2587_s15 = smov (%p34_p1, %s32_s15), 0  ;;  %p189_p3 = pnand %p1768_p0, %p188_p2 }
   0x6   : > { %s1769_s18 = sshll.u32 (!%p189_p3), %s2349_s12, 6 }
   0x7   : > { %192 = sbr.rel (%p189_p3) target bundleno = 307 (0x133), region = 32  ;;  %p230_p4 = scmp.lt.s32.totalorder (!%p189_p3), %s1769_s18, 127 }
   0xc   : > { %v2295_v0 = vld [vmem:[%s2581_s1 + $0x38] sm:$0xff]   ;;  %v2296_v1 = vld [vmem:[%s2581_s1 + $0x30] sm:$0xff]   ;;  %s2589_s18 = smov (!%p230_p4, %s1769_s18), 127  ;;  %v2297_v2 = vld [vmem:[%s2581_s1 + $0x28] sm:$0xff]  }
   0xd   : > { %2175 = vmatprep.subr.bf16.mxu0 %v2295_v0  ;;  %2255 = vmatprep.subr.bf16.mxu1 %v2295_v0  ;;  %s1770_s23 = sshll.u32 %s2589_s18, 2  ;;  %v2298_v3 = vld [vmem:[%s2581_s1 + $0x20] sm:$0xff]   ;;  %v2299_v6 = vld [vmem:[%s2581_s1 + $0x18] sm:$0xff]   ;;  %v2300_v7 = vld [vmem:[%s2581_s1 + $0x10] sm:$0xff]  }
   0xe   : > { %2176 = vmatpush3.bf16.msra.mxu0 %v2295_v0  ;;  %2263 = vmatpush3.bf16.msra.mxu1 %v2295_v0  ;;  %s2414_s26 = scalar_lea.vmem %s2580_s0, %s1770_s23  ;;  %v2301_v8 = vld [vmem:[%s2581_s1 + $0x8] sm:$0xff]   ;;  %v2302_v9 = vld [vmem:[%s2581_s1] sm:$0xff]   ;;  %s2481_s17 = scalar_lea.vmem %s2583_s3, %s1770_s23 }
   0xf   : > { %2177 = vmatprep.subr.bf16.mxu0 %v2296_v1  ;;  %2256 = vmatprep.subr.bf16.mxu1 %v2296_v1  ;;  %v2303_v4 = vld [vmem:[%s2414_s26] sm:$0xff]   ;;  %v2305_v10 = vld [vmem:[%s2414_s26 + $0x8] sm:$0xff]   ;;  %v2307_v12 = vld [vmem:[%s2414_s26 + $0x10] sm:$0xff]  }
  0x10   : > { %v2304_v5 = vld [vmem:[%s2414_s26 + $0x80] sm:$0xff]   ;;  %2191 = vmatprep.mubr.bf16.mxu0 %v2303_v4  ;;  %v2306_v11 = vld [vmem:[%s2414_s26 + $0x88] sm:$0xff]   ;;  %v2308_v13 = vld [vmem:[%s2414_s26 + $0x90] sm:$0xff]  }
  0x11   : > { %2223 = vmatprep.mubr.bf16.mxu1 %v2304_v5  ;;  %v2309_v14 = vld [vmem:[%s2414_s26 + $0x18] sm:$0xff]   ;;  %v2311_v16 = vld [vmem:[%s2414_s26 + $0x20] sm:$0xff]   ;;  %v2313_v18 = vld [vmem:[%s2414_s26 + $0x28] sm:$0xff]  }
  0x12   : > { %2178 = vmatpush3.bf16.msra.mxu0 %v2296_v1  ;;  %2264 = vmatpush3.bf16.msra.mxu1 %v2296_v1  ;;  %v2310_v15 = vld [vmem:[%s2414_s26 + $0x98] sm:$0xff]   ;;  %v2312_v17 = vld [vmem:[%s2414_s26 + $0xa0] sm:$0xff]   ;;  %v2314_v19 = vld [vmem:[%s2414_s26 + $0xa8] sm:$0xff]  }
  0x13   : > { %2179 = vmatprep.subr.bf16.mxu0 %v2297_v2  ;;  %2257 = vmatprep.subr.bf16.mxu1 %v2297_v2  ;;  %v2315_v20 = vld [vmem:[%s2414_s26 + $0x30] sm:$0xff]   ;;  %v2317_v22 = vld [vmem:[%s2414_s26 + $0x38] sm:$0xff]   ;;  %v2319_v24 = vld [vmem:[%s2414_s26 + $0x40] sm:$0xff]  }
  0x14   : > { %v2316_v21 = vld [vmem:[%s2414_s26 + $0xb0] sm:$0xff]   ;;  %v2318_v23 = vld [vmem:[%s2414_s26 + $0xb8] sm:$0xff]   ;;  %v2320_v25 = vld [vmem:[%s2414_s26 + $0xc0] sm:$0xff]  }
  0x15   : > { %v2321_v26 = vld [vmem:[%s2414_s26 + $0x48] sm:$0xff]   ;;  %v2323_v28 = vld [vmem:[%s2414_s26 + $0x50] sm:$0xff]   ;;  %v2325_v30 = vld [vmem:[%s2414_s26 + $0x58] sm:$0xff]  }
  0x16   : > { %2180 = vmatpush3.bf16.msra.mxu0 %v2297_v2  ;;  %2265 = vmatpush3.bf16.msra.mxu1 %v2297_v2  ;;  %v2322_v27 = vld [vmem:[%s2414_s26 + $0xc8] sm:$0xff]   ;;  %v2324_v29 = vld [vmem:[%s2414_s26 + $0xd0] sm:$0xff]   ;;  %v2326_v31 = vld [vmem:[%s2414_s26 + $0xd8] sm:$0xff]  }
  0x17   : > { %2181 = vmatprep.subr.bf16.mxu0 %v2298_v3  ;;  %2258 = vmatprep.subr.bf16.mxu1 %v2298_v3  ;;  %v2327_v32 = vld [vmem:[%s2414_s26 + $0x60] sm:$0xff]   ;;  %v2329_v34 = vld [vmem:[%s2414_s26 + $0x68] sm:$0xff]   ;;  %v2331_v36 = vld [vmem:[%s2414_s26 + $0x70] sm:$0xff]  }
  0x18   : > { %v2328_v33 = vld [vmem:[%s2414_s26 + $0xe0] sm:$0xff]   ;;  %v2330_v35 = vld [vmem:[%s2414_s26 + $0xe8] sm:$0xff]   ;;  %v2332_v37 = vld [vmem:[%s2414_s26 + $0xf0] sm:$0xff]  }
  0x19   : > { %v2333_v38 = vld [vmem:[%s2414_s26 + $0x78] sm:$0xff]   ;;  %v2466_v40 = vld [vmem:[%s2582_s2] ss:$0 sm:$0xff] }
  0x1a   : > { %2182 = vmatpush3.bf16.msra.mxu0 %v2298_v3  ;;  %2266 = vmatpush3.bf16.msra.mxu1 %v2298_v3  ;;  %v2334_v39 = vld [vmem:[%s2414_s26 + $0xf8] sm:$0xff]  }
  0x1b   : > { %2183 = vmatprep.subr.bf16.mxu0 %v2299_v6  ;;  %2259 = vmatprep.subr.bf16.mxu1 %v2299_v6 }
  0x1e   : > { %2184 = vmatpush3.bf16.msra.mxu0 %v2299_v6  ;;  %2267 = vmatpush3.bf16.msra.mxu1 %v2299_v6 }
  0x1f   : > { %2185 = vmatprep.subr.bf16.mxu0 %v2300_v7  ;;  %2260 = vmatprep.subr.bf16.mxu1 %v2300_v7 }
  0x22   : > { %2186 = vmatpush3.bf16.msra.mxu0 %v2300_v7  ;;  %2268 = vmatpush3.bf16.msra.mxu1 %v2300_v7 }
  0x23   : > { %2187 = vmatprep.subr.bf16.mxu0 %v2301_v8  ;;  %2261 = vmatprep.subr.bf16.mxu1 %v2301_v8 }
  0x26   : > { %2188 = vmatpush3.bf16.msra.mxu0 %v2301_v8  ;;  %2269 = vmatpush3.bf16.msra.mxu1 %v2301_v8 }
  0x27   : > { %2189 = vmatprep.subr.bf16.mxu0 %v2302_v9  ;;  %2262 = vmatprep.subr.bf16.mxu1 %v2302_v9 }
  0x2a   : > { %2190 = vmatpush3.bf16.msra.mxu0 %v2302_v9  ;;  %2270 = vmatpush3.bf16.msra.mxu1 %v2302_v9 }
  0x2d   : > { %2192 = vmatmul.mubr.bf16.vlgmr.msra.gmra.mxu0 %v2305_v10  ;;  %2224 = vmatmul.mubr.bf16.vlgmr.msra.gmra.mxu1 %v2306_v11 }
  0x2e   : > { %2195 = vmatprep.mubr.bf16.mxu0 %v2307_v12  ;;  %2227 = vmatprep.mubr.bf16.mxu1 %v2308_v13 }
  0x35   : > { %2196 = vmatmul.mubr.bf16.gmra.mxu0 %v2309_v14  ;;  %2228 = vmatmul.mubr.bf16.gmra.mxu1 %v2310_v15 }
  0x36   : > { %2199 = vmatprep.mubr.bf16.mxu0 %v2311_v16  ;;  %2231 = vmatprep.mubr.bf16.mxu1 %v2312_v17 }
  0x3d   : > { %2200 = vmatmul.mubr.bf16.gmra.mxu0 %v2313_v18  ;;  %2232 = vmatmul.mubr.bf16.gmra.mxu1 %v2314_v19 }
  0x3e   : > { %2203 = vmatprep.mubr.bf16.mxu0 %v2315_v20  ;;  %2235 = vmatprep.mubr.bf16.mxu1 %v2316_v21 }
  0x45   : > { %2204 = vmatmul.mubr.bf16.gmra.mxu0 %v2317_v22  ;;  %2236 = vmatmul.mubr.bf16.gmra.mxu1 %v2318_v23 }
  0x46   : > { %2207 = vmatprep.mubr.bf16.mxu0 %v2319_v24  ;;  %2239 = vmatprep.mubr.bf16.mxu1 %v2320_v25 }
  0x4d   : > { %2208 = vmatmul.mubr.bf16.gmra.mxu0 %v2321_v26  ;;  %2240 = vmatmul.mubr.bf16.gmra.mxu1 %v2322_v27 }
  0x4e   : > { %2211 = vmatprep.mubr.bf16.mxu0 %v2323_v28  ;;  %2243 = vmatprep.mubr.bf16.mxu1 %v2324_v29 }
  0x55   : > { %2212 = vmatmul.mubr.bf16.gmra.mxu0 %v2325_v30  ;;  %2244 = vmatmul.mubr.bf16.gmra.mxu1 %v2326_v31 }
  0x56   : > { %2215 = vmatprep.mubr.bf16.mxu0 %v2327_v32  ;;  %2247 = vmatprep.mubr.bf16.mxu1 %v2328_v33 }
  0x5d   : > { %2216 = vmatmul.mubr.bf16.gmra.mxu0 %v2329_v34  ;;  %2248 = vmatmul.mubr.bf16.gmra.mxu1 %v2330_v35 }
  0x5e   : > { %2219 = vmatprep.mubr.bf16.mxu0 %v2331_v36  ;;  %2251 = vmatprep.mubr.bf16.mxu1 %v2332_v37 }
  0x65   : > { %2220 = vmatmul.mubr.bf16.gmra.mxu0 %v2333_v38  ;;  %2252 = vmatmul.mubr.bf16.gmra.mxu1 %v2334_v39 }
  0xed   : > { %v2193_v41 = vpop.f32.mrf.mxu0  ;;  %v2225_v42 = vpop.f32.mrf.mxu1 }
  0xee   : > { %v1205_v43 = vadd.f32 %v2193_v41, %v2466_v40  ;;  %v1237_v44 = vadd.f32 %v2225_v42, %v2466_v40 }
  0xef   : > { %v746_v45 = vpop.f32.mrf.mxu0  ;;  %v874_v46 = vpop.f32.mrf.mxu1 }
  0xf0   : > { %v1203_v47 = vadd.f32 %v2466_v40, %v746_v45  ;;  %v1235_v48 = vadd.f32 %v2466_v40, %v874_v46  ;;  %v1269_v53 = vmax.f32 %v1205_v43, 0.0  ;;  %v1301_v54 = vmax.f32 %v1237_v44, 0.0 }
  0xf1   : > { %v2194_v49 = vpop.f32.mrf.mxu0  ;;  %v2226_v50 = vpop.f32.mrf.mxu1 }
  0xf2   : > { %v1206_v51 = vadd.f32 %v2194_v49, %v2466_v40  ;;  %v1238_v52 = vadd.f32 %v2226_v50, %v2466_v40  ;;  %v1267_v61 = vmax.f32 %v1203_v47, 0.0  ;;  %v1299_v62 = vmax.f32 %v1235_v48, 0.0 }
  0xf3   : > { %v749_v55 = vpop.f32.mrf.mxu0  ;;  %v877_v56 = vpop.f32.mrf.mxu1 }
  0xf4   : > { %v1270_v57 = vmax.f32 %v1206_v51, 0.0  ;;  %v1302_v58 = vmax.f32 %v1238_v52, 0.0  ;;  %v1204_v59 = vadd.f32 %v2466_v40, %v749_v55  ;;  %v1236_v60 = vadd.f32 %v2466_v40, %v877_v56 }
  0xf5   : > { %v2197_v63 = vpop.f32.mrf.mxu0  ;;  %v2229_v0 = vpop.f32.mrf.mxu1 }
  0xf6   : > { %v1952_v1 = vpack.c.bf16 %v1270_v57, %v1269_v53  ;;  %v2032_v2 = vpack.c.bf16 %v1302_v58, %v1301_v54  ;;  %v1268_v3 = vmax.f32 %v1204_v59, 0.0  ;;  %v1300_v4 = vmax.f32 %v1236_v60, 0.0 }
  0xf7   : > { %v1209_v5 = vadd.f32 %v2197_v63, %v2466_v40  ;;  %v1241_v6 = vadd.f32 %v2229_v0, %v2466_v40  ;;  %v762_v7 = vpop.f32.mrf.mxu0  ;;  %v890_v8 = vpop.f32.mrf.mxu1 }
  0xf8   : > { %2104 = vst [vmem:[%s2481_s17 + $0x8] sm:$0xff] %v1952_v1   ;;  %2120 = vst [vmem:[%s2481_s17 + $0x88] sm:$0xff] %v2032_v2   ;;  %v1947_v9 = vpack.c.bf16 %v1268_v3, %v1267_v61  ;;  %v2027_v10 = vpack.c.bf16 %v1300_v4, %v1299_v62  ;;  %v1207_v11 = vadd.f32 %v2466_v40, %v762_v7 }
  0xf9   : > { %v1239_v12 = vadd.f32 %v2466_v40, %v890_v8  ;;  %v2198_v13 = vpop.f32.mrf.mxu0  ;;  %v2230_v14 = vpop.f32.mrf.mxu1  ;;  %v1273_v17 = vmax.f32 %v1209_v5, 0.0  ;;  %v1305_v18 = vmax.f32 %v1241_v6, 0.0 }
  0xfa   : > { %1948 = vst [vmem:[%s2481_s17] sm:$0xff] %v1947_v9   ;;  %2119 = vst [vmem:[%s2481_s17 + $0x80] sm:$0xff] %v2027_v10   ;;  %v1210_v15 = vadd.f32 %v2198_v13, %v2466_v40  ;;  %v1242_v16 = vadd.f32 %v2230_v14, %v2466_v40  ;;  %v1271_v25 = vmax.f32 %v1207_v11, 0.0 }
  0xfb   : > { %v765_v19 = vpop.f32.mrf.mxu0  ;;  %v893_v20 = vpop.f32.mrf.mxu1  ;;  %v1303_v26 = vmax.f32 %v1239_v12, 0.0 }
  0xfc   : > { %v1274_v21 = vmax.f32 %v1210_v15, 0.0  ;;  %v1306_v22 = vmax.f32 %v1242_v16, 0.0  ;;  %v1208_v23 = vadd.f32 %v2466_v40, %v765_v19  ;;  %v1240_v24 = vadd.f32 %v2466_v40, %v893_v20 }
  0xfd   : > { %v2201_v27 = vpop.f32.mrf.mxu0  ;;  %v2233_v28 = vpop.f32.mrf.mxu1 }
  0xfe   : > { %v1962_v29 = vpack.c.bf16 %v1274_v21, %v1273_v17  ;;  %v2042_v30 = vpack.c.bf16 %v1306_v22, %v1305_v18  ;;  %v1272_v31 = vmax.f32 %v1208_v23, 0.0  ;;  %v1304_v32 = vmax.f32 %v1240_v24, 0.0 }
  0xff   : > { %v1213_v33 = vadd.f32 %v2201_v27, %v2466_v40  ;;  %v1245_v34 = vadd.f32 %v2233_v28, %v2466_v40  ;;  %v778_v35 = vpop.f32.mrf.mxu0  ;;  %v906_v36 = vpop.f32.mrf.mxu1 }
 0x100   : > { %2106 = vst [vmem:[%s2481_s17 + $0x18] sm:$0xff] %v1962_v29   ;;  %2122 = vst [vmem:[%s2481_s17 + $0x98] sm:$0xff] %v2042_v30   ;;  %v1957_v37 = vpack.c.bf16 %v1272_v31, %v1271_v25  ;;  %v2037_v38 = vpack.c.bf16 %v1304_v32, %v1303_v26  ;;  %v1211_v39 = vadd.f32 %v2466_v40, %v778_v35 }
 0x101   : > { %v1243_v41 = vadd.f32 %v2466_v40, %v906_v36  ;;  %v2202_v42 = vpop.f32.mrf.mxu0  ;;  %v2234_v43 = vpop.f32.mrf.mxu1  ;;  %v1277_v46 = vmax.f32 %v1213_v33, 0.0  ;;  %v1309_v47 = vmax.f32 %v1245_v34, 0.0 }
 0x102   : > { %2105 = vst [vmem:[%s2481_s17 + $0x10] sm:$0xff] %v1957_v37   ;;  %2121 = vst [vmem:[%s2481_s17 + $0x90] sm:$0xff] %v2037_v38   ;;  %v1214_v44 = vadd.f32 %v2202_v42, %v2466_v40  ;;  %v1246_v45 = vadd.f32 %v2234_v43, %v2466_v40  ;;  %v1275_v54 = vmax.f32 %v1211_v39, 0.0 }
 0x103   : > { %v781_v48 = vpop.f32.mrf.mxu0  ;;  %v909_v49 = vpop.f32.mrf.mxu1  ;;  %v1307_v55 = vmax.f32 %v1243_v41, 0.0 }
 0x104   : > { %v1278_v50 = vmax.f32 %v1214_v44, 0.0  ;;  %v1310_v51 = vmax.f32 %v1246_v45, 0.0  ;;  %v1212_v52 = vadd.f32 %v2466_v40, %v781_v48  ;;  %v1244_v53 = vadd.f32 %v2466_v40, %v909_v49 }
 0x105   : > { %v2205_v56 = vpop.f32.mrf.mxu0  ;;  %v2237_v57 = vpop.f32.mrf.mxu1 }
 0x106   : > { %v1972_v58 = vpack.c.bf16 %v1278_v50, %v1277_v46  ;;  %v2052_v59 = vpack.c.bf16 %v1310_v51, %v1309_v47  ;;  %v1276_v60 = vmax.f32 %v1212_v52, 0.0  ;;  %v1308_v61 = vmax.f32 %v1244_v53, 0.0 }
 0x107   : > { %v1217_v62 = vadd.f32 %v2205_v56, %v2466_v40  ;;  %v1249_v63 = vadd.f32 %v2237_v57, %v2466_v40  ;;  %v794_v0 = vpop.f32.mrf.mxu0  ;;  %v922_v1 = vpop.f32.mrf.mxu1 }
 0x108   : > { %2108 = vst [vmem:[%s2481_s17 + $0x28] sm:$0xff] %v1972_v58   ;;  %2124 = vst [vmem:[%s2481_s17 + $0xa8] sm:$0xff] %v2052_v59   ;;  %v1967_v2 = vpack.c.bf16 %v1276_v60, %v1275_v54  ;;  %v2047_v3 = vpack.c.bf16 %v1308_v61, %v1307_v55  ;;  %v1215_v4 = vadd.f32 %v2466_v40, %v794_v0 }
 0x109   : > { %v1247_v5 = vadd.f32 %v2466_v40, %v922_v1  ;;  %v2206_v6 = vpop.f32.mrf.mxu0  ;;  %v2238_v7 = vpop.f32.mrf.mxu1  ;;  %v1281_v10 = vmax.f32 %v1217_v62, 0.0  ;;  %v1313_v11 = vmax.f32 %v1249_v63, 0.0 }
 0x10a   : > { %2107 = vst [vmem:[%s2481_s17 + $0x20] sm:$0xff] %v1967_v2   ;;  %2123 = vst [vmem:[%s2481_s17 + $0xa0] sm:$0xff] %v2047_v3   ;;  %v1218_v8 = vadd.f32 %v2206_v6, %v2466_v40  ;;  %v1250_v9 = vadd.f32 %v2238_v7, %v2466_v40  ;;  %v1279_v18 = vmax.f32 %v1215_v4, 0.0 }
 0x10b   : > { %v797_v12 = vpop.f32.mrf.mxu0  ;;  %v925_v13 = vpop.f32.mrf.mxu1  ;;  %v1311_v19 = vmax.f32 %v1247_v5, 0.0 }
 0x10c   : > { %v1282_v14 = vmax.f32 %v1218_v8, 0.0  ;;  %v1314_v15 = vmax.f32 %v1250_v9, 0.0  ;;  %v1216_v16 = vadd.f32 %v2466_v40, %v797_v12  ;;  %v1248_v17 = vadd.f32 %v2466_v40, %v925_v13 }
 0x10d   : > { %v2209_v20 = vpop.f32.mrf.mxu0  ;;  %v2241_v21 = vpop.f32.mrf.mxu1 }
 0x10e   : > { %v1982_v22 = vpack.c.bf16 %v1282_v14, %v1281_v10  ;;  %v2062_v23 = vpack.c.bf16 %v1314_v15, %v1313_v11  ;;  %v1280_v24 = vmax.f32 %v1216_v16, 0.0  ;;  %v1312_v25 = vmax.f32 %v1248_v17, 0.0 }
 0x10f   : > { %v1221_v26 = vadd.f32 %v2209_v20, %v2466_v40  ;;  %v1253_v27 = vadd.f32 %v2241_v21, %v2466_v40  ;;  %v810_v28 = vpop.f32.mrf.mxu0  ;;  %v938_v29 = vpop.f32.mrf.mxu1 }
 0x110   : > { %2110 = vst [vmem:[%s2481_s17 + $0x38] sm:$0xff] %v1982_v22   ;;  %2126 = vst [vmem:[%s2481_s17 + $0xb8] sm:$0xff] %v2062_v23   ;;  %v1977_v30 = vpack.c.bf16 %v1280_v24, %v1279_v18  ;;  %v2057_v31 = vpack.c.bf16 %v1312_v25, %v1311_v19  ;;  %v1219_v32 = vadd.f32 %v2466_v40, %v810_v28 }
 0x111   : > { %v1251_v33 = vadd.f32 %v2466_v40, %v938_v29  ;;  %v2210_v34 = vpop.f32.mrf.mxu0  ;;  %v2242_v35 = vpop.f32.mrf.mxu1  ;;  %v1285_v38 = vmax.f32 %v1221_v26, 0.0  ;;  %v1317_v39 = vmax.f32 %v1253_v27, 0.0 }
 0x112   : > { %2109 = vst [vmem:[%s2481_s17 + $0x30] sm:$0xff] %v1977_v30   ;;  %2125 = vst [vmem:[%s2481_s17 + $0xb0] sm:$0xff] %v2057_v31   ;;  %v1222_v36 = vadd.f32 %v2210_v34, %v2466_v40  ;;  %v1254_v37 = vadd.f32 %v2242_v35, %v2466_v40  ;;  %v1283_v47 = vmax.f32 %v1219_v32, 0.0 }
 0x113   : > { %v813_v41 = vpop.f32.mrf.mxu0  ;;  %v941_v42 = vpop.f32.mrf.mxu1  ;;  %v1315_v48 = vmax.f32 %v1251_v33, 0.0 }
 0x114   : > { %v1286_v43 = vmax.f32 %v1222_v36, 0.0  ;;  %v1318_v44 = vmax.f32 %v1254_v37, 0.0  ;;  %v1220_v45 = vadd.f32 %v2466_v40, %v813_v41  ;;  %v1252_v46 = vadd.f32 %v2466_v40, %v941_v42 }
 0x115   : > { %v2213_v49 = vpop.f32.mrf.mxu0  ;;  %v2245_v50 = vpop.f32.mrf.mxu1 }
 0x116   : > { %v1992_v51 = vpack.c.bf16 %v1286_v43, %v1285_v38  ;;  %v2072_v52 = vpack.c.bf16 %v1318_v44, %v1317_v39  ;;  %v1284_v53 = vmax.f32 %v1220_v45, 0.0  ;;  %v1316_v54 = vmax.f32 %v1252_v46, 0.0 }
 0x117   : > { %v1225_v55 = vadd.f32 %v2213_v49, %v2466_v40  ;;  %v1257_v56 = vadd.f32 %v2245_v50, %v2466_v40  ;;  %v826_v57 = vpop.f32.mrf.mxu0  ;;  %v954_v58 = vpop.f32.mrf.mxu1 }
 0x118   : > { %2112 = vst [vmem:[%s2481_s17 + $0x48] sm:$0xff] %v1992_v51   ;;  %2128 = vst [vmem:[%s2481_s17 + $0xc8] sm:$0xff] %v2072_v52   ;;  %v1987_v59 = vpack.c.bf16 %v1284_v53, %v1283_v47  ;;  %v2067_v60 = vpack.c.bf16 %v1316_v54, %v1315_v48  ;;  %v1223_v61 = vadd.f32 %v2466_v40, %v826_v57 }
 0x119   : > { %v1255_v62 = vadd.f32 %v2466_v40, %v954_v58  ;;  %v2214_v63 = vpop.f32.mrf.mxu0  ;;  %v2246_v0 = vpop.f32.mrf.mxu1  ;;  %v1289_v3 = vmax.f32 %v1225_v55, 0.0  ;;  %v1321_v4 = vmax.f32 %v1257_v56, 0.0 }
 0x11a   : > { %2111 = vst [vmem:[%s2481_s17 + $0x40] sm:$0xff] %v1987_v59   ;;  %2127 = vst [vmem:[%s2481_s17 + $0xc0] sm:$0xff] %v2067_v60   ;;  %v1226_v1 = vadd.f32 %v2214_v63, %v2466_v40  ;;  %v1258_v2 = vadd.f32 %v2246_v0, %v2466_v40  ;;  %v1287_v11 = vmax.f32 %v1223_v61, 0.0 }
 0x11b   : > { %v829_v5 = vpop.f32.mrf.mxu0  ;;  %v957_v6 = vpop.f32.mrf.mxu1  ;;  %v1319_v12 = vmax.f32 %v1255_v62, 0.0 }
 0x11c   : > { %v1290_v7 = vmax.f32 %v1226_v1, 0.0  ;;  %v1322_v8 = vmax.f32 %v1258_v2, 0.0  ;;  %v1224_v9 = vadd.f32 %v2466_v40, %v829_v5  ;;  %v1256_v10 = vadd.f32 %v2466_v40, %v957_v6 }
 0x11d   : > { %v2217_v13 = vpop.f32.mrf.mxu0  ;;  %v2249_v14 = vpop.f32.mrf.mxu1 }
 0x11e   : > { %v2002_v15 = vpack.c.bf16 %v1290_v7, %v1289_v3  ;;  %v2082_v16 = vpack.c.bf16 %v1322_v8, %v1321_v4  ;;  %v1288_v17 = vmax.f32 %v1224_v9, 0.0  ;;  %v1320_v18 = vmax.f32 %v1256_v10, 0.0 }
 0x11f   : > { %v1229_v19 = vadd.f32 %v2217_v13, %v2466_v40  ;;  %v1261_v20 = vadd.f32 %v2249_v14, %v2466_v40  ;;  %v842_v21 = vpop.f32.mrf.mxu0  ;;  %v970_v22 = vpop.f32.mrf.mxu1 }
 0x120   : > { %2114 = vst [vmem:[%s2481_s17 + $0x58] sm:$0xff] %v2002_v15   ;;  %2130 = vst [vmem:[%s2481_s17 + $0xd8] sm:$0xff] %v2082_v16   ;;  %v1997_v23 = vpack.c.bf16 %v1288_v17, %v1287_v11  ;;  %v2077_v24 = vpack.c.bf16 %v1320_v18, %v1319_v12  ;;  %v1227_v25 = vadd.f32 %v2466_v40, %v842_v21 }
 0x121   : > { %v1259_v26 = vadd.f32 %v2466_v40, %v970_v22  ;;  %v2218_v27 = vpop.f32.mrf.mxu0  ;;  %v2250_v28 = vpop.f32.mrf.mxu1  ;;  %v1293_v31 = vmax.f32 %v1229_v19, 0.0  ;;  %v1325_v32 = vmax.f32 %v1261_v20, 0.0 }
 0x122   : > { %2113 = vst [vmem:[%s2481_s17 + $0x50] sm:$0xff] %v1997_v23   ;;  %2129 = vst [vmem:[%s2481_s17 + $0xd0] sm:$0xff] %v2077_v24   ;;  %v1230_v29 = vadd.f32 %v2218_v27, %v2466_v40  ;;  %v1262_v30 = vadd.f32 %v2250_v28, %v2466_v40  ;;  %v1291_v39 = vmax.f32 %v1227_v25, 0.0 }
 0x123   : > { %v845_v33 = vpop.f32.mrf.mxu0  ;;  %v973_v34 = vpop.f32.mrf.mxu1  ;;  %v1323_v41 = vmax.f32 %v1259_v26, 0.0 }
 0x124   : > { %v1294_v35 = vmax.f32 %v1230_v29, 0.0  ;;  %v1326_v36 = vmax.f32 %v1262_v30, 0.0  ;;  %v1228_v37 = vadd.f32 %v2466_v40, %v845_v33  ;;  %v1260_v38 = vadd.f32 %v2466_v40, %v973_v34 }
 0x125   : > { %v2221_v42 = vpop.f32.mrf.mxu0  ;;  %v2253_v43 = vpop.f32.mrf.mxu1 }
 0x126   : > { %v2012_v44 = vpack.c.bf16 %v1294_v35, %v1293_v31  ;;  %v2092_v45 = vpack.c.bf16 %v1326_v36, %v1325_v32  ;;  %v1292_v46 = vmax.f32 %v1228_v37, 0.0  ;;  %v1324_v47 = vmax.f32 %v1260_v38, 0.0 }
 0x127   : > { %v1233_v48 = vadd.f32 %v2221_v42, %v2466_v40  ;;  %v1265_v49 = vadd.f32 %v2253_v43, %v2466_v40  ;;  %v858_v50 = vpop.f32.mrf.mxu0  ;;  %v986_v51 = vpop.f32.mrf.mxu1 }
 0x128   : > { %2116 = vst [vmem:[%s2481_s17 + $0x68] sm:$0xff] %v2012_v44   ;;  %2132 = vst [vmem:[%s2481_s17 + $0xe8] sm:$0xff] %v2092_v45   ;;  %v2007_v52 = vpack.c.bf16 %v1292_v46, %v1291_v39  ;;  %v2087_v53 = vpack.c.bf16 %v1324_v47, %v1323_v41  ;;  %v1231_v54 = vadd.f32 %v2466_v40, %v858_v50 }
 0x129   : > { %v1263_v55 = vadd.f32 %v2466_v40, %v986_v51  ;;  %v2222_v56 = vpop.f32.mrf.mxu0  ;;  %v2254_v57 = vpop.f32.mrf.mxu1  ;;  %v1297_v60 = vmax.f32 %v1233_v48, 0.0  ;;  %v1329_v61 = vmax.f32 %v1265_v49, 0.0 }
 0x12a   : > { %2115 = vst [vmem:[%s2481_s17 + $0x60] sm:$0xff] %v2007_v52   ;;  %2131 = vst [vmem:[%s2481_s17 + $0xe0] sm:$0xff] %v2087_v53   ;;  %v1234_v58 = vadd.f32 %v2222_v56, %v2466_v40  ;;  %v1266_v59 = vadd.f32 %v2254_v57, %v2466_v40  ;;  %v1295_v4 = vmax.f32 %v1231_v54, 0.0 }
 0x12b   : > { %v861_v62 = vpop.f32.mrf.mxu0  ;;  %v989_v63 = vpop.f32.mrf.mxu1  ;;  %v1327_v5 = vmax.f32 %v1263_v55, 0.0 }
 0x12c   : > { %v1298_v0 = vmax.f32 %v1234_v58, 0.0  ;;  %v1330_v1 = vmax.f32 %v1266_v59, 0.0  ;;  %v1232_v2 = vadd.f32 %v2466_v40, %v861_v62  ;;  %v1264_v3 = vadd.f32 %v2466_v40, %v989_v63 }
 0x12e   : > { %v2022_v6 = vpack.c.bf16 %v1298_v0, %v1297_v60  ;;  %v2102_v7 = vpack.c.bf16 %v1330_v1, %v1329_v61  ;;  %v1296_v8 = vmax.f32 %v1232_v2, 0.0  ;;  %v1328_v9 = vmax.f32 %v1264_v3, 0.0 }
 0x130   : > { %2118 = vst [vmem:[%s2481_s17 + $0x78] sm:$0xff] %v2022_v6   ;;  %2134 = vst [vmem:[%s2481_s17 + $0xf8] sm:$0xff] %v2102_v7   ;;  %v2017_v10 = vpack.c.bf16 %v1296_v8, %v1295_v4  ;;  %v2097_v11 = vpack.c.bf16 %v1328_v9, %v1327_v5 }
 0x132   : > { %2117 = vst [vmem:[%s2481_s17 + $0x70] sm:$0xff] %v2017_v10   ;;  %2133 = vst [vmem:[%s2481_s17 + $0xf0] sm:$0xff] %v2097_v11  }
 0x133 PF: > { %s13_s14 = sadd.s32 1, %s2357_s14   ;;  %s2584_s12 = smov %s2353_s13 }
 0x134   : > { %p10_p5 = scmp.ge.s32.totalorder %s13_s14, 4   ;;  %s2585_s13 = smov %s2587_s15 }
 0x136   :  { %12 = sbr.rel (!%p10_p5) target bundleno = 2 (0x2), region = 76 }

// kernel: loss_network_forward.11
= control target key start
LH: loop header
LB: loop body
LE: loop exit
PB: predicated region body
PF: predicated region fallthrough
CT: control target
= control target key end

     0   :  { %s2746_s12 = smov 0   ;;  %s2748_s13 = smov 0   ;;  %s3183_s0 = inlined_call_operand.vmem [shape: bf16[1024,1152], index: 0, kind: input, shape index: {}]   ;;  %s3184_s1 = inlined_call_operand.vmem [shape: bf16[1152,128], index: 1, kind: input, shape index: {}]   ;;  %s3185_s2 = inlined_call_operand.vmem [shape: f32[1,128], index: 2, kind: input, shape index: {}]   ;;  %s3186_s3 = inlined_call_operand.vmem [shape: bf16[1024,128], index: 3, kind: output, shape index: {}]  }
   0x1   :  { %s2750_s14 = smov 0   ;;  %s2752_s15 = smov 0  }
   0x2   :  { %s2754_s16 = smov 0   ;;  %s2756_s17 = smov 0  }
   0x3   :  { %s2758_s18 = smov 0  }
   0x4 LB: > { %s25_s19 = sadd.s32 1, %s2715_s16  ;;  %s32_s20 = sadd.s32 1, %s2719_s17  ;;  %s2723_s18 = sphi %s2758_s18, %s13_s18   ;;  %s2719_s17 = sphi %s2756_s17, %s3192_s17   ;;  %s2715_s16 = sphi %s2754_s16, %s3191_s16   ;;  %s2711_s15 = sphi %s2752_s15, %s3190_s15   ;;  %s2707_s14 = sphi %s2750_s14, %s3189_s14   ;;  %s2703_s13 = sphi %s2748_s13, %s3188_s13   ;;  %s2699_s12 = sphi %s2746_s12, %s3187_s12  }
   0x5   : > { %p26_p0 = scmp.ge.s32.totalorder %s25_s19, 9  ;;  %p48_p1 = scmp.ne.s32.totalorder %s2703_s13, %s2699_s12 }
   0x6   : > { %p49_p2 = scmp.eq.s32.totalorder %s2723_s18, 0  ;;  %s41_s24 = sadd.s32 1, %s2703_s13 }
   0x7   : > { %s3194_s19 = smov (%p26_p0, %s25_s19), 0  ;;  %s3196_s20 = smov (!%p26_p0, %s32_s20), %s2719_s17 }
   0x8   : > { %p50_p3 = por %p49_p2, %p48_p1  ;;  %p34_p4 = scmp.ge.s32.totalorder %s3196_s20, 2 }
   0x9   : > { %s37_s21 = ssub.s32 %s2715_s16, %s3194_s19  ;;  %p2060_p6 = scmp.ge.s32.totalorder %s2723_s18, 18 }
   0xa   : > { %s3198_s20 = smov (%p34_p4, %s3196_s20), 0 }
   0xb   : > { %s36_s22 = ssub.s32 %s2719_s17, %s3198_s20  ;;  %162 = sbr.rel (%p2060_p6) target bundleno = 65 (0x41), region = 20 }
   0xc   : > { %s38_s23 = sor.u32 %s37_s21, %s36_s22 }
   0xd   : > { %p39_p5 = scmp.eq.s32.totalorder %s38_s23, 0 }
   0xf   : > { %s2797_s25 = scalar_select %p39_p5, %s2703_s13, %s41_s24  }
  0x10   : > { %165 = sbr.rel (!%p50_p3) target bundleno = 65 (0x41), region = 24  ;;  %s167_s26 = sand.u32 (%p50_p3), 1, %s2703_s13  }
  0x11   : > { %s2571_s27 = smul.u32 (%p50_p3), 576, %s2719_s17  ;;  %s2061_s28 = sshll.u32 (%p50_p3), %s167_s26, 8 }
  0x12   : > { %s2811_s7 = scalar_lea.vmem (%p50_p3), [#allocation3], %s2061_s28 }
  0x13   : > { %s172_s29 = sadd.s32 (%p50_p3), %s2715_s16, %s2571_s27 }
  0x14   : > { %s2064_s30 = sshll.u32 (%p50_p3), %s172_s29, 2 }
  0x15   : > { %s2806_s6 = scalar_lea.vmem %s3183_s0, %s2064_s30 }
  0x16   : > { %v191_v0 = vld [vmem:[%s2806_s6] sm:$0xf]  ;;  %v193_v1 = vld [vmem:[%s2806_s6 + $0x24] sm:$0xf]  ;;  %v195_v2 = vld [vmem:[%s2806_s6 + $0x48] sm:$0xf] }
  0x17   : > { %192 = vst [vmem:[%s2811_s7] sm:$0xf] %v191_v0  ;;  %194 = vst [vmem:[%s2811_s7 + $0x4] sm:$0xf] %v193_v1  ;;  %v197_v3 = vld [vmem:[%s2806_s6 + $0x6c] sm:$0xf] }
  0x18   : > { %196 = vst [vmem:[%s2811_s7 + $0x8] sm:$0xf] %v195_v2  ;;  %v199_v4 = vld [vmem:[%s2806_s6 + $0x90] sm:$0xf]  ;;  %v201_v5 = vld [vmem:[%s2806_s6 + $0xb4] sm:$0xf] }
  0x19   : > { %198 = vst [vmem:[%s2811_s7 + $0xc] sm:$0xf] %v197_v3  ;;  %200 = vst [vmem:[%s2811_s7 + $0x10] sm:$0xf] %v199_v4  ;;  %v203_v6 = vld [vmem:[%s2806_s6 + $0xd8] sm:$0xf] }
  0x1a   : > { %202 = vst [vmem:[%s2811_s7 + $0x14] sm:$0xf] %v201_v5  ;;  %v205_v7 = vld [vmem:[%s2806_s6 + $0xfc] sm:$0xf]  ;;  %v207_v8 = vld [vmem:[%s2806_s6 + $0x120] sm:$0xf] }
  0x1b   : > { %204 = vst [vmem:[%s2811_s7 + $0x18] sm:$0xf] %v203_v6  ;;  %206 = vst [vmem:[%s2811_s7 + $0x1c] sm:$0xf] %v205_v7  ;;  %v209_v9 = vld [vmem:[%s2806_s6 + $0x144] sm:$0xf] }
  0x1c   : > { %208 = vst [vmem:[%s2811_s7 + $0x20] sm:$0xf] %v207_v8  ;;  %v211_v10 = vld [vmem:[%s2806_s6 + $0x168] sm:$0xf]  ;;  %v213_v11 = vld [vmem:[%s2806_s6 + $0x18c] sm:$0xf] }
  0x1d   : > { %210 = vst [vmem:[%s2811_s7 + $0x24] sm:$0xf] %v209_v9  ;;  %212 = vst [vmem:[%s2811_s7 + $0x28] sm:$0xf] %v211_v10  ;;  %v215_v12 = vld [vmem:[%s2806_s6 + $0x1b0] sm:$0xf] }
  0x1e   : > { %214 = vst [vmem:[%s2811_s7 + $0x2c] sm:$0xf] %v213_v11  ;;  %v217_v13 = vld [vmem:[%s2806_s6 + $0x1d4] sm:$0xf]  ;;  %v219_v14 = vld [vmem:[%s2806_s6 + $0x1f8] sm:$0xf] }
  0x1f   : > { %216 = vst [vmem:[%s2811_s7 + $0x30] sm:$0xf] %v215_v12  ;;  %218 = vst [vmem:[%s2811_s7 + $0x34] sm:$0xf] %v217_v13  ;;  %v221_v15 = vld [vmem:[%s2806_s6 + $0x21c] sm:$0xf] }
  0x20   : > { %220 = vst [vmem:[%s2811_s7 + $0x38] sm:$0xf] %v219_v14  ;;  %v223_v16 = vld [vmem:[%s2806_s6 + $0x240] sm:$0xf]  ;;  %v225_v17 = vld [vmem:[%s2806_s6 + $0x264] sm:$0xf] }
  0x21   : > { %222 = vst [vmem:[%s2811_s7 + $0x3c] sm:$0xf] %v221_v15  ;;  %224 = vst [vmem:[%s2811_s7 + $0x40] sm:$0xf] %v223_v16  ;;  %v227_v18 = vld [vmem:[%s2806_s6 + $0x288] sm:$0xf] }
  0x22   : > { %226 = vst [vmem:[%s2811_s7 + $0x44] sm:$0xf] %v225_v17  ;;  %v229_v19 = vld [vmem:[%s2806_s6 + $0x2ac] sm:$0xf]  ;;  %v231_v20 = vld [vmem:[%s2806_s6 + $0x2d0] sm:$0xf] }
  0x23   : > { %228 = vst [vmem:[%s2811_s7 + $0x48] sm:$0xf] %v227_v18  ;;  %230 = vst [vmem:[%s2811_s7 + $0x4c] sm:$0xf] %v229_v19  ;;  %v233_v21 = vld [vmem:[%s2806_s6 + $0x2f4] sm:$0xf] }
  0x24   : > { %232 = vst [vmem:[%s2811_s7 + $0x50] sm:$0xf] %v231_v20  ;;  %v235_v22 = vld [vmem:[%s2806_s6 + $0x318] sm:$0xf]  ;;  %v237_v23 = vld [vmem:[%s2806_s6 + $0x33c] sm:$0xf] }
  0x25   : > { %234 = vst [vmem:[%s2811_s7 + $0x54] sm:$0xf] %v233_v21  ;;  %236 = vst [vmem:[%s2811_s7 + $0x58] sm:$0xf] %v235_v22  ;;  %v239_v24 = vld [vmem:[%s2806_s6 + $0x360] sm:$0xf] }
  0x26   : > { %238 = vst [vmem:[%s2811_s7 + $0x5c] sm:$0xf] %v237_v23  ;;  %v241_v25 = vld [vmem:[%s2806_s6 + $0x384] sm:$0xf]  ;;  %v243_v26 = vld [vmem:[%s2806_s6 + $0x3a8] sm:$0xf] }
  0x27   : > { %240 = vst [vmem:[%s2811_s7 + $0x60] sm:$0xf] %v239_v24  ;;  %242 = vst [vmem:[%s2811_s7 + $0x64] sm:$0xf] %v241_v25  ;;  %v245_v27 = vld [vmem:[%s2806_s6 + $0x3cc] sm:$0xf] }
  0x28   : > { %244 = vst [vmem:[%s2811_s7 + $0x68] sm:$0xf] %v243_v26  ;;  %v247_v28 = vld [vmem:[%s2806_s6 + $0x3f0] sm:$0xf]  ;;  %v249_v29 = vld [vmem:[%s2806_s6 + $0x414] sm:$0xf] }
  0x29   : > { %246 = vst [vmem:[%s2811_s7 + $0x6c] sm:$0xf] %v245_v27  ;;  %248 = vst [vmem:[%s2811_s7 + $0x70] sm:$0xf] %v247_v28  ;;  %v251_v30 = vld [vmem:[%s2806_s6 + $0x438] sm:$0xf] }
  0x2a   : > { %250 = vst [vmem:[%s2811_s7 + $0x74] sm:$0xf] %v249_v29  ;;  %v253_v31 = vld [vmem:[%s2806_s6 + $0x45c] sm:$0xf]  ;;  %v255_v32 = vld [vmem:[%s2806_s6 + $0x480] sm:$0xf] }
  0x2b   : > { %252 = vst [vmem:[%s2811_s7 + $0x78] sm:$0xf] %v251_v30  ;;  %254 = vst [vmem:[%s2811_s7 + $0x7c] sm:$0xf] %v253_v31  ;;  %v257_v33 = vld [vmem:[%s2806_s6 + $0x4a4] sm:$0xf] }
  0x2c   : > { %256 = vst [vmem:[%s2811_s7 + $0x80] sm:$0xf] %v255_v32  ;;  %v259_v34 = vld [vmem:[%s2806_s6 + $0x4c8] sm:$0xf]  ;;  %v261_v35 = vld [vmem:[%s2806_s6 + $0x4ec] sm:$0xf] }
  0x2d   : > { %258 = vst [vmem:[%s2811_s7 + $0x84] sm:$0xf] %v257_v33  ;;  %260 = vst [vmem:[%s2811_s7 + $0x88] sm:$0xf] %v259_v34  ;;  %v263_v36 = vld [vmem:[%s2806_s6 + $0x510] sm:$0xf] }
  0x2e   : > { %262 = vst [vmem:[%s2811_s7 + $0x8c] sm:$0xf] %v261_v35  ;;  %v265_v37 = vld [vmem:[%s2806_s6 + $0x534] sm:$0xf]  ;;  %v267_v38 = vld [vmem:[%s2806_s6 + $0x558] sm:$0xf] }
  0x2f   : > { %264 = vst [vmem:[%s2811_s7 + $0x90] sm:$0xf] %v263_v36  ;;  %266 = vst [vmem:[%s2811_s7 + $0x94] sm:$0xf] %v265_v37  ;;  %v269_v39 = vld [vmem:[%s2806_s6 + $0x57c] sm:$0xf] }
  0x30   : > { %268 = vst [vmem:[%s2811_s7 + $0x98] sm:$0xf] %v267_v38  ;;  %v271_v40 = vld [vmem:[%s2806_s6 + $0x5a0] sm:$0xf]  ;;  %v273_v41 = vld [vmem:[%s2806_s6 + $0x5c4] sm:$0xf] }
  0x31   : > { %270 = vst [vmem:[%s2811_s7 + $0x9c] sm:$0xf] %v269_v39  ;;  %272 = vst [vmem:[%s2811_s7 + $0xa0] sm:$0xf] %v271_v40  ;;  %v275_v42 = vld [vmem:[%s2806_s6 + $0x5e8] sm:$0xf] }
  0x32   : > { %274 = vst [vmem:[%s2811_s7 + $0xa4] sm:$0xf] %v273_v41  ;;  %v277_v43 = vld [vmem:[%s2806_s6 + $0x60c] sm:$0xf]  ;;  %v279_v44 = vld [vmem:[%s2806_s6 + $0x630] sm:$0xf] }
  0x33   : > { %276 = vst [vmem:[%s2811_s7 + $0xa8] sm:$0xf] %v275_v42  ;;  %278 = vst [vmem:[%s2811_s7 + $0xac] sm:$0xf] %v277_v43  ;;  %v281_v45 = vld [vmem:[%s2806_s6 + $0x654] sm:$0xf] }
  0x34   : > { %280 = vst [vmem:[%s2811_s7 + $0xb0] sm:$0xf] %v279_v44  ;;  %v283_v46 = vld [vmem:[%s2806_s6 + $0x678] sm:$0xf]  ;;  %v285_v47 = vld [vmem:[%s2806_s6 + $0x69c] sm:$0xf] }
  0x35   : > { %282 = vst [vmem:[%s2811_s7 + $0xb4] sm:$0xf] %v281_v45  ;;  %284 = vst [vmem:[%s2811_s7 + $0xb8] sm:$0xf] %v283_v46  ;;  %v287_v48 = vld [vmem:[%s2806_s6 + $0x6c0] sm:$0xf] }
  0x36   : > { %286 = vst [vmem:[%s2811_s7 + $0xbc] sm:$0xf] %v285_v47  ;;  %v289_v49 = vld [vmem:[%s2806_s6 + $0x6e4] sm:$0xf]  ;;  %v291_v50 = vld [vmem:[%s2806_s6 + $0x708] sm:$0xf] }
  0x37   : > { %288 = vst [vmem:[%s2811_s7 + $0xc0] sm:$0xf] %v287_v48  ;;  %290 = vst [vmem:[%s2811_s7 + $0xc4] sm:$0xf] %v289_v49  ;;  %v293_v51 = vld [vmem:[%s2806_s6 + $0x72c] sm:$0xf] }
  0x38   : > { %292 = vst [vmem:[%s2811_s7 + $0xc8] sm:$0xf] %v291_v50  ;;  %v295_v52 = vld [vmem:[%s2806_s6 + $0x750] sm:$0xf]  ;;  %v297_v53 = vld [vmem:[%s2806_s6 + $0x774] sm:$0xf] }
  0x39   : > { %294 = vst [vmem:[%s2811_s7 + $0xcc] sm:$0xf] %v293_v51  ;;  %296 = vst [vmem:[%s2811_s7 + $0xd0] sm:$0xf] %v295_v52  ;;  %v299_v54 = vld [vmem:[%s2806_s6 + $0x798] sm:$0xf] }
  0x3a   : > { %298 = vst [vmem:[%s2811_s7 + $0xd4] sm:$0xf] %v297_v53  ;;  %v301_v55 = vld [vmem:[%s2806_s6 + $0x7bc] sm:$0xf]  ;;  %v303_v56 = vld [vmem:[%s2806_s6 + $0x7e0] sm:$0xf] }
  0x3b   : > { %300 = vst [vmem:[%s2811_s7 + $0xd8] sm:$0xf] %v299_v54  ;;  %302 = vst [vmem:[%s2811_s7 + $0xdc] sm:$0xf] %v301_v55  ;;  %v305_v57 = vld [vmem:[%s2806_s6 + $0x804] sm:$0xf] }
  0x3c   : > { %304 = vst [vmem:[%s2811_s7 + $0xe0] sm:$0xf] %v303_v56  ;;  %v307_v58 = vld [vmem:[%s2806_s6 + $0x828] sm:$0xf]  ;;  %v309_v59 = vld [vmem:[%s2806_s6 + $0x84c] sm:$0xf] }
  0x3d   : > { %306 = vst [vmem:[%s2811_s7 + $0xe4] sm:$0xf] %v305_v57  ;;  %308 = vst [vmem:[%s2811_s7 + $0xe8] sm:$0xf] %v307_v58  ;;  %v311_v60 = vld [vmem:[%s2806_s6 + $0x870] sm:$0xf] }
  0x3e   : > { %310 = vst [vmem:[%s2811_s7 + $0xec] sm:$0xf] %v309_v59  ;;  %v313_v61 = vld [vmem:[%s2806_s6 + $0x894] sm:$0xf]  ;;  %v315_v62 = vld [vmem:[%s2806_s6 + $0x8b8] sm:$0xf] }
  0x3f   : > { %312 = vst [vmem:[%s2811_s7 + $0xf0] sm:$0xf] %v311_v60  ;;  %314 = vst [vmem:[%s2811_s7 + $0xf4] sm:$0xf] %v313_v61  ;;  %v317_v63 = vld [vmem:[%s2806_s6 + $0x8dc] sm:$0xf] }
  0x40   : > { %316 = vst [vmem:[%s2811_s7 + $0xf8] sm:$0xf] %v315_v62  ;;  %318 = vst [vmem:[%s2811_s7 + $0xfc] sm:$0xf] %v317_v63 }
  0x41 PF: > { %p2065_p7 = scmp.ge.s32.totalorder %s2723_s18, 1  ;;  %p481_p8 = scmp.lt.s32.totalorder %s2723_s18, 19 }
  0x43   : > { %p482_p9 = pnand %p2065_p7, %p481_p8 }
  0x44   : > { %s488_s8 = sand.u32 (!%p482_p9), 1, %s2699_s12   ;;  %s2067_s9 = sshll.u32 (!%p482_p9), %s2707_s14, 4 }
  0x45   : > { %485 = sbr.rel (%p482_p9) target bundleno = 452 (0x1c4), region = 69  ;;  %s2066_s10 = sshll.u32 (!%p482_p9), %s488_s8, 8 }
  0x46   : > { %p527_p10 = scmp.lt.s32.totalorder (!%p482_p9), %s2067_s9, 143  ;;  %s2069_s11 = sshll.u32 (!%p482_p9), %s2711_s15, 6 }
  0x47   : > { %p539_p11 = scmp.lt.s32.totalorder (!%p482_p9), %s2069_s11, 127  ;;  %s2953_s12 = scalar_lea.vmem (!%p482_p9), [#allocation3], %s2066_s10 }
  0x48   : > { %p2071_p12 = scmp.ne.s32.totalorder (!%p482_p9), %s2707_s14, 0 }
  0x4a   : > { %s3200_s9 = smov (!%p527_p10, %s2067_s9), 143  ;;  %s3202_s11 = smov (!%p539_p11, %s2069_s11), 127 }
  0x4b   : > { %s2068_s21 = sshll.u32 %s3200_s9, 2  ;;  %s2070_s26 = sshll.u32 %s3202_s11, 2 }
  0x4c   : > { %s2946_s24 = scalar_lea.vmem %s3184_s1, %s2068_s21  ;;  %s2951_s29 = scalar_lea.vmem %s3186_s3, %s2070_s26 }
  0x4d   : > { %551 = sbr.rel (%p2071_p12) target bundleno = 115 (0x73), region = 77 }
  0x52   : > { %v2725_v0 = vmov 0.0  }
  0x53   : > { %552 = vst [vmem:[#allocation2 + $0xb0] sm:$0xff] %v2725_v0  ;;  %553 = vst [vmem:[#allocation2 + $0x1b0] sm:$0xff] %v2725_v0 }
  0x54   : > { %554 = vst [vmem:[#allocation2 + $0xd8] sm:$0xff] %v2725_v0  ;;  %555 = vst [vmem:[#allocation2 + $0x18] sm:$0xff] %v2725_v0 }
  0x55   : > { %556 = vst [vmem:[#allocation2 + $0x50] sm:$0xff] %v2725_v0  ;;  %557 = vst [vmem:[#allocation2 + $0x168] sm:$0xff] %v2725_v0 }
  0x56   : > { %558 = vst [vmem:[#allocation2 + $0x130] sm:$0xff] %v2725_v0  ;;  %559 = vst [vmem:[#allocation2 + $0x48] sm:$0xff] %v2725_v0 }
  0x57   : > { %560 = vst [vmem:[#allocation2 + $0x180] sm:$0xff] %v2725_v0  ;;  %561 = vst [vmem:[#allocation2 + $0x110] sm:$0xff] %v2725_v0 }
  0x58   : > { %562 = vst [vmem:[#allocation2 + $0x118] sm:$0xff] %v2725_v0  ;;  %563 = vst [vmem:[#allocation2 + $0x98] sm:$0xff] %v2725_v0 }
  0x59   : > { %564 = vst [vmem:[#allocation2 + $0x120] sm:$0xff] %v2725_v0  ;;  %565 = vst [vmem:[#allocation2 + $0x150] sm:$0xff] %v2725_v0 }
  0x5a   : > { %566 = vst [vmem:[#allocation2 + $0x108] sm:$0xff] %v2725_v0  ;;  %567 = vst [vmem:[#allocation2 + $0x60] sm:$0xff] %v2725_v0 }
  0x5b   : > { %568 = vst [vmem:[#allocation2 + $0xe0] sm:$0xff] %v2725_v0  ;;  %569 = vst [vmem:[#allocation2 + $0x188] sm:$0xff] %v2725_v0 }
  0x5c   : > { %570 = vst [vmem:[#allocation2 + $0x138] sm:$0xff] %v2725_v0  ;;  %571 = vst [vmem:[#allocation2 + $0x140] sm:$0xff] %v2725_v0 }
  0x5d   : > { %572 = vst [vmem:[#allocation2 + $0x80] sm:$0xff] %v2725_v0  ;;  %573 = vst [vmem:[#allocation2 + $0x1a8] sm:$0xff] %v2725_v0 }
  0x5e   : > { %574 = vst [vmem:[#allocation2 + $0x1b8] sm:$0xff] %v2725_v0  ;;  %575 = vst [vmem:[#allocation2 + $0x28] sm:$0xff] %v2725_v0 }
  0x5f   : > { %576 = vst [vmem:[#allocation2 + $0x1e8] sm:$0xff] %v2725_v0  ;;  %577 = vst [vmem:[#allocation2 + $0xf8] sm:$0xff] %v2725_v0 }
  0x60   : > { %578 = vst [vmem:[#allocation2 + $0x160] sm:$0xff] %v2725_v0  ;;  %579 = vst [vmem:[#allocation2 + $0x30] sm:$0xff] %v2725_v0 }
  0x61   : > { %580 = vst [vmem:[#allocation2 + $0x1e0] sm:$0xff] %v2725_v0  ;;  %581 = vst [vmem:[#allocation2] sm:$0xff] %v2725_v0 }
  0x62   : > { %582 = vst [vmem:[#allocation2 + $0xf0] sm:$0xff] %v2725_v0  ;;  %583 = vst [vmem:[#allocation2 + $0x8] sm:$0xff] %v2725_v0 }
  0x63   : > { %584 = vst [vmem:[#allocation2 + $0x148] sm:$0xff] %v2725_v0  ;;  %585 = vst [vmem:[#allocation2 + $0x1d0] sm:$0xff] %v2725_v0 }
  0x64   : > { %586 = vst [vmem:[#allocation2 + $0x100] sm:$0xff] %v2725_v0  ;;  %587 = vst [vmem:[#allocation2 + $0xc8] sm:$0xff] %v2725_v0 }
  0x65   : > { %588 = vst [vmem:[#allocation2 + $0x40] sm:$0xff] %v2725_v0  ;;  %589 = vst [vmem:[#allocation2 + $0x1f8] sm:$0xff] %v2725_v0 }
  0x66   : > { %590 = vst [vmem:[#allocation2 + $0x20] sm:$0xff] %v2725_v0  ;;  %591 = vst [vmem:[#allocation2 + $0x128] sm:$0xff] %v2725_v0 }
  0x67   : > { %592 = vst [vmem:[#allocation2 + $0x1a0] sm:$0xff] %v2725_v0  ;;  %593 = vst [vmem:[#allocation2 + $0x1f0] sm:$0xff] %v2725_v0 }
  0x68   : > { %594 = vst [vmem:[#allocation2 + $0xe8] sm:$0xff] %v2725_v0  ;;  %595 = vst [vmem:[#allocation2 + $0x78] sm:$0xff] %v2725_v0 }
  0x69   : > { %596 = vst [vmem:[#allocation2 + $0x70] sm:$0xff] %v2725_v0  ;;  %597 = vst [vmem:[#allocation2 + $0x90] sm:$0xff] %v2725_v0 }
  0x6a   : > { %598 = vst [vmem:[#allocation2 + $0x1d8] sm:$0xff] %v2725_v0  ;;  %599 = vst [vmem:[#allocation2 + $0xd0] sm:$0xff] %v2725_v0 }
  0x6b   : > { %600 = vst [vmem:[#allocation2 + $0xb8] sm:$0xff] %v2725_v0  ;;  %601 = vst [vmem:[#allocation2 + $0x88] sm:$0xff] %v2725_v0 }
  0x6c   : > { %602 = vst [vmem:[#allocation2 + $0xa8] sm:$0xff] %v2725_v0  ;;  %603 = vst [vmem:[#allocation2 + $0x1c8] sm:$0xff] %v2725_v0 }
  0x6d   : > { %604 = vst [vmem:[#allocation2 + $0x170] sm:$0xff] %v2725_v0  ;;  %605 = vst [vmem:[#allocation2 + $0x178] sm:$0xff] %v2725_v0 }
  0x6e   : > { %606 = vst [vmem:[#allocation2 + $0x68] sm:$0xff] %v2725_v0  ;;  %607 = vst [vmem:[#allocation2 + $0x190] sm:$0xff] %v2725_v0 }
  0x6f   : > { %608 = vst [vmem:[#allocation2 + $0x198] sm:$0xff] %v2725_v0  ;;  %609 = vst [vmem:[#allocation2 + $0x38] sm:$0xff] %v2725_v0 }
  0x70   : > { %610 = vst [vmem:[#allocation2 + $0xc0] sm:$0xff] %v2725_v0  ;;  %611 = vst [vmem:[#allocation2 + $0x1c0] sm:$0xff] %v2725_v0 }
  0x71   : > { %612 = vst [vmem:[#allocation2 + $0x158] sm:$0xff] %v2725_v0  ;;  %613 = vst [vmem:[#allocation2 + $0x10] sm:$0xff] %v2725_v0 }
  0x72   : > { %614 = vst [vmem:[#allocation2 + $0x58] sm:$0xff] %v2725_v0  ;;  %615 = vst [vmem:[#allocation2 + $0xa0] sm:$0xff] %v2725_v0 }
  0x73 PF: > { %v2629_v1 = vld [vmem:[%s2946_s24 + $0x38] sm:$0xff]   ;;  %v2630_v2 = vld [vmem:[%s2946_s24 + $0x30] sm:$0xff]   ;;  %v2631_v3 = vld [vmem:[%s2946_s24 + $0x28] sm:$0xff]   ;;  %p2112_p13 = scmp.ne.s32.totalorder %s2707_s14, 8 }
  0x74   : > { %2475 = vmatprep.subr.bf16.mxu0 %v2629_v1  ;;  %2555 = vmatprep.subr.bf16.mxu1 %v2629_v1  ;;  %v2632_v4 = vld [vmem:[%s2946_s24 + $0x20] sm:$0xff]   ;;  %v2633_v7 = vld [vmem:[%s2946_s24 + $0x18] sm:$0xff]   ;;  %v2634_v8 = vld [vmem:[%s2946_s24 + $0x10] sm:$0xff]  }
  0x75   : > { %2476 = vmatpush3.bf16.msra.mxu0 %v2629_v1  ;;  %2563 = vmatpush3.bf16.msra.mxu1 %v2629_v1  ;;  %v2637_v5 = vld [vmem:[%s2953_s12] sm:$0xff]   ;;  %v2635_v9 = vld [vmem:[%s2946_s24 + $0x8] sm:$0xff]   ;;  %v2641_v13 = vld [vmem:[%s2953_s12 + $0x10] sm:$0xff]  }
  0x76   : > { %2477 = vmatprep.subr.bf16.mxu0 %v2630_v2  ;;  %2556 = vmatprep.subr.bf16.mxu1 %v2630_v2  ;;  %v2638_v6 = vld [vmem:[%s2953_s12 + $0x80] sm:$0xff]   ;;  %v2639_v11 = vld [vmem:[%s2953_s12 + $0x8] sm:$0xff]   ;;  %v2642_v14 = vld [vmem:[%s2953_s12 + $0x90] sm:$0xff]  }
  0x77   : > { %2491 = vmatprep.mubr.bf16.mxu0 %v2637_v5  ;;  %2523 = vmatprep.mubr.bf16.mxu1 %v2638_v6  ;;  %v2636_v10 = vld [vmem:[%s2946_s24] sm:$0xff]   ;;  %v2640_v12 = vld [vmem:[%s2953_s12 + $0x88] sm:$0xff]   ;;  %v2643_v15 = vld [vmem:[%s2953_s12 + $0x18] sm:$0xff]  }
  0x78   : > { %v2644_v16 = vld [vmem:[%s2953_s12 + $0x98] sm:$0xff]   ;;  %v2645_v17 = vld [vmem:[%s2953_s12 + $0x20] sm:$0xff]   ;;  %v2647_v19 = vld [vmem:[%s2953_s12 + $0x28] sm:$0xff]  }
  0x79   : > { %2478 = vmatpush3.bf16.msra.mxu0 %v2630_v2  ;;  %2564 = vmatpush3.bf16.msra.mxu1 %v2630_v2  ;;  %v2646_v18 = vld [vmem:[%s2953_s12 + $0xa0] sm:$0xff]   ;;  %v2648_v20 = vld [vmem:[%s2953_s12 + $0xa8] sm:$0xff]   ;;  %v2649_v21 = vld [vmem:[%s2953_s12 + $0x30] sm:$0xff]  }
  0x7a   : > { %2479 = vmatprep.subr.bf16.mxu0 %v2631_v3  ;;  %2557 = vmatprep.subr.bf16.mxu1 %v2631_v3  ;;  %v2650_v22 = vld [vmem:[%s2953_s12 + $0xb0] sm:$0xff]   ;;  %v2651_v23 = vld [vmem:[%s2953_s12 + $0x38] sm:$0xff]   ;;  %v2653_v25 = vld [vmem:[%s2953_s12 + $0x40] sm:$0xff]  }
  0x7b   : > { %v2652_v24 = vld [vmem:[%s2953_s12 + $0xb8] sm:$0xff]   ;;  %v2654_v26 = vld [vmem:[%s2953_s12 + $0xc0] sm:$0xff]   ;;  %v2655_v27 = vld [vmem:[%s2953_s12 + $0x48] sm:$0xff]  }
  0x7c   : > { %v2656_v28 = vld [vmem:[%s2953_s12 + $0xc8] sm:$0xff]   ;;  %v2657_v29 = vld [vmem:[%s2953_s12 + $0x50] sm:$0xff]   ;;  %v2659_v31 = vld [vmem:[%s2953_s12 + $0x58] sm:$0xff]  }
  0x7d   : > { %2480 = vmatpush3.bf16.msra.mxu0 %v2631_v3  ;;  %2565 = vmatpush3.bf16.msra.mxu1 %v2631_v3  ;;  %v2658_v30 = vld [vmem:[%s2953_s12 + $0xd0] sm:$0xff]   ;;  %v2660_v32 = vld [vmem:[%s2953_s12 + $0xd8] sm:$0xff]   ;;  %v2661_v33 = vld [vmem:[%s2953_s12 + $0x60] sm:$0xff]  }
  0x7e   : > { %2481 = vmatprep.subr.bf16.mxu0 %v2632_v4  ;;  %2558 = vmatprep.subr.bf16.mxu1 %v2632_v4  ;;  %v2662_v34 = vld [vmem:[%s2953_s12 + $0xe0] sm:$0xff]   ;;  %v2663_v35 = vld [vmem:[%s2953_s12 + $0x68] sm:$0xff]   ;;  %v2665_v37 = vld [vmem:[%s2953_s12 + $0x70] sm:$0xff]  }
  0x7f   : > { %v2664_v36 = vld [vmem:[%s2953_s12 + $0xe8] sm:$0xff]   ;;  %v2666_v38 = vld [vmem:[%s2953_s12 + $0xf0] sm:$0xff]   ;;  %v2667_v39 = vld [vmem:[%s2953_s12 + $0x78] sm:$0xff]  }
  0x80   : > { %v2668_v40 = vld [vmem:[%s2953_s12 + $0xf8] sm:$0xff]   ;;  %v650_v42 = vld [vmem:[#allocation2 + $0x100] sm:$0xff]  ;;  %v616_v45 = vld [vmem:[#allocation2 + $0xb0] sm:$0xff] }
  0x81   : > { %2482 = vmatpush3.bf16.msra.mxu0 %v2632_v4  ;;  %2566 = vmatpush3.bf16.msra.mxu1 %v2632_v4  ;;  %v618_v41 = vld [vmem:[#allocation2 + $0xd8] sm:$0xff]  ;;  %v648_v46 = vld [vmem:[#allocation2 + $0x148] sm:$0xff]  ;;  %v617_v57 = vld [vmem:[#allocation2 + $0x1b0] sm:$0xff] }
  0x82   : > { %2483 = vmatprep.subr.bf16.mxu0 %v2633_v7  ;;  %2559 = vmatprep.subr.bf16.mxu1 %v2633_v7  ;;  %v619_v51 = vld [vmem:[#allocation2 + $0x18] sm:$0xff]  ;;  %v651_v52 = vld [vmem:[#allocation2 + $0xc8] sm:$0xff]  ;;  %v649_v58 = vld [vmem:[#allocation2 + $0x1d0] sm:$0xff] }
  0x83   : > { %v622_v63 = vld [vmem:[#allocation2 + $0x130] sm:$0xff]  ;;  %v654_v0 = vld [vmem:[#allocation2 + $0x20] sm:$0xff] }
  0x84   : > { %v620_v5 = vld [vmem:[#allocation2 + $0x50] sm:$0xff]  ;;  %v652_v6 = vld [vmem:[#allocation2 + $0x40] sm:$0xff] }
  0x85   : > { %2484 = vmatpush3.bf16.msra.mxu0 %v2633_v7  ;;  %2567 = vmatpush3.bf16.msra.mxu1 %v2633_v7 }
  0x86   : > { %2485 = vmatprep.subr.bf16.mxu0 %v2634_v8  ;;  %2560 = vmatprep.subr.bf16.mxu1 %v2634_v8 }
  0x89   : > { %2486 = vmatpush3.bf16.msra.mxu0 %v2634_v8  ;;  %2568 = vmatpush3.bf16.msra.mxu1 %v2634_v8 }
  0x8a   : > { %2487 = vmatprep.subr.bf16.mxu0 %v2635_v9  ;;  %2561 = vmatprep.subr.bf16.mxu1 %v2635_v9 }
  0x8d   : > { %2488 = vmatpush3.bf16.msra.mxu0 %v2635_v9  ;;  %2569 = vmatpush3.bf16.msra.mxu1 %v2635_v9 }
  0x8e   : > { %2489 = vmatprep.subr.bf16.mxu0 %v2636_v10  ;;  %2562 = vmatprep.subr.bf16.mxu1 %v2636_v10 }
  0x91   : > { %2490 = vmatpush3.bf16.msra.mxu0 %v2636_v10  ;;  %2570 = vmatpush3.bf16.msra.mxu1 %v2636_v10 }
  0x94   : > { %2492 = vmatmul.mubr.bf16.vlgmr.msra.gmra.mxu0 %v2639_v11  ;;  %2524 = vmatmul.mubr.bf16.vlgmr.msra.gmra.mxu1 %v2640_v12  ;;  %v623_v11 = vld [vmem:[#allocation2 + $0x48] sm:$0xff] }
  0x95   : > { %2495 = vmatprep.mubr.bf16.mxu0 %v2641_v13  ;;  %2527 = vmatprep.mubr.bf16.mxu1 %v2642_v14  ;;  %v655_v12 = vld [vmem:[#allocation2 + $0x128] sm:$0xff] }
  0x9c   : > { %2496 = vmatmul.mubr.bf16.gmra.mxu0 %v2643_v15  ;;  %2528 = vmatmul.mubr.bf16.gmra.mxu1 %v2644_v16 }
  0x9d   : > { %2499 = vmatprep.mubr.bf16.mxu0 %v2645_v17  ;;  %2531 = vmatprep.mubr.bf16.mxu1 %v2646_v18  ;;  %v621_v17 = vld [vmem:[#allocation2 + $0x168] sm:$0xff]  ;;  %v653_v18 = vld [vmem:[#allocation2 + $0x1f8] sm:$0xff] }
  0xa4   : > { %2500 = vmatmul.mubr.bf16.gmra.mxu0 %v2647_v19  ;;  %2532 = vmatmul.mubr.bf16.gmra.mxu1 %v2648_v20 }
  0xa5   : > { %2503 = vmatprep.mubr.bf16.mxu0 %v2649_v21  ;;  %2535 = vmatprep.mubr.bf16.mxu1 %v2650_v22 }
  0xac   : > { %2504 = vmatmul.mubr.bf16.gmra.mxu0 %v2651_v23  ;;  %2536 = vmatmul.mubr.bf16.gmra.mxu1 %v2652_v24  ;;  %v626_v23 = vld [vmem:[#allocation2 + $0x118] sm:$0xff]  ;;  %v658_v24 = vld [vmem:[#allocation2 + $0xe8] sm:$0xff] }
  0xad   : > { %2507 = vmatprep.mubr.bf16.mxu0 %v2653_v25  ;;  %2539 = vmatprep.mubr.bf16.mxu1 %v2654_v26 }
  0xb4   : > { %2508 = vmatmul.mubr.bf16.gmra.mxu0 %v2655_v27  ;;  %2540 = vmatmul.mubr.bf16.gmra.mxu1 %v2656_v28 }
  0xb5   : > { %2511 = vmatprep.mubr.bf16.mxu0 %v2657_v29  ;;  %2543 = vmatprep.mubr.bf16.mxu1 %v2658_v30  ;;  %v624_v29 = vld [vmem:[#allocation2 + $0x180] sm:$0xff] }
  0xb6   : > { %v656_v30 = vld [vmem:[#allocation2 + $0x1a0] sm:$0xff] }
  0xbc   : > { %2512 = vmatmul.mubr.bf16.gmra.mxu0 %v2659_v31  ;;  %2544 = vmatmul.mubr.bf16.gmra.mxu1 %v2660_v32 }
  0xbd   : > { %2515 = vmatprep.mubr.bf16.mxu0 %v2661_v33  ;;  %2547 = vmatprep.mubr.bf16.mxu1 %v2662_v34 }
  0xc4   : > { %2516 = vmatmul.mubr.bf16.gmra.mxu0 %v2663_v35  ;;  %2548 = vmatmul.mubr.bf16.gmra.mxu1 %v2664_v36  ;;  %v627_v35 = vld [vmem:[#allocation2 + $0x98] sm:$0xff] }
  0xc5   : > { %2519 = vmatprep.mubr.bf16.mxu0 %v2665_v37  ;;  %2551 = vmatprep.mubr.bf16.mxu1 %v2666_v38  ;;  %v659_v36 = vld [vmem:[#allocation2 + $0x78] sm:$0xff] }
  0xcc   : > { %2520 = vmatmul.mubr.bf16.gmra.mxu0 %v2667_v39  ;;  %2552 = vmatmul.mubr.bf16.gmra.mxu1 %v2668_v40 }
 0x154   : > { %v2493_v43 = vpop.f32.mrf.mxu0  ;;  %v2525_v44 = vpop.f32.mrf.mxu1 }
 0x155   : > { %v1291_v47 = vadd.f32 %v2493_v43, %v618_v41  ;;  %v1323_v48 = vadd.f32 %v2525_v44, %v650_v42  ;;  %v625_v41 = vld [vmem:[#allocation2 + $0x110] sm:$0xff] }
 0x156   : > { %v1034_v49 = vpop.f32.mrf.mxu0  ;;  %v1162_v50 = vpop.f32.mrf.mxu1  ;;  %v657_v42 = vld [vmem:[#allocation2 + $0x1f0] sm:$0xff] }
 0x157   : > { %1355 = vst [vmem:[#allocation2 + $0xd8] sm:$0xff] %v1291_v47  ;;  %1387 = vst [vmem:[#allocation2 + $0x100] sm:$0xff] %v1323_v48  ;;  %v1289_v53 = vadd.f32 %v1034_v49, %v616_v45  ;;  %v1321_v54 = vadd.f32 %v1162_v50, %v648_v46  ;;  %v630_v47 = vld [vmem:[#allocation2 + $0x108] sm:$0xff]  ;;  %v662_v48 = vld [vmem:[#allocation2 + $0x1d8] sm:$0xff] }
 0x158   : > { %v2494_v55 = vpop.f32.mrf.mxu0  ;;  %v2526_v56 = vpop.f32.mrf.mxu1 }
 0x159   : > { %1353 = vst [vmem:[#allocation2 + $0xb0] sm:$0xff] %v1289_v53  ;;  %1385 = vst [vmem:[#allocation2 + $0x148] sm:$0xff] %v1321_v54  ;;  %v1292_v59 = vadd.f32 %v2494_v55, %v619_v51  ;;  %v1324_v60 = vadd.f32 %v2526_v56, %v651_v52  ;;  %v628_v53 = vld [vmem:[#allocation2 + $0x120] sm:$0xff]  ;;  %v660_v54 = vld [vmem:[#allocation2 + $0x70] sm:$0xff] }
 0x15a   : > { %v1037_v61 = vpop.f32.mrf.mxu0  ;;  %v1165_v62 = vpop.f32.mrf.mxu1 }
 0x15b   : > { %1356 = vst [vmem:[#allocation2 + $0x18] sm:$0xff] %v1292_v59  ;;  %1388 = vst [vmem:[#allocation2 + $0xc8] sm:$0xff] %v1324_v60  ;;  %v1290_v1 = vadd.f32 %v1037_v61, %v617_v57  ;;  %v1322_v2 = vadd.f32 %v1165_v62, %v649_v58  ;;  %v631_v59 = vld [vmem:[#allocation2 + $0x60] sm:$0xff]  ;;  %v663_v60 = vld [vmem:[#allocation2 + $0xd0] sm:$0xff] }
 0x15c   : > { %v2497_v3 = vpop.f32.mrf.mxu0  ;;  %v2529_v4 = vpop.f32.mrf.mxu1 }
 0x15d   : > { %1354 = vst [vmem:[#allocation2 + $0x1b0] sm:$0xff] %v1290_v1  ;;  %1386 = vst [vmem:[#allocation2 + $0x1d0] sm:$0xff] %v1322_v2  ;;  %v1295_v7 = vadd.f32 %v2497_v3, %v622_v63  ;;  %v1327_v8 = vadd.f32 %v2529_v4, %v654_v0  ;;  %v629_v1 = vld [vmem:[#allocation2 + $0x150] sm:$0xff] }
 0x15e   : > { %v1050_v9 = vpop.f32.mrf.mxu0  ;;  %v1178_v10 = vpop.f32.mrf.mxu1  ;;  %v661_v2 = vld [vmem:[#allocation2 + $0x90] sm:$0xff] }
 0x15f   : > { %1359 = vst [vmem:[#allocation2 + $0x130] sm:$0xff] %v1295_v7  ;;  %1391 = vst [vmem:[#allocation2 + $0x20] sm:$0xff] %v1327_v8  ;;  %v1293_v13 = vadd.f32 %v1050_v9, %v620_v5  ;;  %v1325_v14 = vadd.f32 %v1178_v10, %v652_v6  ;;  %v634_v7 = vld [vmem:[#allocation2 + $0x138] sm:$0xff]  ;;  %v666_v8 = vld [vmem:[#allocation2 + $0xa8] sm:$0xff] }
 0x160   : > { %v2498_v15 = vpop.f32.mrf.mxu0  ;;  %v2530_v16 = vpop.f32.mrf.mxu1 }
 0x161   : > { %1357 = vst [vmem:[#allocation2 + $0x50] sm:$0xff] %v1293_v13  ;;  %1389 = vst [vmem:[#allocation2 + $0x40] sm:$0xff] %v1325_v14  ;;  %v1296_v19 = vadd.f32 %v2498_v15, %v623_v11  ;;  %v1328_v20 = vadd.f32 %v2530_v16, %v655_v12  ;;  %v632_v13 = vld [vmem:[#allocation2 + $0xe0] sm:$0xff]  ;;  %v664_v14 = vld [vmem:[#allocation2 + $0xb8] sm:$0xff] }
 0x162   : > { %v1053_v21 = vpop.f32.mrf.mxu0  ;;  %v1181_v22 = vpop.f32.mrf.mxu1 }
 0x163   : > { %1360 = vst [vmem:[#allocation2 + $0x48] sm:$0xff] %v1296_v19  ;;  %1392 = vst [vmem:[#allocation2 + $0x128] sm:$0xff] %v1328_v20  ;;  %v1294_v25 = vadd.f32 %v1053_v21, %v621_v17  ;;  %v1326_v26 = vadd.f32 %v1181_v22, %v653_v18  ;;  %v635_v19 = vld [vmem:[#allocation2 + $0x140] sm:$0xff]  ;;  %v667_v20 = vld [vmem:[#allocation2 + $0x1c8] sm:$0xff] }
 0x164   : > { %v2501_v27 = vpop.f32.mrf.mxu0  ;;  %v2533_v28 = vpop.f32.mrf.mxu1 }
 0x165   : > { %1358 = vst [vmem:[#allocation2 + $0x168] sm:$0xff] %v1294_v25  ;;  %1390 = vst [vmem:[#allocation2 + $0x1f8] sm:$0xff] %v1326_v26  ;;  %v1299_v31 = vadd.f32 %v2501_v27, %v626_v23  ;;  %v1331_v32 = vadd.f32 %v2533_v28, %v658_v24  ;;  %v633_v25 = vld [vmem:[#allocation2 + $0x188] sm:$0xff] }
 0x166   : > { %v1066_v33 = vpop.f32.mrf.mxu0  ;;  %v1194_v34 = vpop.f32.mrf.mxu1  ;;  %v665_v26 = vld [vmem:[#allocation2 + $0x88] sm:$0xff] }
 0x167   : > { %1363 = vst [vmem:[#allocation2 + $0x118] sm:$0xff] %v1299_v31  ;;  %1395 = vst [vmem:[#allocation2 + $0xe8] sm:$0xff] %v1331_v32  ;;  %v1297_v37 = vadd.f32 %v1066_v33, %v624_v29  ;;  %v1329_v38 = vadd.f32 %v1194_v34, %v656_v30  ;;  %v638_v31 = vld [vmem:[#allocation2 + $0x1b8] sm:$0xff]  ;;  %v670_v32 = vld [vmem:[#allocation2 + $0x68] sm:$0xff] }
 0x168   : > { %v2502_v39 = vpop.f32.mrf.mxu0  ;;  %v2534_v40 = vpop.f32.mrf.mxu1 }
 0x169   : > { %1361 = vst [vmem:[#allocation2 + $0x180] sm:$0xff] %v1297_v37  ;;  %1393 = vst [vmem:[#allocation2 + $0x1a0] sm:$0xff] %v1329_v38  ;;  %v1300_v43 = vadd.f32 %v2502_v39, %v627_v35  ;;  %v1332_v44 = vadd.f32 %v2534_v40, %v659_v36  ;;  %v636_v37 = vld [vmem:[#allocation2 + $0x80] sm:$0xff]  ;;  %v668_v38 = vld [vmem:[#allocation2 + $0x170] sm:$0xff] }
 0x16a   : > { %v1069_v45 = vpop.f32.mrf.mxu0  ;;  %v1197_v46 = vpop.f32.mrf.mxu1 }
 0x16b   : > { %1364 = vst [vmem:[#allocation2 + $0x98] sm:$0xff] %v1300_v43  ;;  %1396 = vst [vmem:[#allocation2 + $0x78] sm:$0xff] %v1332_v44  ;;  %v1298_v49 = vadd.f32 %v1069_v45, %v625_v41  ;;  %v1330_v50 = vadd.f32 %v1197_v46, %v657_v42  ;;  %v639_v43 = vld [vmem:[#allocation2 + $0x28] sm:$0xff]  ;;  %v671_v44 = vld [vmem:[#allocation2 + $0x190] sm:$0xff] }
 0x16c   : > { %v2505_v51 = vpop.f32.mrf.mxu0  ;;  %v2537_v52 = vpop.f32.mrf.mxu1 }
 0x16d   : > { %1362 = vst [vmem:[#allocation2 + $0x110] sm:$0xff] %v1298_v49  ;;  %1394 = vst [vmem:[#allocation2 + $0x1f0] sm:$0xff] %v1330_v50  ;;  %v1303_v55 = vadd.f32 %v2505_v51, %v630_v47  ;;  %v1335_v56 = vadd.f32 %v2537_v52, %v662_v48  ;;  %v637_v49 = vld [vmem:[#allocation2 + $0x1a8] sm:$0xff]  ;;  %v669_v50 = vld [vmem:[#allocation2 + $0x178] sm:$0xff] }
 0x16e   : > { %v1082_v57 = vpop.f32.mrf.mxu0  ;;  %v1210_v58 = vpop.f32.mrf.mxu1 }
 0x16f   : > { %1367 = vst [vmem:[#allocation2 + $0x108] sm:$0xff] %v1303_v55  ;;  %1399 = vst [vmem:[#allocation2 + $0x1d8] sm:$0xff] %v1335_v56  ;;  %v1301_v61 = vadd.f32 %v1082_v57, %v628_v53  ;;  %v1333_v62 = vadd.f32 %v1210_v58, %v660_v54  ;;  %v642_v55 = vld [vmem:[#allocation2 + $0x160] sm:$0xff] }
 0x170   : > { %v2506_v63 = vpop.f32.mrf.mxu0  ;;  %v2538_v0 = vpop.f32.mrf.mxu1  ;;  %v674_v56 = vld [vmem:[#allocation2 + $0xc0] sm:$0xff] }
 0x171   : > { %1365 = vst [vmem:[#allocation2 + $0x120] sm:$0xff] %v1301_v61  ;;  %1397 = vst [vmem:[#allocation2 + $0x70] sm:$0xff] %v1333_v62  ;;  %v1304_v3 = vadd.f32 %v2506_v63, %v631_v59  ;;  %v1336_v4 = vadd.f32 %v2538_v0, %v663_v60  ;;  %v640_v61 = vld [vmem:[#allocation2 + $0x1e8] sm:$0xff]  ;;  %v672_v62 = vld [vmem:[#allocation2 + $0x198] sm:$0xff] }
 0x172   : > { %v1085_v5 = vpop.f32.mrf.mxu0  ;;  %v1213_v6 = vpop.f32.mrf.mxu1 }
 0x173   : > { %1368 = vst [vmem:[#allocation2 + $0x60] sm:$0xff] %v1304_v3  ;;  %1400 = vst [vmem:[#allocation2 + $0xd0] sm:$0xff] %v1336_v4  ;;  %v1302_v9 = vadd.f32 %v1085_v5, %v629_v1  ;;  %v1334_v10 = vadd.f32 %v1213_v6, %v661_v2  ;;  %v643_v3 = vld [vmem:[#allocation2 + $0x30] sm:$0xff]  ;;  %v675_v4 = vld [vmem:[#allocation2 + $0x1c0] sm:$0xff] }
 0x174   : > { %v2509_v11 = vpop.f32.mrf.mxu0  ;;  %v2541_v12 = vpop.f32.mrf.mxu1 }
 0x175   : > { %1366 = vst [vmem:[#allocation2 + $0x150] sm:$0xff] %v1302_v9  ;;  %1398 = vst [vmem:[#allocation2 + $0x90] sm:$0xff] %v1334_v10  ;;  %v1307_v15 = vadd.f32 %v2509_v11, %v634_v7  ;;  %v1339_v16 = vadd.f32 %v2541_v12, %v666_v8  ;;  %v641_v9 = vld [vmem:[#allocation2 + $0xf8] sm:$0xff] }
 0x176   : > { %v1098_v17 = vpop.f32.mrf.mxu0  ;;  %v1226_v18 = vpop.f32.mrf.mxu1  ;;  %v673_v10 = vld [vmem:[#allocation2 + $0x38] sm:$0xff] }
 0x177   : > { %1371 = vst [vmem:[#allocation2 + $0x138] sm:$0xff] %v1307_v15  ;;  %1403 = vst [vmem:[#allocation2 + $0xa8] sm:$0xff] %v1339_v16  ;;  %v1305_v21 = vadd.f32 %v1098_v17, %v632_v13  ;;  %v1337_v22 = vadd.f32 %v1226_v18, %v664_v14  ;;  %v646_v15 = vld [vmem:[#allocation2 + $0xf0] sm:$0xff]  ;;  %v678_v16 = vld [vmem:[#allocation2 + $0x58] sm:$0xff] }
 0x178   : > { %v2510_v23 = vpop.f32.mrf.mxu0  ;;  %v2542_v24 = vpop.f32.mrf.mxu1 }
 0x179   : > { %1369 = vst [vmem:[#allocation2 + $0xe0] sm:$0xff] %v1305_v21  ;;  %1401 = vst [vmem:[#allocation2 + $0xb8] sm:$0xff] %v1337_v22  ;;  %v1308_v27 = vadd.f32 %v2510_v23, %v635_v19  ;;  %v1340_v28 = vadd.f32 %v2542_v24, %v667_v20  ;;  %v644_v21 = vld [vmem:[#allocation2 + $0x1e0] sm:$0xff]  ;;  %v676_v22 = vld [vmem:[#allocation2 + $0x158] sm:$0xff] }
 0x17a   : > { %v1101_v29 = vpop.f32.mrf.mxu0  ;;  %v1229_v30 = vpop.f32.mrf.mxu1 }
 0x17b   : > { %1372 = vst [vmem:[#allocation2 + $0x140] sm:$0xff] %v1308_v27  ;;  %1404 = vst [vmem:[#allocation2 + $0x1c8] sm:$0xff] %v1340_v28  ;;  %v1306_v33 = vadd.f32 %v1101_v29, %v633_v25  ;;  %v1338_v34 = vadd.f32 %v1229_v30, %v665_v26  ;;  %v647_v27 = vld [vmem:[#allocation2 + $0x8] sm:$0xff]  ;;  %v679_v28 = vld [vmem:[#allocation2 + $0xa0] sm:$0xff] }
 0x17c   : > { %v2513_v35 = vpop.f32.mrf.mxu0  ;;  %v2545_v36 = vpop.f32.mrf.mxu1 }
 0x17d   : > { %1370 = vst [vmem:[#allocation2 + $0x188] sm:$0xff] %v1306_v33  ;;  %1402 = vst [vmem:[#allocation2 + $0x88] sm:$0xff] %v1338_v34  ;;  %v1311_v39 = vadd.f32 %v2513_v35, %v638_v31  ;;  %v1343_v40 = vadd.f32 %v2545_v36, %v670_v32  ;;  %v645_v33 = vld [vmem:[#allocation2] sm:$0xff]  ;;  %v677_v34 = vld [vmem:[#allocation2 + $0x10] sm:$0xff] }
 0x17e   : > { %v1114_v41 = vpop.f32.mrf.mxu0  ;;  %v1242_v42 = vpop.f32.mrf.mxu1 }
 0x17f   : > { %1375 = vst [vmem:[#allocation2 + $0x1b8] sm:$0xff] %v1311_v39  ;;  %1407 = vst [vmem:[#allocation2 + $0x68] sm:$0xff] %v1343_v40  ;;  %v1309_v45 = vadd.f32 %v1114_v41, %v636_v37  ;;  %v1341_v46 = vadd.f32 %v1242_v42, %v668_v38 }
 0x180   : > { %v2514_v47 = vpop.f32.mrf.mxu0  ;;  %v2546_v48 = vpop.f32.mrf.mxu1 }
 0x181   : > { %1373 = vst [vmem:[#allocation2 + $0x80] sm:$0xff] %v1309_v45  ;;  %1405 = vst [vmem:[#allocation2 + $0x170] sm:$0xff] %v1341_v46  ;;  %v1312_v51 = vadd.f32 %v2514_v47, %v639_v43  ;;  %v1344_v52 = vadd.f32 %v2546_v48, %v671_v44 }
 0x182   : > { %v1117_v53 = vpop.f32.mrf.mxu0  ;;  %v1245_v54 = vpop.f32.mrf.mxu1 }
 0x183   : > { %1376 = vst [vmem:[#allocation2 + $0x28] sm:$0xff] %v1312_v51  ;;  %1408 = vst [vmem:[#allocation2 + $0x190] sm:$0xff] %v1344_v52  ;;  %v1310_v57 = vadd.f32 %v1117_v53, %v637_v49  ;;  %v1342_v58 = vadd.f32 %v1245_v54, %v669_v50 }
 0x184   : > { %v2517_v59 = vpop.f32.mrf.mxu0  ;;  %v2549_v60 = vpop.f32.mrf.mxu1 }
 0x185   : > { %1374 = vst [vmem:[#allocation2 + $0x1a8] sm:$0xff] %v1310_v57  ;;  %1406 = vst [vmem:[#allocation2 + $0x178] sm:$0xff] %v1342_v58  ;;  %v1315_v63 = vadd.f32 %v2517_v59, %v642_v55  ;;  %v1347_v0 = vadd.f32 %v2549_v60, %v674_v56 }
 0x186   : > { %v1130_v1 = vpop.f32.mrf.mxu0  ;;  %v1258_v2 = vpop.f32.mrf.mxu1 }
 0x187   : > { %1379 = vst [vmem:[#allocation2 + $0x160] sm:$0xff] %v1315_v63  ;;  %1411 = vst [vmem:[#allocation2 + $0xc0] sm:$0xff] %v1347_v0  ;;  %v1313_v5 = vadd.f32 %v1130_v1, %v640_v61  ;;  %v1345_v6 = vadd.f32 %v1258_v2, %v672_v62 }
 0x188   : > { %v2518_v7 = vpop.f32.mrf.mxu0  ;;  %v2550_v8 = vpop.f32.mrf.mxu1 }
 0x189   : > { %1377 = vst [vmem:[#allocation2 + $0x1e8] sm:$0xff] %v1313_v5  ;;  %1409 = vst [vmem:[#allocation2 + $0x198] sm:$0xff] %v1345_v6  ;;  %v1316_v11 = vadd.f32 %v2518_v7, %v643_v3  ;;  %v1348_v12 = vadd.f32 %v2550_v8, %v675_v4 }
 0x18a   : > { %v1133_v13 = vpop.f32.mrf.mxu0  ;;  %v1261_v14 = vpop.f32.mrf.mxu1 }
 0x18b   : > { %1380 = vst [vmem:[#allocation2 + $0x30] sm:$0xff] %v1316_v11  ;;  %1412 = vst [vmem:[#allocation2 + $0x1c0] sm:$0xff] %v1348_v12  ;;  %v1314_v17 = vadd.f32 %v1133_v13, %v641_v9  ;;  %v1346_v18 = vadd.f32 %v1261_v14, %v673_v10 }
 0x18c   : > { %v2521_v19 = vpop.f32.mrf.mxu0  ;;  %v2553_v20 = vpop.f32.mrf.mxu1 }
 0x18d   : > { %1378 = vst [vmem:[#allocation2 + $0xf8] sm:$0xff] %v1314_v17  ;;  %1410 = vst [vmem:[#allocation2 + $0x38] sm:$0xff] %v1346_v18  ;;  %v1319_v23 = vadd.f32 %v2521_v19, %v646_v15  ;;  %v1351_v24 = vadd.f32 %v2553_v20, %v678_v16 }
 0x18e   : > { %v1146_v25 = vpop.f32.mrf.mxu0  ;;  %v1274_v26 = vpop.f32.mrf.mxu1 }
 0x18f   : > { %1383 = vst [vmem:[#allocation2 + $0xf0] sm:$0xff] %v1319_v23  ;;  %1415 = vst [vmem:[#allocation2 + $0x58] sm:$0xff] %v1351_v24  ;;  %v1317_v29 = vadd.f32 %v1146_v25, %v644_v21  ;;  %v1349_v30 = vadd.f32 %v1274_v26, %v676_v22 }
 0x190   : > { %v2522_v31 = vpop.f32.mrf.mxu0  ;;  %v2554_v32 = vpop.f32.mrf.mxu1 }
 0x191   : > { %1381 = vst [vmem:[#allocation2 + $0x1e0] sm:$0xff] %v1317_v29  ;;  %1413 = vst [vmem:[#allocation2 + $0x158] sm:$0xff] %v1349_v30  ;;  %v1320_v35 = vadd.f32 %v2522_v31, %v647_v27  ;;  %v1352_v36 = vadd.f32 %v2554_v32, %v679_v28  ;;  %1420 = sbr.rel (%p2112_p13) target bundleno = 452 (0x1c4), region = 81 }
 0x192   : > { %v1149_v37 = vpop.f32.mrf.mxu0  ;;  %v1277_v38 = vpop.f32.mrf.mxu1 }
 0x193   : > { %1384 = vst [vmem:[#allocation2 + $0x8] sm:$0xff] %v1320_v35  ;;  %1416 = vst [vmem:[#allocation2 + $0xa0] sm:$0xff] %v1352_v36  ;;  %v1318_v39 = vadd.f32 %v1149_v37, %v645_v33  ;;  %v1350_v40 = vadd.f32 %v1277_v38, %v677_v34 }
 0x195   : > { %1382 = vst [vmem:[#allocation2] sm:$0xff] %v1318_v39  ;;  %1414 = vst [vmem:[#allocation2 + $0x10] sm:$0xff] %v1350_v40 }
 0x196   : > { %v1421_v41 = vld [vmem:[#allocation2 + $0xb0] sm:$0xff]  ;;  %v3064_v43 = vld [vmem:[%s3185_s2] ss:$0 sm:$0xff]  ;;  %v1423_v46 = vld [vmem:[#allocation2 + $0xd8] sm:$0xff] }
 0x197   : > { %v1422_v42 = vld [vmem:[#allocation2 + $0x1b0] sm:$0xff]  ;;  %v1492_v44 = vadd.f32 %v3064_v43, %v1421_v41  ;;  %v1424_v47 = vld [vmem:[#allocation2 + $0x18] sm:$0xff]  ;;  %v1494_v49 = vadd.f32 %v3064_v43, %v1423_v46  ;;  %v1426_v51 = vld [vmem:[#allocation2 + $0x168] sm:$0xff] }
 0x198   : > { %v1493_v45 = vadd.f32 %v3064_v43, %v1422_v42  ;;  %v1425_v48 = vld [vmem:[#allocation2 + $0x50] sm:$0xff]  ;;  %v1495_v50 = vadd.f32 %v3064_v43, %v1424_v47  ;;  %v1428_v54 = vld [vmem:[#allocation2 + $0x48] sm:$0xff]  ;;  %v1497_v57 = vadd.f32 %v3064_v43, %v1426_v51  ;;  %v1429_v59 = vld [vmem:[#allocation2 + $0x180] sm:$0xff] }
 0x199   : > { %v1496_v52 = vadd.f32 %v3064_v43, %v1425_v48  ;;  %v1427_v53 = vld [vmem:[#allocation2 + $0x130] sm:$0xff]  ;;  %v1556_v55 = vmax.f32 %v1492_v44, 0.0  ;;  %v1431_v61 = vld [vmem:[#allocation2 + $0x118] sm:$0xff]  ;;  %v1558_v62 = vmax.f32 %v1494_v49, 0.0  ;;  %v1499_v1 = vadd.f32 %v3064_v43, %v1428_v54  ;;  %v1433_v3 = vld [vmem:[#allocation2 + $0x120] sm:$0xff] }
 0x19a   : > { %v1557_v56 = vmax.f32 %v1493_v45, 0.0  ;;  %v1498_v58 = vadd.f32 %v3064_v43, %v1427_v53  ;;  %v1430_v60 = vld [vmem:[#allocation2 + $0x110] sm:$0xff]  ;;  %v1559_v63 = vmax.f32 %v1495_v50, 0.0  ;;  %v1432_v2 = vld [vmem:[#allocation2 + $0x98] sm:$0xff]  ;;  %v1561_v5 = vmax.f32 %v1497_v57, 0.0  ;;  %v1435_v13 = vld [vmem:[#allocation2 + $0x108] sm:$0xff] }
 0x19b   : > { %v1560_v0 = vmax.f32 %v1496_v52, 0.0  ;;  %v1500_v7 = vadd.f32 %v3064_v43, %v1429_v59  ;;  %v1434_v8 = vld [vmem:[#allocation2 + $0x150] sm:$0xff]  ;;  %v1563_v10 = vmax.f32 %v1499_v1, 0.0  ;;  %v1501_v11 = vadd.f32 %v3064_v43, %v1430_v60  ;;  %v1436_v14 = vld [vmem:[#allocation2 + $0x60] sm:$0xff]  ;;  %v1438_v20 = vld [vmem:[#allocation2 + $0x188] sm:$0xff] }
 0x19c   : > { %v2247_v4 = vpack.c.bf16 %v1557_v56, %v1556_v55  ;;  %v1562_v6 = vmax.f32 %v1498_v58, 0.0  ;;  %v2252_v9 = vpack.c.bf16 %v1559_v63, %v1558_v62  ;;  %v1502_v12 = vadd.f32 %v3064_v43, %v1431_v61  ;;  %v1437_v19 = vld [vmem:[#allocation2 + $0xe0] sm:$0xff]  ;;  %v1439_v25 = vld [vmem:[#allocation2 + $0x138] sm:$0xff]  ;;  %v1442_v36 = vld [vmem:[#allocation2 + $0x1a8] sm:$0xff] }
 0x19d   : > { %v2257_v15 = vpack.c.bf16 %v1561_v5, %v1560_v0  ;;  %v1564_v16 = vmax.f32 %v1500_v7, 0.0  ;;  %v1503_v17 = vadd.f32 %v3064_v43, %v1432_v2  ;;  %v1504_v18 = vadd.f32 %v3064_v43, %v1433_v3  ;;  %v1440_v30 = vld [vmem:[#allocation2 + $0x140] sm:$0xff]  ;;  %v1443_v41 = vld [vmem:[#allocation2 + $0x1b8] sm:$0xff]  ;;  %v1444_v42 = vld [vmem:[#allocation2 + $0x28] sm:$0xff] }
 0x19e   : > { %2248 = vst [vmem:[%s2951_s29] sm:$0xff] %v2247_v4   ;;  %2404 = vst [vmem:[%s2951_s29 + $0x8] sm:$0xff] %v2252_v9   ;;  %v2262_v21 = vpack.c.bf16 %v1563_v10, %v1562_v6  ;;  %v1565_v22 = vmax.f32 %v1501_v11, 0.0  ;;  %v1566_v23 = vmax.f32 %v1502_v12, 0.0  ;;  %v1505_v24 = vadd.f32 %v3064_v43, %v1434_v8  ;;  %v1441_v35 = vld [vmem:[#allocation2 + $0x80] sm:$0xff]  ;;  %v1445_v48 = vld [vmem:[#allocation2 + $0x1e8] sm:$0xff] }
 0x19f   : > { %2405 = vst [vmem:[%s2951_s29 + $0x10] sm:$0xff] %v2257_v15   ;;  %v1567_v26 = vmax.f32 %v1503_v17, 0.0  ;;  %v1568_v27 = vmax.f32 %v1504_v18, 0.0  ;;  %v1506_v28 = vadd.f32 %v3064_v43, %v1435_v13  ;;  %v1507_v29 = vadd.f32 %v3064_v43, %v1436_v14  ;;  %v1446_v49 = vld [vmem:[#allocation2 + $0xf8] sm:$0xff]  ;;  %v1447_v54 = vld [vmem:[#allocation2 + $0x160] sm:$0xff]  ;;  %v1448_v59 = vld [vmem:[#allocation2 + $0x30] sm:$0xff] }
 0x1a0   : > { %2406 = vst [vmem:[%s2951_s29 + $0x18] sm:$0xff] %v2262_v21   ;;  %v2267_v31 = vpack.c.bf16 %v1565_v22, %v1564_v16  ;;  %v1569_v32 = vmax.f32 %v1505_v24, 0.0  ;;  %v1508_v33 = vadd.f32 %v3064_v43, %v1437_v19  ;;  %v1509_v34 = vadd.f32 %v3064_v43, %v1438_v20  ;;  %v1449_v0 = vld [vmem:[#allocation2 + $0x1e0] sm:$0xff]  ;;  %v1451_v6 = vld [vmem:[#allocation2 + $0xf0] sm:$0xff]  ;;  %v1452_v7 = vld [vmem:[#allocation2 + $0x8] sm:$0xff] }
 0x1a1   : > { %v2272_v37 = vpack.c.bf16 %v1567_v26, %v1566_v23  ;;  %v1570_v38 = vmax.f32 %v1506_v28, 0.0  ;;  %v1571_v39 = vmax.f32 %v1507_v29, 0.0  ;;  %v1510_v40 = vadd.f32 %v3064_v43, %v1439_v25  ;;  %v1450_v1 = vld [vmem:[#allocation2] sm:$0xff]  ;;  %v1453_v12 = vld [vmem:[#allocation2 + $0x148] sm:$0xff]  ;;  %v1454_v13 = vld [vmem:[#allocation2 + $0x1d0] sm:$0xff] }
 0x1a2   : > { %2407 = vst [vmem:[%s2951_s29 + $0x20] sm:$0xff] %v2267_v31   ;;  %v2277_v44 = vpack.c.bf16 %v1569_v32, %v1568_v27  ;;  %v1572_v45 = vmax.f32 %v1508_v33, 0.0  ;;  %v1573_v46 = vmax.f32 %v1509_v34, 0.0  ;;  %v1511_v47 = vadd.f32 %v3064_v43, %v1440_v30  ;;  %v1455_v18 = vld [vmem:[#allocation2 + $0x100] sm:$0xff]  ;;  %v1456_v23 = vld [vmem:[#allocation2 + $0xc8] sm:$0xff]  ;;  %v1458_v29 = vld [vmem:[#allocation2 + $0x1f8] sm:$0xff] }
 0x1a3   : > { %2408 = vst [vmem:[%s2951_s29 + $0x28] sm:$0xff] %v2272_v37   ;;  %v2282_v50 = vpack.c.bf16 %v1571_v39, %v1570_v38  ;;  %v1574_v51 = vmax.f32 %v1510_v40, 0.0  ;;  %v1512_v52 = vadd.f32 %v3064_v43, %v1441_v35  ;;  %v1513_v53 = vadd.f32 %v3064_v43, %v1442_v36  ;;  %v1457_v28 = vld [vmem:[#allocation2 + $0x40] sm:$0xff]  ;;  %v1460_v35 = vld [vmem:[#allocation2 + $0x128] sm:$0xff] }
 0x1a4   : > { %2409 = vst [vmem:[%s2951_s29 + $0x30] sm:$0xff] %v2277_v44   ;;  %v2287_v55 = vpack.c.bf16 %v1573_v46, %v1572_v45  ;;  %v1575_v56 = vmax.f32 %v1511_v47, 0.0  ;;  %v1514_v57 = vadd.f32 %v3064_v43, %v1443_v41  ;;  %v1515_v58 = vadd.f32 %v3064_v43, %v1444_v42  ;;  %v1459_v34 = vld [vmem:[#allocation2 + $0x20] sm:$0xff]  ;;  %v1462_v41 = vld [vmem:[#allocation2 + $0x1f0] sm:$0xff]  ;;  %v1463_v47 = vld [vmem:[#allocation2 + $0xe8] sm:$0xff] }
 0x1a5   : > { %2410 = vst [vmem:[%s2951_s29 + $0x38] sm:$0xff] %v2282_v50   ;;  %v1576_v60 = vmax.f32 %v1512_v52, 0.0  ;;  %v1577_v61 = vmax.f32 %v1513_v53, 0.0  ;;  %v1516_v62 = vadd.f32 %v3064_v43, %v1445_v48  ;;  %v1517_v63 = vadd.f32 %v3064_v43, %v1446_v49  ;;  %v1461_v40 = vld [vmem:[#allocation2 + $0x1a0] sm:$0xff]  ;;  %v1464_v52 = vld [vmem:[#allocation2 + $0x78] sm:$0xff] }
 0x1a6   : > { %2411 = vst [vmem:[%s2951_s29 + $0x40] sm:$0xff] %v2287_v55   ;;  %v2292_v2 = vpack.c.bf16 %v1575_v56, %v1574_v51  ;;  %v1578_v3 = vmax.f32 %v1514_v57, 0.0  ;;  %v1579_v4 = vmax.f32 %v1515_v58, 0.0  ;;  %v1518_v5 = vadd.f32 %v3064_v43, %v1447_v54  ;;  %v1465_v57 = vld [vmem:[#allocation2 + $0x70] sm:$0xff] }
 0x1a7   : > { %v2297_v8 = vpack.c.bf16 %v1577_v61, %v1576_v60  ;;  %v1580_v9 = vmax.f32 %v1516_v62, 0.0  ;;  %v1581_v10 = vmax.f32 %v1517_v63, 0.0  ;;  %v1519_v11 = vadd.f32 %v3064_v43, %v1448_v59  ;;  %v1466_v58 = vld [vmem:[#allocation2 + $0x90] sm:$0xff]  ;;  %v1467_v63 = vld [vmem:[#allocation2 + $0x1d8] sm:$0xff] }
 0x1a8   : > { %2412 = vst [vmem:[%s2951_s29 + $0x48] sm:$0xff] %v2292_v2   ;;  %v2302_v14 = vpack.c.bf16 %v1579_v4, %v1578_v3  ;;  %v1582_v15 = vmax.f32 %v1518_v5, 0.0  ;;  %v1520_v16 = vadd.f32 %v3064_v43, %v1449_v0  ;;  %v1521_v17 = vadd.f32 %v3064_v43, %v1450_v1  ;;  %v1468_v0 = vld [vmem:[#allocation2 + $0xd0] sm:$0xff]  ;;  %v1469_v5 = vld [vmem:[#allocation2 + $0xb8] sm:$0xff] }
 0x1a9   : > { %2413 = vst [vmem:[%s2951_s29 + $0x50] sm:$0xff] %v2297_v8   ;;  %v2307_v19 = vpack.c.bf16 %v1581_v10, %v1580_v9  ;;  %v1583_v20 = vmax.f32 %v1519_v11, 0.0  ;;  %v1522_v21 = vadd.f32 %v3064_v43, %v1451_v6  ;;  %v1523_v22 = vadd.f32 %v3064_v43, %v1452_v7  ;;  %v1470_v6 = vld [vmem:[#allocation2 + $0x88] sm:$0xff] }
 0x1aa   : > { %2414 = vst [vmem:[%s2951_s29 + $0x58] sm:$0xff] %v2302_v14   ;;  %v1584_v24 = vmax.f32 %v1520_v16, 0.0  ;;  %v1585_v25 = vmax.f32 %v1521_v17, 0.0  ;;  %v1524_v26 = vadd.f32 %v3064_v43, %v1453_v12  ;;  %v1525_v27 = vadd.f32 %v3064_v43, %v1454_v13  ;;  %v1471_v11 = vld [vmem:[#allocation2 + $0xa8] sm:$0xff] }
 0x1ab   : > { %2415 = vst [vmem:[%s2951_s29 + $0x60] sm:$0xff] %v2307_v19   ;;  %v2312_v30 = vpack.c.bf16 %v1583_v20, %v1582_v15  ;;  %v1586_v31 = vmax.f32 %v1522_v21, 0.0  ;;  %v1587_v32 = vmax.f32 %v1523_v22, 0.0  ;;  %v1526_v33 = vadd.f32 %v3064_v43, %v1455_v18  ;;  %v1472_v16 = vld [vmem:[#allocation2 + $0x1c8] sm:$0xff]  ;;  %v1473_v21 = vld [vmem:[#allocation2 + $0x170] sm:$0xff]  ;;  %v1474_v22 = vld [vmem:[#allocation2 + $0x178] sm:$0xff] }
 0x1ac   : > { %v2317_v36 = vpack.c.bf16 %v1585_v25, %v1584_v24  ;;  %v1588_v37 = vmax.f32 %v1524_v26, 0.0  ;;  %v1589_v38 = vmax.f32 %v1525_v27, 0.0  ;;  %v1527_v39 = vadd.f32 %v3064_v43, %v1456_v23  ;;  %v1475_v27 = vld [vmem:[#allocation2 + $0x68] sm:$0xff] }
 0x1ad   : > { %2416 = vst [vmem:[%s2951_s29 + $0x68] sm:$0xff] %v2312_v30   ;;  %v2322_v42 = vpack.c.bf16 %v1587_v32, %v1586_v31  ;;  %v1590_v44 = vmax.f32 %v1526_v33, 0.0  ;;  %v1528_v45 = vadd.f32 %v3064_v43, %v1457_v28  ;;  %v1529_v46 = vadd.f32 %v3064_v43, %v1458_v29  ;;  %v1476_v28 = vld [vmem:[#allocation2 + $0x190] sm:$0xff]  ;;  %v1477_v33 = vld [vmem:[#allocation2 + $0x198] sm:$0xff] }
 0x1ae   : > { %2417 = vst [vmem:[%s2951_s29 + $0x70] sm:$0xff] %v2317_v36   ;;  %v2327_v48 = vpack.c.bf16 %v1589_v38, %v1588_v37  ;;  %v1591_v49 = vmax.f32 %v1527_v39, 0.0  ;;  %v1530_v50 = vadd.f32 %v3064_v43, %v1459_v34  ;;  %v1531_v51 = vadd.f32 %v3064_v43, %v1460_v35  ;;  %v1478_v34 = vld [vmem:[#allocation2 + $0x38] sm:$0xff]  ;;  %v1479_v39 = vld [vmem:[#allocation2 + $0xc0] sm:$0xff] }
 0x1af   : > { %2418 = vst [vmem:[%s2951_s29 + $0x78] sm:$0xff] %v2322_v42   ;;  %v1592_v53 = vmax.f32 %v1528_v45, 0.0  ;;  %v1593_v54 = vmax.f32 %v1529_v46, 0.0  ;;  %v1532_v55 = vadd.f32 %v3064_v43, %v1461_v40  ;;  %v1533_v56 = vadd.f32 %v3064_v43, %v1462_v41  ;;  %v1480_v45 = vld [vmem:[#allocation2 + $0x1c0] sm:$0xff] }
 0x1b0   : > { %2419 = vst [vmem:[%s2951_s29 + $0x80] sm:$0xff] %v2327_v48   ;;  %v2332_v59 = vpack.c.bf16 %v1591_v49, %v1590_v44  ;;  %v1594_v60 = vmax.f32 %v1530_v50, 0.0  ;;  %v1595_v61 = vmax.f32 %v1531_v51, 0.0  ;;  %v1534_v62 = vadd.f32 %v3064_v43, %v1463_v47  ;;  %v1481_v50 = vld [vmem:[#allocation2 + $0x158] sm:$0xff]  ;;  %v1482_v51 = vld [vmem:[#allocation2 + $0x10] sm:$0xff] }
 0x1b1   : > { %v2337_v1 = vpack.c.bf16 %v1593_v54, %v1592_v53  ;;  %v1596_v2 = vmax.f32 %v1532_v55, 0.0  ;;  %v1597_v3 = vmax.f32 %v1533_v56, 0.0  ;;  %v1535_v4 = vadd.f32 %v3064_v43, %v1464_v52  ;;  %v1483_v56 = vld [vmem:[#allocation2 + $0x58] sm:$0xff] }
 0x1b2   : > { %2420 = vst [vmem:[%s2951_s29 + $0x88] sm:$0xff] %v2332_v59   ;;  %v2342_v7 = vpack.c.bf16 %v1595_v61, %v1594_v60  ;;  %v1598_v8 = vmax.f32 %v1534_v62, 0.0  ;;  %v1536_v9 = vadd.f32 %v3064_v43, %v1465_v57  ;;  %v1537_v10 = vadd.f32 %v3064_v43, %v1466_v58  ;;  %v1484_v57 = vld [vmem:[#allocation2 + $0xa0] sm:$0xff] }
 0x1b3   : > { %2421 = vst [vmem:[%s2951_s29 + $0x90] sm:$0xff] %v2337_v1   ;;  %v2347_v12 = vpack.c.bf16 %v1597_v3, %v1596_v2  ;;  %v1599_v13 = vmax.f32 %v1535_v4, 0.0  ;;  %v1538_v14 = vadd.f32 %v3064_v43, %v1467_v63  ;;  %v1539_v15 = vadd.f32 %v3064_v43, %v1468_v0 }
 0x1b4   : > { %2422 = vst [vmem:[%s2951_s29 + $0x98] sm:$0xff] %v2342_v7   ;;  %v1600_v17 = vmax.f32 %v1536_v9, 0.0  ;;  %v1601_v18 = vmax.f32 %v1537_v10, 0.0  ;;  %v1540_v19 = vadd.f32 %v3064_v43, %v1469_v5  ;;  %v1541_v20 = vadd.f32 %v3064_v43, %v1470_v6 }
 0x1b5   : > { %2423 = vst [vmem:[%s2951_s29 + $0xa0] sm:$0xff] %v2347_v12   ;;  %v2352_v23 = vpack.c.bf16 %v1599_v13, %v1598_v8  ;;  %v1602_v24 = vmax.f32 %v1538_v14, 0.0  ;;  %v1603_v25 = vmax.f32 %v1539_v15, 0.0  ;;  %v1542_v26 = vadd.f32 %v3064_v43, %v1471_v11 }
 0x1b6   : > { %v2357_v29 = vpack.c.bf16 %v1601_v18, %v1600_v17  ;;  %v1604_v30 = vmax.f32 %v1540_v19, 0.0  ;;  %v1605_v31 = vmax.f32 %v1541_v20, 0.0  ;;  %v1543_v32 = vadd.f32 %v3064_v43, %v1472_v16 }
 0x1b7   : > { %2424 = vst [vmem:[%s2951_s29 + $0xa8] sm:$0xff] %v2352_v23   ;;  %v2362_v35 = vpack.c.bf16 %v1603_v25, %v1602_v24  ;;  %v1606_v36 = vmax.f32 %v1542_v26, 0.0  ;;  %v1544_v37 = vadd.f32 %v3064_v43, %v1473_v21  ;;  %v1545_v38 = vadd.f32 %v3064_v43, %v1474_v22 }
 0x1b8   : > { %2425 = vst [vmem:[%s2951_s29 + $0xb0] sm:$0xff] %v2357_v29   ;;  %v2367_v40 = vpack.c.bf16 %v1605_v31, %v1604_v30  ;;  %v1607_v41 = vmax.f32 %v1543_v32, 0.0  ;;  %v1546_v42 = vadd.f32 %v3064_v43, %v1475_v27  ;;  %v1547_v44 = vadd.f32 %v3064_v43, %v1476_v28 }
 0x1b9   : > { %2426 = vst [vmem:[%s2951_s29 + $0xb8] sm:$0xff] %v2362_v35   ;;  %v1608_v46 = vmax.f32 %v1544_v37, 0.0  ;;  %v1609_v47 = vmax.f32 %v1545_v38, 0.0  ;;  %v1548_v48 = vadd.f32 %v3064_v43, %v1477_v33  ;;  %v1549_v49 = vadd.f32 %v3064_v43, %v1478_v34 }
 0x1ba   : > { %2427 = vst [vmem:[%s2951_s29 + $0xc0] sm:$0xff] %v2367_v40   ;;  %v2372_v52 = vpack.c.bf16 %v1607_v41, %v1606_v36  ;;  %v1610_v53 = vmax.f32 %v1546_v42, 0.0  ;;  %v1611_v54 = vmax.f32 %v1547_v44, 0.0  ;;  %v1550_v55 = vadd.f32 %v3064_v43, %v1479_v39 }
 0x1bb   : > { %v2377_v58 = vpack.c.bf16 %v1609_v47, %v1608_v46  ;;  %v1612_v59 = vmax.f32 %v1548_v48, 0.0  ;;  %v1613_v60 = vmax.f32 %v1549_v49, 0.0  ;;  %v1551_v61 = vadd.f32 %v3064_v43, %v1480_v45 }
 0x1bc   : > { %2428 = vst [vmem:[%s2951_s29 + $0xc8] sm:$0xff] %v2372_v52   ;;  %v2382_v62 = vpack.c.bf16 %v1611_v54, %v1610_v53  ;;  %v1614_v63 = vmax.f32 %v1550_v55, 0.0  ;;  %v1552_v0 = vadd.f32 %v3064_v43, %v1481_v50  ;;  %v1553_v1 = vadd.f32 %v3064_v43, %v1482_v51 }
 0x1bd   : > { %2429 = vst [vmem:[%s2951_s29 + $0xd0] sm:$0xff] %v2377_v58   ;;  %v2387_v2 = vpack.c.bf16 %v1613_v60, %v1612_v59  ;;  %v1615_v3 = vmax.f32 %v1551_v61, 0.0  ;;  %v1554_v4 = vadd.f32 %v3064_v43, %v1483_v56  ;;  %v1555_v5 = vadd.f32 %v3064_v43, %v1484_v57 }
 0x1be   : > { %2430 = vst [vmem:[%s2951_s29 + $0xd8] sm:$0xff] %v2382_v62   ;;  %v1616_v6 = vmax.f32 %v1552_v0, 0.0  ;;  %v1617_v7 = vmax.f32 %v1553_v1, 0.0 }
 0x1bf   : > { %2431 = vst [vmem:[%s2951_s29 + $0xe0] sm:$0xff] %v2387_v2   ;;  %v2392_v8 = vpack.c.bf16 %v1615_v3, %v1614_v63  ;;  %v1618_v9 = vmax.f32 %v1554_v4, 0.0  ;;  %v1619_v10 = vmax.f32 %v1555_v5, 0.0 }
 0x1c0   : > { %v2397_v11 = vpack.c.bf16 %v1617_v7, %v1616_v6 }
 0x1c1   : > { %2432 = vst [vmem:[%s2951_s29 + $0xe8] sm:$0xff] %v2392_v8   ;;  %v2402_v12 = vpack.c.bf16 %v1619_v10, %v1618_v9 }
 0x1c2   : > { %2433 = vst [vmem:[%s2951_s29 + $0xf0] sm:$0xff] %v2397_v11  }
 0x1c3   : > { %2434 = vst [vmem:[%s2951_s29 + $0xf8] sm:$0xff] %v2402_v12  }
 0x1c4 PF: > { %s13_s18 = sadd.s32 1, %s2723_s18   ;;  %s3187_s12 = smov %s2703_s13 }
 0x1c5   : > { %p10_p0 = scmp.ge.s32.totalorder %s13_s18, 20   ;;  %s3188_s13 = smov %s2797_s25 }
 0x1c6   : > { %s3189_s14 = smov %s2715_s16  ;;  %s3190_s15 = smov %s2719_s17 }
 0x1c7   : > { %s3191_s16 = smov %s3194_s19  ;;  %s3192_s17 = smov %s3198_s20 }
 0x1c8   :  { %12 = sbr.rel (!%p10_p0) target bundleno = 4 (0x4), region = 122 }

// kernel: loss_network_forward.17
= control target key start
LH: loop header
LB: loop body
LE: loop exit
PB: predicated region body
PF: predicated region fallthrough
CT: control target
= control target key end

     0   :  { %7 = vsyncpa [#allocation4], 0  ;;  %vm16_vm0 = vcmask 0   ;;  %v1226_v0 = vmov 0.0   ;;  %s1227_s22 = smov [#allocation3]   ;;  %s2319_s0 = inlined_call_operand.vmem [shape: bf16[512,128], index: 0, kind: input, shape index: {}]   ;;  %s2320_s1 = inlined_call_operand.vmem [shape: bf16[512,128], index: 1, kind: input, shape index: {}]   ;;  %s2321_s2 = inlined_call_operand.hbm [shape: f32[1,1], index: 2, kind: output, shape index: {}]  }
   0x1   :  { %17 = vst.msk [vmem:[#allocation2] sm:$0x1] %vm16_vm0, %v1226_v0  ;;  %v1247_v1 = vld [vmem:[%s2319_s0] sm:$0xff]   ;;  %v1252_v2 = vld [vmem:[%s2319_s0 + $0x8] sm:$0xff]   ;;  %v1257_v3 = vld [vmem:[%s2319_s0 + $0x10] sm:$0xff]   ;;  %s810_s23 = sshll.u32 %s1227_s22, 4  ;;  %s811_s23 = int_to_ptr.vmem [resolvable:$true] %s810_s23 }
   0x2   :  { %v1262_v4 = vld [vmem:[%s2319_s0 + $0x18] sm:$0xff]   ;;  %v1267_v5 = vld [vmem:[%s2319_s0 + $0x20] sm:$0xff]   ;;  %v1272_v6 = vld [vmem:[%s2319_s0 + $0x28] sm:$0xff]   ;;  %v2389_v44 = vunpack.c.l.bf16 %v1247_v1  ;;  %v2398_v13 = vunpack.c.h.bf16 %v1252_v2  ;;  %s1204_s24 = scalar_lea.vmem %s811_s23, 16  ;;  %s1208_s25 = scalar_lea.vmem %s811_s23, 32 }
   0x3   :  { %v1281_v11 = vld [vmem:[%s2319_s0 + $0x30] sm:$0xff]   ;;  %v1286_v12 = vld [vmem:[%s2319_s0 + $0x38] sm:$0xff]   ;;  %v1295_v17 = vld [vmem:[%s2319_s0 + $0x40] sm:$0xff]   ;;  %p1205_p0 = scmp.ne.s32.totalorder %s811_s23, %s1204_s24  ;;  %p1209_p1 = scmp.lt.s32.totalorder %s811_s23, %s811_s23 }
   0x4   :  { %v1300_v18 = vld [vmem:[%s2319_s0 + $0x48] sm:$0xff]   ;;  %v1309_v23 = vld [vmem:[%s2319_s0 + $0x50] sm:$0xff]   ;;  %v1314_v24 = vld [vmem:[%s2319_s0 + $0x58] sm:$0xff]   ;;  %p1210_p2 = scmp.lt.s32.totalorder %s1208_s25, %s1204_s24 }
   0x5   :  { %v1323_v29 = vld [vmem:[%s2319_s0 + $0x60] sm:$0xff]   ;;  %v1328_v30 = vld [vmem:[%s2319_s0 + $0x68] sm:$0xff]   ;;  %v1337_v35 = vld [vmem:[%s2319_s0 + $0x70] sm:$0xff]  }
   0x6   :  { %v1342_v36 = vld [vmem:[%s2319_s0 + $0x78] sm:$0xff]   ;;  %v1351_v41 = vld [vmem:[%s2319_s0 + $0x80] sm:$0xff]   ;;  %v1356_v42 = vld [vmem:[%s2319_s0 + $0x88] sm:$0xff]   ;;  %p1211_p3 = por %p1210_p2, %p1209_p1 }
   0x7   :  { %v1365_v47 = vld [vmem:[%s2319_s0 + $0x90] sm:$0xff]   ;;  %v1370_v48 = vld [vmem:[%s2319_s0 + $0x98] sm:$0xff]   ;;  %v1379_v53 = vld [vmem:[%s2319_s0 + $0xa0] sm:$0xff]  }
   0x8   :  { %2368 = vst [vmem:[#allocation6_spill] sm:$0xff] %v1379_v53  ;;  %v1384_v54 = vld [vmem:[%s2319_s0 + $0xa8] sm:$0xff]   ;;  %v1393_v59 = vld [vmem:[%s2319_s0 + $0xb0] sm:$0xff]   ;;  %v1398_v60 = vld [vmem:[%s2319_s0 + $0xb8] sm:$0xff]   ;;  %p1212_p4 = pnand %p1211_p3, %p1205_p0 }
   0x9   :  { %2369 = vst [vmem:[#allocation7_spill] sm:$0xff] %v1384_v54  ;;  %2370 = vst [vmem:[#allocation8_spill] sm:$0xff] %v1393_v59  ;;  %v1407_v58 = vld [vmem:[%s2319_s0 + $0xc0] sm:$0xff]   ;;  %v1412_v57 = vld [vmem:[%s2319_s0 + $0xc8] sm:$0xff]  }
   0xa   :  { %2371 = vst [vmem:[#allocation9_spill] sm:$0xff] %v1398_v60  ;;  %2372 = vst [vmem:[#allocation10_spill] sm:$0xff] %v1407_v58  ;;  %v1421_v0 = vld [vmem:[%s2319_s0 + $0xd0] sm:$0xff]   ;;  %v1426_v55 = vld [vmem:[%s2319_s0 + $0xd8] sm:$0xff]  }
   0xb   :  { %2373 = vst [vmem:[#allocation11_spill] sm:$0xff] %v1412_v57  ;;  %2374 = vst [vmem:[#allocation12_spill] sm:$0xff] %v1421_v0  ;;  %v1435_v63 = vld [vmem:[%s2319_s0 + $0xe0] sm:$0xff]   ;;  %v1440_v51 = vld [vmem:[%s2319_s0 + $0xe8] sm:$0xff]  }
   0xc   :  { %2375 = vst [vmem:[#allocation13_spill] sm:$0xff] %v1426_v55  ;;  %2376 = vst [vmem:[#allocation14_spill] sm:$0xff] %v1435_v63  ;;  %v1449_v62 = vld [vmem:[%s2319_s0 + $0xf0] sm:$0xff]   ;;  %v1454_v49 = vld [vmem:[%s2319_s0 + $0xf8] sm:$0xff]  }
   0xd   :  { %2377 = vst [vmem:[#allocation15_spill] sm:$0xff] %v1440_v51  ;;  %2378 = vst [vmem:[#allocation16_spill] sm:$0xff] %v1449_v62  ;;  %v1463_v61 = vld [vmem:[%s2320_s1] sm:$0xff]   ;;  %v1468_v45 = vld [vmem:[%s2320_s1 + $0x8] sm:$0xff]   ;;  %v2391_v51 = vunpack.c.h.bf16 %v1247_v1 }
   0xe   :  { %2379 = vst [vmem:[#allocation17_spill] sm:$0xff] %v1454_v49  ;;  %v1477_v56 = vld [vmem:[%s2320_s1 + $0x10] sm:$0xff]   ;;  %v1482_v43 = vld [vmem:[%s2320_s1 + $0x18] sm:$0xff]   ;;  %v1491_v52 = vld [vmem:[%s2320_s1 + $0x20] sm:$0xff]   ;;  %v2388_v40 = vunpack.c.l.bf16 %v1463_v61  ;;  %v2390_v62 = vunpack.c.h.bf16 %v1463_v61  ;;  %v2397_v0 = vunpack.c.h.bf16 %v1468_v45 }
   0xf   :  { %v1496_v39 = vld [vmem:[%s2320_s1 + $0x28] sm:$0xff]   ;;  %v1505_v50 = vld [vmem:[%s2320_s1 + $0x30] sm:$0xff]   ;;  %v1510_v37 = vld [vmem:[%s2320_s1 + $0x38] sm:$0xff]   ;;  %v2401_v60 = vunpack.c.h.bf16 %v1477_v56  ;;  %v2403_v53 = vunpack.c.l.bf16 %v1482_v43 }
  0x10   :  { %v1519_v28 = vld [vmem:[%s2320_s1 + $0x40] sm:$0xff]   ;;  %v1524_v27 = vld [vmem:[%s2320_s1 + $0x48] sm:$0xff]   ;;  %v1533_v20 = vld [vmem:[%s2320_s1 + $0x50] sm:$0xff]   ;;  %v274_v49 = vsub.f32 %v2389_v44, %v2388_v40  ;;  %v275_v63 = vsub.f32 %v2391_v51, %v2390_v62  ;;  %v2394_v44 = vunpack.c.l.bf16 %v1468_v45  ;;  %v2395_v51 = vunpack.c.l.bf16 %v1252_v2 }
  0x11   :  { %v1538_v19 = vld [vmem:[%s2320_s1 + $0x58] sm:$0xff]   ;;  %v1547_v21 = vld [vmem:[%s2320_s1 + $0x60] sm:$0xff]   ;;  %v1552_v31 = vld [vmem:[%s2320_s1 + $0x68] sm:$0xff]   ;;  %v277_v38 = vsub.f32 %v2398_v13, %v2397_v0  ;;  %v2399_v2 = vunpack.c.l.bf16 %v1477_v56  ;;  %v2400_v13 = vunpack.c.l.bf16 %v1257_v3  ;;  %v2402_v62 = vunpack.c.h.bf16 %v1257_v3 }
  0x12   :  { %v1561_v22 = vld [vmem:[%s2320_s1 + $0x70] sm:$0xff]   ;;  %v1566_v32 = vld [vmem:[%s2320_s1 + $0x78] sm:$0xff]   ;;  %v1575_v25 = vld [vmem:[%s2320_s1 + $0x80] sm:$0xff]   ;;  %v276_v61 = vsub.f32 %v2395_v51, %v2394_v44  ;;  %v338_v55 = vand.u32 2147483647, %v274_v49  ;;  %v467_v44 = vmul.f32 0.5, %v275_v63 }
  0x13   :  { %v1580_v33 = vld [vmem:[%s2320_s1 + $0x88] sm:$0xff]   ;;  %v1589_v26 = vld [vmem:[%s2320_s1 + $0x90] sm:$0xff]   ;;  %v1594_v34 = vld [vmem:[%s2320_s1 + $0x98] sm:$0xff]   ;;  %v278_v0 = vsub.f32 %v2400_v13, %v2399_v2  ;;  %v2404_v2 = vunpack.c.l.bf16 %v1262_v4 }
  0x14   :  { %v1603_v16 = vld [vmem:[%s2320_s1 + $0xa0] sm:$0xff]   ;;  %v1608_v46 = vld [vmem:[%s2320_s1 + $0xa8] sm:$0xff]   ;;  %v1617_v15 = vld [vmem:[%s2320_s1 + $0xb0] sm:$0xff]   ;;  %v468_v51 = vmul.f32 0.5, %v276_v61  ;;  %v531_v59 = vmul.f32 %v467_v44, %v275_v63  ;;  %vm1719_vm1 = vcmp.lt.f32.partialorder %v338_v55, 1.0 }
  0x15   :  { %2380 = vst [vmem:[#allocation18_spill] sm:$0xff] %v1603_v16  ;;  %2381 = vst [vmem:[#allocation19_spill] sm:$0xff] %v1608_v46  ;;  %v1626_v10 = vld [vmem:[%s2320_s1 + $0xb8] sm:$0xff]   ;;  %v1631_v14 = vld [vmem:[%s2320_s1 + $0xc0] sm:$0xff]   ;;  %v280_v13 = vsub.f32 %v2404_v2, %v2403_v53  ;;  %v342_v56 = vand.u32 2147483647, %v278_v0 }
  0x16   :  { %2382 = vst [vmem:[#allocation20_spill] sm:$0xff] %v1617_v15  ;;  %2383 = vst [vmem:[#allocation21_spill] sm:$0xff] %v1626_v10  ;;  %v1640_v7 = vld [vmem:[%s2320_s1 + $0xc8] sm:$0xff]   ;;  %v1645_v9 = vld [vmem:[%s2320_s1 + $0xd0] sm:$0xff]   ;;  %v818_v15 = vadd.f32 -0.5, %v338_v55 }
  0x17   :  { %2384 = vst [vmem:[#allocation22_spill] sm:$0xff] %v1631_v14  ;;  %2385 = vst [vmem:[#allocation23_spill] sm:$0xff] %v1640_v7  ;;  %v1652_v8 = vld [vmem:[%s2320_s1 + $0xd8] sm:$0xff]   ;;  %v1672_v40 = vld [vmem:[%s2320_s1 + $0xe0] sm:$0xff]   ;;  %v339_v7 = vand.u32 2147483647, %v275_v63  ;;  %v2409_v63 = vunpack.c.h.bf16 %v1482_v43  ;;  %v2413_v43 = vunpack.c.l.bf16 %v1491_v52 }
  0x18   :  { %2386 = vst [vmem:[#allocation24_spill] sm:$0xff] %v1645_v9  ;;  %2387 = vst [vmem:[#allocation25_spill] sm:$0xff] %v1652_v8  ;;  %v1677_v1 = vld [vmem:[%s2320_s1 + $0xe8] sm:$0xff]   ;;  %v1689_v57 = vld [vmem:[%s2320_s1 + $0xf0] sm:$0xff]   ;;  %v466_v14 = vmul.f32 0.5, %v274_v49  ;;  %v822_v16 = vadd.f32 -0.5, %v342_v56 }
  0x19   :  { %2392 = vst [vmem:[#allocation26_spill] sm:$0xff] %v1672_v40  ;;  %2393 = vst [vmem:[#allocation27_spill] sm:$0xff] %v1677_v1  ;;  %v1703_v45 = vld [vmem:[%s2320_s1 + $0xf8] sm:$0xff]   ;;  %v340_v9 = vand.u32 2147483647, %v276_v61  ;;  %v279_v1 = vsub.f32 %v2402_v62, %v2401_v60  ;;  %v469_v40 = vmul.f32 0.5, %v277_v38  ;;  %v2410_v62 = vunpack.c.h.bf16 %v1262_v4 }
  0x1a   :  { %2396 = vst [vmem:[#allocation28_spill] sm:$0xff] %v1689_v57  ;;  %v341_v8 = vand.u32 2147483647, %v277_v38  ;;  %v530_v10 = vmul.f32 %v466_v14, %v274_v49  ;;  %v819_v54 = vadd.f32 -0.5, %v339_v7  ;;  %vm1723_vm2 = vcmp.lt.f32.partialorder %v339_v7, 1.0 }
  0x1b   :  { %v470_v14 = vmul.f32 0.5, %v278_v0  ;;  %v532_v49 = vmul.f32 %v468_v51, %v276_v61  ;;  %v820_v60 = vadd.f32 -0.5, %v340_v9  ;;  %v281_v44 = vsub.f32 %v2410_v62, %v2409_v63 }
  0x1c   :  { %v343_v46 = vand.u32 2147483647, %v279_v1  ;;  %vm1731_vm3 = vcmp.lt.f32.partialorder %v340_v9, 1.0  ;;  %v471_v55 = vmul.f32 0.5, %v279_v1  ;;  %v533_v2 = vmul.f32 %v469_v40, %v277_v38 }
  0x1d   :  { %v821_v7 = vadd.f32 -0.5, %v341_v8  ;;  %v658_v57 = vsel %vm1719_vm1, %v530_v10, %v818_v15  ;;  %v659_v61 = vsel %vm1723_vm2, %v531_v59, %v819_v54  ;;  %v2414_v4 = vunpack.c.l.bf16 %v1267_v5 }
  0x1e   :  { %v344_v9 = vand.u32 2147483647, %v280_v13  ;;  %vm1744_vm4 = vcmp.lt.f32.partialorder %v341_v8, 1.0  ;;  %v472_v38 = vmul.f32 0.5, %v280_v13  ;;  %v534_v40 = vmul.f32 %v470_v14, %v278_v0 }
  0x1f   :  { %v282_v63 = vsub.f32 %v2414_v4, %v2413_v43  ;;  %v660_v10 = vsel %vm1731_vm3, %v532_v49, %v820_v60  ;;  %v2417_v15 = vunpack.c.h.bf16 %v1491_v52  ;;  %v2418_v54 = vunpack.c.h.bf16 %v1267_v5 }
  0x20   :  { %v345_v59 = vand.u32 2147483647, %v281_v44  ;;  %vm1754_vm5 = vcmp.lt.f32.partialorder %v342_v56, 1.0  ;;  %v723_v8 = vadd.f32 %v659_v61, %v658_v57  ;;  %v473_v43 = vmul.f32 0.5, %v281_v44 }
  0x21   :  { %v283_v58 = vsub.f32 %v2418_v54, %v2417_v15  ;;  %v535_v4 = vmul.f32 %v471_v55, %v279_v1  ;;  %v823_v51 = vadd.f32 -0.5, %v343_v46  ;;  %v661_v0 = vsel %vm1744_vm4, %v533_v2, %v821_v7 }
  0x22   :  { %v2421_v14 = vunpack.c.l.bf16 %v1496_v39  ;;  %v2422_v49 = vunpack.c.l.bf16 %v1272_v6  ;;  %v346_v60 = vand.u32 2147483647, %v282_v63  ;;  %vm1764_vm6 = vcmp.lt.f32.partialorder %v343_v46, 1.0 }
  0x23   :  { %v724_v56 = vadd.f32 %v723_v8, %v660_v10  ;;  %v474_v53 = vmul.f32 0.5, %v282_v63  ;;  %v536_v15 = vmul.f32 %v472_v38, %v280_v13  ;;  %v824_v57 = vadd.f32 -0.5, %v344_v9 }
  0x24   :  { %v284_v52 = vsub.f32 %v2422_v49, %v2421_v14  ;;  %v662_v1 = vsel %vm1754_vm5, %v534_v40, %v822_v16  ;;  %v2425_v55 = vunpack.c.h.bf16 %v1496_v39  ;;  %v2426_v2 = vunpack.c.h.bf16 %v1272_v6 }
  0x25   :  { %v347_v61 = vand.u32 2147483647, %v283_v58  ;;  %vm1774_vm7 = vcmp.lt.f32.partialorder %v344_v9, 1.0  ;;  %v725_v46 = vadd.f32 %v724_v56, %v661_v0  ;;  %v475_v54 = vmul.f32 0.5, %v283_v58 }
  0x26   :  { %v285_v7 = vsub.f32 %v2426_v2, %v2425_v55  ;;  %v537_v14 = vmul.f32 %v473_v43, %v281_v44  ;;  %v825_v10 = vadd.f32 -0.5, %v345_v59  ;;  %v663_v13 = vsel %vm1764_vm6, %v535_v4, %v823_v51 }
  0x27   :  { %v2429_v38 = vunpack.c.l.bf16 %v1505_v50  ;;  %v2430_v16 = vunpack.c.l.bf16 %v1281_v11  ;;  %v348_v40 = vand.u32 2147483647, %v284_v52  ;;  %vm1784_vm8 = vcmp.lt.f32.partialorder %v345_v59, 1.0 }
  0x28   :  { %v726_v9 = vadd.f32 %v725_v46, %v662_v1  ;;  %v476_v3 = vmul.f32 0.5, %v284_v52  ;;  %v538_v8 = vmul.f32 %v474_v53, %v282_v63  ;;  %v826_v0 = vadd.f32 -0.5, %v346_v60 }
  0x29   :  { %v286_v39 = vsub.f32 %v2430_v16, %v2429_v38  ;;  %v664_v44 = vsel %vm1774_vm7, %v536_v15, %v824_v57  ;;  %v2433_v43 = vunpack.c.h.bf16 %v1505_v50  ;;  %v2434_v51 = vunpack.c.h.bf16 %v1281_v11 }
  0x2a   :  { %v349_v49 = vand.u32 2147483647, %v285_v7  ;;  %vm1794_vm9 = vcmp.lt.f32.partialorder %v346_v60, 1.0  ;;  %v727_v59 = vadd.f32 %v726_v9, %v663_v13  ;;  %v477_v56 = vmul.f32 0.5, %v285_v7 }
  0x2b   :  { %v287_v4 = vsub.f32 %v2434_v51, %v2433_v43  ;;  %v539_v55 = vmul.f32 %v475_v54, %v283_v58  ;;  %v827_v1 = vadd.f32 -0.5, %v347_v61  ;;  %v665_v63 = vsel %vm1784_vm8, %v537_v14, %v825_v10 }
  0x2c   :  { %v2437_v53 = vunpack.c.l.bf16 %v1510_v37  ;;  %v2438_v15 = vunpack.c.l.bf16 %v1286_v12  ;;  %v350_v57 = vand.u32 2147483647, %v286_v39  ;;  %vm1804_vm10 = vcmp.lt.f32.partialorder %v347_v61, 1.0 }
  0x2d   :  { %v728_v60 = vadd.f32 %v727_v59, %v664_v44  ;;  %v478_v2 = vmul.f32 0.5, %v286_v39  ;;  %v540_v62 = vmul.f32 %v476_v3, %v284_v52  ;;  %v828_v46 = vadd.f32 -0.5, %v348_v40 }
  0x2e   :  { %v288_v50 = vsub.f32 %v2438_v15, %v2437_v53  ;;  %v666_v58 = vsel %vm1794_vm9, %v538_v8, %v826_v0  ;;  %v2441_v54 = vunpack.c.h.bf16 %v1510_v37  ;;  %v2442_v14 = vunpack.c.h.bf16 %v1286_v12 }
  0x2f   :  { %v351_v13 = vand.u32 2147483647, %v287_v4  ;;  %vm1814_vm11 = vcmp.lt.f32.partialorder %v348_v40, 1.0  ;;  %v729_v61 = vadd.f32 %v728_v60, %v665_v63  ;;  %v479_v16 = vmul.f32 0.5, %v287_v4 }
  0x30   :  { %v289_v10 = vsub.f32 %v2442_v14, %v2441_v54  ;;  %v541_v6 = vmul.f32 %v477_v56, %v285_v7  ;;  %v829_v9 = vadd.f32 -0.5, %v349_v49  ;;  %v667_v52 = vsel %vm1804_vm10, %v539_v55, %v827_v1 }
  0x31   :  { %v2445_v3 = vunpack.c.l.bf16 %v1519_v28  ;;  %v2446_v8 = vunpack.c.l.bf16 %v1295_v17  ;;  %v352_v0 = vand.u32 2147483647, %v288_v50  ;;  %vm1824_vm12 = vcmp.lt.f32.partialorder %v349_v49, 1.0 }
  0x32   :  { %v730_v40 = vadd.f32 %v729_v61, %v666_v58  ;;  %v480_v44 = vmul.f32 0.5, %v288_v50  ;;  %v542_v43 = vmul.f32 %v478_v2, %v286_v39  ;;  %v830_v51 = vadd.f32 -0.5, %v350_v57 }
  0x33   :  { %v290_v37 = vsub.f32 %v2446_v8, %v2445_v3  ;;  %v668_v7 = vsel %vm1814_vm11, %v540_v62, %v828_v46  ;;  %v2449_v5 = vunpack.c.h.bf16 %v1519_v28  ;;  %v2450_v59 = vunpack.c.h.bf16 %v1295_v17 }
  0x34   :  { %v353_v55 = vand.u32 2147483647, %v289_v10  ;;  %vm1834_vm13 = vcmp.lt.f32.partialorder %v350_v57, 1.0  ;;  %v731_v49 = vadd.f32 %v730_v40, %v667_v52  ;;  %v481_v63 = vmul.f32 0.5, %v289_v10 }
  0x35   :  { %v291_v56 = vsub.f32 %v2450_v59, %v2449_v5  ;;  %v543_v53 = vmul.f32 %v479_v16, %v287_v4  ;;  %v831_v15 = vadd.f32 -0.5, %v351_v13  ;;  %v669_v39 = vsel %vm1824_vm12, %v541_v6, %v829_v9 }
  0x36   :  { %v2453_v11 = vunpack.c.l.bf16 %v1524_v27  ;;  %v2454_v60 = vunpack.c.l.bf16 %v1300_v18  ;;  %v354_v2 = vand.u32 2147483647, %v290_v37  ;;  %vm1844_vm14 = vcmp.lt.f32.partialorder %v351_v13, 1.0 }
  0x37   :  { %v732_v57 = vadd.f32 %v731_v49, %v668_v7  ;;  %v482_v62 = vmul.f32 0.5, %v290_v37  ;;  %v544_v46 = vmul.f32 %v480_v44, %v288_v50  ;;  %v832_v58 = vadd.f32 -0.5, %v352_v0 }
  0x38   :  { %v292_v28 = vsub.f32 %v2454_v60, %v2453_v11  ;;  %v670_v4 = vsel %vm1834_vm13, %v542_v43, %v830_v51  ;;  %v2457_v54 = vunpack.c.h.bf16 %v1524_v27  ;;  %v2458_v14 = vunpack.c.h.bf16 %v1300_v18 }
  0x39   :  { %v355_v61 = vand.u32 2147483647, %v291_v56  ;;  %vm1854_vm15 = vcmp.lt.f32.partialorder %v352_v0, 1.0  ;;  %v733_v13 = vadd.f32 %v732_v57, %v669_v39  ;;  %v483_v6 = vmul.f32 0.5, %v291_v56 }
  0x3a   :  { %v293_v38 = vsub.f32 %v2458_v14, %v2457_v54  ;;  %v545_v9 = vmul.f32 %v481_v63, %v289_v10  ;;  %v833_v52 = vadd.f32 -0.5, %v353_v55  ;;  %v671_v50 = vsel %vm1844_vm14, %v543_v53, %v831_v15 }
  0x3b   :  { %v2461_v3 = vunpack.c.l.bf16 %v1533_v20  ;;  %v2462_v8 = vunpack.c.l.bf16 %v1309_v23  ;;  %v356_v12 = vand.u32 2147483647, %v292_v28  ;;  %vm1864_vm1 = vcmp.lt.f32.partialorder %v353_v55, 1.0 }
  0x3c   :  { %v734_v0 = vadd.f32 %v733_v13, %v670_v4  ;;  %v484_v40 = vmul.f32 0.5, %v292_v28  ;;  %v546_v44 = vmul.f32 %v482_v62, %v290_v37  ;;  %v834_v43 = vadd.f32 -0.5, %v354_v2 }
  0x3d   :  { %v294_v27 = vsub.f32 %v2462_v8, %v2461_v3  ;;  %v672_v10 = vsel %vm1854_vm15, %v544_v46, %v832_v58  ;;  %v2465_v51 = vunpack.c.h.bf16 %v1533_v20  ;;  %v2466_v7 = vunpack.c.h.bf16 %v1309_v23 }
  0x3e   :  { %v357_v59 = vand.u32 2147483647, %v293_v38  ;;  %vm1874_vm2 = vcmp.lt.f32.partialorder %v354_v2, 1.0  ;;  %v735_v55 = vadd.f32 %v734_v0, %v671_v50  ;;  %v485_v49 = vmul.f32 0.5, %v293_v38 }
  0x3f   :  { %v295_v5 = vsub.f32 %v2466_v7, %v2465_v51  ;;  %v547_v63 = vmul.f32 %v483_v6, %v291_v56  ;;  %v835_v53 = vadd.f32 -0.5, %v355_v61  ;;  %v673_v37 = vsel %vm1864_vm1, %v545_v9, %v833_v52 }
  0x40   :  { %v2469_v15 = vunpack.c.l.bf16 %v1538_v19  ;;  %v2470_v39 = vunpack.c.l.bf16 %v1314_v24  ;;  %v358_v11 = vand.u32 2147483647, %v294_v27  ;;  %vm1884_vm3 = vcmp.lt.f32.partialorder %v355_v61, 1.0 }
  0x41   :  { %v736_v60 = vadd.f32 %v735_v55, %v672_v10  ;;  %v486_v2 = vmul.f32 0.5, %v294_v27  ;;  %v548_v17 = vmul.f32 %v484_v40, %v292_v28  ;;  %v836_v57 = vadd.f32 -0.5, %v356_v12 }
  0x42   :  { %v296_v20 = vsub.f32 %v2470_v39, %v2469_v15  ;;  %v674_v56 = vsel %vm1874_vm2, %v546_v44, %v834_v43  ;;  %v2473_v62 = vunpack.c.h.bf16 %v1538_v19  ;;  %v2474_v46 = vunpack.c.h.bf16 %v1314_v24 }
  0x43   :  { %v359_v4 = vand.u32 2147483647, %v295_v5  ;;  %vm1894_vm4 = vcmp.lt.f32.partialorder %v356_v12, 1.0  ;;  %v737_v14 = vadd.f32 %v736_v60, %v673_v37  ;;  %v487_v61 = vmul.f32 0.5, %v295_v5 }
  0x44   :  { %v297_v58 = vsub.f32 %v2474_v46, %v2473_v62  ;;  %v549_v16 = vmul.f32 %v485_v49, %v293_v38  ;;  %v837_v13 = vadd.f32 -0.5, %v357_v59  ;;  %v675_v28 = vsel %vm1884_vm3, %v547_v63, %v835_v53 }
  0x45   :  { %v2477_v6 = vunpack.c.l.bf16 %v1547_v21  ;;  %v2478_v9 = vunpack.c.l.bf16 %v1323_v29  ;;  %v360_v52 = vand.u32 2147483647, %v296_v20  ;;  %vm1904_vm5 = vcmp.lt.f32.partialorder %v357_v59, 1.0 }
  0x46   :  { %v738_v50 = vadd.f32 %v737_v14, %v674_v56  ;;  %v488_v3 = vmul.f32 0.5, %v296_v20  ;;  %v550_v8 = vmul.f32 %v486_v2, %v294_v27  ;;  %v838_v12 = vadd.f32 -0.5, %v358_v11 }
  0x47   :  { %v298_v19 = vsub.f32 %v2478_v9, %v2477_v6  ;;  %v676_v38 = vsel %vm1894_vm4, %v548_v17, %v836_v57  ;;  %v2481_v18 = vunpack.c.h.bf16 %v1547_v21  ;;  %v2482_v0 = vunpack.c.h.bf16 %v1323_v29 }
  0x48   :  { %v361_v44 = vand.u32 2147483647, %v297_v58  ;;  %vm1914_vm6 = vcmp.lt.f32.partialorder %v358_v11, 1.0  ;;  %v739_v10 = vadd.f32 %v738_v50, %v675_v28  ;;  %v489_v51 = vmul.f32 0.5, %v297_v58 }
  0x49   :  { %v299_v40 = vsub.f32 %v2482_v0, %v2481_v18  ;;  %v551_v7 = vmul.f32 %v487_v61, %v295_v5  ;;  %v839_v59 = vadd.f32 -0.5, %v359_v4  ;;  %v677_v27 = vsel %vm1904_vm5, %v549_v16, %v837_v13 }
  0x4a   :  { %v2485_v1 = vunpack.c.l.bf16 %v1552_v31  ;;  %v2486_v55 = vunpack.c.l.bf16 %v1328_v30  ;;  %v362_v49 = vand.u32 2147483647, %v298_v19  ;;  %vm1924_vm7 = vcmp.lt.f32.partialorder %v359_v4, 1.0 }
  0x4b   :  { %v740_v63 = vadd.f32 %v739_v10, %v676_v38  ;;  %v490_v53 = vmul.f32 0.5, %v298_v19  ;;  %v552_v37 = vmul.f32 %v488_v3, %v296_v20  ;;  %v840_v15 = vadd.f32 -0.5, %v360_v52 }
  0x4c   :  { %v300_v21 = vsub.f32 %v2486_v55, %v2485_v1  ;;  %v678_v5 = vsel %vm1914_vm6, %v550_v8, %v838_v12  ;;  %v2489_v39 = vunpack.c.h.bf16 %v1552_v31  ;;  %v2490_v11 = vunpack.c.h.bf16 %v1328_v30 }
  0x4d   :  { %v363_v60 = vand.u32 2147483647, %v299_v40  ;;  %vm1934_vm8 = vcmp.lt.f32.partialorder %v360_v52, 1.0  ;;  %v741_v17 = vadd.f32 %v740_v63, %v677_v27  ;;  %v491_v57 = vmul.f32 0.5, %v299_v40 }
  0x4e   :  { %v301_v23 = vsub.f32 %v2490_v11, %v2489_v39  ;;  %v553_v56 = vmul.f32 %v489_v51, %v297_v58  ;;  %v841_v62 = vadd.f32 -0.5, %v361_v44  ;;  %v679_v20 = vsel %vm1924_vm7, %v551_v7, %v839_v59 }
  0x4f   :  { %v2493_v46 = vunpack.c.l.bf16 %v1561_v22  ;;  %v2494_v4 = vunpack.c.l.bf16 %v1337_v35  ;;  %v364_v54 = vand.u32 2147483647, %v300_v21  ;;  %vm1944_vm9 = vcmp.lt.f32.partialorder %v361_v44, 1.0 }
  0x50   :  { %v742_v14 = vadd.f32 %v741_v17, %v678_v5  ;;  %v492_v61 = vmul.f32 0.5, %v300_v21  ;;  %v554_v16 = vmul.f32 %v490_v53, %v298_v19  ;;  %v842_v13 = vadd.f32 -0.5, %v362_v49 }
  0x51   :  { %v302_v31 = vsub.f32 %v2494_v4, %v2493_v46  ;;  %v680_v58 = vsel %vm1934_vm8, %v552_v37, %v840_v15  ;;  %v2497_v28 = vunpack.c.h.bf16 %v1561_v22  ;;  %v2498_v6 = vunpack.c.h.bf16 %v1337_v35 }
  0x52   :  { %v365_v52 = vand.u32 2147483647, %v301_v23  ;;  %vm1954_vm10 = vcmp.lt.f32.partialorder %v362_v49, 1.0  ;;  %v743_v50 = vadd.f32 %v742_v14, %v679_v20  ;;  %v493_v3 = vmul.f32 0.5, %v301_v23 }
  0x53   :  { %v303_v9 = vsub.f32 %v2498_v6, %v2497_v28  ;;  %v555_v8 = vmul.f32 %v491_v57, %v299_v40  ;;  %v843_v12 = vadd.f32 -0.5, %v363_v60  ;;  %v681_v19 = vsel %vm1944_vm9, %v553_v56, %v841_v62 }
  0x54   :  { %v2501_v38 = vunpack.c.l.bf16 %v1566_v32  ;;  %v2502_v18 = vunpack.c.l.bf16 %v1342_v36  ;;  %v366_v0 = vand.u32 2147483647, %v302_v31  ;;  %vm1964_vm11 = vcmp.lt.f32.partialorder %v363_v60, 1.0 }
  0x55   :  { %v744_v44 = vadd.f32 %v743_v50, %v680_v58  ;;  %v494_v43 = vmul.f32 0.5, %v302_v31  ;;  %v556_v10 = vmul.f32 %v492_v61, %v300_v21  ;;  %v844_v51 = vadd.f32 -0.5, %v364_v54 }
  0x56   :  { %v304_v22 = vsub.f32 %v2502_v18, %v2501_v38  ;;  %v682_v40 = vsel %vm1954_vm10, %v554_v16, %v842_v13  ;;  %v2505_v7 = vunpack.c.h.bf16 %v1566_v32  ;;  %v2506_v59 = vunpack.c.h.bf16 %v1342_v36 }
  0x57   :  { %v367_v1 = vand.u32 2147483647, %v303_v9  ;;  %vm1974_vm12 = vcmp.lt.f32.partialorder %v364_v54, 1.0  ;;  %v745_v49 = vadd.f32 %v744_v44, %v681_v19  ;;  %v495_v29 = vmul.f32 0.5, %v303_v9 }
  0x58   :  { %v305_v27 = vsub.f32 %v2506_v59, %v2505_v7  ;;  %v557_v63 = vmul.f32 %v493_v3, %v301_v23  ;;  %v845_v53 = vadd.f32 -0.5, %v365_v52  ;;  %v683_v21 = vsel %vm1964_vm11, %v555_v8, %v843_v12 }
  0x59   :  { %v2509_v37 = vunpack.c.l.bf16 %v1575_v25  ;;  %v2510_v15 = vunpack.c.l.bf16 %v1351_v41  ;;  %v368_v5 = vand.u32 2147483647, %v304_v22  ;;  %vm1984_vm13 = vcmp.lt.f32.partialorder %v365_v52, 1.0 }
  0x5a   :  { %v746_v39 = vadd.f32 %v745_v49, %v682_v40  ;;  %v496_v11 = vmul.f32 0.5, %v304_v22  ;;  %v558_v60 = vmul.f32 %v494_v43, %v302_v31  ;;  %v846_v2 = vadd.f32 -0.5, %v366_v0 }
  0x5b   :  { %v306_v32 = vsub.f32 %v2510_v15, %v2509_v37  ;;  %v684_v23 = vsel %vm1974_vm12, %v556_v10, %v844_v51  ;;  %v2513_v17 = vunpack.c.h.bf16 %v1575_v25  ;;  %v2514_v57 = vunpack.c.h.bf16 %v1351_v41 }
  0x5c   :  { %v369_v62 = vand.u32 2147483647, %v305_v27  ;;  %vm1994_vm14 = vcmp.lt.f32.partialorder %v366_v0, 1.0  ;;  %v747_v46 = vadd.f32 %v746_v39, %v683_v21  ;;  %v497_v4 = vmul.f32 0.5, %v305_v27 }
  0x5d   :  { %v307_v56 = vsub.f32 %v2514_v57, %v2513_v17  ;;  %v559_v54 = vmul.f32 %v495_v29, %v303_v9  ;;  %v847_v30 = vadd.f32 -0.5, %v367_v1  ;;  %v685_v31 = vsel %vm1984_vm13, %v557_v63, %v845_v53 }
  0x5e   :  { %v2517_v14 = vunpack.c.l.bf16 %v1580_v33  ;;  %v2518_v61 = vunpack.c.l.bf16 %v1356_v42  ;;  %v370_v16 = vand.u32 2147483647, %v306_v32  ;;  %vm2004_vm15 = vcmp.lt.f32.partialorder %v367_v1, 1.0 }
  0x5f   :  { %v748_v13 = vadd.f32 %v747_v46, %v684_v23  ;;  %v498_v58 = vmul.f32 0.5, %v306_v32  ;;  %v560_v28 = vmul.f32 %v496_v11, %v304_v22  ;;  %v848_v6 = vadd.f32 -0.5, %v368_v5 }
  0x60   :  { %v308_v25 = vsub.f32 %v2518_v61, %v2517_v14  ;;  %v686_v9 = vsel %vm1994_vm14, %v558_v60, %v846_v2  ;;  %v2521_v52 = vunpack.c.h.bf16 %v1580_v33  ;;  %v2522_v24 = vunpack.c.h.bf16 %v1356_v42  ;;  %v2543_v61 = vld [vmem:[#allocation6_spill] sm:$0xff] }
  0x61   :  { %v371_v3 = vand.u32 2147483647, %v307_v56  ;;  %vm2014_vm1 = vcmp.lt.f32.partialorder %v368_v5, 1.0  ;;  %v749_v12 = vadd.f32 %v748_v13, %v685_v31  ;;  %v499_v19 = vmul.f32 0.5, %v307_v56  ;;  %v2541_v31 = vld [vmem:[#allocation18_spill] sm:$0xff] }
  0x62   :  { %v309_v50 = vsub.f32 %v2522_v24, %v2521_v52  ;;  %v561_v38 = vmul.f32 %v497_v4, %v305_v27  ;;  %v849_v18 = vadd.f32 -0.5, %v369_v62  ;;  %v687_v22 = vsel %vm2004_vm15, %v559_v54, %v847_v30 }
  0x63   :  { %v2525_v0 = vunpack.c.l.bf16 %v1589_v26  ;;  %v2526_v35 = vunpack.c.l.bf16 %v1365_v47  ;;  %v372_v44 = vand.u32 2147483647, %v308_v25  ;;  %vm2024_vm2 = vcmp.lt.f32.partialorder %v369_v62, 1.0 }
  0x64   :  { %v750_v43 = vadd.f32 %v749_v12, %v686_v9  ;;  %v500_v10 = vmul.f32 0.5, %v308_v25  ;;  %v562_v51 = vmul.f32 %v498_v58, %v306_v32  ;;  %v850_v40 = vadd.f32 -0.5, %v370_v16 }
  0x65   :  { %v310_v33 = vsub.f32 %v2526_v35, %v2525_v0  ;;  %v688_v7 = vsel %vm2014_vm1, %v560_v28, %v848_v6  ;;  %v2529_v59 = vunpack.c.h.bf16 %v1589_v26  ;;  %v2530_v27 = vunpack.c.h.bf16 %v1365_v47  ;;  %v2553_v35 = vld [vmem:[#allocation7_spill] sm:$0xff] }
  0x66   :  { %v373_v55 = vand.u32 2147483647, %v309_v50  ;;  %vm2034_vm3 = vcmp.lt.f32.partialorder %v370_v16, 1.0  ;;  %v751_v29 = vadd.f32 %v750_v43, %v687_v22  ;;  %v501_v63 = vmul.f32 0.5, %v309_v50  ;;  %v2551_v22 = vld [vmem:[#allocation19_spill] sm:$0xff] }
  0x67   :  { %v311_v1 = vsub.f32 %v2530_v27, %v2529_v59  ;;  %v563_v53 = vmul.f32 %v499_v19, %v307_v56  ;;  %v851_v21 = vadd.f32 -0.5, %v371_v3  ;;  %v689_v37 = vsel %vm2024_vm2, %v561_v38, %v849_v18 }
  0x68   :  { %v2533_v15 = vunpack.c.l.bf16 %v1594_v34  ;;  %v2534_v32 = vunpack.c.l.bf16 %v1370_v48  ;;  %v374_v5 = vand.u32 2147483647, %v310_v33  ;;  %vm2044_vm4 = vcmp.lt.f32.partialorder %v371_v3, 1.0 }
  0x69   :  { %v752_v36 = vadd.f32 %v751_v29, %v688_v7  ;;  %v502_v39 = vmul.f32 0.5, %v310_v33  ;;  %v564_v11 = vmul.f32 %v500_v10, %v308_v25  ;;  %v852_v60 = vadd.f32 -0.5, %v372_v44 }
  0x6a   :  { %v312_v26 = vsub.f32 %v2534_v32, %v2533_v15  ;;  %v690_v2 = vsel %vm2034_vm3, %v562_v51, %v850_v40  ;;  %v2537_v23 = vunpack.c.h.bf16 %v1594_v34  ;;  %v2538_v17 = vunpack.c.h.bf16 %v1370_v48  ;;  %v2561_v32 = vld [vmem:[#allocation20_spill] sm:$0xff] }
  0x6b   :  { %v375_v56 = vand.u32 2147483647, %v311_v1  ;;  %vm2054_vm5 = vcmp.lt.f32.partialorder %v372_v44, 1.0  ;;  %v753_v20 = vadd.f32 %v752_v36, %v689_v37  ;;  %v503_v46 = vmul.f32 0.5, %v311_v1 }
  0x6c   :  { %v313_v57 = vsub.f32 %v2538_v17, %v2537_v23  ;;  %v565_v4 = vmul.f32 %v501_v63, %v309_v50  ;;  %v853_v54 = vadd.f32 -0.5, %v373_v55  ;;  %v691_v30 = vsel %vm2044_vm4, %v563_v53, %v851_v21 }
  0x6d   :  { %v2542_v14 = vunpack.c.l.bf16 %v2541_v31  ;;  %v2544_v25 = vunpack.c.l.bf16 %v2543_v61  ;;  %v376_v16 = vand.u32 2147483647, %v312_v26  ;;  %vm2064_vm6 = vcmp.lt.f32.partialorder %v373_v55, 1.0 }
  0x6e   :  { %v754_v41 = vadd.f32 %v753_v20, %v690_v2  ;;  %v504_v13 = vmul.f32 0.5, %v312_v26  ;;  %v566_v58 = vmul.f32 %v502_v39, %v310_v33  ;;  %v854_v28 = vadd.f32 -0.5, %v374_v5 }
  0x6f   :  { %v314_v34 = vsub.f32 %v2544_v25, %v2542_v14  ;;  %v692_v6 = vsel %vm2054_vm5, %v564_v11, %v852_v60  ;;  %v2547_v9 = vunpack.c.h.bf16 %v2541_v31  ;;  %v2548_v52 = vunpack.c.h.bf16 %v2543_v61  ;;  %v2571_v25 = vld [vmem:[#allocation21_spill] sm:$0xff] }
  0x70   :  { %v377_v50 = vand.u32 2147483647, %v313_v57  ;;  %vm2074_vm7 = vcmp.lt.f32.partialorder %v374_v5, 1.0  ;;  %v755_v8 = vadd.f32 %v754_v41, %v691_v30  ;;  %v505_v12 = vmul.f32 0.5, %v313_v57  ;;  %v2563_v5 = vld [vmem:[#allocation8_spill] sm:$0xff] }
  0x71   :  { %v315_v24 = vsub.f32 %v2548_v52, %v2547_v9  ;;  %v567_v19 = vmul.f32 %v503_v46, %v311_v1  ;;  %v855_v38 = vadd.f32 -0.5, %v375_v56  ;;  %v693_v18 = vsel %vm2064_vm6, %v565_v4, %v853_v54 }
  0x72   :  { %v2552_v0 = vunpack.c.l.bf16 %v2551_v22  ;;  %v2554_v33 = vunpack.c.l.bf16 %v2553_v35  ;;  %v378_v42 = vand.u32 2147483647, %v314_v34  ;;  %vm2084_vm8 = vcmp.lt.f32.partialorder %v375_v56, 1.0 }
  0x73   :  { %v756_v10 = vadd.f32 %v755_v8, %v692_v6  ;;  %v506_v51 = vmul.f32 0.5, %v314_v34  ;;  %v568_v40 = vmul.f32 %v504_v13, %v312_v26  ;;  %v856_v7 = vadd.f32 -0.5, %v376_v16 }
  0x74   :  { %v316_v44 = vsub.f32 %v2554_v33, %v2552_v0  ;;  %v694_v59 = vsel %vm2074_vm7, %v566_v58, %v854_v28  ;;  %v2557_v27 = vunpack.c.h.bf16 %v2551_v22  ;;  %v2558_v1 = vunpack.c.h.bf16 %v2553_v35  ;;  %v2581_v33 = vld [vmem:[#allocation22_spill] sm:$0xff] }
  0x75   :  { %v379_v49 = vand.u32 2147483647, %v315_v24  ;;  %vm2094_vm9 = vcmp.lt.f32.partialorder %v376_v16, 1.0  ;;  %v757_v63 = vadd.f32 %v756_v10, %v693_v18  ;;  %v507_v53 = vmul.f32 0.5, %v315_v24  ;;  %v2573_v16 = vld [vmem:[#allocation9_spill] sm:$0xff] }
  0x76   :  { %v317_v55 = vsub.f32 %v2558_v1, %v2557_v27  ;;  %v569_v21 = vmul.f32 %v505_v12, %v313_v57  ;;  %v857_v37 = vadd.f32 -0.5, %v377_v50  ;;  %v695_v15 = vsel %vm2084_vm8, %v567_v19, %v855_v38 }
  0x77   :  { %v2562_v26 = vunpack.c.l.bf16 %v2561_v32  ;;  %v2564_v47 = vunpack.c.l.bf16 %v2563_v5  ;;  %v380_v39 = vand.u32 2147483647, %v316_v44  ;;  %vm2104_vm10 = vcmp.lt.f32.partialorder %v377_v50, 1.0 }
  0x78   :  { %v758_v60 = vadd.f32 %v757_v63, %v694_v59  ;;  %v508_v2 = vmul.f32 0.5, %v316_v44  ;;  %v570_v23 = vmul.f32 %v506_v51, %v314_v34  ;;  %v858_v17 = vadd.f32 -0.5, %v378_v42 }
  0x79   :  { %v318_v36 = vsub.f32 %v2564_v47, %v2562_v26  ;;  %v696_v57 = vsel %vm2094_vm9, %v568_v40, %v856_v7  ;;  %v2567_v56 = vunpack.c.h.bf16 %v2561_v32  ;;  %v2568_v62 = vunpack.c.h.bf16 %v2563_v5  ;;  %v2591_v47 = vld [vmem:[#allocation23_spill] sm:$0xff] }
  0x7a   :  { %v381_v46 = vand.u32 2147483647, %v317_v55  ;;  %vm2114_vm11 = vcmp.lt.f32.partialorder %v378_v42, 1.0  ;;  %v759_v54 = vadd.f32 %v758_v60, %v695_v15  ;;  %v509_v30 = vmul.f32 0.5, %v317_v55  ;;  %v2583_v42 = vld [vmem:[#allocation10_spill] sm:$0xff] }
  0x7b   :  { %v319_v20 = vsub.f32 %v2568_v62, %v2567_v56  ;;  %v571_v31 = vmul.f32 %v507_v53, %v315_v24  ;;  %v859_v14 = vadd.f32 -0.5, %v379_v49  ;;  %v697_v61 = vsel %vm2104_vm10, %v569_v21, %v857_v37 }
  0x7c   :  { %v2572_v34 = vunpack.c.l.bf16 %v2571_v25  ;;  %v2574_v48 = vunpack.c.l.bf16 %v2573_v16  ;;  %v382_v13 = vand.u32 2147483647, %v318_v36  ;;  %vm2124_vm12 = vcmp.lt.f32.partialorder %v379_v49, 1.0 }
  0x7d   :  { %v760_v28 = vadd.f32 %v759_v54, %v696_v57  ;;  %v510_v6 = vmul.f32 0.5, %v318_v36  ;;  %v572_v9 = vmul.f32 %v508_v2, %v316_v44  ;;  %v860_v52 = vadd.f32 -0.5, %v380_v39 }
  0x7e   :  { %v320_v41 = vsub.f32 %v2574_v48, %v2572_v34  ;;  %v698_v24 = vsel %vm2114_vm11, %v570_v23, %v858_v17  ;;  %v2577_v50 = vunpack.c.h.bf16 %v2571_v25  ;;  %v2578_v3 = vunpack.c.h.bf16 %v2573_v16  ;;  %v2601_v48 = vld [vmem:[#allocation24_spill] sm:$0xff] }
  0x7f   :  { %v383_v12 = vand.u32 2147483647, %v319_v20  ;;  %vm2134_vm13 = vcmp.lt.f32.partialorder %v380_v39, 1.0  ;;  %v761_v38 = vadd.f32 %v760_v28, %v697_v61  ;;  %v511_v18 = vmul.f32 0.5, %v319_v20  ;;  %v2593_v39 = vld [vmem:[#allocation11_spill] sm:$0xff] }
  0x80   :  { %v321_v8 = vsub.f32 %v2578_v3, %v2577_v50  ;;  %v573_v22 = vmul.f32 %v509_v30, %v317_v55  ;;  %v861_v0 = vadd.f32 -0.5, %v381_v46  ;;  %v699_v35 = vsel %vm2124_vm12, %v571_v31, %v859_v14 }
  0x81   :  { %v2582_v44 = vunpack.c.l.bf16 %v2581_v33  ;;  %v2584_v43 = vunpack.c.l.bf16 %v2583_v42  ;;  %v384_v51 = vand.u32 2147483647, %v320_v41  ;;  %vm2144_vm14 = vcmp.lt.f32.partialorder %v381_v46, 1.0 }
  0x82   :  { %v762_v7 = vadd.f32 %v761_v38, %v698_v24  ;;  %v512_v59 = vmul.f32 0.5, %v320_v41  ;;  %v574_v27 = vmul.f32 %v510_v6, %v318_v36  ;;  %v862_v1 = vadd.f32 -0.5, %v382_v13 }
  0x83   :  { %v322_v10 = vsub.f32 %v2584_v43, %v2582_v44  ;;  %v700_v55 = vsel %vm2134_vm13, %v572_v9, %v860_v52  ;;  %v2587_v49 = vunpack.c.h.bf16 %v2581_v33  ;;  %v2588_v29 = vunpack.c.h.bf16 %v2583_v42  ;;  %v2611_v43 = vld [vmem:[#allocation25_spill] sm:$0xff] }
  0x84   :  { %v385_v53 = vand.u32 2147483647, %v321_v8  ;;  %vm2154_vm15 = vcmp.lt.f32.partialorder %v382_v13, 1.0  ;;  %v763_v37 = vadd.f32 %v762_v7, %v699_v35  ;;  %v513_v15 = vmul.f32 0.5, %v321_v8  ;;  %v2603_v13 = vld [vmem:[#allocation12_spill] sm:$0xff] }
  0x85   :  { %v323_v63 = vsub.f32 %v2588_v29, %v2587_v49  ;;  %v575_v32 = vmul.f32 %v511_v18, %v319_v20  ;;  %v863_v26 = vadd.f32 -0.5, %v383_v12  ;;  %v701_v5 = vsel %vm2144_vm14, %v573_v22, %v861_v0 }
  0x86   :  { %v2592_v36 = vunpack.c.l.bf16 %v2591_v47  ;;  %v2594_v11 = vunpack.c.l.bf16 %v2593_v39  ;;  %v386_v2 = vand.u32 2147483647, %v322_v10  ;;  %vm2164_vm1 = vcmp.lt.f32.partialorder %v383_v12, 1.0 }
  0x87   :  { %v764_v17 = vadd.f32 %v763_v37, %v700_v55  ;;  %v514_v57 = vmul.f32 0.5, %v322_v10  ;;  %v576_v56 = vmul.f32 %v512_v59, %v320_v41  ;;  %v864_v62 = vadd.f32 -0.5, %v384_v51 }
  0x88   :  { %v324_v60 = vsub.f32 %v2594_v11, %v2592_v36  ;;  %v702_v20 = vsel %vm2154_vm15, %v574_v27, %v862_v1  ;;  %v2597_v46 = vunpack.c.h.bf16 %v2591_v47  ;;  %v2598_v4 = vunpack.c.h.bf16 %v2593_v39  ;;  %v2621_v11 = vld [vmem:[#allocation26_spill] sm:$0xff] }
  0x89   :  { %v387_v30 = vand.u32 2147483647, %v323_v63  ;;  %vm2174_vm2 = vcmp.lt.f32.partialorder %v384_v51, 1.0  ;;  %v765_v14 = vadd.f32 %v764_v17, %v701_v5  ;;  %v515_v61 = vmul.f32 0.5, %v323_v63  ;;  %v2613_v51 = vld [vmem:[#allocation13_spill] sm:$0xff] }
  0x8a   :  { %v325_v54 = vsub.f32 %v2598_v4, %v2597_v46  ;;  %v577_v25 = vmul.f32 %v513_v15, %v321_v8  ;;  %v865_v34 = vadd.f32 -0.5, %v385_v53  ;;  %v703_v16 = vsel %vm2164_vm1, %v575_v32, %v863_v26 }
  0x8b   :  { %v2602_v41 = vunpack.c.l.bf16 %v2601_v48  ;;  %v2604_v58 = vunpack.c.l.bf16 %v2603_v13  ;;  %v388_v6 = vand.u32 2147483647, %v324_v60  ;;  %vm2184_vm3 = vcmp.lt.f32.partialorder %v385_v53, 1.0 }
  0x8c   :  { %v766_v52 = vadd.f32 %v765_v14, %v702_v20  ;;  %v516_v24 = vmul.f32 0.5, %v324_v60  ;;  %v578_v50 = vmul.f32 %v514_v57, %v322_v10  ;;  %v866_v3 = vadd.f32 -0.5, %v386_v2 }
  0x8d   :  { %v326_v28 = vsub.f32 %v2604_v58, %v2602_v41  ;;  %v704_v8 = vsel %vm2174_vm2, %v576_v56, %v864_v62  ;;  %v2607_v12 = vunpack.c.h.bf16 %v2601_v48  ;;  %v2608_v19 = vunpack.c.h.bf16 %v2603_v13  ;;  %v2631_v58 = vld [vmem:[#allocation27_spill] sm:$0xff] }
  0x8e   :  { %v389_v18 = vand.u32 2147483647, %v325_v54  ;;  %vm2194_vm4 = vcmp.lt.f32.partialorder %v386_v2, 1.0  ;;  %v767_v0 = vadd.f32 %v766_v52, %v703_v16  ;;  %v517_v35 = vmul.f32 0.5, %v325_v54  ;;  %v2623_v2 = vld [vmem:[#allocation14_spill] sm:$0xff] }
  0x8f   :  { %v327_v38 = vsub.f32 %v2608_v19, %v2607_v12  ;;  %v579_v33 = vmul.f32 %v515_v61, %v323_v63  ;;  %v867_v44 = vadd.f32 -0.5, %v387_v30  ;;  %v705_v42 = vsel %vm2184_vm3, %v577_v25, %v865_v34 }
  0x90   :  { %v2612_v10 = vunpack.c.l.bf16 %v2611_v43  ;;  %v2614_v40 = vunpack.c.l.bf16 %v2613_v51  ;;  %v390_v59 = vand.u32 2147483647, %v326_v28  ;;  %vm2204_vm5 = vcmp.lt.f32.partialorder %v387_v30, 1.0 }
  0x91   :  { %v768_v1 = vadd.f32 %v767_v0, %v704_v8  ;;  %v518_v55 = vmul.f32 0.5, %v326_v28  ;;  %v580_v49 = vmul.f32 %v516_v24, %v324_v60  ;;  %v868_v29 = vadd.f32 -0.5, %v388_v6 }
  0x92   :  { %v328_v7 = vsub.f32 %v2614_v40, %v2612_v10  ;;  %v706_v63 = vsel %vm2194_vm4, %v578_v50, %v866_v3  ;;  %v2617_v53 = vunpack.c.h.bf16 %v2611_v43  ;;  %v2618_v21 = vunpack.c.h.bf16 %v2613_v51  ;;  %v2641_v40 = vld [vmem:[#allocation28_spill] sm:$0xff] }
  0x93   :  { %v391_v15 = vand.u32 2147483647, %v327_v38  ;;  %vm2214_vm6 = vcmp.lt.f32.partialorder %v388_v6, 1.0  ;;  %v769_v26 = vadd.f32 %v768_v1, %v705_v42  ;;  %v519_v5 = vmul.f32 0.5, %v327_v38  ;;  %v2633_v6 = vld [vmem:[#allocation15_spill] sm:$0xff] }
  0x94   :  { %v329_v37 = vsub.f32 %v2618_v21, %v2617_v53  ;;  %v581_v47 = vmul.f32 %v517_v35, %v325_v54  ;;  %v869_v36 = vadd.f32 -0.5, %v389_v18  ;;  %v707_v39 = vsel %vm2204_vm5, %v579_v33, %v867_v44 }
  0x95   :  { %v2622_v60 = vunpack.c.l.bf16 %v2621_v11  ;;  %v2624_v23 = vunpack.c.l.bf16 %v2623_v2  ;;  %v392_v57 = vand.u32 2147483647, %v328_v7  ;;  %vm2224_vm7 = vcmp.lt.f32.partialorder %v389_v18, 1.0 }
  0x96   :  { %v770_v62 = vadd.f32 %v769_v26, %v706_v63  ;;  %v520_v20 = vmul.f32 0.5, %v328_v7  ;;  %v582_v46 = vmul.f32 %v518_v55, %v326_v28  ;;  %v870_v4 = vadd.f32 -0.5, %v390_v59 }
  0x97   :  { %v330_v17 = vsub.f32 %v2624_v23, %v2622_v60  ;;  %v708_v54 = vsel %vm2214_vm6, %v580_v49, %v868_v29  ;;  %v2627_v30 = vunpack.c.h.bf16 %v2621_v11  ;;  %v2628_v31 = vunpack.c.h.bf16 %v2623_v2 }
  0x98   :  { %v393_v61 = vand.u32 2147483647, %v329_v37  ;;  %vm2234_vm8 = vcmp.lt.f32.partialorder %v390_v59, 1.0  ;;  %v771_v34 = vadd.f32 %v770_v62, %v707_v39  ;;  %v521_v16 = vmul.f32 0.5, %v329_v37  ;;  %v2643_v59 = vld [vmem:[#allocation16_spill] sm:$0xff] }
  0x99   :  { %v331_v14 = vsub.f32 %v2628_v31, %v2627_v30  ;;  %v583_v48 = vmul.f32 %v519_v5, %v327_v38  ;;  %v871_v41 = vadd.f32 -0.5, %v391_v15  ;;  %v709_v13 = vsel %vm2224_vm7, %v581_v47, %v869_v36 }
  0x9a   :  { %v2632_v28 = vunpack.c.l.bf16 %v2631_v58  ;;  %v2634_v9 = vunpack.c.l.bf16 %v2633_v6  ;;  %v394_v24 = vand.u32 2147483647, %v330_v17  ;;  %vm2244_vm9 = vcmp.lt.f32.partialorder %v391_v15, 1.0 }
  0x9b   :  { %v772_v3 = vadd.f32 %v771_v34, %v708_v54  ;;  %v522_v8 = vmul.f32 0.5, %v330_v17  ;;  %v584_v12 = vmul.f32 %v520_v20, %v328_v7  ;;  %v872_v19 = vadd.f32 -0.5, %v392_v57 }
  0x9c   :  { %v332_v52 = vsub.f32 %v2634_v9, %v2632_v28  ;;  %v710_v38 = vsel %vm2234_vm8, %v582_v46, %v870_v4  ;;  %v2637_v18 = vunpack.c.h.bf16 %v2631_v58  ;;  %v2638_v22 = vunpack.c.h.bf16 %v2633_v6 }
  0x9d   :  { %v395_v35 = vand.u32 2147483647, %v331_v14  ;;  %vm2254_vm10 = vcmp.lt.f32.partialorder %v392_v57, 1.0  ;;  %v773_v44 = vadd.f32 %v772_v3, %v709_v13  ;;  %v523_v42 = vmul.f32 0.5, %v331_v14 }
  0x9e   :  { %v333_v0 = vsub.f32 %v2638_v22, %v2637_v18  ;;  %v585_v43 = vmul.f32 %v521_v16, %v329_v37  ;;  %v873_v10 = vadd.f32 -0.5, %v393_v61  ;;  %v711_v51 = vsel %vm2244_vm9, %v583_v48, %v871_v41 }
  0x9f   :  { %v2642_v7 = vunpack.c.l.bf16 %v2641_v40  ;;  %v2644_v27 = vunpack.c.l.bf16 %v2643_v59  ;;  %v396_v55 = vand.u32 2147483647, %v332_v52  ;;  %vm2264_vm11 = vcmp.lt.f32.partialorder %v393_v61, 1.0 }
  0xa0   :  { %v774_v29 = vadd.f32 %v773_v44, %v710_v38  ;;  %v524_v63 = vmul.f32 0.5, %v332_v52  ;;  %v586_v53 = vmul.f32 %v522_v8, %v330_v17  ;;  %v874_v21 = vadd.f32 -0.5, %v394_v24  ;;  %v2652_v17 = vld [vmem:[#allocation17_spill] sm:$0xff] }
  0xa1   :  { %v334_v1 = vsub.f32 %v2644_v27, %v2642_v7  ;;  %v712_v37 = vsel %vm2254_vm10, %v584_v12, %v872_v19  ;;  %v2647_v15 = vunpack.c.h.bf16 %v2641_v40  ;;  %v2648_v32 = vunpack.c.h.bf16 %v2643_v59 }
  0xa2   :  { %v397_v5 = vand.u32 2147483647, %v333_v0  ;;  %vm2274_vm12 = vcmp.lt.f32.partialorder %v394_v24, 1.0  ;;  %v775_v36 = vadd.f32 %v774_v29, %v711_v51  ;;  %v525_v39 = vmul.f32 0.5, %v333_v0 }
  0xa3   :  { %v335_v26 = vsub.f32 %v2648_v32, %v2647_v15  ;;  %v587_v11 = vmul.f32 %v523_v42, %v331_v14  ;;  %v875_v60 = vadd.f32 -0.5, %v395_v35  ;;  %v713_v2 = vsel %vm2264_vm11, %v585_v43, %v873_v10 }
  0xa4   :  { %v2651_v23 = vunpack.c.l.bf16 %v1703_v45  ;;  %v2653_v57 = vunpack.c.l.bf16 %v2652_v17  ;;  %v398_v62 = vand.u32 2147483647, %v334_v1  ;;  %vm2284_vm13 = vcmp.lt.f32.partialorder %v395_v35, 1.0 }
  0xa5   :  { %v776_v46 = vadd.f32 %v775_v36, %v712_v37  ;;  %v526_v4 = vmul.f32 0.5, %v334_v1  ;;  %v588_v54 = vmul.f32 %v524_v63, %v332_v52  ;;  %v876_v30 = vadd.f32 -0.5, %v396_v55 }
  0xa6   :  { %v336_v56 = vsub.f32 %v2653_v57, %v2651_v23  ;;  %v714_v31 = vsel %vm2274_vm12, %v586_v53, %v874_v21  ;;  %v2656_v14 = vunpack.c.h.bf16 %v1703_v45  ;;  %v2657_v61 = vunpack.c.h.bf16 %v2652_v17 }
  0xa7   :  { %v399_v34 = vand.u32 2147483647, %v335_v26  ;;  %vm2294_vm14 = vcmp.lt.f32.partialorder %v396_v55, 1.0  ;;  %v777_v48 = vadd.f32 %v776_v46, %v713_v2  ;;  %v527_v41 = vmul.f32 0.5, %v335_v26 }
  0xa8   :  { %v337_v25 = vsub.f32 %v2657_v61, %v2656_v14  ;;  %v589_v13 = vmul.f32 %v525_v39, %v333_v0  ;;  %v877_v58 = vadd.f32 -0.5, %v397_v5  ;;  %v715_v28 = vsel %vm2284_vm13, %v587_v11, %v875_v60 }
  0xa9   :  { %v400_v6 = vand.u32 2147483647, %v336_v56  ;;  %vm2300_vm15 = vcmp.lt.f32.partialorder %v397_v5, 1.0  ;;  %v778_v45 = vadd.f32 %v777_v48, %v714_v31  ;;  %v528_v52 = vmul.f32 0.5, %v336_v56 }
  0xaa   :  { %v590_v24 = vmul.f32 %v526_v4, %v334_v1  ;;  %v878_v50 = vadd.f32 -0.5, %v398_v62  ;;  %v716_v3 = vsel %vm2294_vm14, %v588_v54, %v876_v30  ;;  %v401_v8 = vand.u32 2147483647, %v337_v25 }
  0xab   :  { %vm2306_vm1 = vcmp.lt.f32.partialorder %v398_v62, 1.0  ;;  %v779_v19 = vadd.f32 %v778_v45, %v715_v28  ;;  %v529_v38 = vmul.f32 0.5, %v337_v25  ;;  %v591_v18 = vmul.f32 %v527_v41, %v335_v26  ;;  %v722_v26 = vld [vmem:[#allocation2] sm:$0x1] }
  0xac   :  { %v879_v22 = vadd.f32 -0.5, %v399_v34  ;;  %v717_v0 = vsel %vm2300_vm15, %v589_v13, %v877_v58  ;;  %vm463_vm2 = vcmp.lt.f32.partialorder %v399_v34, 1.0  ;;  %v592_v33 = vmul.f32 %v528_v52, %v336_v56 }
  0xad   :  { %v780_v35 = vadd.f32 %v779_v19, %v716_v3  ;;  %v880_v44 = vadd.f32 -0.5, %v400_v6  ;;  %v718_v42 = vsel %vm2306_vm1, %v590_v24, %v878_v50  ;;  %vm464_vm3 = vcmp.lt.f32.partialorder %v400_v6, 1.0 }
  0xae   :  { %v593_v10 = vmul.f32 %v529_v38, %v337_v25  ;;  %v881_v51 = vadd.f32 -0.5, %v401_v8  ;;  %v719_v40 = vsel %vm463_vm2, %v591_v18, %v879_v22  ;;  %vm465_vm4 = vcmp.lt.f32.partialorder %v401_v8, 1.0 }
  0xaf   :  { %v781_v43 = vadd.f32 %v780_v35, %v717_v0  ;;  %v720_v59 = vsel %vm464_vm3, %v592_v33, %v880_v44 }
  0xb0   :  { %v721_v1 = vsel %vm465_vm4, %v593_v10, %v881_v51 }
  0xb1   :  { %v782_v7 = vadd.f32 %v781_v43, %v718_v42 }
  0xb3   :  { %v783_v27 = vadd.f32 %v782_v7, %v719_v40 }
  0xb5   :  { %v784_v55 = vadd.f32 %v783_v27, %v720_v59 }
  0xb7   :  { %v785_v49 = vadd.f32 %v784_v55, %v721_v1 }
  0xb9   :  { %786 = vadd.xlane.f32.xlu0 %v785_v49 }
 0x142   :  { %v787_v29 = vpop.xlane.xlu0 %786 }
 0x143   :  { %v788_v63 = vrot.slane %v787_v29, 4 }
 0x145   :  { %v789_v53 = vadd.f32 %v788_v63, %v787_v29 }
 0x147   :  { %v790_v21 = vrot.slane %v789_v53, 2 }
 0x149   :  { %v791_v37 = vadd.f32 %v790_v21, %v789_v53 }
 0x14b   :  { %v792_v15 = vrot.slane %v791_v37, 1 }
 0x14d   :  { %v793_v32 = vadd.f32 %v792_v15, %v791_v37 }
 0x14f   :  { %1200 = vpush %v793_v32 }
 0x180   :  { %s1201_s1 = spop %1200 }
 0x181   :  { %v795_v5 = vstv %s1201_s1 }
 0x182   :  { %v796_v47 = vadd.f32 %v795_v5, %v722_v26 }
 0x184   :  { %798 = vst.msk [vmem:[#allocation2] sm:$0x1] %vm16_vm0, %v796_v47 }
 0x18b   :  { %v802_v36 = vld [vmem:[#allocation2] sm:$0x1] }
 0x18c   :  { %803 = vst.msk [vmem:[#allocation3] sm:$0x1] %vm16_vm0, %v802_v36 }
 0x18d   :  { %1215 = shalt.err (!%p1212_p4)
}
 0x18e   :  { %813 = dma.vmem_to_hbm [thread:$0]  %s811_s23, 16, %s2321_s2, [#allocation4]  }
 0x18f   :  { %1224 = dma.done.wait [#allocation4], 16  }
 0x190   :  { %1225 = vsyncadd [#allocation4], 4294967280 }
 0x191   :  { %817 = vsyncpa [#allocation4], 1 }

// kernel: loss_network_forward.12
= control target key start
LH: loop header
LB: loop body
LE: loop exit
PB: predicated region body
PF: predicated region fallthrough
CT: control target
= control target key end

     0   :  { %s1696_s12 = smov 0   ;;  %s1698_s13 = smov 0   ;;  %s1944_s0 = inlined_call_operand.vmem [shape: bf16[256,1152], index: 0, kind: input, shape index: {}]   ;;  %s1945_s1 = inlined_call_operand.vmem [shape: bf16[1152,128], index: 1, kind: input, shape index: {}]   ;;  %s1946_s2 = inlined_call_operand.vmem [shape: f32[1,128], index: 2, kind: input, shape index: {}]   ;;  %s1947_s3 = inlined_call_operand.vmem [shape: bf16[256,128], index: 3, kind: output, shape index: {}]  }
   0x1   :  { %s1700_s14 = smov 0   ;;  %s1702_s15 = smov 0  }
   0x2   :  { %s1704_s16 = smov 0  }
   0x3 LB: > { %s25_s17 = sadd.s32 1, %s1669_s15  ;;  %p48_p1 = scmp.ne.s32.totalorder %s1661_s13, %s1657_s12  ;;  %s1673_s16 = sphi %s1704_s16, %s13_s16   ;;  %s1669_s15 = sphi %s1702_s15, %s1951_s15   ;;  %s1665_s14 = sphi %s1700_s14, %s1950_s14   ;;  %s1661_s13 = sphi %s1698_s13, %s1949_s13   ;;  %s1657_s12 = sphi %s1696_s12, %s1948_s12  }
   0x4   : > { %p26_p0 = scmp.ge.s32.totalorder %s25_s17, 9  ;;  %p49_p2 = scmp.eq.s32.totalorder %s1673_s16, 0 }
   0x5   : > { %s41_s19 = sadd.s32 1, %s1661_s13  ;;  %p1285_p5 = scmp.ge.s32.totalorder %s1673_s16, 9 }
   0x6   : > { %s1953_s17 = smov (%p26_p0, %s25_s17), 0  ;;  %p50_p3 = por %p49_p2, %p48_p1 }
   0x7   : > { %s37_s18 = ssub.s32 %s1669_s15, %s1953_s17  ;;  %162 = sbr.rel (%p1285_p5) target bundleno = 37 (0x25), region = 20 }
   0x8   : > { %p39_p4 = scmp.eq.s32.totalorder %s37_s18, 0 }
   0xa   : > { %s1731_s20 = scalar_select %p39_p4, %s1661_s13, %s41_s19  }
   0xc   : > { %165 = sbr.rel (!%p50_p3) target bundleno = 37 (0x25), region = 24  ;;  %s167_s21 = sand.u32 (%p50_p3), 1, %s1661_s13  }
   0xd   : > { %s1287_s22 = sshll.u32 (%p50_p3), %s1669_s15, 2  ;;  %s1286_s23 = sshll.u32 (%p50_p3), %s167_s21, 7 }
   0xe   : > { %s1739_s26 = scalar_lea.vmem (%p50_p3), %s1944_s0, %s1287_s22  ;;  %s1743_s27 = scalar_lea.vmem (%p50_p3), [#allocation3], %s1286_s23 }
   0xf   : > { %v191_v0 = vld [vmem:[%s1739_s26] sm:$0xf] (%p50_p3)  ;;  %v193_v1 = vld [vmem:[%s1739_s26 + $0x24] sm:$0xf] (%p50_p3)  ;;  %v195_v2 = vld [vmem:[%s1739_s26 + $0x48] sm:$0xf] (%p50_p3) }
  0x10   : > { %192 = vst [vmem:[%s1743_s27] sm:$0xf] (%p50_p3), %v191_v0  ;;  %194 = vst [vmem:[%s1743_s27 + $0x4] sm:$0xf] (%p50_p3), %v193_v1  ;;  %v197_v3 = vld [vmem:[%s1739_s26 + $0x6c] sm:$0xf] (%p50_p3) }
  0x11   : > { %v199_v4 = vld [vmem:[%s1739_s26 + $0x90] sm:$0xf]  ;;  %196 = vst [vmem:[%s1743_s27 + $0x8] sm:$0xf] %v195_v2  ;;  %198 = vst [vmem:[%s1743_s27 + $0xc] sm:$0xf] %v197_v3 }
  0x12   : > { %200 = vst [vmem:[%s1743_s27 + $0x10] sm:$0xf] %v199_v4  ;;  %v201_v5 = vld [vmem:[%s1739_s26 + $0xb4] sm:$0xf]  ;;  %v203_v6 = vld [vmem:[%s1739_s26 + $0xd8] sm:$0xf] }
  0x13   : > { %v205_v7 = vld [vmem:[%s1739_s26 + $0xfc] sm:$0xf]  ;;  %202 = vst [vmem:[%s1743_s27 + $0x14] sm:$0xf] %v201_v5  ;;  %204 = vst [vmem:[%s1743_s27 + $0x18] sm:$0xf] %v203_v6 }
  0x14   : > { %206 = vst [vmem:[%s1743_s27 + $0x1c] sm:$0xf] %v205_v7  ;;  %v207_v8 = vld [vmem:[%s1739_s26 + $0x120] sm:$0xf]  ;;  %v209_v9 = vld [vmem:[%s1739_s26 + $0x144] sm:$0xf] }
  0x15   : > { %v211_v10 = vld [vmem:[%s1739_s26 + $0x168] sm:$0xf]  ;;  %208 = vst [vmem:[%s1743_s27 + $0x20] sm:$0xf] %v207_v8  ;;  %210 = vst [vmem:[%s1743_s27 + $0x24] sm:$0xf] %v209_v9 }
  0x16   : > { %212 = vst [vmem:[%s1743_s27 + $0x28] sm:$0xf] %v211_v10  ;;  %v213_v11 = vld [vmem:[%s1739_s26 + $0x18c] sm:$0xf]  ;;  %v215_v12 = vld [vmem:[%s1739_s26 + $0x1b0] sm:$0xf] }
  0x17   : > { %v217_v13 = vld [vmem:[%s1739_s26 + $0x1d4] sm:$0xf]  ;;  %214 = vst [vmem:[%s1743_s27 + $0x2c] sm:$0xf] %v213_v11  ;;  %216 = vst [vmem:[%s1743_s27 + $0x30] sm:$0xf] %v215_v12 }
  0x18   : > { %218 = vst [vmem:[%s1743_s27 + $0x34] sm:$0xf] %v217_v13  ;;  %v219_v14 = vld [vmem:[%s1739_s26 + $0x1f8] sm:$0xf]  ;;  %v221_v15 = vld [vmem:[%s1739_s26 + $0x21c] sm:$0xf] }
  0x19   : > { %v223_v16 = vld [vmem:[%s1739_s26 + $0x240] sm:$0xf]  ;;  %220 = vst [vmem:[%s1743_s27 + $0x38] sm:$0xf] %v219_v14  ;;  %222 = vst [vmem:[%s1743_s27 + $0x3c] sm:$0xf] %v221_v15 }
  0x1a   : > { %224 = vst [vmem:[%s1743_s27 + $0x40] sm:$0xf] %v223_v16  ;;  %v225_v17 = vld [vmem:[%s1739_s26 + $0x264] sm:$0xf]  ;;  %v227_v18 = vld [vmem:[%s1739_s26 + $0x288] sm:$0xf] }
  0x1b   : > { %v229_v19 = vld [vmem:[%s1739_s26 + $0x2ac] sm:$0xf]  ;;  %226 = vst [vmem:[%s1743_s27 + $0x44] sm:$0xf] %v225_v17  ;;  %228 = vst [vmem:[%s1743_s27 + $0x48] sm:$0xf] %v227_v18 }
  0x1c   : > { %230 = vst [vmem:[%s1743_s27 + $0x4c] sm:$0xf] %v229_v19  ;;  %v231_v20 = vld [vmem:[%s1739_s26 + $0x2d0] sm:$0xf]  ;;  %v233_v21 = vld [vmem:[%s1739_s26 + $0x2f4] sm:$0xf] }
  0x1d   : > { %v235_v22 = vld [vmem:[%s1739_s26 + $0x318] sm:$0xf]  ;;  %232 = vst [vmem:[%s1743_s27 + $0x50] sm:$0xf] %v231_v20  ;;  %234 = vst [vmem:[%s1743_s27 + $0x54] sm:$0xf] %v233_v21 }
  0x1e   : > { %236 = vst [vmem:[%s1743_s27 + $0x58] sm:$0xf] %v235_v22  ;;  %v237_v23 = vld [vmem:[%s1739_s26 + $0x33c] sm:$0xf]  ;;  %v239_v24 = vld [vmem:[%s1739_s26 + $0x360] sm:$0xf] }
  0x1f   : > { %v241_v25 = vld [vmem:[%s1739_s26 + $0x384] sm:$0xf]  ;;  %238 = vst [vmem:[%s1743_s27 + $0x5c] sm:$0xf] %v237_v23  ;;  %240 = vst [vmem:[%s1743_s27 + $0x60] sm:$0xf] %v239_v24 }
  0x20   : > { %242 = vst [vmem:[%s1743_s27 + $0x64] sm:$0xf] %v241_v25  ;;  %v243_v26 = vld [vmem:[%s1739_s26 + $0x3a8] sm:$0xf]  ;;  %v245_v27 = vld [vmem:[%s1739_s26 + $0x3cc] sm:$0xf] }
  0x21   : > { %v247_v28 = vld [vmem:[%s1739_s26 + $0x3f0] sm:$0xf]  ;;  %244 = vst [vmem:[%s1743_s27 + $0x68] sm:$0xf] %v243_v26  ;;  %246 = vst [vmem:[%s1743_s27 + $0x6c] sm:$0xf] %v245_v27 }
  0x22   : > { %248 = vst [vmem:[%s1743_s27 + $0x70] sm:$0xf] %v247_v28  ;;  %v249_v29 = vld [vmem:[%s1739_s26 + $0x414] sm:$0xf]  ;;  %v251_v30 = vld [vmem:[%s1739_s26 + $0x438] sm:$0xf] }
  0x23   : > { %v253_v31 = vld [vmem:[%s1739_s26 + $0x45c] sm:$0xf]  ;;  %250 = vst [vmem:[%s1743_s27 + $0x74] sm:$0xf] %v249_v29  ;;  %252 = vst [vmem:[%s1743_s27 + $0x78] sm:$0xf] %v251_v30 }
  0x24   : > { %254 = vst [vmem:[%s1743_s27 + $0x7c] sm:$0xf] %v253_v31 }
  0x25 PF: > { %p1288_p6 = scmp.ge.s32.totalorder %s1673_s16, 1  ;;  %p353_p7 = scmp.lt.s32.totalorder %s1673_s16, 10 }
  0x27   : > { %p354_p8 = pnand %p1288_p6, %p353_p7 }
  0x28   : > { %s360_s28 = sand.u32 (!%p354_p8), 1, %s1657_s12   ;;  %s1290_s29 = sshll.u32 (!%p354_p8), %s1665_s14, 4 }
  0x29   : > { %357 = sbr.rel (%p354_p8) target bundleno = 353 (0x161), region = 69  ;;  %s1289_s30 = sshll.u32 (!%p354_p8), %s360_s28, 7 }
  0x2a   : > { %p399_p9 = scmp.lt.s32.totalorder (!%p354_p8), %s1290_s29, 143  ;;  %s1816_s8 = scalar_lea.vmem (!%p354_p8), [#allocation3], %s1289_s30 }
  0x2b   : > { %p1292_p10 = scmp.ne.s32.totalorder (!%p354_p8), %s1665_s14, 0 }
  0x2e   : > { %s1955_s29 = smov (!%p399_p9, %s1290_s29), 143  ;;  %423 = sbr.rel (%p1292_p10) target bundleno = 68 (0x44), region = 77 }
  0x2f   : > { %s1291_s4 = sshll.u32 %s1955_s29, 2 }
  0x30   : > { %s1814_s7 = scalar_lea.vmem %s1945_s1, %s1291_s4 }
  0x33   : > { %v1675_v32 = vmov 0.0  }
  0x34   : > { %424 = vst [vmem:[#allocation2 + $0xb0] sm:$0xff] %v1675_v32  ;;  %425 = vst [vmem:[#allocation2] sm:$0xff] %v1675_v32 }
  0x35   : > { %426 = vst [vmem:[#allocation2 + $0xd8] sm:$0xff] %v1675_v32  ;;  %427 = vst [vmem:[#allocation2 + $0x18] sm:$0xff] %v1675_v32 }
  0x36   : > { %428 = vst [vmem:[#allocation2 + $0x50] sm:$0xff] %v1675_v32  ;;  %429 = vst [vmem:[#allocation2 + $0x68] sm:$0xff] %v1675_v32 }
  0x37   : > { %430 = vst [vmem:[#allocation2 + $0x30] sm:$0xff] %v1675_v32  ;;  %431 = vst [vmem:[#allocation2 + $0x48] sm:$0xff] %v1675_v32 }
  0x38   : > { %432 = vst [vmem:[#allocation2 + $0x80] sm:$0xff] %v1675_v32  ;;  %433 = vst [vmem:[#allocation2 + $0x88] sm:$0xff] %v1675_v32 }
  0x39   : > { %434 = vst [vmem:[#allocation2 + $0xe8] sm:$0xff] %v1675_v32  ;;  %435 = vst [vmem:[#allocation2 + $0xb8] sm:$0xff] %v1675_v32 }
  0x3a   : > { %436 = vst [vmem:[#allocation2 + $0x60] sm:$0xff] %v1675_v32  ;;  %437 = vst [vmem:[#allocation2 + $0xf0] sm:$0xff] %v1675_v32 }
  0x3b   : > { %438 = vst [vmem:[#allocation2 + $0x8] sm:$0xff] %v1675_v32  ;;  %439 = vst [vmem:[#allocation2 + $0x78] sm:$0xff] %v1675_v32 }
  0x3c   : > { %440 = vst [vmem:[#allocation2 + $0x38] sm:$0xff] %v1675_v32  ;;  %441 = vst [vmem:[#allocation2 + $0x58] sm:$0xff] %v1675_v32 }
  0x3d   : > { %442 = vst [vmem:[#allocation2 + $0x40] sm:$0xff] %v1675_v32  ;;  %443 = vst [vmem:[#allocation2 + $0xc8] sm:$0xff] %v1675_v32 }
  0x3e   : > { %444 = vst [vmem:[#allocation2 + $0xe0] sm:$0xff] %v1675_v32  ;;  %445 = vst [vmem:[#allocation2 + $0x90] sm:$0xff] %v1675_v32 }
  0x3f   : > { %446 = vst [vmem:[#allocation2 + $0x70] sm:$0xff] %v1675_v32  ;;  %447 = vst [vmem:[#allocation2 + $0xc0] sm:$0xff] %v1675_v32 }
  0x40   : > { %448 = vst [vmem:[#allocation2 + $0xa8] sm:$0xff] %v1675_v32  ;;  %449 = vst [vmem:[#allocation2 + $0xd0] sm:$0xff] %v1675_v32 }
  0x41   : > { %450 = vst [vmem:[#allocation2 + $0x10] sm:$0xff] %v1675_v32  ;;  %451 = vst [vmem:[#allocation2 + $0x28] sm:$0xff] %v1675_v32 }
  0x42   : > { %452 = vst [vmem:[#allocation2 + $0xa0] sm:$0xff] %v1675_v32  ;;  %453 = vst [vmem:[#allocation2 + $0xf8] sm:$0xff] %v1675_v32 }
  0x43   : > { %454 = vst [vmem:[#allocation2 + $0x20] sm:$0xff] %v1675_v32  ;;  %455 = vst [vmem:[#allocation2 + $0x98] sm:$0xff] %v1675_v32 }
  0x44 PF: > { %v1611_v33 = vld [vmem:[%s1814_s7 + $0x38] sm:$0xff]   ;;  %v1612_v34 = vld [vmem:[%s1814_s7 + $0x30] sm:$0xff]   ;;  %v1613_v35 = vld [vmem:[%s1814_s7 + $0x28] sm:$0xff]   ;;  %p1317_p11 = scmp.ne.s32.totalorder %s1665_s14, 8 }
  0x45   : > { %1506 = vmatprep.subr.bf16.mxu0 %v1611_v33  ;;  %1554 = vmatprep.subr.bf16.mxu1 %v1611_v33  ;;  %v1614_v36 = vld [vmem:[%s1814_s7 + $0x20] sm:$0xff]   ;;  %v1615_v39 = vld [vmem:[%s1814_s7 + $0x18] sm:$0xff]   ;;  %v1616_v40 = vld [vmem:[%s1814_s7 + $0x10] sm:$0xff]  }
  0x46   : > { %1507 = vmatpush3.bf16.msra.mxu0 %v1611_v33  ;;  %1562 = vmatpush3.bf16.msra.mxu1 %v1611_v33  ;;  %v1619_v37 = vld [vmem:[%s1816_s8] sm:$0xff]   ;;  %v1617_v41 = vld [vmem:[%s1814_s7 + $0x8] sm:$0xff]   ;;  %v1623_v45 = vld [vmem:[%s1816_s8 + $0x10] sm:$0xff]  }
  0x47   : > { %1508 = vmatprep.subr.bf16.mxu0 %v1612_v34  ;;  %1555 = vmatprep.subr.bf16.mxu1 %v1612_v34  ;;  %v1620_v38 = vld [vmem:[%s1816_s8 + $0x40] sm:$0xff]   ;;  %v1621_v43 = vld [vmem:[%s1816_s8 + $0x8] sm:$0xff]   ;;  %v1624_v46 = vld [vmem:[%s1816_s8 + $0x50] sm:$0xff]  }
  0x48   : > { %1522 = vmatprep.mubr.bf16.mxu0 %v1619_v37  ;;  %1538 = vmatprep.mubr.bf16.mxu1 %v1620_v38  ;;  %v1618_v42 = vld [vmem:[%s1814_s7] sm:$0xff]   ;;  %v1622_v44 = vld [vmem:[%s1816_s8 + $0x48] sm:$0xff]   ;;  %v1625_v47 = vld [vmem:[%s1816_s8 + $0x18] sm:$0xff]  }
  0x49   : > { %v1626_v48 = vld [vmem:[%s1816_s8 + $0x58] sm:$0xff]   ;;  %v1627_v49 = vld [vmem:[%s1816_s8 + $0x20] sm:$0xff]   ;;  %v1629_v51 = vld [vmem:[%s1816_s8 + $0x28] sm:$0xff]  }
  0x4a   : > { %1509 = vmatpush3.bf16.msra.mxu0 %v1612_v34  ;;  %1563 = vmatpush3.bf16.msra.mxu1 %v1612_v34  ;;  %v1628_v50 = vld [vmem:[%s1816_s8 + $0x60] sm:$0xff]   ;;  %v1630_v52 = vld [vmem:[%s1816_s8 + $0x68] sm:$0xff]   ;;  %v1631_v53 = vld [vmem:[%s1816_s8 + $0x30] sm:$0xff]  }
  0x4b   : > { %1510 = vmatprep.subr.bf16.mxu0 %v1613_v35  ;;  %1556 = vmatprep.subr.bf16.mxu1 %v1613_v35  ;;  %v1632_v54 = vld [vmem:[%s1816_s8 + $0x70] sm:$0xff]   ;;  %v1633_v55 = vld [vmem:[%s1816_s8 + $0x38] sm:$0xff]   ;;  %v474_v58 = vld [vmem:[#allocation2 + $0x40] sm:$0xff] }
  0x4c   : > { %v1634_v56 = vld [vmem:[%s1816_s8 + $0x78] sm:$0xff]   ;;  %v456_v61 = vld [vmem:[#allocation2 + $0xb0] sm:$0xff]  ;;  %v475_v4 = vld [vmem:[#allocation2 + $0xc8] sm:$0xff] }
  0x4d   : > { %v458_v57 = vld [vmem:[#allocation2 + $0xd8] sm:$0xff]  ;;  %v457_v9 = vld [vmem:[#allocation2] sm:$0xff]  ;;  %v462_v15 = vld [vmem:[#allocation2 + $0x30] sm:$0xff] }
  0x4e   : > { %1511 = vmatpush3.bf16.msra.mxu0 %v1613_v35  ;;  %1564 = vmatpush3.bf16.msra.mxu1 %v1613_v35  ;;  %v472_v62 = vld [vmem:[#allocation2 + $0x38] sm:$0xff]  ;;  %v478_v16 = vld [vmem:[#allocation2 + $0x70] sm:$0xff]  ;;  %v476_v22 = vld [vmem:[#allocation2 + $0xe0] sm:$0xff] }
  0x4f   : > { %1512 = vmatprep.subr.bf16.mxu0 %v1614_v36  ;;  %1557 = vmatprep.subr.bf16.mxu1 %v1614_v36  ;;  %v459_v3 = vld [vmem:[#allocation2 + $0x18] sm:$0xff]  ;;  %v460_v21 = vld [vmem:[#allocation2 + $0x50] sm:$0xff]  ;;  %v463_v27 = vld [vmem:[#allocation2 + $0x48] sm:$0xff] }
  0x50   : > { %v473_v10 = vld [vmem:[#allocation2 + $0x58] sm:$0xff]  ;;  %v479_v28 = vld [vmem:[#allocation2 + $0xc0] sm:$0xff]  ;;  %v461_v33 = vld [vmem:[#allocation2 + $0x68] sm:$0xff] }
  0x51   : > { %v477_v34 = vld [vmem:[#allocation2 + $0x90] sm:$0xff] }
  0x52   : > { %1513 = vmatpush3.bf16.msra.mxu0 %v1614_v36  ;;  %1565 = vmatpush3.bf16.msra.mxu1 %v1614_v36 }
  0x53   : > { %1514 = vmatprep.subr.bf16.mxu0 %v1615_v39  ;;  %1558 = vmatprep.subr.bf16.mxu1 %v1615_v39 }
  0x56   : > { %1515 = vmatpush3.bf16.msra.mxu0 %v1615_v39  ;;  %1566 = vmatpush3.bf16.msra.mxu1 %v1615_v39  ;;  %v466_v39 = vld [vmem:[#allocation2 + $0xe8] sm:$0xff] }
  0x57   : > { %1516 = vmatprep.subr.bf16.mxu0 %v1616_v40  ;;  %1559 = vmatprep.subr.bf16.mxu1 %v1616_v40 }
  0x5a   : > { %1517 = vmatpush3.bf16.msra.mxu0 %v1616_v40  ;;  %1567 = vmatpush3.bf16.msra.mxu1 %v1616_v40  ;;  %v482_v40 = vld [vmem:[#allocation2 + $0x10] sm:$0xff] }
  0x5b   : > { %1518 = vmatprep.subr.bf16.mxu0 %v1617_v41  ;;  %1560 = vmatprep.subr.bf16.mxu1 %v1617_v41 }
  0x5e   : > { %1519 = vmatpush3.bf16.msra.mxu0 %v1617_v41  ;;  %1568 = vmatpush3.bf16.msra.mxu1 %v1617_v41 }
  0x5f   : > { %1520 = vmatprep.subr.bf16.mxu0 %v1618_v42  ;;  %1561 = vmatprep.subr.bf16.mxu1 %v1618_v42 }
  0x62   : > { %1521 = vmatpush3.bf16.msra.mxu0 %v1618_v42  ;;  %1569 = vmatpush3.bf16.msra.mxu1 %v1618_v42 }
  0x65   : > { %1523 = vmatmul.mubr.bf16.vlgmr.msra.gmra.mxu0 %v1621_v43  ;;  %1539 = vmatmul.mubr.bf16.vlgmr.msra.gmra.mxu1 %v1622_v44 }
  0x66   : > { %1526 = vmatprep.mubr.bf16.mxu0 %v1623_v45  ;;  %1542 = vmatprep.mubr.bf16.mxu1 %v1624_v46  ;;  %v464_v45 = vld [vmem:[#allocation2 + $0x80] sm:$0xff]  ;;  %v480_v46 = vld [vmem:[#allocation2 + $0xa8] sm:$0xff] }
  0x6d   : > { %1527 = vmatmul.mubr.bf16.gmra.mxu0 %v1625_v47  ;;  %1543 = vmatmul.mubr.bf16.gmra.mxu1 %v1626_v48 }
  0x6e   : > { %1530 = vmatprep.mubr.bf16.mxu0 %v1627_v49  ;;  %1546 = vmatprep.mubr.bf16.mxu1 %v1628_v50 }
  0x75   : > { %1531 = vmatmul.mubr.bf16.gmra.mxu0 %v1629_v51  ;;  %1547 = vmatmul.mubr.bf16.gmra.mxu1 %v1630_v52  ;;  %v467_v51 = vld [vmem:[#allocation2 + $0xb8] sm:$0xff]  ;;  %v483_v52 = vld [vmem:[#allocation2 + $0x28] sm:$0xff] }
  0x76   : > { %1534 = vmatprep.mubr.bf16.mxu0 %v1631_v53  ;;  %1550 = vmatprep.mubr.bf16.mxu1 %v1632_v54 }
  0x7d   : > { %1535 = vmatmul.mubr.bf16.gmra.mxu0 %v1633_v55  ;;  %1551 = vmatmul.mubr.bf16.gmra.mxu1 %v1634_v56 }
 0x125   : > { %v1524_v59 = vpop.f32.mrf.mxu0  ;;  %v1540_v60 = vpop.f32.mrf.mxu1 }
 0x126   : > { %v843_v63 = vadd.f32 %v1524_v59, %v458_v57  ;;  %v859_v0 = vadd.f32 %v1540_v60, %v474_v58  ;;  %v465_v57 = vld [vmem:[#allocation2 + $0x88] sm:$0xff]  ;;  %v481_v58 = vld [vmem:[#allocation2 + $0xd0] sm:$0xff] }
 0x127   : > { %v714_v1 = vpop.f32.mrf.mxu0  ;;  %v778_v2 = vpop.f32.mrf.mxu1 }
 0x128   : > { %875 = vst [vmem:[#allocation2 + $0xd8] sm:$0xff] %v843_v63  ;;  %891 = vst [vmem:[#allocation2 + $0x40] sm:$0xff] %v859_v0  ;;  %v841_v5 = vadd.f32 %v714_v1, %v456_v61  ;;  %v857_v6 = vadd.f32 %v778_v2, %v472_v62  ;;  %v470_v63 = vld [vmem:[#allocation2 + $0x8] sm:$0xff]  ;;  %v486_v0 = vld [vmem:[#allocation2 + $0x20] sm:$0xff] }
 0x129   : > { %v1525_v7 = vpop.f32.mrf.mxu0  ;;  %v1541_v8 = vpop.f32.mrf.mxu1 }
 0x12a   : > { %873 = vst [vmem:[#allocation2 + $0xb0] sm:$0xff] %v841_v5  ;;  %889 = vst [vmem:[#allocation2 + $0x38] sm:$0xff] %v857_v6  ;;  %v844_v11 = vadd.f32 %v1525_v7, %v459_v3  ;;  %v860_v12 = vadd.f32 %v1541_v8, %v475_v4  ;;  %v468_v5 = vld [vmem:[#allocation2 + $0x60] sm:$0xff] }
 0x12b   : > { %v717_v13 = vpop.f32.mrf.mxu0  ;;  %v781_v14 = vpop.f32.mrf.mxu1  ;;  %v484_v6 = vld [vmem:[#allocation2 + $0xa0] sm:$0xff] }
 0x12c   : > { %876 = vst [vmem:[#allocation2 + $0x18] sm:$0xff] %v844_v11  ;;  %892 = vst [vmem:[#allocation2 + $0xc8] sm:$0xff] %v860_v12  ;;  %v842_v17 = vadd.f32 %v717_v13, %v457_v9  ;;  %v858_v18 = vadd.f32 %v781_v14, %v473_v10  ;;  %v471_v11 = vld [vmem:[#allocation2 + $0x78] sm:$0xff] }
 0x12d   : > { %v1528_v19 = vpop.f32.mrf.mxu0  ;;  %v1544_v20 = vpop.f32.mrf.mxu1  ;;  %v487_v12 = vld [vmem:[#allocation2 + $0x98] sm:$0xff] }
 0x12e   : > { %874 = vst [vmem:[#allocation2] sm:$0xff] %v842_v17  ;;  %890 = vst [vmem:[#allocation2 + $0x58] sm:$0xff] %v858_v18  ;;  %v847_v23 = vadd.f32 %v1528_v19, %v462_v15  ;;  %v863_v24 = vadd.f32 %v1544_v20, %v478_v16  ;;  %v469_v17 = vld [vmem:[#allocation2 + $0xf0] sm:$0xff]  ;;  %v485_v18 = vld [vmem:[#allocation2 + $0xf8] sm:$0xff] }
 0x12f   : > { %v730_v25 = vpop.f32.mrf.mxu0  ;;  %v794_v26 = vpop.f32.mrf.mxu1 }
 0x130   : > { %879 = vst [vmem:[#allocation2 + $0x30] sm:$0xff] %v847_v23  ;;  %895 = vst [vmem:[#allocation2 + $0x70] sm:$0xff] %v863_v24  ;;  %v845_v29 = vadd.f32 %v730_v25, %v460_v21  ;;  %v861_v30 = vadd.f32 %v794_v26, %v476_v22 }
 0x131   : > { %v1529_v31 = vpop.f32.mrf.mxu0  ;;  %v1545_v32 = vpop.f32.mrf.mxu1 }
 0x132   : > { %877 = vst [vmem:[#allocation2 + $0x50] sm:$0xff] %v845_v29  ;;  %893 = vst [vmem:[#allocation2 + $0xe0] sm:$0xff] %v861_v30  ;;  %v848_v35 = vadd.f32 %v1529_v31, %v463_v27  ;;  %v864_v36 = vadd.f32 %v1545_v32, %v479_v28 }
 0x133   : > { %v733_v37 = vpop.f32.mrf.mxu0  ;;  %v797_v38 = vpop.f32.mrf.mxu1 }
 0x134   : > { %880 = vst [vmem:[#allocation2 + $0x48] sm:$0xff] %v848_v35  ;;  %896 = vst [vmem:[#allocation2 + $0xc0] sm:$0xff] %v864_v36  ;;  %v846_v41 = vadd.f32 %v733_v37, %v461_v33  ;;  %v862_v42 = vadd.f32 %v797_v38, %v477_v34 }
 0x135   : > { %v1532_v43 = vpop.f32.mrf.mxu0  ;;  %v1548_v44 = vpop.f32.mrf.mxu1 }
 0x136   : > { %878 = vst [vmem:[#allocation2 + $0x68] sm:$0xff] %v846_v41  ;;  %894 = vst [vmem:[#allocation2 + $0x90] sm:$0xff] %v862_v42  ;;  %v851_v47 = vadd.f32 %v1532_v43, %v466_v39  ;;  %v867_v48 = vadd.f32 %v1548_v44, %v482_v40 }
 0x137   : > { %v746_v49 = vpop.f32.mrf.mxu0  ;;  %v810_v50 = vpop.f32.mrf.mxu1 }
 0x138   : > { %883 = vst [vmem:[#allocation2 + $0xe8] sm:$0xff] %v851_v47  ;;  %899 = vst [vmem:[#allocation2 + $0x10] sm:$0xff] %v867_v48  ;;  %v849_v53 = vadd.f32 %v746_v49, %v464_v45  ;;  %v865_v54 = vadd.f32 %v810_v50, %v480_v46 }
 0x139   : > { %v1533_v55 = vpop.f32.mrf.mxu0  ;;  %v1549_v56 = vpop.f32.mrf.mxu1 }
 0x13a   : > { %881 = vst [vmem:[#allocation2 + $0x80] sm:$0xff] %v849_v53  ;;  %897 = vst [vmem:[#allocation2 + $0xa8] sm:$0xff] %v865_v54  ;;  %v852_v59 = vadd.f32 %v1533_v55, %v467_v51  ;;  %v868_v60 = vadd.f32 %v1549_v56, %v483_v52 }
 0x13b   : > { %v749_v61 = vpop.f32.mrf.mxu0  ;;  %v813_v62 = vpop.f32.mrf.mxu1 }
 0x13c   : > { %884 = vst [vmem:[#allocation2 + $0xb8] sm:$0xff] %v852_v59  ;;  %900 = vst [vmem:[#allocation2 + $0x28] sm:$0xff] %v868_v60  ;;  %v850_v1 = vadd.f32 %v749_v61, %v465_v57  ;;  %v866_v2 = vadd.f32 %v813_v62, %v481_v58 }
 0x13d   : > { %v1536_v3 = vpop.f32.mrf.mxu0  ;;  %v1552_v4 = vpop.f32.mrf.mxu1 }
 0x13e   : > { %882 = vst [vmem:[#allocation2 + $0x88] sm:$0xff] %v850_v1  ;;  %898 = vst [vmem:[#allocation2 + $0xd0] sm:$0xff] %v866_v2  ;;  %v855_v7 = vadd.f32 %v1536_v3, %v470_v63  ;;  %v871_v8 = vadd.f32 %v1552_v4, %v486_v0 }
 0x13f   : > { %v762_v9 = vpop.f32.mrf.mxu0  ;;  %v826_v10 = vpop.f32.mrf.mxu1 }
 0x140   : > { %887 = vst [vmem:[#allocation2 + $0x8] sm:$0xff] %v855_v7  ;;  %903 = vst [vmem:[#allocation2 + $0x20] sm:$0xff] %v871_v8  ;;  %v853_v13 = vadd.f32 %v762_v9, %v468_v5  ;;  %v869_v14 = vadd.f32 %v826_v10, %v484_v6 }
 0x141   : > { %v1537_v15 = vpop.f32.mrf.mxu0  ;;  %v1553_v16 = vpop.f32.mrf.mxu1 }
 0x142   : > { %885 = vst [vmem:[#allocation2 + $0x60] sm:$0xff] %v853_v13  ;;  %901 = vst [vmem:[#allocation2 + $0xa0] sm:$0xff] %v869_v14  ;;  %v856_v19 = vadd.f32 %v1537_v15, %v471_v11  ;;  %v872_v20 = vadd.f32 %v1553_v16, %v487_v12  ;;  %908 = sbr.rel (%p1317_p11) target bundleno = 353 (0x161), region = 81 }
 0x143   : > { %v765_v21 = vpop.f32.mrf.mxu0  ;;  %v829_v22 = vpop.f32.mrf.mxu1 }
 0x144   : > { %888 = vst [vmem:[#allocation2 + $0x78] sm:$0xff] %v856_v19  ;;  %904 = vst [vmem:[#allocation2 + $0x98] sm:$0xff] %v872_v20  ;;  %v854_v23 = vadd.f32 %v765_v21, %v469_v17  ;;  %v870_v24 = vadd.f32 %v829_v22, %v485_v18 }
 0x146   : > { %886 = vst [vmem:[#allocation2 + $0xf0] sm:$0xff] %v854_v23  ;;  %902 = vst [vmem:[#allocation2 + $0xf8] sm:$0xff] %v870_v24 }
 0x147   : > { %v909_v25 = vld [vmem:[#allocation2 + $0xb0] sm:$0xff]  ;;  %v910_v26 = vld [vmem:[#allocation2] sm:$0xff]  ;;  %v911_v30 = vld [vmem:[#allocation2 + $0xd8] sm:$0xff] }
 0x148   : > { %v1847_v27 = vld [vmem:[%s1946_s2] ss:$0 sm:$0xff]  ;;  %v912_v31 = vld [vmem:[#allocation2 + $0x18] sm:$0xff]  ;;  %v913_v32 = vld [vmem:[#allocation2 + $0x50] sm:$0xff] }
 0x149   : > { %v948_v28 = vadd.f32 %v1847_v27, %v909_v25  ;;  %v949_v29 = vadd.f32 %v1847_v27, %v910_v26  ;;  %v950_v33 = vadd.f32 %v1847_v27, %v911_v30  ;;  %v951_v34 = vadd.f32 %v1847_v27, %v912_v31  ;;  %v914_v35 = vld [vmem:[#allocation2 + $0x68] sm:$0xff]  ;;  %v915_v37 = vld [vmem:[#allocation2 + $0x30] sm:$0xff]  ;;  %v917_v43 = vld [vmem:[#allocation2 + $0x80] sm:$0xff] }
 0x14a   : > { %v952_v36 = vadd.f32 %v1847_v27, %v913_v32  ;;  %v916_v38 = vld [vmem:[#allocation2 + $0x48] sm:$0xff]  ;;  %v953_v41 = vadd.f32 %v1847_v27, %v914_v35  ;;  %v954_v42 = vadd.f32 %v1847_v27, %v915_v37  ;;  %v920_v50 = vld [vmem:[#allocation2 + $0xb8] sm:$0xff]  ;;  %v921_v51 = vld [vmem:[#allocation2 + $0x60] sm:$0xff]  ;;  %v956_v55 = vadd.f32 %v1847_v27, %v917_v43 }
 0x14b   : > { %v980_v39 = vmax.f32 %v948_v28, 0.0  ;;  %v981_v40 = vmax.f32 %v949_v29, 0.0  ;;  %v918_v44 = vld [vmem:[#allocation2 + $0x88] sm:$0xff]  ;;  %v982_v46 = vmax.f32 %v950_v33, 0.0  ;;  %v983_v47 = vmax.f32 %v951_v34, 0.0  ;;  %v924_v62 = vld [vmem:[#allocation2 + $0x78] sm:$0xff] }
 0x14c   : > { %v919_v45 = vld [vmem:[#allocation2 + $0xe8] sm:$0xff]  ;;  %v984_v48 = vmax.f32 %v952_v36, 0.0  ;;  %v955_v49 = vadd.f32 %v1847_v27, %v916_v38  ;;  %v985_v53 = vmax.f32 %v953_v41, 0.0  ;;  %v986_v54 = vmax.f32 %v954_v42, 0.0  ;;  %v925_v3 = vld [vmem:[#allocation2 + $0x38] sm:$0xff]  ;;  %v927_v9 = vld [vmem:[#allocation2 + $0x40] sm:$0xff] }
 0x14d   : > { %v1390_v52 = vpack.c.bf16 %v981_v40, %v980_v39  ;;  %v922_v56 = vld [vmem:[#allocation2 + $0xf0] sm:$0xff]  ;;  %v1395_v57 = vpack.c.bf16 %v983_v47, %v982_v46  ;;  %v957_v59 = vadd.f32 %v1847_v27, %v918_v44  ;;  %v958_v60 = vadd.f32 %v1847_v27, %v919_v45  ;;  %v923_v61 = vld [vmem:[#allocation2 + $0x8] sm:$0xff]  ;;  %v926_v4 = vld [vmem:[#allocation2 + $0x58] sm:$0xff] }
 0x14e   : > { %v987_v58 = vmax.f32 %v955_v49, 0.0  ;;  %v1400_v63 = vpack.c.bf16 %v985_v53, %v984_v48  ;;  %v988_v0 = vmax.f32 %v956_v55, 0.0  ;;  %v959_v1 = vadd.f32 %v1847_v27, %v920_v50  ;;  %v928_v14 = vld [vmem:[#allocation2 + $0xc8] sm:$0xff]  ;;  %v929_v19 = vld [vmem:[#allocation2 + $0xe0] sm:$0xff]  ;;  %v930_v20 = vld [vmem:[#allocation2 + $0x90] sm:$0xff] }
 0x14f   : > { %1391 = vst [vmem:[%s1947_s3] sm:$0xff] %v1390_v52   ;;  %v960_v2 = vadd.f32 %v1847_v27, %v921_v51  ;;  %1467 = vst [vmem:[%s1947_s3 + $0x8] sm:$0xff] %v1395_v57   ;;  %v989_v6 = vmax.f32 %v957_v59, 0.0  ;;  %v990_v7 = vmax.f32 %v958_v60, 0.0  ;;  %v961_v8 = vadd.f32 %v1847_v27, %v922_v56  ;;  %v931_v25 = vld [vmem:[#allocation2 + $0x70] sm:$0xff]  ;;  %v932_v26 = vld [vmem:[#allocation2 + $0xc0] sm:$0xff] }
 0x150   : > { %v1405_v5 = vpack.c.bf16 %v987_v58, %v986_v54  ;;  %1468 = vst [vmem:[%s1947_s3 + $0x10] sm:$0xff] %v1400_v63   ;;  %v991_v10 = vmax.f32 %v959_v1, 0.0  ;;  %v962_v12 = vadd.f32 %v1847_v27, %v923_v61  ;;  %v963_v13 = vadd.f32 %v1847_v27, %v924_v62  ;;  %v933_v32 = vld [vmem:[#allocation2 + $0xa8] sm:$0xff]  ;;  %v934_v33 = vld [vmem:[#allocation2 + $0xd0] sm:$0xff]  ;;  %v937_v48 = vld [vmem:[#allocation2 + $0xa0] sm:$0xff] }
 0x151   : > { %v992_v11 = vmax.f32 %v960_v2, 0.0  ;;  %v1410_v15 = vpack.c.bf16 %v989_v6, %v988_v0  ;;  %v993_v16 = vmax.f32 %v961_v8, 0.0  ;;  %v964_v17 = vadd.f32 %v1847_v27, %v925_v3  ;;  %v935_v38 = vld [vmem:[#allocation2 + $0x10] sm:$0xff]  ;;  %v936_v43 = vld [vmem:[#allocation2 + $0x28] sm:$0xff]  ;;  %v938_v49 = vld [vmem:[#allocation2 + $0xf8] sm:$0xff] }
 0x152   : > { %1469 = vst [vmem:[%s1947_s3 + $0x18] sm:$0xff] %v1405_v5   ;;  %v965_v18 = vadd.f32 %v1847_v27, %v926_v4  ;;  %v1415_v21 = vpack.c.bf16 %v991_v10, %v990_v7  ;;  %v994_v22 = vmax.f32 %v962_v12, 0.0  ;;  %v995_v23 = vmax.f32 %v963_v13, 0.0  ;;  %v939_v54 = vld [vmem:[#allocation2 + $0x20] sm:$0xff]  ;;  %v940_v55 = vld [vmem:[#allocation2 + $0x98] sm:$0xff] }
 0x153   : > { %v966_v24 = vadd.f32 %v1847_v27, %v927_v9  ;;  %1470 = vst [vmem:[%s1947_s3 + $0x20] sm:$0xff] %v1410_v15   ;;  %v1420_v28 = vpack.c.bf16 %v993_v16, %v992_v11  ;;  %v996_v29 = vmax.f32 %v964_v17, 0.0  ;;  %v967_v31 = vadd.f32 %v1847_v27, %v928_v14 }
 0x154   : > { %v997_v30 = vmax.f32 %v965_v18, 0.0  ;;  %1471 = vst [vmem:[%s1947_s3 + $0x28] sm:$0xff] %v1415_v21   ;;  %v1425_v34 = vpack.c.bf16 %v995_v23, %v994_v22  ;;  %v968_v36 = vadd.f32 %v1847_v27, %v929_v19  ;;  %v969_v37 = vadd.f32 %v1847_v27, %v930_v20 }
 0x155   : > { %v998_v35 = vmax.f32 %v966_v24, 0.0  ;;  %1472 = vst [vmem:[%s1947_s3 + $0x30] sm:$0xff] %v1420_v28   ;;  %v999_v40 = vmax.f32 %v967_v31, 0.0  ;;  %v970_v41 = vadd.f32 %v1847_v27, %v931_v25  ;;  %v971_v42 = vadd.f32 %v1847_v27, %v932_v26 }
 0x156   : > { %v1430_v39 = vpack.c.bf16 %v997_v30, %v996_v29  ;;  %1473 = vst [vmem:[%s1947_s3 + $0x38] sm:$0xff] %v1425_v34   ;;  %v1000_v44 = vmax.f32 %v968_v36, 0.0  ;;  %v1001_v45 = vmax.f32 %v969_v37, 0.0  ;;  %v972_v46 = vadd.f32 %v1847_v27, %v933_v32 }
 0x157   : > { %v973_v47 = vadd.f32 %v1847_v27, %v934_v33  ;;  %v1435_v50 = vpack.c.bf16 %v999_v40, %v998_v35  ;;  %v1002_v51 = vmax.f32 %v970_v41, 0.0  ;;  %v1003_v52 = vmax.f32 %v971_v42, 0.0 }
 0x158   : > { %1474 = vst [vmem:[%s1947_s3 + $0x40] sm:$0xff] %v1430_v39   ;;  %v974_v53 = vadd.f32 %v1847_v27, %v935_v38  ;;  %v1440_v56 = vpack.c.bf16 %v1001_v45, %v1000_v44  ;;  %v1004_v57 = vmax.f32 %v972_v46, 0.0  ;;  %v975_v59 = vadd.f32 %v1847_v27, %v936_v43 }
 0x159   : > { %v1005_v58 = vmax.f32 %v973_v47, 0.0  ;;  %1475 = vst [vmem:[%s1947_s3 + $0x48] sm:$0xff] %v1435_v50   ;;  %v1445_v60 = vpack.c.bf16 %v1003_v52, %v1002_v51  ;;  %v976_v62 = vadd.f32 %v1847_v27, %v937_v48  ;;  %v977_v63 = vadd.f32 %v1847_v27, %v938_v49 }
 0x15a   : > { %v1006_v61 = vmax.f32 %v974_v53, 0.0  ;;  %1476 = vst [vmem:[%s1947_s3 + $0x50] sm:$0xff] %v1440_v56   ;;  %v1007_v1 = vmax.f32 %v975_v59, 0.0  ;;  %v978_v2 = vadd.f32 %v1847_v27, %v939_v54  ;;  %v979_v3 = vadd.f32 %v1847_v27, %v940_v55 }
 0x15b   : > { %v1450_v0 = vpack.c.bf16 %v1005_v58, %v1004_v57  ;;  %1477 = vst [vmem:[%s1947_s3 + $0x58] sm:$0xff] %v1445_v60   ;;  %v1008_v4 = vmax.f32 %v976_v62, 0.0  ;;  %v1009_v5 = vmax.f32 %v977_v63, 0.0 }
 0x15c   : > { %v1455_v6 = vpack.c.bf16 %v1007_v1, %v1006_v61  ;;  %v1010_v7 = vmax.f32 %v978_v2, 0.0  ;;  %v1011_v8 = vmax.f32 %v979_v3, 0.0 }
 0x15d   : > { %1478 = vst [vmem:[%s1947_s3 + $0x60] sm:$0xff] %v1450_v0   ;;  %v1460_v9 = vpack.c.bf16 %v1009_v5, %v1008_v4 }
 0x15e   : > { %1479 = vst [vmem:[%s1947_s3 + $0x68] sm:$0xff] %v1455_v6   ;;  %v1465_v10 = vpack.c.bf16 %v1011_v8, %v1010_v7 }
 0x15f   : > { %1480 = vst [vmem:[%s1947_s3 + $0x70] sm:$0xff] %v1460_v9  }
 0x160   : > { %1481 = vst [vmem:[%s1947_s3 + $0x78] sm:$0xff] %v1465_v10  }
 0x161 PF: > { %s13_s16 = sadd.s32 1, %s1673_s16   ;;  %s1948_s12 = smov %s1661_s13 }
 0x162   : > { %p10_p12 = scmp.ge.s32.totalorder %s13_s16, 11   ;;  %s1949_s13 = smov %s1731_s20 }
 0x163   : > { %s1950_s14 = smov %s1669_s15  ;;  %s1951_s15 = smov %s1953_s17 }
 0x164   :  { %12 = sbr.rel (!%p10_p12) target bundleno = 3 (0x3), region = 122 }

// kernel: loss_network_forward.18
= control target key start
LH: loop header
LB: loop body
LE: loop exit
PB: predicated region body
PF: predicated region fallthrough
CT: control target
= control target key end

     0   :  { %7 = vsyncpa [#allocation4], 0  ;;  %s363_s12 = smov [#allocation3]   ;;  %s561_s0 = inlined_call_operand.vmem [shape: bf16[128,128], index: 0, kind: input, shape index: {}]   ;;  %s562_s1 = inlined_call_operand.vmem [shape: bf16[128,128], index: 1, kind: input, shape index: {}]   ;;  %s563_s2 = inlined_call_operand.hbm [shape: f32[1,1], index: 2, kind: output, shape index: {}]  }
   0x1   :  { %v259_v0 = vld [vmem:[%s561_s0] sm:$0xff]   ;;  %v322_v2 = vld [vmem:[%s561_s0 + $0x8] sm:$0xff]   ;;  %v323_v3 = vld [vmem:[%s561_s0 + $0x10] sm:$0xff]   ;;  %s234_s13 = sshll.u32 %s363_s12, 4  ;;  %s235_s13 = int_to_ptr.vmem [resolvable:$true] %s234_s13 }
   0x2   :  { %v291_v1 = vld [vmem:[%s562_s1] sm:$0xff]   ;;  %v329_v4 = vld [vmem:[%s562_s1 + $0x8] sm:$0xff]   ;;  %v260_v5 = vunpack.c.l.bf16 %v259_v0  ;;  %v261_v6 = vunpack.c.h.bf16 %v259_v0  ;;  %v397_v7 = vld [vmem:[%s561_s0 + $0x18] sm:$0xff]   ;;  %v264_v11 = vunpack.c.l.bf16 %v322_v2  ;;  %v265_v12 = vunpack.c.h.bf16 %v322_v2  ;;  %s340_s14 = scalar_lea.vmem %s235_s13, 16  ;;  %s344_s15 = scalar_lea.vmem %s235_s13, 32 }
   0x3   :  { %v292_v8 = vunpack.c.l.bf16 %v291_v1  ;;  %v293_v9 = vunpack.c.h.bf16 %v291_v1  ;;  %v402_v10 = vld [vmem:[%s561_s0 + $0x20] sm:$0xff]   ;;  %v268_v13 = vunpack.c.l.bf16 %v323_v3  ;;  %v407_v14 = vld [vmem:[%s561_s0 + $0x28] sm:$0xff]   ;;  %v412_v15 = vld [vmem:[%s561_s0 + $0x30] sm:$0xff]   ;;  %v296_v16 = vunpack.c.l.bf16 %v329_v4  ;;  %p341_p0 = scmp.ne.s32.totalorder %s235_s13, %s340_s14  ;;  %p345_p1 = scmp.lt.s32.totalorder %s235_s13, %s235_s13 }
   0x4   :  { %v269_v17 = vunpack.c.h.bf16 %v323_v3  ;;  %v272_v18 = vunpack.c.l.bf16 %v397_v7  ;;  %v273_v19 = vunpack.c.h.bf16 %v397_v7  ;;  %v419_v20 = vld [vmem:[%s561_s0 + $0x38] sm:$0xff]   ;;  %v297_v21 = vunpack.c.h.bf16 %v329_v4  ;;  %v330_v22 = vld [vmem:[%s562_s1 + $0x10] sm:$0xff]   ;;  %v332_v35 = vld [vmem:[%s562_s1 + $0x20] sm:$0xff]   ;;  %p346_p2 = scmp.lt.s32.totalorder %s344_s15, %s340_s14 }
   0x5   :  { %v276_v23 = vunpack.c.l.bf16 %v402_v10  ;;  %v277_v24 = vunpack.c.h.bf16 %v402_v10  ;;  %v331_v25 = vld [vmem:[%s562_s1 + $0x18] sm:$0xff]   ;;  %v82_v26 = vsub.f32 %v260_v5, %v292_v8  ;;  %v83_v27 = vsub.f32 %v261_v6, %v293_v9  ;;  %v441_v36 = vld [vmem:[%s562_s1 + $0x28] sm:$0xff]   ;;  %v446_v41 = vld [vmem:[%s562_s1 + $0x30] sm:$0xff]  }
   0x6   :  { %v280_v28 = vunpack.c.l.bf16 %v407_v14  ;;  %v281_v29 = vunpack.c.h.bf16 %v407_v14  ;;  %v284_v30 = vunpack.c.l.bf16 %v412_v15  ;;  %v285_v31 = vunpack.c.h.bf16 %v412_v15  ;;  %v454_v52 = vld [vmem:[%s562_s1 + $0x38] sm:$0xff]   ;;  %p347_p3 = por %p346_p2, %p345_p1 }
   0x7   :  { %v288_v32 = vunpack.c.l.bf16 %v419_v20  ;;  %v289_v33 = vunpack.c.h.bf16 %v419_v20  ;;  %v300_v34 = vunpack.c.l.bf16 %v330_v22  ;;  %v84_v37 = vsub.f32 %v264_v11, %v296_v16 }
   0x8   :  { %v301_v38 = vunpack.c.h.bf16 %v330_v22  ;;  %v304_v39 = vunpack.c.l.bf16 %v331_v25  ;;  %v305_v40 = vunpack.c.h.bf16 %v331_v25  ;;  %v85_v42 = vsub.f32 %v265_v12, %v297_v21  ;;  %p348_p4 = pnand %p347_p3, %p341_p0 }
   0x9   :  { %v98_v43 = vand.u32 2147483647, %v82_v26  ;;  %v99_v44 = vand.u32 2147483647, %v83_v27  ;;  %v130_v45 = vmul.f32 0.5, %v82_v26  ;;  %v131_v46 = vmul.f32 0.5, %v83_v27 }
   0xa   :  { %v308_v47 = vunpack.c.l.bf16 %v332_v35  ;;  %v309_v48 = vunpack.c.h.bf16 %v332_v35  ;;  %v312_v49 = vunpack.c.l.bf16 %v441_v36  ;;  %v313_v50 = vunpack.c.h.bf16 %v441_v36 }
   0xb   :  { %v316_v51 = vunpack.c.l.bf16 %v446_v41  ;;  %v86_v53 = vsub.f32 %v268_v13, %v300_v34  ;;  %v100_v54 = vand.u32 2147483647, %v84_v37  ;;  %v132_v55 = vmul.f32 0.5, %v84_v37 }
   0xc   :  { %v317_v56 = vunpack.c.h.bf16 %v446_v41  ;;  %v87_v57 = vsub.f32 %v269_v17, %v301_v38  ;;  %v101_v58 = vand.u32 2147483647, %v85_v42  ;;  %v133_v59 = vmul.f32 0.5, %v85_v42 }
   0xd   :  { %v146_v60 = vmul.f32 %v130_v45, %v82_v26  ;;  %v147_v61 = vmul.f32 %v131_v46, %v83_v27  ;;  %v242_v62 = vadd.f32 -0.5, %v98_v43  ;;  %v243_v63 = vadd.f32 -0.5, %v99_v44 }
   0xe   :  { %v320_v0 = vunpack.c.l.bf16 %v454_v52  ;;  %v88_v1 = vsub.f32 %v272_v18, %v304_v39  ;;  %vm458_vm0 = vcmp.lt.f32.partialorder %v98_v43, 1.0  ;;  %vm462_vm1 = vcmp.lt.f32.partialorder %v99_v44, 1.0 }
   0xf   :  { %v102_v4 = vand.u32 2147483647, %v86_v53  ;;  %v134_v5 = vmul.f32 0.5, %v86_v53  ;;  %v148_v6 = vmul.f32 %v132_v55, %v84_v37  ;;  %v244_v7 = vadd.f32 -0.5, %v100_v54 }
  0x10   :  { %v89_v8 = vsub.f32 %v273_v19, %v305_v40  ;;  %v103_v9 = vand.u32 2147483647, %v87_v57  ;;  %vm466_vm2 = vcmp.lt.f32.partialorder %v100_v54, 1.0  ;;  %v135_v12 = vmul.f32 0.5, %v87_v57 }
  0x11   :  { %v149_v13 = vmul.f32 %v133_v59, %v85_v42  ;;  %v245_v16 = vadd.f32 -0.5, %v101_v58  ;;  %v178_v17 = vsel %vm458_vm0, %v146_v60, %v242_v62  ;;  %v179_v18 = vsel %vm462_vm1, %v147_v61, %v243_v63 }
  0x12   :  { %v321_v21 = vunpack.c.h.bf16 %v454_v52  ;;  %v90_v22 = vsub.f32 %v276_v23, %v308_v47  ;;  %v104_v25 = vand.u32 2147483647, %v88_v1  ;;  %vm475_vm3 = vcmp.lt.f32.partialorder %v101_v58, 1.0 }
  0x13   :  { %v136_v26 = vmul.f32 0.5, %v88_v1  ;;  %v150_v27 = vmul.f32 %v134_v5, %v86_v53  ;;  %v246_v34 = vadd.f32 -0.5, %v102_v4  ;;  %v180_v35 = vsel %vm466_vm2, %v148_v6, %v244_v7 }
  0x14   :  { %v91_v36 = vsub.f32 %v277_v24, %v309_v48  ;;  %v105_v37 = vand.u32 2147483647, %v89_v8  ;;  %vm483_vm4 = vcmp.lt.f32.partialorder %v102_v4, 1.0  ;;  %v195_v23 = vadd.f32 %v179_v18, %v178_v17 }
  0x15   :  { %v137_v39 = vmul.f32 0.5, %v89_v8  ;;  %v151_v40 = vmul.f32 %v135_v12, %v87_v57  ;;  %v247_v42 = vadd.f32 -0.5, %v103_v9  ;;  %v181_v43 = vsel %vm475_vm3, %v149_v13, %v245_v16 }
  0x16   :  { %v92_v44 = vsub.f32 %v280_v28, %v312_v49  ;;  %v106_v45 = vand.u32 2147483647, %v90_v22  ;;  %vm491_vm5 = vcmp.lt.f32.partialorder %v103_v9, 1.0  ;;  %v196_v10 = vadd.f32 %v195_v23, %v180_v35 }
  0x17   :  { %v138_v24 = vmul.f32 0.5, %v90_v22  ;;  %v152_v47 = vmul.f32 %v136_v26, %v88_v1  ;;  %v248_v48 = vadd.f32 -0.5, %v104_v25  ;;  %v182_v53 = vsel %vm483_vm4, %v150_v27, %v246_v34 }
  0x18   :  { %v93_v54 = vsub.f32 %v281_v29, %v313_v50  ;;  %v107_v55 = vand.u32 2147483647, %v91_v36  ;;  %vm499_vm6 = vcmp.lt.f32.partialorder %v104_v25, 1.0  ;;  %v197_v28 = vadd.f32 %v196_v10, %v181_v43 }
  0x19   :  { %v139_v49 = vmul.f32 0.5, %v91_v36  ;;  %v153_v58 = vmul.f32 %v137_v39, %v89_v8  ;;  %v249_v59 = vadd.f32 -0.5, %v105_v37  ;;  %v183_v60 = vsel %vm491_vm5, %v151_v40, %v247_v42 }
  0x1a   :  { %v94_v61 = vsub.f32 %v284_v30, %v316_v51  ;;  %v108_v62 = vand.u32 2147483647, %v92_v44  ;;  %vm507_vm7 = vcmp.lt.f32.partialorder %v105_v37, 1.0  ;;  %v198_v14 = vadd.f32 %v197_v28, %v182_v53 }
  0x1b   :  { %v140_v29 = vmul.f32 0.5, %v92_v44  ;;  %v154_v50 = vmul.f32 %v138_v24, %v90_v22  ;;  %v250_v1 = vadd.f32 -0.5, %v106_v45  ;;  %v184_v2 = vsel %vm499_vm6, %v152_v47, %v248_v48 }
  0x1c   :  { %v95_v3 = vsub.f32 %v285_v31, %v317_v56  ;;  %v109_v4 = vand.u32 2147483647, %v93_v54  ;;  %vm517_vm8 = vcmp.lt.f32.partialorder %v106_v45, 1.0  ;;  %v199_v51 = vadd.f32 %v198_v14, %v183_v60 }
  0x1d   :  { %v141_v5 = vmul.f32 0.5, %v93_v54  ;;  %v155_v6 = vmul.f32 %v139_v49, %v91_v36  ;;  %v251_v7 = vadd.f32 -0.5, %v107_v55  ;;  %v185_v8 = vsel %vm507_vm7, %v153_v58, %v249_v59 }
  0x1e   :  { %v96_v41 = vsub.f32 %v288_v32, %v320_v0  ;;  %v110_v9 = vand.u32 2147483647, %v94_v61  ;;  %vm527_vm9 = vcmp.lt.f32.partialorder %v107_v55, 1.0  ;;  %v200_v31 = vadd.f32 %v199_v51, %v184_v2 }
  0x1f   :  { %v142_v56 = vmul.f32 0.5, %v94_v61  ;;  %v156_v11 = vmul.f32 %v140_v29, %v92_v44  ;;  %v252_v12 = vadd.f32 -0.5, %v108_v62  ;;  %v186_v13 = vsel %vm517_vm8, %v154_v50, %v250_v1 }
  0x20   :  { %v97_v16 = vsub.f32 %v289_v33, %v321_v21  ;;  %v111_v17 = vand.u32 2147483647, %v95_v3  ;;  %vm535_vm10 = vcmp.lt.f32.partialorder %v108_v62, 1.0  ;;  %v201_v32 = vadd.f32 %v200_v31, %v185_v8 }
  0x21   :  { %v143_v0 = vmul.f32 0.5, %v95_v3  ;;  %v157_v18 = vmul.f32 %v141_v5, %v93_v54  ;;  %v253_v22 = vadd.f32 -0.5, %v109_v4  ;;  %v187_v25 = vsel %vm527_vm9, %v155_v6, %v251_v7 }
  0x22   :  { %v112_v19 = vand.u32 2147483647, %v96_v41  ;;  %vm541_vm11 = vcmp.lt.f32.partialorder %v109_v4, 1.0  ;;  %v202_v27 = vadd.f32 %v201_v32, %v186_v13  ;;  %v144_v20 = vmul.f32 0.5, %v96_v41 }
  0x23   :  { %v158_v33 = vmul.f32 %v142_v56, %v94_v61  ;;  %v254_v21 = vadd.f32 -0.5, %v110_v9  ;;  %v188_v34 = vsel %vm535_vm10, %v156_v11, %v252_v12  ;;  %v113_v35 = vand.u32 2147483647, %v97_v16 }
  0x24   :  { %vm547_vm12 = vcmp.lt.f32.partialorder %v110_v9, 1.0  ;;  %v203_v37 = vadd.f32 %v202_v27, %v187_v25  ;;  %v145_v38 = vmul.f32 0.5, %v97_v16  ;;  %v159_v23 = vmul.f32 %v143_v0, %v95_v3 }
  0x25   :  { %v255_v39 = vadd.f32 -0.5, %v111_v17  ;;  %v189_v40 = vsel %vm541_vm11, %v157_v18, %v253_v22  ;;  %vm127_vm13 = vcmp.lt.f32.partialorder %v111_v17, 1.0  ;;  %v160_v43 = vmul.f32 %v144_v20, %v96_v41 }
  0x26   :  { %v204_v42 = vadd.f32 %v203_v37, %v188_v34  ;;  %v256_v44 = vadd.f32 -0.5, %v112_v19  ;;  %v190_v45 = vsel %vm547_vm12, %v158_v33, %v254_v21  ;;  %vm128_vm14 = vcmp.lt.f32.partialorder %v112_v19, 1.0 }
  0x27   :  { %v161_v10 = vmul.f32 %v145_v38, %v97_v16  ;;  %v257_v24 = vadd.f32 -0.5, %v113_v35  ;;  %v191_v47 = vsel %vm127_vm13, %v159_v23, %v255_v39  ;;  %vm129_vm15 = vcmp.lt.f32.partialorder %v113_v35, 1.0 }
  0x28   :  { %v205_v46 = vadd.f32 %v204_v42, %v189_v40  ;;  %v192_v53 = vsel %vm128_vm14, %v160_v43, %v256_v44  ;;  %vm16_vm0 = vcmask 0   ;;  %v362_v49 = vmov 0.0  }
  0x29   :  { %v193_v55 = vsel %vm129_vm15, %v161_v10, %v257_v24  ;;  %17 = vst.msk [vmem:[#allocation2] sm:$0x1] %vm16_vm0, %v362_v49 }
  0x2a   :  { %v206_v48 = vadd.f32 %v205_v46, %v190_v45 }
  0x2c   :  { %v207_v54 = vadd.f32 %v206_v48, %v191_v47 }
  0x2e   :  { %v208_v57 = vadd.f32 %v207_v54, %v192_v53 }
  0x30   :  { %v209_v28 = vadd.f32 %v208_v57, %v193_v55  ;;  %v194_v29 = vld [vmem:[#allocation2] sm:$0x1] }
  0x32   :  { %210 = vadd.xlane.f32.xlu0 %v209_v28 }
  0xbb   :  { %v211_v58 = vpop.xlane.xlu0 %210 }
  0xbc   :  { %v212_v59 = vrot.slane %v211_v58, 4 }
  0xbe   :  { %v213_v60 = vadd.f32 %v212_v59, %v211_v58 }
  0xc0   :  { %v214_v61 = vrot.slane %v213_v60, 2 }
  0xc2   :  { %v215_v62 = vadd.f32 %v214_v61, %v213_v60 }
  0xc4   :  { %v216_v63 = vrot.slane %v215_v62, 1 }
  0xc6   :  { %v217_v14 = vadd.f32 %v216_v63, %v215_v62 }
  0xc8   :  { %336 = vpush %v217_v14 }
  0xf9   :  { %s337_s1 = spop %336 }
  0xfa   :  { %v219_v50 = vstv %s337_s1 }
  0xfb   :  { %v220_v1 = vadd.f32 %v219_v50, %v194_v29 }
  0xfd   :  { %222 = vst.msk [vmem:[#allocation2] sm:$0x1] %vm16_vm0, %v220_v1 }
 0x104   :  { %v226_v2 = vld [vmem:[#allocation2] sm:$0x1] }
 0x105   :  { %227 = vst.msk [vmem:[#allocation3] sm:$0x1] %vm16_vm0, %v226_v2 }
 0x106   :  { %351 = shalt.err (!%p348_p4)
}
 0x107   :  { %237 = dma.vmem_to_hbm [thread:$0]  %s235_s13, 16, %s563_s2, [#allocation4]  }
 0x108   :  { %360 = dma.done.wait [#allocation4], 16  }
 0x109   :  { %361 = vsyncadd [#allocation4], 4294967280 }
 0x10a   :  { %241 = vsyncpa [#allocation4], 1 }

// kernel: loss_network_forward.14
= control target key start
LH: loop header
LB: loop body
LE: loop exit
PB: predicated region body
PF: predicated region fallthrough
CT: control target
= control target key end

     0   :  { %s1351_s12 = smov 0   ;;  %s1353_s13 = smov 0   ;;  %s1559_s0 = inlined_call_operand.vmem [shape: bf16[128,1152], index: 0, kind: input, shape index: {}]   ;;  %s1560_s1 = inlined_call_operand.vmem [shape: bf16[1152,256], index: 1, kind: input, shape index: {}]   ;;  %s1561_s2 = inlined_call_operand.vmem [shape: f32[1,256], index: 2, kind: input, shape index: {}]   ;;  %s1562_s3 = inlined_call_operand.vmem [shape: bf16[128,256], index: 3, kind: output, shape index: {}]  }
   0x1   :  { %s1355_s14 = smov 0   ;;  %s1357_s15 = smov 0  }
   0x2   :  { %s1359_s16 = smov 0  }
   0x3 LB: > { %s25_s17 = sadd.s32 1, %s1323_s15  ;;  %p48_p1 = scmp.ne.s32.totalorder %s1315_s13, %s1311_s12  ;;  %s1327_s16 = sphi %s1359_s16, %s13_s16   ;;  %s1323_s15 = sphi %s1357_s15, %s1566_s15   ;;  %s1319_s14 = sphi %s1355_s14, %s1565_s14   ;;  %s1315_s13 = sphi %s1353_s13, %s1564_s13   ;;  %s1311_s12 = sphi %s1351_s12, %s1563_s12  }
   0x4   : > { %p26_p0 = scmp.ge.s32.totalorder %s25_s17, 9  ;;  %p49_p2 = scmp.eq.s32.totalorder %s1327_s16, 0 }
   0x5   : > { %s41_s19 = sadd.s32 1, %s1315_s13  ;;  %p1128_p5 = scmp.ge.s32.totalorder %s1327_s16, 9 }
   0x6   : > { %s1568_s17 = smov (%p26_p0, %s25_s17), 0  ;;  %p50_p3 = por %p49_p2, %p48_p1 }
   0x7   : > { %s37_s18 = ssub.s32 %s1323_s15, %s1568_s17  ;;  %164 = sbr.rel (%p1128_p5) target bundleno = 26 (0x1a), region = 20 }
   0x8   : > { %p39_p4 = scmp.eq.s32.totalorder %s37_s18, 0 }
   0xa   : > { %s1386_s20 = scalar_select %p39_p4, %s1315_s13, %s41_s19  }
   0xc   : > { %167 = sbr.rel (!%p50_p3) target bundleno = 26 (0x1a), region = 24  ;;  %s169_s21 = sand.u32 (%p50_p3), 1, %s1315_s13  }
   0xd   : > { %s1130_s22 = sshll.u32 (%p50_p3), %s1323_s15, 2  ;;  %s1129_s23 = sshll.u32 (%p50_p3), %s169_s21, 6 }
   0xe   : > { %s1394_s26 = scalar_lea.vmem (%p50_p3), %s1559_s0, %s1130_s22  ;;  %s171_s27 = scalar_lea.vmem (%p50_p3), [#allocation3], %s1129_s23 }
   0xf   : > { %v193_v0 = vld [vmem:[%s1394_s26] sm:$0xf] (%p50_p3)  ;;  %v195_v1 = vld [vmem:[%s1394_s26 + $0x24] sm:$0xf] (%p50_p3)  ;;  %v197_v2 = vld [vmem:[%s1394_s26 + $0x48] sm:$0xf] (%p50_p3) }
  0x10   : > { %194 = vst [vmem:[%s171_s27] sm:$0xf] (%p50_p3), %v193_v0  ;;  %196 = vst [vmem:[%s171_s27 + $0x4] sm:$0xf] (%p50_p3), %v195_v1  ;;  %v199_v3 = vld [vmem:[%s1394_s26 + $0x6c] sm:$0xf] (%p50_p3) }
  0x11   : > { %v201_v4 = vld [vmem:[%s1394_s26 + $0x90] sm:$0xf]  ;;  %198 = vst [vmem:[%s171_s27 + $0x8] sm:$0xf] %v197_v2  ;;  %200 = vst [vmem:[%s171_s27 + $0xc] sm:$0xf] %v199_v3 }
  0x12   : > { %202 = vst [vmem:[%s171_s27 + $0x10] sm:$0xf] %v201_v4  ;;  %v203_v5 = vld [vmem:[%s1394_s26 + $0xb4] sm:$0xf]  ;;  %v205_v6 = vld [vmem:[%s1394_s26 + $0xd8] sm:$0xf] }
  0x13   : > { %v207_v7 = vld [vmem:[%s1394_s26 + $0xfc] sm:$0xf]  ;;  %204 = vst [vmem:[%s171_s27 + $0x14] sm:$0xf] %v203_v5  ;;  %206 = vst [vmem:[%s171_s27 + $0x18] sm:$0xf] %v205_v6 }
  0x14   : > { %208 = vst [vmem:[%s171_s27 + $0x1c] sm:$0xf] %v207_v7  ;;  %v209_v8 = vld [vmem:[%s1394_s26 + $0x120] sm:$0xf]  ;;  %v211_v9 = vld [vmem:[%s1394_s26 + $0x144] sm:$0xf] }
  0x15   : > { %v213_v10 = vld [vmem:[%s1394_s26 + $0x168] sm:$0xf]  ;;  %210 = vst [vmem:[%s171_s27 + $0x20] sm:$0xf] %v209_v8  ;;  %212 = vst [vmem:[%s171_s27 + $0x24] sm:$0xf] %v211_v9 }
  0x16   : > { %214 = vst [vmem:[%s171_s27 + $0x28] sm:$0xf] %v213_v10  ;;  %v215_v11 = vld [vmem:[%s1394_s26 + $0x18c] sm:$0xf]  ;;  %v217_v12 = vld [vmem:[%s1394_s26 + $0x1b0] sm:$0xf] }
  0x17   : > { %v219_v13 = vld [vmem:[%s1394_s26 + $0x1d4] sm:$0xf]  ;;  %216 = vst [vmem:[%s171_s27 + $0x2c] sm:$0xf] %v215_v11  ;;  %218 = vst [vmem:[%s171_s27 + $0x30] sm:$0xf] %v217_v12 }
  0x18   : > { %220 = vst [vmem:[%s171_s27 + $0x34] sm:$0xf] %v219_v13  ;;  %v221_v14 = vld [vmem:[%s1394_s26 + $0x1f8] sm:$0xf]  ;;  %v223_v15 = vld [vmem:[%s1394_s26 + $0x21c] sm:$0xf] }
  0x19   : > { %222 = vst [vmem:[%s171_s27 + $0x38] sm:$0xf] %v221_v14  ;;  %224 = vst [vmem:[%s171_s27 + $0x3c] sm:$0xf] %v223_v15 }
  0x1a PF: > { %p1131_p6 = scmp.ge.s32.totalorder %s1327_s16, 1  ;;  %p294_p7 = scmp.lt.s32.totalorder %s1327_s16, 10 }
  0x1c   : > { %p295_p8 = pnand %p1131_p6, %p294_p7 }
  0x1d   : > { %s301_s28 = sand.u32 (!%p295_p8), 1, %s1311_s12   ;;  %s1133_s29 = sshll.u32 (!%p295_p8), %s1319_s14, 4 }
  0x1e   : > { %298 = sbr.rel (%p295_p8) target bundleno = 349 (0x15d), region = 69  ;;  %s1132_s30 = sshll.u32 (!%p295_p8), %s301_s28, 6 }
  0x1f   : > { %p346_p9 = scmp.lt.s32.totalorder (!%p295_p8), %s1133_s29, 143  ;;  %s1421_s8 = scalar_lea.vmem (!%p295_p8), [#allocation3], %s1132_s30 }
  0x20   : > { %p1136_p10 = scmp.ne.s32.totalorder (!%p295_p8), %s1319_s14, 0 }
  0x23   : > { %s1570_s29 = smov (!%p346_p9, %s1133_s29), 143  ;;  %377 = sbr.rel (%p1136_p10) target bundleno = 57 (0x39), region = 77 }
  0x24   : > { %s1182_s4 = sshll.u32 %s1570_s29, 3 }
  0x25   : > { %s1419_s7 = scalar_lea.vmem %s1560_s1, %s1182_s4 }
  0x28   : > { %v1329_v16 = vmov 0.0  }
  0x29   : > { %378 = vst [vmem:[#allocation2 + $0xb0] sm:$0xff] %v1329_v16  ;;  %379 = vst [vmem:[#allocation2] sm:$0xff] %v1329_v16 }
  0x2a   : > { %380 = vst [vmem:[#allocation2 + $0xd8] sm:$0xff] %v1329_v16  ;;  %381 = vst [vmem:[#allocation2 + $0x18] sm:$0xff] %v1329_v16 }
  0x2b   : > { %382 = vst [vmem:[#allocation2 + $0x50] sm:$0xff] %v1329_v16  ;;  %383 = vst [vmem:[#allocation2 + $0x68] sm:$0xff] %v1329_v16 }
  0x2c   : > { %384 = vst [vmem:[#allocation2 + $0x30] sm:$0xff] %v1329_v16  ;;  %385 = vst [vmem:[#allocation2 + $0x48] sm:$0xff] %v1329_v16 }
  0x2d   : > { %386 = vst [vmem:[#allocation2 + $0x80] sm:$0xff] %v1329_v16  ;;  %387 = vst [vmem:[#allocation2 + $0x88] sm:$0xff] %v1329_v16 }
  0x2e   : > { %388 = vst [vmem:[#allocation2 + $0xe8] sm:$0xff] %v1329_v16  ;;  %389 = vst [vmem:[#allocation2 + $0xb8] sm:$0xff] %v1329_v16 }
  0x2f   : > { %390 = vst [vmem:[#allocation2 + $0x60] sm:$0xff] %v1329_v16  ;;  %391 = vst [vmem:[#allocation2 + $0xf0] sm:$0xff] %v1329_v16 }
  0x30   : > { %392 = vst [vmem:[#allocation2 + $0x8] sm:$0xff] %v1329_v16  ;;  %393 = vst [vmem:[#allocation2 + $0x78] sm:$0xff] %v1329_v16 }
  0x31   : > { %394 = vst [vmem:[#allocation2 + $0x38] sm:$0xff] %v1329_v16  ;;  %395 = vst [vmem:[#allocation2 + $0x58] sm:$0xff] %v1329_v16 }
  0x32   : > { %396 = vst [vmem:[#allocation2 + $0x40] sm:$0xff] %v1329_v16  ;;  %397 = vst [vmem:[#allocation2 + $0xc8] sm:$0xff] %v1329_v16 }
  0x33   : > { %398 = vst [vmem:[#allocation2 + $0xe0] sm:$0xff] %v1329_v16  ;;  %399 = vst [vmem:[#allocation2 + $0x90] sm:$0xff] %v1329_v16 }
  0x34   : > { %400 = vst [vmem:[#allocation2 + $0x70] sm:$0xff] %v1329_v16  ;;  %401 = vst [vmem:[#allocation2 + $0xc0] sm:$0xff] %v1329_v16 }
  0x35   : > { %402 = vst [vmem:[#allocation2 + $0xa8] sm:$0xff] %v1329_v16  ;;  %403 = vst [vmem:[#allocation2 + $0xd0] sm:$0xff] %v1329_v16 }
  0x36   : > { %404 = vst [vmem:[#allocation2 + $0x10] sm:$0xff] %v1329_v16  ;;  %405 = vst [vmem:[#allocation2 + $0x28] sm:$0xff] %v1329_v16 }
  0x37   : > { %406 = vst [vmem:[#allocation2 + $0xa0] sm:$0xff] %v1329_v16  ;;  %407 = vst [vmem:[#allocation2 + $0xf8] sm:$0xff] %v1329_v16 }
  0x38   : > { %408 = vst [vmem:[#allocation2 + $0x20] sm:$0xff] %v1329_v16  ;;  %409 = vst [vmem:[#allocation2 + $0x98] sm:$0xff] %v1329_v16 }
  0x39 PF: > { %v1257_v17 = vld [vmem:[%s1419_s7 + $0x74] ss:$8 sps:$4 sm:$0xff]   ;;  %v1259_v18 = vld [vmem:[%s1419_s7 + $0x70] ss:$8 sps:$4 sm:$0xff]   ;;  %v1330_v19 = vmov 0   ;;  %v1281_v34 = vld [vmem:[%s1421_s8] sm:$0xff]  }
  0x3a   : > { %634 = vmatprep.mubr.bf16.mxu0 %v1330_v19  ;;  %674 = vmatprep.mubr.bf16.mxu1 %v1330_v19  ;;  %v1260_v20 = vld [vmem:[%s1419_s7 + $0x64] ss:$8 sps:$4 sm:$0xff]   ;;  %v1262_v21 = vld [vmem:[%s1419_s7 + $0x60] ss:$8 sps:$4 sm:$0xff]   ;;  %v1263_v22 = vld [vmem:[%s1419_s7 + $0x54] ss:$8 sps:$4 sm:$0xff]  }
  0x3b   : > { %602 = vmatprep.subr.bf16.mxu0 %v1257_v17  ;;  %1199 = vmatprep.subr.bf16.mxu1 %v1257_v17  ;;  %v1265_v23 = vld [vmem:[%s1419_s7 + $0x50] ss:$8 sps:$4 sm:$0xff]   ;;  %v1266_v24 = vld [vmem:[%s1419_s7 + $0x44] ss:$8 sps:$4 sm:$0xff]   ;;  %v1268_v25 = vld [vmem:[%s1419_s7 + $0x40] ss:$8 sps:$4 sm:$0xff]  }
  0x3c   : > { %603 = vmatpush1.bf16.msra.mxu0 %v1259_v18  ;;  %1207 = vmatpush1.bf16.msra.mxu1 %v1259_v18  ;;  %v1269_v26 = vld [vmem:[%s1419_s7 + $0x34] ss:$8 sps:$4 sm:$0xff]   ;;  %v1271_v27 = vld [vmem:[%s1419_s7 + $0x30] ss:$8 sps:$4 sm:$0xff]   ;;  %v1272_v28 = vld [vmem:[%s1419_s7 + $0x24] ss:$8 sps:$4 sm:$0xff]  }
  0x3d   : > { %604 = vmatprep.subr.bf16.mxu0 %v1260_v20  ;;  %1200 = vmatprep.subr.bf16.mxu1 %v1260_v20  ;;  %v1274_v29 = vld [vmem:[%s1419_s7 + $0x20] ss:$8 sps:$4 sm:$0xff]   ;;  %v1275_v30 = vld [vmem:[%s1419_s7 + $0x14] ss:$8 sps:$4 sm:$0xff]   ;;  %v1277_v31 = vld [vmem:[%s1419_s7 + $0x10] ss:$8 sps:$4 sm:$0xff]  }
  0x3e   : > { %v1278_v32 = vld [vmem:[%s1419_s7 + $0x4] ss:$8 sps:$4 sm:$0xff]   ;;  %v1280_v33 = vld [vmem:[%s1419_s7] ss:$8 sps:$4 sm:$0xff]   ;;  %v1285_v38 = vld [vmem:[%s1421_s8 + $0x10] sm:$0xff]   ;;  %p1161_p11 = scmp.ne.s32.totalorder %s1319_s14, 8 }
  0x3f   : > { %v1282_v35 = vld [vmem:[%s1421_s8 + $0x20] sm:$0xff]   ;;  %v1283_v36 = vld [vmem:[%s1421_s8 + $0x8] sm:$0xff]   ;;  %v1286_v39 = vld [vmem:[%s1421_s8 + $0x30] sm:$0xff]  }
  0x40   : > { %605 = vmatpush1.bf16.msra.mxu0 %v1262_v21  ;;  %1208 = vmatpush1.bf16.msra.mxu1 %v1262_v21  ;;  %v1284_v37 = vld [vmem:[%s1421_s8 + $0x28] sm:$0xff]   ;;  %v1287_v40 = vld [vmem:[%s1421_s8 + $0x18] sm:$0xff]   ;;  %v410_v42 = vld [vmem:[#allocation2 + $0xb0] sm:$0xff] }
  0x41   : > { %606 = vmatprep.subr.bf16.mxu0 %v1263_v22  ;;  %1201 = vmatprep.subr.bf16.mxu1 %v1263_v22  ;;  %v1288_v41 = vld [vmem:[%s1421_s8 + $0x38] sm:$0xff]   ;;  %v411_v46 = vld [vmem:[#allocation2] sm:$0xff]  ;;  %v429_v59 = vld [vmem:[#allocation2 + $0xc8] sm:$0xff] }
  0x42   : > { %v426_v43 = vld [vmem:[#allocation2 + $0x38] sm:$0xff]  ;;  %v428_v53 = vld [vmem:[#allocation2 + $0x40] sm:$0xff]  ;;  %v414_v0 = vld [vmem:[#allocation2 + $0x50] sm:$0xff] }
  0x43   : > { %v427_v47 = vld [vmem:[#allocation2 + $0x58] sm:$0xff]  ;;  %v430_v1 = vld [vmem:[#allocation2 + $0xe0] sm:$0xff]  ;;  %v415_v6 = vld [vmem:[#allocation2 + $0x68] sm:$0xff] }
  0x44   : > { %607 = vmatpush1.bf16.msra.mxu0 %v1265_v23  ;;  %1209 = vmatpush1.bf16.msra.mxu1 %v1265_v23  ;;  %v412_v52 = vld [vmem:[#allocation2 + $0xd8] sm:$0xff]  ;;  %v431_v7 = vld [vmem:[#allocation2 + $0x90] sm:$0xff]  ;;  %v417_v18 = vld [vmem:[#allocation2 + $0x48] sm:$0xff] }
  0x45   : > { %608 = vmatprep.subr.bf16.mxu0 %v1266_v24  ;;  %1202 = vmatprep.subr.bf16.mxu1 %v1266_v24  ;;  %v413_v58 = vld [vmem:[#allocation2 + $0x18] sm:$0xff]  ;;  %v416_v12 = vld [vmem:[#allocation2 + $0x30] sm:$0xff]  ;;  %v418_v24 = vld [vmem:[#allocation2 + $0x80] sm:$0xff] }
  0x46   : > { %v432_v13 = vld [vmem:[#allocation2 + $0x70] sm:$0xff] }
  0x48   : > { %609 = vmatpush1.bf16.msra.mxu0 %v1268_v25  ;;  %1210 = vmatpush1.bf16.msra.mxu1 %v1268_v25  ;;  %v434_v25 = vld [vmem:[#allocation2 + $0xa8] sm:$0xff] }
  0x49   : > { %610 = vmatprep.subr.bf16.mxu0 %v1269_v26  ;;  %1203 = vmatprep.subr.bf16.mxu1 %v1269_v26 }
  0x4c   : > { %611 = vmatpush1.bf16.msra.mxu0 %v1271_v27  ;;  %1211 = vmatpush1.bf16.msra.mxu1 %v1271_v27 }
  0x4d   : > { %612 = vmatprep.subr.bf16.mxu0 %v1272_v28  ;;  %1204 = vmatprep.subr.bf16.mxu1 %v1272_v28 }
  0x50   : > { %613 = vmatpush1.bf16.msra.mxu0 %v1274_v29  ;;  %1212 = vmatpush1.bf16.msra.mxu1 %v1274_v29 }
  0x51   : > { %614 = vmatprep.subr.bf16.mxu0 %v1275_v30  ;;  %1205 = vmatprep.subr.bf16.mxu1 %v1275_v30  ;;  %v419_v30 = vld [vmem:[#allocation2 + $0x88] sm:$0xff] }
  0x54   : > { %615 = vmatpush1.bf16.msra.mxu0 %v1277_v31  ;;  %1213 = vmatpush1.bf16.msra.mxu1 %v1277_v31  ;;  %v435_v31 = vld [vmem:[#allocation2 + $0xd0] sm:$0xff] }
  0x55   : > { %616 = vmatprep.subr.bf16.mxu0 %v1278_v32  ;;  %1206 = vmatprep.subr.bf16.mxu1 %v1278_v32 }
  0x58   : > { %617 = vmatpush1.bf16.msra.mxu0 %v1280_v33  ;;  %1214 = vmatpush1.bf16.msra.mxu1 %v1280_v33 }
  0x5b   : > { %635 = vmatmul.mubr.bf16.vlgmr.msra.gmra.mxu0 %v1281_v34  ;;  %675 = vmatmul.mubr.bf16.vlgmr.msra.gmra.mxu1 %v1282_v35 }
  0x5c   : > { %644 = vmatprep.mubr.bf16.mxu0 %v1330_v19  ;;  %684 = vmatprep.mubr.bf16.mxu1 %v1330_v19 }
  0x63   : > { %645 = vmatmul.mubr.bf16.gmra.mxu0 %v1283_v36  ;;  %685 = vmatmul.mubr.bf16.gmra.mxu1 %v1284_v37  ;;  %v420_v36 = vld [vmem:[#allocation2 + $0xe8] sm:$0xff]  ;;  %v436_v37 = vld [vmem:[#allocation2 + $0x10] sm:$0xff] }
  0x64   : > { %654 = vmatprep.mubr.bf16.mxu0 %v1330_v19  ;;  %694 = vmatprep.mubr.bf16.mxu1 %v1330_v19 }
  0x6b   : > { %655 = vmatmul.mubr.bf16.gmra.mxu0 %v1285_v38  ;;  %695 = vmatmul.mubr.bf16.gmra.mxu1 %v1286_v39 }
  0x6c   : > { %664 = vmatprep.mubr.bf16.mxu0 %v1330_v19  ;;  %704 = vmatprep.mubr.bf16.mxu1 %v1330_v19  ;;  %v433_v19 = vld [vmem:[#allocation2 + $0xc0] sm:$0xff] }
  0x73   : > { %665 = vmatmul.mubr.bf16.gmra.mxu0 %v1287_v40  ;;  %705 = vmatmul.mubr.bf16.gmra.mxu1 %v1288_v41 }
 0x11b   : > { %v636_v44 = vpop.f32.mrf.mxu0  ;;  %v676_v45 = vpop.f32.mrf.mxu1 }
 0x11c   : > { %v715_v48 = vadd.f32 %v636_v44, %v410_v42  ;;  %v731_v49 = vadd.f32 %v676_v45, %v426_v43  ;;  %v421_v42 = vld [vmem:[#allocation2 + $0xb8] sm:$0xff]  ;;  %v437_v43 = vld [vmem:[#allocation2 + $0x28] sm:$0xff] }
 0x11d   : > { %v638_v50 = vpop.f32.mrf.mxu0  ;;  %v678_v51 = vpop.f32.mrf.mxu1 }
 0x11e   : > { %747 = vst [vmem:[#allocation2 + $0xb0] sm:$0xff] %v715_v48  ;;  %763 = vst [vmem:[#allocation2 + $0x38] sm:$0xff] %v731_v49  ;;  %v716_v54 = vadd.f32 %v638_v50, %v411_v46  ;;  %v732_v55 = vadd.f32 %v678_v51, %v427_v47  ;;  %v422_v48 = vld [vmem:[#allocation2 + $0x60] sm:$0xff] }
 0x11f   : > { %v640_v56 = vpop.f32.mrf.mxu0  ;;  %v680_v57 = vpop.f32.mrf.mxu1  ;;  %v438_v49 = vld [vmem:[#allocation2 + $0xa0] sm:$0xff] }
 0x120   : > { %748 = vst [vmem:[#allocation2] sm:$0xff] %v716_v54  ;;  %764 = vst [vmem:[#allocation2 + $0x58] sm:$0xff] %v732_v55  ;;  %v717_v60 = vadd.f32 %v640_v56, %v412_v52  ;;  %v733_v61 = vadd.f32 %v680_v57, %v428_v53  ;;  %v423_v54 = vld [vmem:[#allocation2 + $0xf0] sm:$0xff]  ;;  %v439_v55 = vld [vmem:[#allocation2 + $0xf8] sm:$0xff] }
 0x121   : > { %v642_v62 = vpop.f32.mrf.mxu0  ;;  %v682_v63 = vpop.f32.mrf.mxu1 }
 0x122   : > { %749 = vst [vmem:[#allocation2 + $0xd8] sm:$0xff] %v717_v60  ;;  %765 = vst [vmem:[#allocation2 + $0x40] sm:$0xff] %v733_v61  ;;  %v718_v2 = vadd.f32 %v642_v62, %v413_v58  ;;  %v734_v3 = vadd.f32 %v682_v63, %v429_v59  ;;  %v424_v60 = vld [vmem:[#allocation2 + $0x8] sm:$0xff]  ;;  %v440_v61 = vld [vmem:[#allocation2 + $0x20] sm:$0xff] }
 0x123   : > { %v646_v4 = vpop.f32.mrf.mxu0  ;;  %v686_v5 = vpop.f32.mrf.mxu1 }
 0x124   : > { %750 = vst [vmem:[#allocation2 + $0x18] sm:$0xff] %v718_v2  ;;  %766 = vst [vmem:[#allocation2 + $0xc8] sm:$0xff] %v734_v3  ;;  %v719_v8 = vadd.f32 %v646_v4, %v414_v0  ;;  %v735_v9 = vadd.f32 %v686_v5, %v430_v1  ;;  %v425_v2 = vld [vmem:[#allocation2 + $0x78] sm:$0xff] }
 0x125   : > { %v648_v10 = vpop.f32.mrf.mxu0  ;;  %v688_v11 = vpop.f32.mrf.mxu1  ;;  %v441_v3 = vld [vmem:[#allocation2 + $0x98] sm:$0xff] }
 0x126   : > { %751 = vst [vmem:[#allocation2 + $0x50] sm:$0xff] %v719_v8  ;;  %767 = vst [vmem:[#allocation2 + $0xe0] sm:$0xff] %v735_v9  ;;  %v720_v14 = vadd.f32 %v648_v10, %v415_v6  ;;  %v736_v15 = vadd.f32 %v688_v11, %v431_v7 }
 0x127   : > { %v650_v16 = vpop.f32.mrf.mxu0  ;;  %v690_v17 = vpop.f32.mrf.mxu1 }
 0x128   : > { %752 = vst [vmem:[#allocation2 + $0x68] sm:$0xff] %v720_v14  ;;  %768 = vst [vmem:[#allocation2 + $0x90] sm:$0xff] %v736_v15  ;;  %v721_v20 = vadd.f32 %v650_v16, %v416_v12  ;;  %v737_v21 = vadd.f32 %v690_v17, %v432_v13 }
 0x129   : > { %v652_v22 = vpop.f32.mrf.mxu0  ;;  %v692_v23 = vpop.f32.mrf.mxu1 }
 0x12a   : > { %753 = vst [vmem:[#allocation2 + $0x30] sm:$0xff] %v721_v20  ;;  %769 = vst [vmem:[#allocation2 + $0x70] sm:$0xff] %v737_v21  ;;  %v722_v26 = vadd.f32 %v652_v22, %v417_v18  ;;  %v738_v27 = vadd.f32 %v692_v23, %v433_v19 }
 0x12b   : > { %v656_v28 = vpop.f32.mrf.mxu0  ;;  %v696_v29 = vpop.f32.mrf.mxu1 }
 0x12c   : > { %754 = vst [vmem:[#allocation2 + $0x48] sm:$0xff] %v722_v26  ;;  %770 = vst [vmem:[#allocation2 + $0xc0] sm:$0xff] %v738_v27  ;;  %v723_v32 = vadd.f32 %v656_v28, %v418_v24  ;;  %v739_v33 = vadd.f32 %v696_v29, %v434_v25 }
 0x12d   : > { %v658_v34 = vpop.f32.mrf.mxu0  ;;  %v698_v35 = vpop.f32.mrf.mxu1 }
 0x12e   : > { %755 = vst [vmem:[#allocation2 + $0x80] sm:$0xff] %v723_v32  ;;  %771 = vst [vmem:[#allocation2 + $0xa8] sm:$0xff] %v739_v33  ;;  %v724_v38 = vadd.f32 %v658_v34, %v419_v30  ;;  %v740_v39 = vadd.f32 %v698_v35, %v435_v31 }
 0x12f   : > { %v660_v40 = vpop.f32.mrf.mxu0  ;;  %v700_v41 = vpop.f32.mrf.mxu1 }
 0x130   : > { %756 = vst [vmem:[#allocation2 + $0x88] sm:$0xff] %v724_v38  ;;  %772 = vst [vmem:[#allocation2 + $0xd0] sm:$0xff] %v740_v39  ;;  %v725_v44 = vadd.f32 %v660_v40, %v420_v36  ;;  %v741_v45 = vadd.f32 %v700_v41, %v436_v37 }
 0x131   : > { %v662_v46 = vpop.f32.mrf.mxu0  ;;  %v702_v47 = vpop.f32.mrf.mxu1 }
 0x132   : > { %757 = vst [vmem:[#allocation2 + $0xe8] sm:$0xff] %v725_v44  ;;  %773 = vst [vmem:[#allocation2 + $0x10] sm:$0xff] %v741_v45  ;;  %v726_v50 = vadd.f32 %v662_v46, %v421_v42  ;;  %v742_v51 = vadd.f32 %v702_v47, %v437_v43 }
 0x133   : > { %v666_v52 = vpop.f32.mrf.mxu0  ;;  %v706_v53 = vpop.f32.mrf.mxu1 }
 0x134   : > { %758 = vst [vmem:[#allocation2 + $0xb8] sm:$0xff] %v726_v50  ;;  %774 = vst [vmem:[#allocation2 + $0x28] sm:$0xff] %v742_v51  ;;  %v727_v56 = vadd.f32 %v666_v52, %v422_v48  ;;  %v743_v57 = vadd.f32 %v706_v53, %v438_v49 }
 0x135   : > { %v668_v58 = vpop.f32.mrf.mxu0  ;;  %v708_v59 = vpop.f32.mrf.mxu1 }
 0x136   : > { %759 = vst [vmem:[#allocation2 + $0x60] sm:$0xff] %v727_v56  ;;  %775 = vst [vmem:[#allocation2 + $0xa0] sm:$0xff] %v743_v57  ;;  %v728_v62 = vadd.f32 %v668_v58, %v423_v54  ;;  %v744_v63 = vadd.f32 %v708_v59, %v439_v55 }
 0x137   : > { %v670_v0 = vpop.f32.mrf.mxu0  ;;  %v710_v1 = vpop.f32.mrf.mxu1 }
 0x138   : > { %760 = vst [vmem:[#allocation2 + $0xf0] sm:$0xff] %v728_v62  ;;  %776 = vst [vmem:[#allocation2 + $0xf8] sm:$0xff] %v744_v63  ;;  %v729_v4 = vadd.f32 %v670_v0, %v424_v60  ;;  %v745_v5 = vadd.f32 %v710_v1, %v440_v61  ;;  %782 = sbr.rel (%p1161_p11) target bundleno = 349 (0x15d), region = 81 }
 0x139   : > { %v672_v6 = vpop.f32.mrf.mxu0  ;;  %v712_v7 = vpop.f32.mrf.mxu1 }
 0x13a   : > { %761 = vst [vmem:[#allocation2 + $0x8] sm:$0xff] %v729_v4  ;;  %777 = vst [vmem:[#allocation2 + $0x20] sm:$0xff] %v745_v5  ;;  %v730_v8 = vadd.f32 %v672_v6, %v425_v2  ;;  %v746_v9 = vadd.f32 %v712_v7, %v441_v3 }
 0x13c   : > { %762 = vst [vmem:[#allocation2 + $0x78] sm:$0xff] %v730_v8  ;;  %778 = vst [vmem:[#allocation2 + $0x98] sm:$0xff] %v746_v9 }
 0x13d   : > { %v817_v10 = vlaneseq  ;;  %v815_v12 = vld [vmem:[%s1561_s2] sm:$0x3]  ;;  %v783_v13 = vld [vmem:[#allocation2 + $0xb0] sm:$0xff]  ;;  %v785_v17 = vld [vmem:[#allocation2 + $0xd8] sm:$0xff] }
 0x13e   : > { %v784_v14 = vld [vmem:[#allocation2] sm:$0xff]  ;;  %v786_v18 = vld [vmem:[#allocation2 + $0x18] sm:$0xff]  ;;  %v787_v19 = vld [vmem:[#allocation2 + $0x50] sm:$0xff] }
 0x13f   : > { %v818_v11 = vshrl.u32 %v817_v10, 7  ;;  %v788_v22 = vld [vmem:[#allocation2 + $0x68] sm:$0xff]  ;;  %v789_v23 = vld [vmem:[#allocation2 + $0x30] sm:$0xff]  ;;  %v791_v33 = vld [vmem:[#allocation2 + $0x80] sm:$0xff] }
 0x140   : > { %v790_v24 = vld [vmem:[#allocation2 + $0x48] sm:$0xff]  ;;  %v794_v40 = vld [vmem:[#allocation2 + $0xb8] sm:$0xff]  ;;  %v795_v45 = vld [vmem:[#allocation2 + $0x60] sm:$0xff] }
 0x141   : > { %v819_v15 = vsub.s32 0, %v818_v11  ;;  %v823_v16 = vsub.s32 1, %v818_v11  ;;  %v792_v34 = vld [vmem:[#allocation2 + $0x88] sm:$0xff]  ;;  %v796_v46 = vld [vmem:[#allocation2 + $0xf0] sm:$0xff]  ;;  %v799_v57 = vld [vmem:[#allocation2 + $0x38] sm:$0xff] }
 0x142   : > { %v793_v39 = vld [vmem:[#allocation2 + $0xe8] sm:$0xff]  ;;  %v800_v62 = vld [vmem:[#allocation2 + $0x58] sm:$0xff]  ;;  %v801_v3 = vld [vmem:[#allocation2 + $0x40] sm:$0xff] }
 0x143   : > { %v1460_v20 = vrot.slane %v815_v12, %v819_v15  ;;  %v1462_v21 = vrot.slane %v815_v12, %v823_v16  ;;  %v797_v51 = vld [vmem:[#allocation2 + $0x8] sm:$0xff]  ;;  %v798_v52 = vld [vmem:[#allocation2 + $0x78] sm:$0xff]  ;;  %v803_v9 = vld [vmem:[#allocation2 + $0xe0] sm:$0xff] }
 0x144   : > { %v802_v4 = vld [vmem:[#allocation2 + $0xc8] sm:$0xff]  ;;  %v804_v10 = vld [vmem:[#allocation2 + $0x90] sm:$0xff]  ;;  %v806_v16 = vld [vmem:[#allocation2 + $0xc0] sm:$0xff] }
 0x145   : > { %v827_v25 = vadd.f32 %v1460_v20, %v783_v13  ;;  %v828_v26 = vadd.f32 %v1462_v21, %v784_v14  ;;  %v829_v27 = vadd.f32 %v1460_v20, %v785_v17  ;;  %v830_v28 = vadd.f32 %v1462_v21, %v786_v18  ;;  %v805_v15 = vld [vmem:[#allocation2 + $0x70] sm:$0xff] }
 0x146   : > { %v831_v29 = vadd.f32 %v1460_v20, %v787_v19  ;;  %v832_v30 = vadd.f32 %v1462_v21, %v788_v22  ;;  %v833_v31 = vadd.f32 %v1460_v20, %v789_v23  ;;  %v834_v32 = vadd.f32 %v1462_v21, %v790_v24  ;;  %v807_v23 = vld [vmem:[#allocation2 + $0xa8] sm:$0xff] }
 0x147   : > { %v859_v35 = vmax.f32 %v827_v25, 0.0  ;;  %v860_v36 = vmax.f32 %v828_v26, 0.0  ;;  %v861_v37 = vmax.f32 %v829_v27, 0.0  ;;  %v862_v38 = vmax.f32 %v830_v28, 0.0  ;;  %v808_v28 = vld [vmem:[#allocation2 + $0xd0] sm:$0xff] }
 0x148   : > { %v863_v41 = vmax.f32 %v831_v29, 0.0  ;;  %v864_v42 = vmax.f32 %v832_v30, 0.0  ;;  %v865_v43 = vmax.f32 %v833_v31, 0.0  ;;  %v866_v44 = vmax.f32 %v834_v32, 0.0 }
 0x149   : > { %v1183_v47 = vpack.c.bf16 %v860_v36, %v859_v35  ;;  %v1184_v48 = vpack.c.bf16 %v862_v38, %v861_v37  ;;  %v835_v49 = vadd.f32 %v1460_v20, %v791_v33  ;;  %v836_v50 = vadd.f32 %v1462_v21, %v792_v34  ;;  %v809_v33 = vld [vmem:[#allocation2 + $0x10] sm:$0xff]  ;;  %v810_v34 = vld [vmem:[#allocation2 + $0x28] sm:$0xff] }
 0x14a   : > { %v1185_v53 = vpack.c.bf16 %v864_v42, %v863_v41  ;;  %v1186_v54 = vpack.c.bf16 %v866_v44, %v865_v43  ;;  %v837_v55 = vadd.f32 %v1460_v20, %v793_v39  ;;  %v838_v56 = vadd.f32 %v1462_v21, %v794_v40  ;;  %v811_v39 = vld [vmem:[#allocation2 + $0xa0] sm:$0xff]  ;;  %v812_v40 = vld [vmem:[#allocation2 + $0xf8] sm:$0xff] }
 0x14b   : > { %987 = vst [vmem:[%s1562_s3] sm:$0xff] %v1183_v47  ;;  %988 = vst [vmem:[%s1562_s3 + $0x8] sm:$0xff] %v1184_v48  ;;  %v867_v58 = vmax.f32 %v835_v49, 0.0  ;;  %v868_v59 = vmax.f32 %v836_v50, 0.0  ;;  %v839_v60 = vadd.f32 %v1460_v20, %v795_v45  ;;  %v840_v61 = vadd.f32 %v1462_v21, %v796_v46  ;;  %v813_v45 = vld [vmem:[#allocation2 + $0x20] sm:$0xff]  ;;  %v814_v46 = vld [vmem:[#allocation2 + $0x98] sm:$0xff] }
 0x14c   : > { %989 = vst [vmem:[%s1562_s3 + $0x10] sm:$0xff] %v1185_v53  ;;  %990 = vst [vmem:[%s1562_s3 + $0x18] sm:$0xff] %v1186_v54  ;;  %v869_v63 = vmax.f32 %v837_v55, 0.0  ;;  %v870_v0 = vmax.f32 %v838_v56, 0.0  ;;  %v841_v1 = vadd.f32 %v1460_v20, %v797_v51  ;;  %v842_v2 = vadd.f32 %v1462_v21, %v798_v52 }
 0x14d   : > { %v1187_v5 = vpack.c.bf16 %v868_v59, %v867_v58  ;;  %v871_v6 = vmax.f32 %v839_v60, 0.0  ;;  %v872_v7 = vmax.f32 %v840_v61, 0.0  ;;  %v843_v8 = vadd.f32 %v1460_v20, %v799_v57 }
 0x14e   : > { %v1188_v11 = vpack.c.bf16 %v870_v0, %v869_v63  ;;  %v873_v12 = vmax.f32 %v841_v1, 0.0  ;;  %v874_v13 = vmax.f32 %v842_v2, 0.0  ;;  %v844_v14 = vadd.f32 %v1462_v21, %v800_v62 }
 0x14f   : > { %991 = vst [vmem:[%s1562_s3 + $0x20] sm:$0xff] %v1187_v5  ;;  %v1189_v17 = vpack.c.bf16 %v872_v7, %v871_v6  ;;  %v875_v18 = vmax.f32 %v843_v8, 0.0  ;;  %v845_v19 = vadd.f32 %v1460_v20, %v801_v3  ;;  %v846_v22 = vadd.f32 %v1462_v21, %v802_v4 }
 0x150   : > { %992 = vst [vmem:[%s1562_s3 + $0x28] sm:$0xff] %v1188_v11  ;;  %v1190_v24 = vpack.c.bf16 %v874_v13, %v873_v12  ;;  %v876_v25 = vmax.f32 %v844_v14, 0.0  ;;  %v847_v26 = vadd.f32 %v1460_v20, %v803_v9  ;;  %v848_v27 = vadd.f32 %v1462_v21, %v804_v10 }
 0x151   : > { %993 = vst [vmem:[%s1562_s3 + $0x30] sm:$0xff] %v1189_v17  ;;  %v877_v29 = vmax.f32 %v845_v19, 0.0  ;;  %v878_v30 = vmax.f32 %v846_v22, 0.0  ;;  %v849_v31 = vadd.f32 %v1460_v20, %v805_v15  ;;  %v850_v32 = vadd.f32 %v1462_v21, %v806_v16 }
 0x152   : > { %994 = vst [vmem:[%s1562_s3 + $0x38] sm:$0xff] %v1190_v24  ;;  %v1191_v35 = vpack.c.bf16 %v876_v25, %v875_v18  ;;  %v879_v36 = vmax.f32 %v847_v26, 0.0  ;;  %v880_v37 = vmax.f32 %v848_v27, 0.0  ;;  %v851_v38 = vadd.f32 %v1460_v20, %v807_v23 }
 0x153   : > { %v1192_v41 = vpack.c.bf16 %v878_v30, %v877_v29  ;;  %v881_v42 = vmax.f32 %v849_v31, 0.0  ;;  %v882_v43 = vmax.f32 %v850_v32, 0.0  ;;  %v852_v44 = vadd.f32 %v1462_v21, %v808_v28 }
 0x154   : > { %995 = vst [vmem:[%s1562_s3 + $0x40] sm:$0xff] %v1191_v35  ;;  %v1193_v47 = vpack.c.bf16 %v880_v37, %v879_v36  ;;  %v883_v48 = vmax.f32 %v851_v38, 0.0  ;;  %v853_v49 = vadd.f32 %v1460_v20, %v809_v33  ;;  %v854_v50 = vadd.f32 %v1462_v21, %v810_v34 }
 0x155   : > { %996 = vst [vmem:[%s1562_s3 + $0x48] sm:$0xff] %v1192_v41  ;;  %v1194_v51 = vpack.c.bf16 %v882_v43, %v881_v42  ;;  %v884_v52 = vmax.f32 %v852_v44, 0.0  ;;  %v855_v53 = vadd.f32 %v1460_v20, %v811_v39  ;;  %v856_v54 = vadd.f32 %v1462_v21, %v812_v40 }
 0x156   : > { %997 = vst [vmem:[%s1562_s3 + $0x50] sm:$0xff] %v1193_v47  ;;  %v885_v55 = vmax.f32 %v853_v49, 0.0  ;;  %v886_v56 = vmax.f32 %v854_v50, 0.0  ;;  %v857_v57 = vadd.f32 %v1460_v20, %v813_v45  ;;  %v858_v58 = vadd.f32 %v1462_v21, %v814_v46 }
 0x157   : > { %998 = vst [vmem:[%s1562_s3 + $0x58] sm:$0xff] %v1194_v51  ;;  %v1195_v59 = vpack.c.bf16 %v884_v52, %v883_v48  ;;  %v887_v60 = vmax.f32 %v855_v53, 0.0  ;;  %v888_v61 = vmax.f32 %v856_v54, 0.0 }
 0x158   : > { %v1196_v62 = vpack.c.bf16 %v886_v56, %v885_v55  ;;  %v889_v63 = vmax.f32 %v857_v57, 0.0  ;;  %v890_v0 = vmax.f32 %v858_v58, 0.0 }
 0x159   : > { %999 = vst [vmem:[%s1562_s3 + $0x60] sm:$0xff] %v1195_v59  ;;  %v1197_v1 = vpack.c.bf16 %v888_v61, %v887_v60 }
 0x15a   : > { %1000 = vst [vmem:[%s1562_s3 + $0x68] sm:$0xff] %v1196_v62  ;;  %v1198_v20 = vpack.c.bf16 %v890_v0, %v889_v63 }
 0x15b   : > { %1001 = vst [vmem:[%s1562_s3 + $0x70] sm:$0xff] %v1197_v1 }
 0x15c   : > { %1002 = vst [vmem:[%s1562_s3 + $0x78] sm:$0xff] %v1198_v20 }
 0x15d PF: > { %s13_s16 = sadd.s32 1, %s1327_s16   ;;  %s1563_s12 = smov %s1315_s13 }
 0x15e   : > { %p10_p12 = scmp.ge.s32.totalorder %s13_s16, 11   ;;  %s1564_s13 = smov %s1386_s20 }
 0x15f   : > { %s1565_s14 = smov %s1323_s15  ;;  %s1566_s15 = smov %s1568_s17 }
 0x160   :  { %12 = sbr.rel (!%p10_p12) target bundleno = 3 (0x3), region = 122 }

// kernel: loss_network_forward.19
= control target key start
LH: loop header
LB: loop body
LE: loop exit
PB: predicated region body
PF: predicated region fallthrough
CT: control target
= control target key end

     0   :  { %s249_s0 = inlined_call_operand.vmem [shape: bf16[32,256], index: 0, kind: input, shape index: {}]   ;;  %s250_s1 = inlined_call_operand.vmem [shape: bf16[32,256], index: 1, kind: input, shape index: {}]   ;;  %s251_s2 = inlined_call_operand.hbm [shape: f32[1,1], index: 2, kind: output, shape index: {}]  }
   0x1   :  { %v18_v0 = vld [vmem:[%s249_s0] sm:$0xff]  ;;  %v19_v1 = vld [vmem:[%s249_s0 + $0x8] sm:$0xff]  ;;  %v20_v4 = vld [vmem:[%s249_s0 + $0x10] sm:$0xff] }
   0x2   :  { %v30_v2 = vld [vmem:[%s250_s1] sm:$0xff]  ;;  %v31_v3 = vld [vmem:[%s250_s1 + $0x8] sm:$0xff]  ;;  %v22_v5 = vunpack.c.l.bf16 %v18_v0  ;;  %v23_v6 = vunpack.c.h.bf16 %v18_v0  ;;  %v32_v7 = vld [vmem:[%s250_s1 + $0x10] sm:$0xff] }
   0x3   :  { %7 = vsyncpa [#allocation4], 0  ;;  %v24_v8 = vunpack.c.l.bf16 %v19_v1  ;;  %v34_v9 = vunpack.c.l.bf16 %v30_v2  ;;  %v35_v10 = vunpack.c.h.bf16 %v30_v2  ;;  %v36_v11 = vunpack.c.l.bf16 %v31_v3  ;;  %v21_v14 = vld [vmem:[%s249_s0 + $0x18] sm:$0xff] }
   0x4   :  { %v25_v12 = vunpack.c.h.bf16 %v19_v1  ;;  %v37_v13 = vunpack.c.h.bf16 %v31_v3  ;;  %v26_v15 = vunpack.c.l.bf16 %v20_v4  ;;  %v33_v16 = vld [vmem:[%s250_s1 + $0x18] sm:$0xff]  ;;  %v38_v17 = vunpack.c.l.bf16 %v32_v7  ;;  %s173_s1 = smov [#allocation3]  }
   0x5   :  { %v42_v18 = vsub.f32 %v22_v5, %v34_v9  ;;  %v43_v19 = vsub.f32 %v23_v6, %v35_v10  ;;  %v27_v20 = vunpack.c.h.bf16 %v20_v4  ;;  %v39_v21 = vunpack.c.h.bf16 %v32_v7  ;;  %s130_s25 = sshll.u32 %s173_s1, 4  ;;  %s131_s25 = int_to_ptr.vmem [resolvable:$true] %s130_s25 }
   0x6   :  { %v44_v22 = vsub.f32 %v24_v8, %v36_v11  ;;  %v28_v23 = vunpack.c.l.bf16 %v21_v14  ;;  %v40_v24 = vunpack.c.l.bf16 %v33_v16  ;;  %v45_v25 = vsub.f32 %v25_v12, %v37_v13  ;;  %s150_s26 = scalar_lea.vmem %s131_s25, 16  ;;  %s154_s27 = scalar_lea.vmem %s131_s25, 32 }
   0x7   :  { %v29_v26 = vunpack.c.h.bf16 %v21_v14  ;;  %v41_v27 = vunpack.c.h.bf16 %v33_v16  ;;  %v46_v28 = vsub.f32 %v26_v15, %v38_v17  ;;  %v50_v29 = vand.u32 2147483647, %v42_v18  ;;  %p151_p0 = scmp.ne.s32.totalorder %s131_s25, %s150_s26  ;;  %p155_p1 = scmp.lt.s32.totalorder %s131_s25, %s131_s25 }
   0x8   :  { %v51_v30 = vand.u32 2147483647, %v43_v19  ;;  %v47_v31 = vsub.f32 %v27_v20, %v39_v21  ;;  %v52_v32 = vand.u32 2147483647, %v44_v22  ;;  %v66_v33 = vmul.f32 0.5, %v42_v18  ;;  %p156_p2 = scmp.lt.s32.totalorder %s154_s27, %s150_s26 }
   0x9   :  { %v67_v34 = vmul.f32 0.5, %v43_v19  ;;  %v48_v35 = vsub.f32 %v28_v23, %v40_v24  ;;  %v53_v36 = vand.u32 2147483647, %v45_v25  ;;  %v68_v37 = vmul.f32 0.5, %v44_v22 }
   0xa   :  { %v69_v38 = vmul.f32 0.5, %v45_v25  ;;  %v49_v39 = vsub.f32 %v29_v26, %v41_v27  ;;  %v54_v40 = vand.u32 2147483647, %v46_v28  ;;  %v74_v41 = vmul.f32 %v66_v33, %v42_v18  ;;  %p157_p3 = por %p156_p2, %p155_p1 }
   0xb   :  { %v75_v42 = vmul.f32 %v67_v34, %v43_v19  ;;  %vm213_vm0 = vcmp.lt.f32.partialorder %v50_v29, 1.0  ;;  %vm217_vm1 = vcmp.lt.f32.partialorder %v51_v30, 1.0  ;;  %v70_v45 = vmul.f32 0.5, %v46_v28 }
   0xc   :  { %v76_v46 = vmul.f32 %v68_v37, %v44_v22  ;;  %v55_v47 = vand.u32 2147483647, %v47_v31  ;;  %vm221_vm2 = vcmp.lt.f32.partialorder %v52_v32, 1.0  ;;  %v138_v49 = vadd.f32 -0.5, %v50_v29  ;;  %p158_p4 = pnand %p157_p3, %p151_p0 }
   0xd   :  { %v139_v50 = vadd.f32 -0.5, %v51_v30  ;;  %v71_v51 = vmul.f32 0.5, %v47_v31  ;;  %v77_v52 = vmul.f32 %v69_v38, %v45_v25  ;;  %v140_v53 = vadd.f32 -0.5, %v52_v32 }
   0xe   :  { %v141_v54 = vadd.f32 -0.5, %v53_v36  ;;  %v56_v55 = vand.u32 2147483647, %v48_v35  ;;  %vm225_vm3 = vcmp.lt.f32.partialorder %v53_v36, 1.0  ;;  %v90_v57 = vsel %vm213_vm0, %v74_v41, %v138_v49 }
   0xf   :  { %v91_v58 = vsel %vm217_vm1, %v75_v42, %v139_v50  ;;  %v72_v59 = vmul.f32 0.5, %v48_v35  ;;  %v78_v60 = vmul.f32 %v70_v45, %v46_v28  ;;  %v142_v61 = vadd.f32 -0.5, %v54_v40 }
  0x10   :  { %v92_v62 = vsel %vm221_vm2, %v76_v46, %v140_v53  ;;  %v57_v63 = vand.u32 2147483647, %v49_v39  ;;  %vm235_vm4 = vcmp.lt.f32.partialorder %v54_v40, 1.0  ;;  %v99_v1 = vadd.f32 %v91_v58, %v90_v57 }
  0x11   :  { %v73_v2 = vmul.f32 0.5, %v49_v39  ;;  %v79_v3 = vmul.f32 %v71_v51, %v47_v31  ;;  %v143_v4 = vadd.f32 -0.5, %v55_v47  ;;  %v93_v5 = vsel %vm225_vm3, %v77_v52, %v141_v54 }
  0x12   :  { %vm63_vm5 = vcmp.lt.f32.partialorder %v55_v47, 1.0  ;;  %v100_v6 = vadd.f32 %v99_v1, %v92_v62  ;;  %v80_v7 = vmul.f32 %v72_v59, %v48_v35  ;;  %v144_v8 = vadd.f32 -0.5, %v56_v55 }
  0x13   :  { %v94_v9 = vsel %vm235_vm4, %v78_v60, %v142_v61  ;;  %vm64_vm6 = vcmp.lt.f32.partialorder %v56_v55, 1.0  ;;  %v81_v11 = vmul.f32 %v73_v2, %v49_v39  ;;  %v145_v12 = vadd.f32 -0.5, %v57_v63 }
  0x14   :  { %v101_v10 = vadd.f32 %v100_v6, %v93_v5  ;;  %v95_v13 = vsel %vm63_vm5, %v79_v3, %v143_v4  ;;  %vm65_vm7 = vcmp.lt.f32.partialorder %v57_v63, 1.0  ;;  %v96_v15 = vsel %vm64_vm6, %v80_v7, %v144_v8 }
  0x15   :  { %v97_v17 = vsel %vm65_vm7, %v81_v11, %v145_v12  ;;  %vm16_vm8 = vcmask 0   ;;  %v172_v20 = vmov 0.0  }
  0x16   :  { %v102_v14 = vadd.f32 %v101_v10, %v94_v9  ;;  %17 = vst.msk [vmem:[#allocation2] sm:$0x1] %vm16_vm8, %v172_v20 }
  0x18   :  { %v103_v16 = vadd.f32 %v102_v14, %v95_v13 }
  0x1a   :  { %v104_v18 = vadd.f32 %v103_v16, %v96_v15 }
  0x1c   :  { %v105_v19 = vadd.f32 %v104_v18, %v97_v17 }
  0x1d   :  { %v98_v28 = vld [vmem:[#allocation2] sm:$0x1] }
  0x1e   :  { %106 = vadd.xlane.f32.xlu0 %v105_v19 }
  0xa7   :  { %v107_v21 = vpop.xlane.xlu0 %106 }
  0xa8   :  { %v108_v22 = vrot.slane %v107_v21, 4 }
  0xaa   :  { %v109_v23 = vadd.f32 %v108_v22, %v107_v21 }
  0xac   :  { %v110_v24 = vrot.slane %v109_v23, 2 }
  0xae   :  { %v111_v25 = vadd.f32 %v110_v24, %v109_v23 }
  0xb0   :  { %v112_v26 = vrot.slane %v111_v25, 1 }
  0xb2   :  { %v113_v27 = vadd.f32 %v112_v26, %v111_v25 }
  0xb4   :  { %146 = vpush %v113_v27 }
  0xe5   :  { %s147_s0 = spop %146 }
  0xe6   :  { %v115_v29 = vstv %s147_s0 }
  0xe7   :  { %v116_v30 = vadd.f32 %v115_v29, %v98_v28 }
  0xe9   :  { %118 = vst.msk [vmem:[#allocation2] sm:$0x1] %vm16_vm8, %v116_v30 }
  0xf0   :  { %v122_v31 = vld [vmem:[#allocation2] sm:$0x1] }
  0xf1   :  { %123 = vst.msk [vmem:[#allocation3] sm:$0x1] %vm16_vm8, %v122_v31 }
  0xf2   :  { %161 = shalt.err (!%p158_p4)
}
  0xf3   :  { %133 = dma.vmem_to_hbm [thread:$0]  %s131_s25, 16, %s251_s2, [#allocation4]  }
  0xf4   :  { %170 = dma.done.wait [#allocation4], 16  }
  0xf5   :  { %171 = vsyncadd [#allocation4], 4294967280 }
  0xf6   :  { %137 = vsyncpa [#allocation4], 1 }

// kernel: loss_network_forward.15
= control target key start
LH: loop header
LB: loop body
LE: loop exit
PB: predicated region body
PF: predicated region fallthrough
CT: control target
= control target key end

     0   :  { %s1553_s12 = smov 0   ;;  %s1555_s13 = smov 0   ;;  %s1777_s0 = inlined_call_operand.vmem [shape: bf16[128,2304], index: 0, kind: input, shape index: {}]   ;;  %s1778_s1 = inlined_call_operand.vmem [shape: bf16[2304,256], index: 1, kind: input, shape index: {}]   ;;  %s1779_s2 = inlined_call_operand.vmem [shape: f32[1,256], index: 2, kind: input, shape index: {}]   ;;  %s1780_s3 = inlined_call_operand.vmem [shape: bf16[128,256], index: 3, kind: output, shape index: {}]  }
   0x1   :  { %s1557_s14 = smov 0   ;;  %s1559_s15 = smov 0  }
   0x2   :  { %s1561_s16 = smov 0  }
   0x3 LB: > { %s25_s17 = sadd.s32 1, %s1526_s15  ;;  %p48_p1 = scmp.ne.s32.totalorder %s1518_s13, %s1514_s12  ;;  %s1530_s16 = sphi %s1561_s16, %s13_s16   ;;  %s1526_s15 = sphi %s1559_s15, %s1784_s15   ;;  %s1522_s14 = sphi %s1557_s14, %s1783_s14   ;;  %s1518_s13 = sphi %s1555_s13, %s1782_s13   ;;  %s1514_s12 = sphi %s1553_s12, %s1781_s12  }
   0x4   : > { %p26_p0 = scmp.ge.s32.totalorder %s25_s17, 9  ;;  %p49_p2 = scmp.eq.s32.totalorder %s1530_s16, 0 }
   0x5   : > { %s41_s19 = sadd.s32 1, %s1518_s13  ;;  %p1250_p5 = scmp.ge.s32.totalorder %s1530_s16, 9 }
   0x6   : > { %s1786_s17 = smov (%p26_p0, %s25_s17), 0  ;;  %p50_p3 = por %p49_p2, %p48_p1 }
   0x7   : > { %s37_s18 = ssub.s32 %s1526_s15, %s1786_s17  ;;  %164 = sbr.rel (%p1250_p5) target bundleno = 24 (0x18), region = 20 }
   0x8   : > { %p39_p4 = scmp.eq.s32.totalorder %s37_s18, 0 }
   0xa   : > { %s1588_s20 = scalar_select %p39_p4, %s1518_s13, %s41_s19  }
   0xc   : > { %167 = sbr.rel (!%p50_p3) target bundleno = 24 (0x18), region = 24  ;;  %s169_s21 = sand.u32 (%p50_p3), 1, %s1518_s13  }
   0xd   : > { %s1329_s22 = sshll.u32 (%p50_p3), %s1526_s15, 3  ;;  %s1251_s23 = sshll.u32 (%p50_p3), %s169_s21, 7 }
   0xe   : > { %s1596_s26 = scalar_lea.vmem (%p50_p3), %s1777_s0, %s1329_s22  ;;  %s171_s27 = scalar_lea.vmem (%p50_p3), [#allocation3], %s1251_s23 }
   0xf   : > { %v236_v0 = vld [vmem:[%s1596_s26] sm:$0xff] (%p50_p3)  ;;  %v238_v1 = vld [vmem:[%s1596_s26 + $0x48] sm:$0xff] (%p50_p3)  ;;  %v240_v2 = vld [vmem:[%s1596_s26 + $0x90] sm:$0xff] (%p50_p3) }
  0x10   : > { %237 = vst [vmem:[%s171_s27] sm:$0xff] (%p50_p3), %v236_v0  ;;  %239 = vst [vmem:[%s171_s27 + $0x8] sm:$0xff] (%p50_p3), %v238_v1  ;;  %v242_v3 = vld [vmem:[%s1596_s26 + $0xd8] sm:$0xff] (%p50_p3)  ;;  %v244_v4 = vld [vmem:[%s1596_s26 + $0x120] sm:$0xff] (%p50_p3) }
  0x11   : > { %241 = vst [vmem:[%s171_s27 + $0x10] sm:$0xff] %v240_v2  ;;  %v246_v5 = vld [vmem:[%s1596_s26 + $0x168] sm:$0xff]  ;;  %243 = vst [vmem:[%s171_s27 + $0x18] sm:$0xff] %v242_v3  ;;  %v248_v6 = vld [vmem:[%s1596_s26 + $0x1b0] sm:$0xff] }
  0x12   : > { %245 = vst [vmem:[%s171_s27 + $0x20] sm:$0xff] %v244_v4  ;;  %247 = vst [vmem:[%s171_s27 + $0x28] sm:$0xff] %v246_v5  ;;  %v250_v7 = vld [vmem:[%s1596_s26 + $0x1f8] sm:$0xff]  ;;  %v252_v8 = vld [vmem:[%s1596_s26 + $0x240] sm:$0xff] }
  0x13   : > { %249 = vst [vmem:[%s171_s27 + $0x30] sm:$0xff] %v248_v6  ;;  %251 = vst [vmem:[%s171_s27 + $0x38] sm:$0xff] %v250_v7  ;;  %v254_v9 = vld [vmem:[%s1596_s26 + $0x288] sm:$0xff]  ;;  %v256_v10 = vld [vmem:[%s1596_s26 + $0x2d0] sm:$0xff] }
  0x14   : > { %253 = vst [vmem:[%s171_s27 + $0x40] sm:$0xff] %v252_v8  ;;  %v258_v11 = vld [vmem:[%s1596_s26 + $0x318] sm:$0xff]  ;;  %255 = vst [vmem:[%s171_s27 + $0x48] sm:$0xff] %v254_v9  ;;  %v260_v12 = vld [vmem:[%s1596_s26 + $0x360] sm:$0xff] }
  0x15   : > { %257 = vst [vmem:[%s171_s27 + $0x50] sm:$0xff] %v256_v10  ;;  %259 = vst [vmem:[%s171_s27 + $0x58] sm:$0xff] %v258_v11  ;;  %v262_v13 = vld [vmem:[%s1596_s26 + $0x3a8] sm:$0xff]  ;;  %v264_v14 = vld [vmem:[%s1596_s26 + $0x3f0] sm:$0xff] }
  0x16   : > { %261 = vst [vmem:[%s171_s27 + $0x60] sm:$0xff] %v260_v12  ;;  %263 = vst [vmem:[%s171_s27 + $0x68] sm:$0xff] %v262_v13  ;;  %v266_v15 = vld [vmem:[%s1596_s26 + $0x438] sm:$0xff] }
  0x17   : > { %265 = vst [vmem:[%s171_s27 + $0x70] sm:$0xff] %v264_v14  ;;  %267 = vst [vmem:[%s171_s27 + $0x78] sm:$0xff] %v266_v15 }
  0x18 PF: > { %p1254_p6 = scmp.ge.s32.totalorder %s1530_s16, 1  ;;  %p287_p7 = scmp.lt.s32.totalorder %s1530_s16, 10 }
  0x1a   : > { %p288_p8 = pnand %p1254_p6, %p287_p7 }
  0x1b   : > { %s294_s28 = sand.u32 (!%p288_p8), 1, %s1514_s12   ;;  %s1256_s29 = sshll.u32 (!%p288_p8), %s1522_s14, 5 }
  0x1c   : > { %291 = sbr.rel (%p288_p8) target bundleno = 378 (0x17a), region = 66  ;;  %s1255_s30 = sshll.u32 (!%p288_p8), %s294_s28, 7 }
  0x1d   : > { %p340_p9 = scmp.lt.s32.totalorder (!%p288_p8), %s1256_s29, 287  ;;  %s1623_s8 = scalar_lea.vmem (!%p288_p8), [#allocation3], %s1255_s30 }
  0x1e   : > { %p1259_p10 = scmp.ne.s32.totalorder (!%p288_p8), %s1522_s14, 0 }
  0x21   : > { %s1788_s29 = smov (!%p340_p9, %s1256_s29), 287  ;;  %370 = sbr.rel (%p1259_p10) target bundleno = 55 (0x37), region = 74 }
  0x22   : > { %s1330_s4 = sshll.u32 %s1788_s29, 3 }
  0x23   : > { %s1621_s7 = scalar_lea.vmem %s1778_s1, %s1330_s4 }
  0x26   : > { %v1532_v16 = vmov 0.0  }
  0x27   : > { %371 = vst [vmem:[#allocation2 + $0xb0] sm:$0xff] %v1532_v16  ;;  %372 = vst [vmem:[#allocation2] sm:$0xff] %v1532_v16 }
  0x28   : > { %373 = vst [vmem:[#allocation2 + $0xd8] sm:$0xff] %v1532_v16  ;;  %374 = vst [vmem:[#allocation2 + $0x18] sm:$0xff] %v1532_v16 }
  0x29   : > { %375 = vst [vmem:[#allocation2 + $0x50] sm:$0xff] %v1532_v16  ;;  %376 = vst [vmem:[#allocation2 + $0x68] sm:$0xff] %v1532_v16 }
  0x2a   : > { %377 = vst [vmem:[#allocation2 + $0x30] sm:$0xff] %v1532_v16  ;;  %378 = vst [vmem:[#allocation2 + $0x48] sm:$0xff] %v1532_v16 }
  0x2b   : > { %379 = vst [vmem:[#allocation2 + $0x80] sm:$0xff] %v1532_v16  ;;  %380 = vst [vmem:[#allocation2 + $0x88] sm:$0xff] %v1532_v16 }
  0x2c   : > { %381 = vst [vmem:[#allocation2 + $0xe8] sm:$0xff] %v1532_v16  ;;  %382 = vst [vmem:[#allocation2 + $0xb8] sm:$0xff] %v1532_v16 }
  0x2d   : > { %383 = vst [vmem:[#allocation2 + $0x60] sm:$0xff] %v1532_v16  ;;  %384 = vst [vmem:[#allocation2 + $0xf0] sm:$0xff] %v1532_v16 }
  0x2e   : > { %385 = vst [vmem:[#allocation2 + $0x8] sm:$0xff] %v1532_v16  ;;  %386 = vst [vmem:[#allocation2 + $0x78] sm:$0xff] %v1532_v16 }
  0x2f   : > { %387 = vst [vmem:[#allocation2 + $0x38] sm:$0xff] %v1532_v16  ;;  %388 = vst [vmem:[#allocation2 + $0x58] sm:$0xff] %v1532_v16 }
  0x30   : > { %389 = vst [vmem:[#allocation2 + $0x40] sm:$0xff] %v1532_v16  ;;  %390 = vst [vmem:[#allocation2 + $0xc8] sm:$0xff] %v1532_v16 }
  0x31   : > { %391 = vst [vmem:[#allocation2 + $0xe0] sm:$0xff] %v1532_v16  ;;  %392 = vst [vmem:[#allocation2 + $0x90] sm:$0xff] %v1532_v16 }
  0x32   : > { %393 = vst [vmem:[#allocation2 + $0x70] sm:$0xff] %v1532_v16  ;;  %394 = vst [vmem:[#allocation2 + $0xc0] sm:$0xff] %v1532_v16 }
  0x33   : > { %395 = vst [vmem:[#allocation2 + $0xa8] sm:$0xff] %v1532_v16  ;;  %396 = vst [vmem:[#allocation2 + $0xd0] sm:$0xff] %v1532_v16 }
  0x34   : > { %397 = vst [vmem:[#allocation2 + $0x10] sm:$0xff] %v1532_v16  ;;  %398 = vst [vmem:[#allocation2 + $0x28] sm:$0xff] %v1532_v16 }
  0x35   : > { %399 = vst [vmem:[#allocation2 + $0xa0] sm:$0xff] %v1532_v16  ;;  %400 = vst [vmem:[#allocation2 + $0xf8] sm:$0xff] %v1532_v16 }
  0x36   : > { %401 = vst [vmem:[#allocation2 + $0x20] sm:$0xff] %v1532_v16  ;;  %402 = vst [vmem:[#allocation2 + $0x98] sm:$0xff] %v1532_v16 }
  0x37 PF: > { %v1420_v17 = vld [vmem:[%s1621_s7 + $0x74] ss:$8 sps:$4 sm:$0xff]   ;;  %v1422_v18 = vld [vmem:[%s1621_s7 + $0x70] ss:$8 sps:$4 sm:$0xff]   ;;  %v1423_v19 = vld [vmem:[%s1621_s7 + $0x64] ss:$8 sps:$4 sm:$0xff]  }
  0x38   : > { %723 = vmatprep.subr.bf16.mxu0 %v1420_v17  ;;  %1347 = vmatprep.subr.bf16.mxu1 %v1420_v17  ;;  %v1425_v20 = vld [vmem:[%s1621_s7 + $0x60] ss:$8 sps:$4 sm:$0xff]   ;;  %v1426_v21 = vld [vmem:[%s1621_s7 + $0x54] ss:$8 sps:$4 sm:$0xff]   ;;  %v1428_v22 = vld [vmem:[%s1621_s7 + $0x50] ss:$8 sps:$4 sm:$0xff]  }
  0x39   : > { %724 = vmatpush1.bf16.msra.mxu0 %v1422_v18  ;;  %1363 = vmatpush1.bf16.msra.mxu1 %v1422_v18  ;;  %v1429_v23 = vld [vmem:[%s1621_s7 + $0x44] ss:$8 sps:$4 sm:$0xff]   ;;  %v1431_v24 = vld [vmem:[%s1621_s7 + $0x40] ss:$8 sps:$4 sm:$0xff]   ;;  %v1432_v25 = vld [vmem:[%s1621_s7 + $0x34] ss:$8 sps:$4 sm:$0xff]  }
  0x3a   : > { %725 = vmatprep.subr.bf16.mxu0 %v1423_v19  ;;  %1348 = vmatprep.subr.bf16.mxu1 %v1423_v19  ;;  %v1434_v26 = vld [vmem:[%s1621_s7 + $0x30] ss:$8 sps:$4 sm:$0xff]   ;;  %v1435_v27 = vld [vmem:[%s1621_s7 + $0x24] ss:$8 sps:$4 sm:$0xff]   ;;  %v1437_v28 = vld [vmem:[%s1621_s7 + $0x20] ss:$8 sps:$4 sm:$0xff]  }
  0x3b   : > { %v1438_v29 = vld [vmem:[%s1621_s7 + $0x14] ss:$8 sps:$4 sm:$0xff]   ;;  %v1470_v30 = vld [vmem:[%s1623_s8 + $0x4] ss:$8 sps:$4 sm:$0xff]   ;;  %v1440_v31 = vld [vmem:[%s1621_s7 + $0x10] ss:$8 sps:$4 sm:$0xff]  }
  0x3c   : > { %v1473_v32 = vld [vmem:[%s1623_s8 + $0x44] ss:$8 sps:$4 sm:$0xff]   ;;  %755 = vmatprep.mubr.bf16.mxu0 %v1470_v30  ;;  %v1443_v34 = vld [vmem:[%s1621_s7] ss:$8 sps:$4 sm:$0xff]   ;;  %v1444_v35 = vld [vmem:[%s1621_s7 + $0xf4] ss:$8 sps:$4 sm:$0xff]  }
  0x3d   : > { %726 = vmatpush1.bf16.msra.mxu0 %v1425_v20  ;;  %1364 = vmatpush1.bf16.msra.mxu1 %v1425_v20  ;;  %v1441_v33 = vld [vmem:[%s1621_s7 + $0x4] ss:$8 sps:$4 sm:$0xff]   ;;  %v1446_v36 = vld [vmem:[%s1621_s7 + $0xf0] ss:$8 sps:$4 sm:$0xff]   ;;  %v1449_v38 = vld [vmem:[%s1621_s7 + $0xe0] ss:$8 sps:$4 sm:$0xff]  }
  0x3e   : > { %727 = vmatprep.subr.bf16.mxu0 %v1426_v21  ;;  %1349 = vmatprep.subr.bf16.mxu1 %v1426_v21  ;;  %v1447_v37 = vld [vmem:[%s1621_s7 + $0xe4] ss:$8 sps:$4 sm:$0xff]   ;;  %v1450_v39 = vld [vmem:[%s1621_s7 + $0xd4] ss:$8 sps:$4 sm:$0xff]   ;;  %v1452_v40 = vld [vmem:[%s1621_s7 + $0xd0] ss:$8 sps:$4 sm:$0xff]  }
  0x3f   : > { %795 = vmatprep.mubr.bf16.mxu1 %v1473_v32  ;;  %v1453_v41 = vld [vmem:[%s1621_s7 + $0xc4] ss:$8 sps:$4 sm:$0xff]   ;;  %v1455_v42 = vld [vmem:[%s1621_s7 + $0xc0] ss:$8 sps:$4 sm:$0xff]   ;;  %v1456_v43 = vld [vmem:[%s1621_s7 + $0xb4] ss:$8 sps:$4 sm:$0xff]  }
  0x40   : > { %v1458_v44 = vld [vmem:[%s1621_s7 + $0xb0] ss:$8 sps:$4 sm:$0xff]   ;;  %v1459_v45 = vld [vmem:[%s1621_s7 + $0xa4] ss:$8 sps:$4 sm:$0xff]   ;;  %v1461_v46 = vld [vmem:[%s1621_s7 + $0xa0] ss:$8 sps:$4 sm:$0xff]  }
  0x41   : > { %728 = vmatpush1.bf16.msra.mxu0 %v1428_v22  ;;  %1365 = vmatpush1.bf16.msra.mxu1 %v1428_v22  ;;  %v1462_v47 = vld [vmem:[%s1621_s7 + $0x94] ss:$8 sps:$4 sm:$0xff]   ;;  %v1464_v48 = vld [vmem:[%s1621_s7 + $0x90] ss:$8 sps:$4 sm:$0xff]   ;;  %v1465_v49 = vld [vmem:[%s1621_s7 + $0x84] ss:$8 sps:$4 sm:$0xff]  }
  0x42   : > { %729 = vmatprep.subr.bf16.mxu0 %v1429_v23  ;;  %1350 = vmatprep.subr.bf16.mxu1 %v1429_v23  ;;  %v1467_v50 = vld [vmem:[%s1621_s7 + $0x80] ss:$8 sps:$4 sm:$0xff]   ;;  %v1474_v53 = vld [vmem:[%s1623_s8 + $0x14] ss:$8 sps:$4 sm:$0xff]   ;;  %v1478_v55 = vld [vmem:[%s1623_s8 + $0x10] ss:$8 sps:$4 sm:$0xff]  }
  0x43   : > { %v1468_v51 = vld [vmem:[%s1623_s8] ss:$8 sps:$4 sm:$0xff]   ;;  %v1476_v54 = vld [vmem:[%s1623_s8 + $0x54] ss:$8 sps:$4 sm:$0xff]   ;;  %v1479_v56 = vld [vmem:[%s1623_s8 + $0x50] ss:$8 sps:$4 sm:$0xff]  }
  0x44   : > { %v1471_v52 = vld [vmem:[%s1623_s8 + $0x40] ss:$8 sps:$4 sm:$0xff]   ;;  %v1480_v57 = vld [vmem:[%s1623_s8 + $0x24] ss:$8 sps:$4 sm:$0xff]   ;;  %v1486_v61 = vld [vmem:[%s1623_s8 + $0x34] ss:$8 sps:$4 sm:$0xff]  }
  0x45   : > { %730 = vmatpush1.bf16.msra.mxu0 %v1431_v24  ;;  %1366 = vmatpush1.bf16.msra.mxu1 %v1431_v24  ;;  %v1482_v58 = vld [vmem:[%s1623_s8 + $0x64] ss:$8 sps:$4 sm:$0xff]   ;;  %v1484_v59 = vld [vmem:[%s1623_s8 + $0x20] ss:$8 sps:$4 sm:$0xff]   ;;  %v1488_v62 = vld [vmem:[%s1623_s8 + $0x74] ss:$8 sps:$4 sm:$0xff]  }
  0x46   : > { %731 = vmatprep.subr.bf16.mxu0 %v1432_v25  ;;  %1351 = vmatprep.subr.bf16.mxu1 %v1432_v25  ;;  %v1485_v60 = vld [vmem:[%s1623_s8 + $0x60] ss:$8 sps:$4 sm:$0xff]   ;;  %v1490_v63 = vld [vmem:[%s1623_s8 + $0x30] ss:$8 sps:$4 sm:$0xff]   ;;  %p1308_p11 = scmp.ne.s32.totalorder %s1522_s14, 8 }
  0x47   : > { %v1491_v0 = vld [vmem:[%s1623_s8 + $0x70] ss:$8 sps:$4 sm:$0xff]   ;;  %v404_v5 = vld [vmem:[#allocation2] sm:$0xff]  ;;  %v422_v18 = vld [vmem:[#allocation2 + $0xc8] sm:$0xff] }
  0x48   : > { %v403_v1 = vld [vmem:[#allocation2 + $0xb0] sm:$0xff]  ;;  %v419_v2 = vld [vmem:[#allocation2 + $0x38] sm:$0xff]  ;;  %v421_v12 = vld [vmem:[#allocation2 + $0x40] sm:$0xff] }
  0x49   : > { %732 = vmatpush1.bf16.msra.mxu0 %v1434_v26  ;;  %1367 = vmatpush1.bf16.msra.mxu1 %v1434_v26  ;;  %v420_v6 = vld [vmem:[#allocation2 + $0x58] sm:$0xff]  ;;  %v407_v23 = vld [vmem:[#allocation2 + $0x50] sm:$0xff]  ;;  %v423_v24 = vld [vmem:[#allocation2 + $0xe0] sm:$0xff] }
  0x4a   : > { %733 = vmatprep.subr.bf16.mxu0 %v1435_v27  ;;  %1352 = vmatprep.subr.bf16.mxu1 %v1435_v27  ;;  %v405_v11 = vld [vmem:[#allocation2 + $0xd8] sm:$0xff]  ;;  %v424_v30 = vld [vmem:[#allocation2 + $0x90] sm:$0xff] }
  0x4b   : > { %v406_v17 = vld [vmem:[#allocation2 + $0x18] sm:$0xff] }
  0x4d   : > { %734 = vmatpush1.bf16.msra.mxu0 %v1437_v28  ;;  %1368 = vmatpush1.bf16.msra.mxu1 %v1437_v28 }
  0x4e   : > { %735 = vmatprep.subr.bf16.mxu0 %v1438_v29  ;;  %1353 = vmatprep.subr.bf16.mxu1 %v1438_v29  ;;  %v408_v29 = vld [vmem:[#allocation2 + $0x68] sm:$0xff] }
  0x51   : > { %736 = vmatpush1.bf16.msra.mxu0 %v1440_v31  ;;  %1369 = vmatpush1.bf16.msra.mxu1 %v1440_v31 }
  0x52   : > { %737 = vmatprep.subr.bf16.mxu0 %v1441_v33  ;;  %1354 = vmatprep.subr.bf16.mxu1 %v1441_v33 }
  0x55   : > { %738 = vmatpush1.bf16.msra.mxu0 %v1443_v34  ;;  %1370 = vmatpush1.bf16.msra.mxu1 %v1443_v34 }
  0x56   : > { %739 = vmatprep.subr.bf16.mxu0 %v1444_v35  ;;  %1355 = vmatprep.subr.bf16.mxu1 %v1444_v35  ;;  %v409_v35 = vld [vmem:[#allocation2 + $0x30] sm:$0xff] }
  0x59   : > { %740 = vmatpush2.bf16.msra.mxu0 %v1446_v36  ;;  %1371 = vmatpush2.bf16.msra.mxu1 %v1446_v36  ;;  %v425_v36 = vld [vmem:[#allocation2 + $0x70] sm:$0xff] }
  0x5a   : > { %741 = vmatprep.subr.bf16.mxu0 %v1447_v37  ;;  %1356 = vmatprep.subr.bf16.mxu1 %v1447_v37 }
  0x5d   : > { %742 = vmatpush2.bf16.msra.mxu0 %v1449_v38  ;;  %1372 = vmatpush2.bf16.msra.mxu1 %v1449_v38 }
  0x5e   : > { %743 = vmatprep.subr.bf16.mxu0 %v1450_v39  ;;  %1357 = vmatprep.subr.bf16.mxu1 %v1450_v39 }
  0x61   : > { %744 = vmatpush2.bf16.msra.mxu0 %v1452_v40  ;;  %1373 = vmatpush2.bf16.msra.mxu1 %v1452_v40 }
  0x62   : > { %745 = vmatprep.subr.bf16.mxu0 %v1453_v41  ;;  %1358 = vmatprep.subr.bf16.mxu1 %v1453_v41  ;;  %v410_v41 = vld [vmem:[#allocation2 + $0x48] sm:$0xff] }
  0x65   : > { %746 = vmatpush2.bf16.msra.mxu0 %v1455_v42  ;;  %1374 = vmatpush2.bf16.msra.mxu1 %v1455_v42  ;;  %v426_v42 = vld [vmem:[#allocation2 + $0xc0] sm:$0xff] }
  0x66   : > { %747 = vmatprep.subr.bf16.mxu0 %v1456_v43  ;;  %1359 = vmatprep.subr.bf16.mxu1 %v1456_v43 }
  0x69   : > { %748 = vmatpush2.bf16.msra.mxu0 %v1458_v44  ;;  %1375 = vmatpush2.bf16.msra.mxu1 %v1458_v44 }
  0x6a   : > { %749 = vmatprep.subr.bf16.mxu0 %v1459_v45  ;;  %1360 = vmatprep.subr.bf16.mxu1 %v1459_v45 }
  0x6d   : > { %750 = vmatpush2.bf16.msra.mxu0 %v1461_v46  ;;  %1376 = vmatpush2.bf16.msra.mxu1 %v1461_v46 }
  0x6e   : > { %751 = vmatprep.subr.bf16.mxu0 %v1462_v47  ;;  %1361 = vmatprep.subr.bf16.mxu1 %v1462_v47  ;;  %v411_v47 = vld [vmem:[#allocation2 + $0x80] sm:$0xff] }
  0x71   : > { %752 = vmatpush2.bf16.msra.mxu0 %v1464_v48  ;;  %1377 = vmatpush2.bf16.msra.mxu1 %v1464_v48  ;;  %v427_v48 = vld [vmem:[#allocation2 + $0xa8] sm:$0xff] }
  0x72   : > { %753 = vmatprep.subr.bf16.mxu0 %v1465_v49  ;;  %1362 = vmatprep.subr.bf16.mxu1 %v1465_v49 }
  0x75   : > { %754 = vmatpush2.bf16.msra.mxu0 %v1467_v50  ;;  %1378 = vmatpush2.bf16.msra.mxu1 %v1467_v50 }
  0x78   : > { %756 = vmatmul.mubr.bf16.vlgmr.msra.gmra.mxu0 %v1468_v51  ;;  %796 = vmatmul.mubr.bf16.vlgmr.msra.gmra.mxu1 %v1471_v52 }
  0x79   : > { %765 = vmatprep.mubr.bf16.mxu0 %v1474_v53  ;;  %805 = vmatprep.mubr.bf16.mxu1 %v1476_v54  ;;  %v412_v53 = vld [vmem:[#allocation2 + $0x88] sm:$0xff]  ;;  %v428_v54 = vld [vmem:[#allocation2 + $0xd0] sm:$0xff] }
  0x80   : > { %766 = vmatmul.mubr.bf16.gmra.mxu0 %v1478_v55  ;;  %806 = vmatmul.mubr.bf16.gmra.mxu1 %v1479_v56 }
  0x81   : > { %775 = vmatprep.mubr.bf16.mxu0 %v1480_v57  ;;  %815 = vmatprep.mubr.bf16.mxu1 %v1482_v58 }
  0x88   : > { %776 = vmatmul.mubr.bf16.gmra.mxu0 %v1484_v59  ;;  %816 = vmatmul.mubr.bf16.gmra.mxu1 %v1485_v60  ;;  %v413_v59 = vld [vmem:[#allocation2 + $0xe8] sm:$0xff]  ;;  %v429_v60 = vld [vmem:[#allocation2 + $0x10] sm:$0xff] }
  0x89   : > { %785 = vmatprep.mubr.bf16.mxu0 %v1486_v61  ;;  %825 = vmatprep.mubr.bf16.mxu1 %v1488_v62 }
  0x90   : > { %786 = vmatmul.mubr.bf16.gmra.mxu0 %v1490_v63  ;;  %826 = vmatmul.mubr.bf16.gmra.mxu1 %v1491_v0 }
 0x138   : > { %v757_v3 = vpop.f32.mrf.mxu0  ;;  %v797_v4 = vpop.f32.mrf.mxu1 }
 0x139   : > { %v836_v7 = vadd.f32 %v757_v3, %v403_v1  ;;  %v852_v8 = vadd.f32 %v797_v4, %v419_v2  ;;  %v414_v1 = vld [vmem:[#allocation2 + $0xb8] sm:$0xff]  ;;  %v430_v2 = vld [vmem:[#allocation2 + $0x28] sm:$0xff] }
 0x13a   : > { %v759_v9 = vpop.f32.mrf.mxu0  ;;  %v799_v10 = vpop.f32.mrf.mxu1 }
 0x13b   : > { %868 = vst [vmem:[#allocation2 + $0xb0] sm:$0xff] %v836_v7  ;;  %884 = vst [vmem:[#allocation2 + $0x38] sm:$0xff] %v852_v8  ;;  %v837_v13 = vadd.f32 %v759_v9, %v404_v5  ;;  %v853_v14 = vadd.f32 %v799_v10, %v420_v6  ;;  %v415_v7 = vld [vmem:[#allocation2 + $0x60] sm:$0xff] }
 0x13c   : > { %v761_v15 = vpop.f32.mrf.mxu0  ;;  %v801_v16 = vpop.f32.mrf.mxu1  ;;  %v431_v8 = vld [vmem:[#allocation2 + $0xa0] sm:$0xff] }
 0x13d   : > { %869 = vst [vmem:[#allocation2] sm:$0xff] %v837_v13  ;;  %885 = vst [vmem:[#allocation2 + $0x58] sm:$0xff] %v853_v14  ;;  %v838_v19 = vadd.f32 %v761_v15, %v405_v11  ;;  %v854_v20 = vadd.f32 %v801_v16, %v421_v12  ;;  %v416_v13 = vld [vmem:[#allocation2 + $0xf0] sm:$0xff]  ;;  %v432_v14 = vld [vmem:[#allocation2 + $0xf8] sm:$0xff] }
 0x13e   : > { %v763_v21 = vpop.f32.mrf.mxu0  ;;  %v803_v22 = vpop.f32.mrf.mxu1 }
 0x13f   : > { %870 = vst [vmem:[#allocation2 + $0xd8] sm:$0xff] %v838_v19  ;;  %886 = vst [vmem:[#allocation2 + $0x40] sm:$0xff] %v854_v20  ;;  %v839_v25 = vadd.f32 %v763_v21, %v406_v17  ;;  %v855_v26 = vadd.f32 %v803_v22, %v422_v18  ;;  %v417_v19 = vld [vmem:[#allocation2 + $0x8] sm:$0xff]  ;;  %v433_v20 = vld [vmem:[#allocation2 + $0x20] sm:$0xff] }
 0x140   : > { %v767_v27 = vpop.f32.mrf.mxu0  ;;  %v807_v28 = vpop.f32.mrf.mxu1 }
 0x141   : > { %871 = vst [vmem:[#allocation2 + $0x18] sm:$0xff] %v839_v25  ;;  %887 = vst [vmem:[#allocation2 + $0xc8] sm:$0xff] %v855_v26  ;;  %v840_v31 = vadd.f32 %v767_v27, %v407_v23  ;;  %v856_v32 = vadd.f32 %v807_v28, %v423_v24  ;;  %v418_v25 = vld [vmem:[#allocation2 + $0x78] sm:$0xff] }
 0x142   : > { %v769_v33 = vpop.f32.mrf.mxu0  ;;  %v809_v34 = vpop.f32.mrf.mxu1  ;;  %v434_v26 = vld [vmem:[#allocation2 + $0x98] sm:$0xff] }
 0x143   : > { %872 = vst [vmem:[#allocation2 + $0x50] sm:$0xff] %v840_v31  ;;  %888 = vst [vmem:[#allocation2 + $0xe0] sm:$0xff] %v856_v32  ;;  %v841_v37 = vadd.f32 %v769_v33, %v408_v29  ;;  %v857_v38 = vadd.f32 %v809_v34, %v424_v30 }
 0x144   : > { %v771_v39 = vpop.f32.mrf.mxu0  ;;  %v811_v40 = vpop.f32.mrf.mxu1 }
 0x145   : > { %873 = vst [vmem:[#allocation2 + $0x68] sm:$0xff] %v841_v37  ;;  %889 = vst [vmem:[#allocation2 + $0x90] sm:$0xff] %v857_v38  ;;  %v842_v43 = vadd.f32 %v771_v39, %v409_v35  ;;  %v858_v44 = vadd.f32 %v811_v40, %v425_v36 }
 0x146   : > { %v773_v45 = vpop.f32.mrf.mxu0  ;;  %v813_v46 = vpop.f32.mrf.mxu1 }
 0x147   : > { %874 = vst [vmem:[#allocation2 + $0x30] sm:$0xff] %v842_v43  ;;  %890 = vst [vmem:[#allocation2 + $0x70] sm:$0xff] %v858_v44  ;;  %v843_v49 = vadd.f32 %v773_v45, %v410_v41  ;;  %v859_v50 = vadd.f32 %v813_v46, %v426_v42 }
 0x148   : > { %v777_v51 = vpop.f32.mrf.mxu0  ;;  %v817_v52 = vpop.f32.mrf.mxu1 }
 0x149   : > { %875 = vst [vmem:[#allocation2 + $0x48] sm:$0xff] %v843_v49  ;;  %891 = vst [vmem:[#allocation2 + $0xc0] sm:$0xff] %v859_v50  ;;  %v844_v55 = vadd.f32 %v777_v51, %v411_v47  ;;  %v860_v56 = vadd.f32 %v817_v52, %v427_v48 }
 0x14a   : > { %v779_v57 = vpop.f32.mrf.mxu0  ;;  %v819_v58 = vpop.f32.mrf.mxu1 }
 0x14b   : > { %876 = vst [vmem:[#allocation2 + $0x80] sm:$0xff] %v844_v55  ;;  %892 = vst [vmem:[#allocation2 + $0xa8] sm:$0xff] %v860_v56  ;;  %v845_v61 = vadd.f32 %v779_v57, %v412_v53  ;;  %v861_v62 = vadd.f32 %v819_v58, %v428_v54 }
 0x14c   : > { %v781_v63 = vpop.f32.mrf.mxu0  ;;  %v821_v0 = vpop.f32.mrf.mxu1 }
 0x14d   : > { %877 = vst [vmem:[#allocation2 + $0x88] sm:$0xff] %v845_v61  ;;  %893 = vst [vmem:[#allocation2 + $0xd0] sm:$0xff] %v861_v62  ;;  %v846_v3 = vadd.f32 %v781_v63, %v413_v59  ;;  %v862_v4 = vadd.f32 %v821_v0, %v429_v60 }
 0x14e   : > { %v783_v5 = vpop.f32.mrf.mxu0  ;;  %v823_v6 = vpop.f32.mrf.mxu1 }
 0x14f   : > { %878 = vst [vmem:[#allocation2 + $0xe8] sm:$0xff] %v846_v3  ;;  %894 = vst [vmem:[#allocation2 + $0x10] sm:$0xff] %v862_v4  ;;  %v847_v9 = vadd.f32 %v783_v5, %v414_v1  ;;  %v863_v10 = vadd.f32 %v823_v6, %v430_v2 }
 0x150   : > { %v787_v11 = vpop.f32.mrf.mxu0  ;;  %v827_v12 = vpop.f32.mrf.mxu1 }
 0x151   : > { %879 = vst [vmem:[#allocation2 + $0xb8] sm:$0xff] %v847_v9  ;;  %895 = vst [vmem:[#allocation2 + $0x28] sm:$0xff] %v863_v10  ;;  %v848_v15 = vadd.f32 %v787_v11, %v415_v7  ;;  %v864_v16 = vadd.f32 %v827_v12, %v431_v8 }
 0x152   : > { %v789_v17 = vpop.f32.mrf.mxu0  ;;  %v829_v18 = vpop.f32.mrf.mxu1 }
 0x153   : > { %880 = vst [vmem:[#allocation2 + $0x60] sm:$0xff] %v848_v15  ;;  %896 = vst [vmem:[#allocation2 + $0xa0] sm:$0xff] %v864_v16  ;;  %v849_v21 = vadd.f32 %v789_v17, %v416_v13  ;;  %v865_v22 = vadd.f32 %v829_v18, %v432_v14 }
 0x154   : > { %v791_v23 = vpop.f32.mrf.mxu0  ;;  %v831_v24 = vpop.f32.mrf.mxu1 }
 0x155   : > { %881 = vst [vmem:[#allocation2 + $0xf0] sm:$0xff] %v849_v21  ;;  %897 = vst [vmem:[#allocation2 + $0xf8] sm:$0xff] %v865_v22  ;;  %v850_v27 = vadd.f32 %v791_v23, %v417_v19  ;;  %v866_v28 = vadd.f32 %v831_v24, %v433_v20  ;;  %903 = sbr.rel (%p1308_p11) target bundleno = 378 (0x17a), region = 78 }
 0x156   : > { %v793_v29 = vpop.f32.mrf.mxu0  ;;  %v833_v30 = vpop.f32.mrf.mxu1 }
 0x157   : > { %882 = vst [vmem:[#allocation2 + $0x8] sm:$0xff] %v850_v27  ;;  %898 = vst [vmem:[#allocation2 + $0x20] sm:$0xff] %v866_v28  ;;  %v851_v31 = vadd.f32 %v793_v29, %v418_v25  ;;  %v867_v32 = vadd.f32 %v833_v30, %v434_v26 }
 0x159   : > { %883 = vst [vmem:[#allocation2 + $0x78] sm:$0xff] %v851_v31  ;;  %899 = vst [vmem:[#allocation2 + $0x98] sm:$0xff] %v867_v32 }
 0x15a   : > { %v938_v33 = vlaneseq  ;;  %v936_v35 = vld [vmem:[%s1779_s2] sm:$0x3]  ;;  %v904_v36 = vld [vmem:[#allocation2 + $0xb0] sm:$0xff]  ;;  %v906_v40 = vld [vmem:[#allocation2 + $0xd8] sm:$0xff] }
 0x15b   : > { %v905_v37 = vld [vmem:[#allocation2] sm:$0xff]  ;;  %v907_v41 = vld [vmem:[#allocation2 + $0x18] sm:$0xff]  ;;  %v908_v42 = vld [vmem:[#allocation2 + $0x50] sm:$0xff] }
 0x15c   : > { %v939_v34 = vshrl.u32 %v938_v33, 7  ;;  %v909_v45 = vld [vmem:[#allocation2 + $0x68] sm:$0xff]  ;;  %v910_v46 = vld [vmem:[#allocation2 + $0x30] sm:$0xff]  ;;  %v912_v56 = vld [vmem:[#allocation2 + $0x80] sm:$0xff] }
 0x15d   : > { %v911_v47 = vld [vmem:[#allocation2 + $0x48] sm:$0xff]  ;;  %v915_v63 = vld [vmem:[#allocation2 + $0xb8] sm:$0xff]  ;;  %v916_v4 = vld [vmem:[#allocation2 + $0x60] sm:$0xff] }
 0x15e   : > { %v940_v38 = vsub.s32 0, %v939_v34  ;;  %v944_v39 = vsub.s32 1, %v939_v34  ;;  %v913_v57 = vld [vmem:[#allocation2 + $0x88] sm:$0xff]  ;;  %v917_v5 = vld [vmem:[#allocation2 + $0xf0] sm:$0xff]  ;;  %v920_v16 = vld [vmem:[#allocation2 + $0x38] sm:$0xff] }
 0x15f   : > { %v914_v62 = vld [vmem:[#allocation2 + $0xe8] sm:$0xff]  ;;  %v921_v21 = vld [vmem:[#allocation2 + $0x58] sm:$0xff]  ;;  %v922_v26 = vld [vmem:[#allocation2 + $0x40] sm:$0xff] }
 0x160   : > { %v1678_v43 = vrot.slane %v936_v35, %v940_v38  ;;  %v1680_v44 = vrot.slane %v936_v35, %v944_v39  ;;  %v918_v10 = vld [vmem:[#allocation2 + $0x8] sm:$0xff]  ;;  %v919_v11 = vld [vmem:[#allocation2 + $0x78] sm:$0xff]  ;;  %v924_v32 = vld [vmem:[#allocation2 + $0xe0] sm:$0xff] }
 0x161   : > { %v923_v27 = vld [vmem:[#allocation2 + $0xc8] sm:$0xff]  ;;  %v925_v33 = vld [vmem:[#allocation2 + $0x90] sm:$0xff]  ;;  %v927_v39 = vld [vmem:[#allocation2 + $0xc0] sm:$0xff] }
 0x162   : > { %v948_v48 = vadd.f32 %v1678_v43, %v904_v36  ;;  %v949_v49 = vadd.f32 %v1680_v44, %v905_v37  ;;  %v950_v50 = vadd.f32 %v1678_v43, %v906_v40  ;;  %v951_v51 = vadd.f32 %v1680_v44, %v907_v41  ;;  %v926_v38 = vld [vmem:[#allocation2 + $0x70] sm:$0xff] }
 0x163   : > { %v952_v52 = vadd.f32 %v1678_v43, %v908_v42  ;;  %v953_v53 = vadd.f32 %v1680_v44, %v909_v45  ;;  %v954_v54 = vadd.f32 %v1678_v43, %v910_v46  ;;  %v955_v55 = vadd.f32 %v1680_v44, %v911_v47  ;;  %v928_v46 = vld [vmem:[#allocation2 + $0xa8] sm:$0xff] }
 0x164   : > { %v980_v58 = vmax.f32 %v948_v48, 0.0  ;;  %v981_v59 = vmax.f32 %v949_v49, 0.0  ;;  %v982_v60 = vmax.f32 %v950_v50, 0.0  ;;  %v983_v61 = vmax.f32 %v951_v51, 0.0  ;;  %v929_v51 = vld [vmem:[#allocation2 + $0xd0] sm:$0xff] }
 0x165   : > { %v984_v0 = vmax.f32 %v952_v52, 0.0  ;;  %v985_v1 = vmax.f32 %v953_v53, 0.0  ;;  %v986_v2 = vmax.f32 %v954_v54, 0.0  ;;  %v987_v3 = vmax.f32 %v955_v55, 0.0 }
 0x166   : > { %v1331_v6 = vpack.c.bf16 %v981_v59, %v980_v58  ;;  %v1332_v7 = vpack.c.bf16 %v983_v61, %v982_v60  ;;  %v956_v8 = vadd.f32 %v1678_v43, %v912_v56  ;;  %v957_v9 = vadd.f32 %v1680_v44, %v913_v57  ;;  %v930_v56 = vld [vmem:[#allocation2 + $0x10] sm:$0xff]  ;;  %v931_v57 = vld [vmem:[#allocation2 + $0x28] sm:$0xff] }
 0x167   : > { %v1333_v12 = vpack.c.bf16 %v985_v1, %v984_v0  ;;  %v1334_v13 = vpack.c.bf16 %v987_v3, %v986_v2  ;;  %v958_v14 = vadd.f32 %v1678_v43, %v914_v62  ;;  %v959_v15 = vadd.f32 %v1680_v44, %v915_v63  ;;  %v932_v62 = vld [vmem:[#allocation2 + $0xa0] sm:$0xff]  ;;  %v933_v63 = vld [vmem:[#allocation2 + $0xf8] sm:$0xff] }
 0x168   : > { %1108 = vst [vmem:[%s1780_s3] sm:$0xff] %v1331_v6  ;;  %1109 = vst [vmem:[%s1780_s3 + $0x8] sm:$0xff] %v1332_v7  ;;  %v988_v17 = vmax.f32 %v956_v8, 0.0  ;;  %v989_v18 = vmax.f32 %v957_v9, 0.0  ;;  %v960_v19 = vadd.f32 %v1678_v43, %v916_v4  ;;  %v961_v20 = vadd.f32 %v1680_v44, %v917_v5  ;;  %v934_v4 = vld [vmem:[#allocation2 + $0x20] sm:$0xff]  ;;  %v935_v5 = vld [vmem:[#allocation2 + $0x98] sm:$0xff] }
 0x169   : > { %1110 = vst [vmem:[%s1780_s3 + $0x10] sm:$0xff] %v1333_v12  ;;  %1111 = vst [vmem:[%s1780_s3 + $0x18] sm:$0xff] %v1334_v13  ;;  %v990_v22 = vmax.f32 %v958_v14, 0.0  ;;  %v991_v23 = vmax.f32 %v959_v15, 0.0  ;;  %v962_v24 = vadd.f32 %v1678_v43, %v918_v10  ;;  %v963_v25 = vadd.f32 %v1680_v44, %v919_v11 }
 0x16a   : > { %v1335_v28 = vpack.c.bf16 %v989_v18, %v988_v17  ;;  %v992_v29 = vmax.f32 %v960_v19, 0.0  ;;  %v993_v30 = vmax.f32 %v961_v20, 0.0  ;;  %v964_v31 = vadd.f32 %v1678_v43, %v920_v16 }
 0x16b   : > { %v1336_v34 = vpack.c.bf16 %v991_v23, %v990_v22  ;;  %v994_v35 = vmax.f32 %v962_v24, 0.0  ;;  %v995_v36 = vmax.f32 %v963_v25, 0.0  ;;  %v965_v37 = vadd.f32 %v1680_v44, %v921_v21 }
 0x16c   : > { %1112 = vst [vmem:[%s1780_s3 + $0x20] sm:$0xff] %v1335_v28  ;;  %v1337_v40 = vpack.c.bf16 %v993_v30, %v992_v29  ;;  %v996_v41 = vmax.f32 %v964_v31, 0.0  ;;  %v966_v42 = vadd.f32 %v1678_v43, %v922_v26  ;;  %v967_v45 = vadd.f32 %v1680_v44, %v923_v27 }
 0x16d   : > { %1113 = vst [vmem:[%s1780_s3 + $0x28] sm:$0xff] %v1336_v34  ;;  %v1338_v47 = vpack.c.bf16 %v995_v36, %v994_v35  ;;  %v997_v48 = vmax.f32 %v965_v37, 0.0  ;;  %v968_v49 = vadd.f32 %v1678_v43, %v924_v32  ;;  %v969_v50 = vadd.f32 %v1680_v44, %v925_v33 }
 0x16e   : > { %1114 = vst [vmem:[%s1780_s3 + $0x30] sm:$0xff] %v1337_v40  ;;  %v998_v52 = vmax.f32 %v966_v42, 0.0  ;;  %v999_v53 = vmax.f32 %v967_v45, 0.0  ;;  %v970_v54 = vadd.f32 %v1678_v43, %v926_v38  ;;  %v971_v55 = vadd.f32 %v1680_v44, %v927_v39 }
 0x16f   : > { %1115 = vst [vmem:[%s1780_s3 + $0x38] sm:$0xff] %v1338_v47  ;;  %v1339_v58 = vpack.c.bf16 %v997_v48, %v996_v41  ;;  %v1000_v59 = vmax.f32 %v968_v49, 0.0  ;;  %v1001_v60 = vmax.f32 %v969_v50, 0.0  ;;  %v972_v61 = vadd.f32 %v1678_v43, %v928_v46 }
 0x170   : > { %v1340_v0 = vpack.c.bf16 %v999_v53, %v998_v52  ;;  %v1002_v1 = vmax.f32 %v970_v54, 0.0  ;;  %v1003_v2 = vmax.f32 %v971_v55, 0.0  ;;  %v973_v3 = vadd.f32 %v1680_v44, %v929_v51 }
 0x171   : > { %1116 = vst [vmem:[%s1780_s3 + $0x40] sm:$0xff] %v1339_v58  ;;  %v1341_v6 = vpack.c.bf16 %v1001_v60, %v1000_v59  ;;  %v1004_v7 = vmax.f32 %v972_v61, 0.0  ;;  %v974_v8 = vadd.f32 %v1678_v43, %v930_v56  ;;  %v975_v9 = vadd.f32 %v1680_v44, %v931_v57 }
 0x172   : > { %1117 = vst [vmem:[%s1780_s3 + $0x48] sm:$0xff] %v1340_v0  ;;  %v1342_v10 = vpack.c.bf16 %v1003_v2, %v1002_v1  ;;  %v1005_v11 = vmax.f32 %v973_v3, 0.0  ;;  %v976_v12 = vadd.f32 %v1678_v43, %v932_v62  ;;  %v977_v13 = vadd.f32 %v1680_v44, %v933_v63 }
 0x173   : > { %1118 = vst [vmem:[%s1780_s3 + $0x50] sm:$0xff] %v1341_v6  ;;  %v1006_v14 = vmax.f32 %v974_v8, 0.0  ;;  %v1007_v15 = vmax.f32 %v975_v9, 0.0  ;;  %v978_v16 = vadd.f32 %v1678_v43, %v934_v4  ;;  %v979_v17 = vadd.f32 %v1680_v44, %v935_v5 }
 0x174   : > { %1119 = vst [vmem:[%s1780_s3 + $0x58] sm:$0xff] %v1342_v10  ;;  %v1343_v18 = vpack.c.bf16 %v1005_v11, %v1004_v7  ;;  %v1008_v19 = vmax.f32 %v976_v12, 0.0  ;;  %v1009_v20 = vmax.f32 %v977_v13, 0.0 }
 0x175   : > { %v1344_v21 = vpack.c.bf16 %v1007_v15, %v1006_v14  ;;  %v1010_v22 = vmax.f32 %v978_v16, 0.0  ;;  %v1011_v23 = vmax.f32 %v979_v17, 0.0 }
 0x176   : > { %1120 = vst [vmem:[%s1780_s3 + $0x60] sm:$0xff] %v1343_v18  ;;  %v1345_v24 = vpack.c.bf16 %v1009_v20, %v1008_v19 }
 0x177   : > { %1121 = vst [vmem:[%s1780_s3 + $0x68] sm:$0xff] %v1344_v21  ;;  %v1346_v43 = vpack.c.bf16 %v1011_v23, %v1010_v22 }
 0x178   : > { %1122 = vst [vmem:[%s1780_s3 + $0x70] sm:$0xff] %v1345_v24 }
 0x179   : > { %1123 = vst [vmem:[%s1780_s3 + $0x78] sm:$0xff] %v1346_v43 }
 0x17a PF: > { %s13_s16 = sadd.s32 1, %s1530_s16   ;;  %s1781_s12 = smov %s1518_s13 }
 0x17b   : > { %p10_p12 = scmp.ge.s32.totalorder %s13_s16, 11   ;;  %s1782_s13 = smov %s1588_s20 }
 0x17c   : > { %s1783_s14 = smov %s1526_s15  ;;  %s1784_s15 = smov %s1786_s17 }
 0x17d   :  { %12 = sbr.rel (!%p10_p12) target bundleno = 3 (0x3), region = 119 }

</bundles_post_ra>
